<compile_context>
chip_gen: v7x
topology: tpu7x:2x2x1
jax: 0.10.0
libtpu: 0.0.40
codegen_flags: <defaults>
</compile_context>

<pallas_src>
import jax
import jax.numpy as jnp
import numpy as np
from jax import lax
from jax.experimental import pallas as pl
from jax.experimental.pallas import tpu as pltpu

EPS = 1e-5


def _instance_norm(acc, gamma, beta, Nb, HW):
    """acc: (Nb*HW, C) f32. Per-sample spatial stats, biased var, eps=1e-5, affine.
    Returns (Nb, HW, C) f32."""
    C = acc.shape[-1]
    y = acc.reshape(Nb, HW, C)
    mean = jnp.mean(y, axis=1, keepdims=True)              # (Nb, 1, C)
    mean_sq = jnp.mean(y * y, axis=1, keepdims=True)       # single sweep: var = E[x^2] - mean^2
    var = mean_sq - mean * mean
    return (y - mean) * lax.rsqrt(var + EPS) * gamma + beta


def _im2col(src, im2col_ref, H, W, C):
    """src: (Nb, H+2, W+2, C) value (zero-padded). Writes (Nb*H*W, 9*C) patch matrix into
    im2col_ref, columns ordered (dy, dx, cin) to match the (9*Cin, Cout) weight layout."""
    Nb = src.shape[0]
    k = 0
    for dy in range(3):
        for dx in range(3):
            patch = src[:, dy:dy + H, dx:dx + W, :]                       # (Nb, H, W, C)
            im2col_ref[:, k * C:(k + 1) * C] = (
                patch.reshape(Nb * H * W, C).astype(im2col_ref.dtype))
            k += 1


def residual_block_kernel(xpad_ref, xres_ref, w1_ref, w2_ref,
                          g1_ref, b1_ref, g2_ref, b2_ref,
                          out_ref, im2col_ref, pad_ref):
    Nb, H, W, C = out_ref.shape
    HW = H * W

    # ---- conv1 (single im2col matmul, bf16 operands, f32 accumulate) --------
    _im2col(xpad_ref[...], im2col_ref, H, W, C)
    acc1 = jnp.dot(im2col_ref[...], w1_ref[...],
                   preferred_element_type=jnp.float32)                     # (Nb*HW, C) f32
    y1 = jnp.maximum(_instance_norm(acc1, g1_ref[...], b1_ref[...], Nb, HW), 0.0)

    # ---- re-pad y1 for conv2: zero only the 1-pixel border, write interior ---
    zero_row = jnp.zeros((Nb, 1, W + 2, C), pad_ref.dtype)
    zero_col = jnp.zeros((Nb, H + 2, 1, C), pad_ref.dtype)
    pad_ref[:, 0:1, :, :] = zero_row
    pad_ref[:, H + 1:H + 2, :, :] = zero_row
    pad_ref[:, :, 0:1, :] = zero_col
    pad_ref[:, :, W + 1:W + 2, :] = zero_col
    pad_ref[:, 1:H + 1, 1:W + 1, :] = y1.reshape(Nb, H, W, C).astype(pad_ref.dtype)

    # ---- conv2 + instance norm 2 ---------------------------------------------
    _im2col(pad_ref[...], im2col_ref, H, W, C)
    acc2 = jnp.dot(im2col_ref[...], w2_ref[...],
                   preferred_element_type=jnp.float32)                     # (Nb*HW, C) f32
    y2 = _instance_norm(acc2, g2_ref[...], b2_ref[...], Nb, HW)            # (Nb, HW, C)

    # ---- residual add from the tile-aligned unpadded input (f32) -------------
    res = xres_ref[...].astype(jnp.float32)                                # (Nb, H, W, C)
    out_ref[...] = (res + y2.reshape(Nb, H, W, C)).astype(out_ref.dtype)


def residual_block(x_nchw, w1_oihw, w2_oihw, g1, b1, g2, b2, *, samples_per_step=2):
    """x_nchw: (N, C, H, W); conv weights PyTorch OIHW (Cout, Cin, 3, 3), bias=False; g/b: (C,)."""
    N, C, H, W = x_nchw.shape
    Nb = min(samples_per_step, N)
    while N % Nb:
        Nb -= 1

    x_nhwc = jnp.transpose(x_nchw, (0, 2, 3, 1))                                    # f32 residual path
    x_pad = jnp.pad(x_nhwc, ((0, 0), (1, 1), (1, 1), (0, 0))).astype(jnp.bfloat16)  # bf16 conv path
    # OIHW -> HWIO -> (9*Cin, Cout), rows ordered (dy, dx, cin); bf16 for the MXU.
    w1 = jnp.transpose(w1_oihw, (2, 3, 1, 0)).reshape(9 * C, C).astype(jnp.bfloat16)
    w2 = jnp.transpose(w2_oihw, (2, 3, 1, 0)).reshape(9 * C, C).astype(jnp.bfloat16)
    g1_2d = g1.reshape(1, C).astype(jnp.float32)
    b1_2d = b1.reshape(1, C).astype(jnp.float32)
    g2_2d = g2.reshape(1, C).astype(jnp.float32)
    b2_2d = b2.reshape(1, C).astype(jnp.float32)

    w_spec = pl.BlockSpec((9 * C, C), lambda b: (0, 0))
    p_spec = pl.BlockSpec((1, C), lambda b: (0, 0))

    out_nhwc = pl.pallas_call(
        residual_block_kernel,
        out_shape=jax.ShapeDtypeStruct((N, H, W, C), x_nhwc.dtype),
        grid=(N // Nb,),
        in_specs=[
            pl.BlockSpec((Nb, H + 2, W + 2, C), lambda b: (b, 0, 0, 0)),   # padded input (bf16)
            pl.BlockSpec((Nb, H, W, C), lambda b: (b, 0, 0, 0)),           # residual input (f32)
            w_spec, w_spec,
            p_spec, p_spec, p_spec, p_spec,
        ],
        out_specs=pl.BlockSpec((Nb, H, W, C), lambda b: (b, 0, 0, 0)),
        scratch_shapes=[
            pltpu.VMEM((Nb * H * W, 9 * C), jnp.bfloat16),    # im2col patches (reused by both convs)
            pltpu.VMEM((Nb, H + 2, W + 2, C), jnp.bfloat16),  # zero-padded y1 for conv2
        ],
        compiler_params=pltpu.CompilerParams(
            dimension_semantics=("parallel",),
            vmem_limit_bytes=32 * 1024 * 1024,
        ),
    )(x_pad, x_nhwc, w1, w2, g1_2d, b1_2d, g2_2d, b2_2d)
    return jnp.transpose(out_nhwc, (0, 3, 1, 2))


def residual_block_reference(x_nchw, w1_oihw, w2_oihw, g1, b1, g2, b2):
    """Pure-JAX f32 reference (matches PyTorch ResidualBlock forward in train mode)."""
    x = jnp.transpose(x_nchw, (0, 2, 3, 1))
    w1 = jnp.transpose(w1_oihw, (2, 3, 1, 0))
    w2 = jnp.transpose(w2_oihw, (2, 3, 1, 0))
    dn = lax.conv_dimension_numbers(x.shape, w1.shape, ('NHWC', 'HWIO', 'NHWC'))

    def inorm(y, g, b):
        m = jnp.mean(y, axis=(1, 2), keepdims=True)
        v = jnp.mean((y - m) ** 2, axis=(1, 2), keepdims=True)
        return (y - m) * lax.rsqrt(v + EPS) * g + b

    y = lax.conv_general_dilated(x, w1, (1, 1), 'SAME', dimension_numbers=dn)
    y = jnp.maximum(inorm(y, g1, b1), 0.0)
    y = lax.conv_general_dilated(y, w2, (1, 1), 'SAME', dimension_numbers=dn)
    y = inorm(y, g2, b2)
    return jnp.transpose(x + y, (0, 3, 1, 2))


if __name__ == "__main__":
    N, C, H, W = 2, 4, 16, 16          # dim_in == dim_out == C (required by the residual add)
    key = jax.random.PRNGKey(0)
    kx, k1, k2, kg1, kb1, kg2, kb2 = jax.random.split(key, 7)

    x = jax.random.normal(kx, (N, C, H, W), jnp.float32)
    w1 = jax.random.normal(k1, (C, C, 3, 3), jnp.float32) * 0.2    # Conv2d weight OIHW, bias=False
    w2 = jax.random.normal(k2, (C, C, 3, 3), jnp.float32) * 0.2
    # InstanceNorm2d affine params (C,)
    g1 = 1.0 + 0.1 * jax.random.normal(kg1, (C,), jnp.float32)
    b1 = 0.1 * jax.random.normal(kb1, (C,), jnp.float32)
    g2 = 1.0 + 0.1 * jax.random.normal(kg2, (C,), jnp.float32)
    b2 = 0.1 * jax.random.normal(kb2, (C,), jnp.float32)

    out = jax.block_until_ready(residual_block(x, w1, w2, g1, b1, g2, b2))
    ref = jax.block_until_ready(residual_block_reference(x, w1, w2, g1, b1, g2, b2))
    # bf16 MXU operands (vs. f32 XLA reference) -> loosened tolerance; norm/residual stay f32.
    np.testing.assert_allclose(np.asarray(out), np.asarray(ref), rtol=1e-1, atol=1e-1)

    print("KERNEL_OK")
</pallas_src>

<mosaic_0001>
module attributes {stable_mosaic.version = 11 : i64} {
  func.func @residual_block_kernel(%arg0: i32, %arg1: memref<2x18x18x4xbf16, #tpu.memory_space<vmem>>, %arg2: memref<2x16x16x4xf32, #tpu.memory_space<vmem>>, %arg3: memref<36x4xbf16, #tpu.memory_space<vmem>>, %arg4: memref<36x4xbf16, #tpu.memory_space<vmem>>, %arg5: memref<1x4xf32, #tpu.memory_space<vmem>>, %arg6: memref<1x4xf32, #tpu.memory_space<vmem>>, %arg7: memref<1x4xf32, #tpu.memory_space<vmem>>, %arg8: memref<1x4xf32, #tpu.memory_space<vmem>>, %arg9: memref<2x16x16x4xf32, #tpu.memory_space<vmem>>, %arg10: memref<512x36xbf16, #tpu.memory_space<vmem>>, %arg11: memref<2x18x18x4xbf16, #tpu.memory_space<vmem>>) attributes {dimension_semantics = [#tpu.dimension_semantics<parallel>], iteration_bounds = array<i64: 1>, scalar_prefetch = 0 : i64, scratch_operands = 2 : i64, tpu.core_type = #tpu.core_type<tc>, window_params = [{transform_indices = @transform_0, window_bounds = array<i64: 2, 18, 18, 4>}, {transform_indices = @transform_1, window_bounds = array<i64: 2, 16, 16, 4>}, {pipeline_mode = #tpu.pipeline_mode<synchronous>, transform_indices = @transform_2, window_bounds = array<i64: 36, 4>}, {pipeline_mode = #tpu.pipeline_mode<synchronous>, transform_indices = @transform_3, window_bounds = array<i64: 36, 4>}, {pipeline_mode = #tpu.pipeline_mode<synchronous>, transform_indices = @transform_4, window_bounds = array<i64: 1, 4>}, {pipeline_mode = #tpu.pipeline_mode<synchronous>, transform_indices = @transform_5, window_bounds = array<i64: 1, 4>}, {pipeline_mode = #tpu.pipeline_mode<synchronous>, transform_indices = @transform_6, window_bounds = array<i64: 1, 4>}, {pipeline_mode = #tpu.pipeline_mode<synchronous>, transform_indices = @transform_7, window_bounds = array<i64: 1, 4>}, {transform_indices = @transform_8, window_bounds = array<i64: 2, 16, 16, 4>}]} {
    %c0 = arith.constant 0 : index
    %c0_0 = arith.constant 0 : index
    %c0_1 = arith.constant 0 : index
    %c0_2 = arith.constant 0 : index
    %0 = vector.load %arg1[%c0, %c0_0, %c0_1, %c0_2] : memref<2x18x18x4xbf16, #tpu.memory_space<vmem>>, vector<2x18x18x4xbf16>
    %1 = vector.extract_strided_slice %0 {offsets = [0, 0, 0, 0], sizes = [2, 16, 16, 4], strides = [1, 1, 1, 1]} : vector<2x18x18x4xbf16> to vector<2x16x16x4xbf16>
    %2 = vector.shape_cast %1 : vector<2x16x16x4xbf16> to vector<512x4xbf16>
    %c0_3 = arith.constant 0 : index
    %c0_4 = arith.constant 0 : index
    %3 = vector.load %arg10[%c0_3, %c0_4] : memref<512x36xbf16, #tpu.memory_space<vmem>>, vector<512x4xbf16>
    tpu.vector_store %arg10[%c0_3, %c0_4], %2 {strides = array<i32>} : memref<512x36xbf16, #tpu.memory_space<vmem>>, vector<512x4xbf16>,
    %4 = vector.extract_strided_slice %0 {offsets = [0, 0, 1, 0], sizes = [2, 16, 16, 4], strides = [1, 1, 1, 1]} : vector<2x18x18x4xbf16> to vector<2x16x16x4xbf16>
    %5 = vector.shape_cast %4 : vector<2x16x16x4xbf16> to vector<512x4xbf16>
    %c0_5 = arith.constant 0 : index
    %c4 = arith.constant 4 : index
    %6 = vector.load %arg10[%c0_5, %c4] : memref<512x36xbf16, #tpu.memory_space<vmem>>, vector<512x4xbf16>
    tpu.vector_store %arg10[%c0_5, %c4], %5 {strides = array<i32>} : memref<512x36xbf16, #tpu.memory_space<vmem>>, vector<512x4xbf16>,
    %7 = vector.extract_strided_slice %0 {offsets = [0, 0, 2, 0], sizes = [2, 16, 16, 4], strides = [1, 1, 1, 1]} : vector<2x18x18x4xbf16> to vector<2x16x16x4xbf16>
    %8 = vector.shape_cast %7 : vector<2x16x16x4xbf16> to vector<512x4xbf16>
    %c0_6 = arith.constant 0 : index
    %c8 = arith.constant 8 : index
    %9 = vector.load %arg10[%c0_6, %c8] : memref<512x36xbf16, #tpu.memory_space<vmem>>, vector<512x4xbf16>
    tpu.vector_store %arg10[%c0_6, %c8], %8 {strides = array<i32>} : memref<512x36xbf16, #tpu.memory_space<vmem>>, vector<512x4xbf16>,
    %10 = vector.extract_strided_slice %0 {offsets = [0, 1, 0, 0], sizes = [2, 16, 16, 4], strides = [1, 1, 1, 1]} : vector<2x18x18x4xbf16> to vector<2x16x16x4xbf16>
    %11 = vector.shape_cast %10 : vector<2x16x16x4xbf16> to vector<512x4xbf16>
    %c0_7 = arith.constant 0 : index
    %c12 = arith.constant 12 : index
    %12 = vector.load %arg10[%c0_7, %c12] : memref<512x36xbf16, #tpu.memory_space<vmem>>, vector<512x4xbf16>
    tpu.vector_store %arg10[%c0_7, %c12], %11 {strides = array<i32>} : memref<512x36xbf16, #tpu.memory_space<vmem>>, vector<512x4xbf16>,
    %13 = vector.extract_strided_slice %0 {offsets = [0, 1, 1, 0], sizes = [2, 16, 16, 4], strides = [1, 1, 1, 1]} : vector<2x18x18x4xbf16> to vector<2x16x16x4xbf16>
    %14 = vector.shape_cast %13 : vector<2x16x16x4xbf16> to vector<512x4xbf16>
    %c0_8 = arith.constant 0 : index
    %c16 = arith.constant 16 : index
    %15 = vector.load %arg10[%c0_8, %c16] : memref<512x36xbf16, #tpu.memory_space<vmem>>, vector<512x4xbf16>
    tpu.vector_store %arg10[%c0_8, %c16], %14 {strides = array<i32>} : memref<512x36xbf16, #tpu.memory_space<vmem>>, vector<512x4xbf16>,
    %16 = vector.extract_strided_slice %0 {offsets = [0, 1, 2, 0], sizes = [2, 16, 16, 4], strides = [1, 1, 1, 1]} : vector<2x18x18x4xbf16> to vector<2x16x16x4xbf16>
    %17 = vector.shape_cast %16 : vector<2x16x16x4xbf16> to vector<512x4xbf16>
    %c0_9 = arith.constant 0 : index
    %c20 = arith.constant 20 : index
    %18 = vector.load %arg10[%c0_9, %c20] : memref<512x36xbf16, #tpu.memory_space<vmem>>, vector<512x4xbf16>
    tpu.vector_store %arg10[%c0_9, %c20], %17 {strides = array<i32>} : memref<512x36xbf16, #tpu.memory_space<vmem>>, vector<512x4xbf16>,
    %19 = vector.extract_strided_slice %0 {offsets = [0, 2, 0, 0], sizes = [2, 16, 16, 4], strides = [1, 1, 1, 1]} : vector<2x18x18x4xbf16> to vector<2x16x16x4xbf16>
    %20 = vector.shape_cast %19 : vector<2x16x16x4xbf16> to vector<512x4xbf16>
    %c0_10 = arith.constant 0 : index
    %c24 = arith.constant 24 : index
    %21 = vector.load %arg10[%c0_10, %c24] : memref<512x36xbf16, #tpu.memory_space<vmem>>, vector<512x4xbf16>
    tpu.vector_store %arg10[%c0_10, %c24], %20 {strides = array<i32>} : memref<512x36xbf16, #tpu.memory_space<vmem>>, vector<512x4xbf16>,
    %22 = vector.extract_strided_slice %0 {offsets = [0, 2, 1, 0], sizes = [2, 16, 16, 4], strides = [1, 1, 1, 1]} : vector<2x18x18x4xbf16> to vector<2x16x16x4xbf16>
    %23 = vector.shape_cast %22 : vector<2x16x16x4xbf16> to vector<512x4xbf16>
    %c0_11 = arith.constant 0 : index
    %c28 = arith.constant 28 : index
    %24 = vector.load %arg10[%c0_11, %c28] : memref<512x36xbf16, #tpu.memory_space<vmem>>, vector<512x4xbf16>
    tpu.vector_store %arg10[%c0_11, %c28], %23 {strides = array<i32>} : memref<512x36xbf16, #tpu.memory_space<vmem>>, vector<512x4xbf16>,
    %25 = vector.extract_strided_slice %0 {offsets = [0, 2, 2, 0], sizes = [2, 16, 16, 4], strides = [1, 1, 1, 1]} : vector<2x18x18x4xbf16> to vector<2x16x16x4xbf16>
    %26 = vector.shape_cast %25 : vector<2x16x16x4xbf16> to vector<512x4xbf16>
    %c0_12 = arith.constant 0 : index
    %c32 = arith.constant 32 : index
    %27 = vector.load %arg10[%c0_12, %c32] : memref<512x36xbf16, #tpu.memory_space<vmem>>, vector<512x4xbf16>
    tpu.vector_store %arg10[%c0_12, %c32], %26 {strides = array<i32>} : memref<512x36xbf16, #tpu.memory_space<vmem>>, vector<512x4xbf16>,
    %c0_13 = arith.constant 0 : index
    %c0_14 = arith.constant 0 : index
    %28 = vector.load %arg10[%c0_13, %c0_14] : memref<512x36xbf16, #tpu.memory_space<vmem>>, vector<512x36xbf16>
    %c0_15 = arith.constant 0 : index
    %c0_16 = arith.constant 0 : index
    %29 = vector.load %arg3[%c0_15, %c0_16] : memref<36x4xbf16, #tpu.memory_space<vmem>>, vector<36x4xbf16>
    %cst = arith.constant dense<0.000000e+00> : vector<512x4xf32>
    %30 = tpu.matmul %28, %29, %cst {dimension_numbers = #tpu.dot_dimension_numbers<[1], [0], [0], [1], [0, 0, 1, 1], [], []>} : vector<512x36xbf16>, vector<36x4xbf16>, vector<512x4xf32> -> vector<512x4xf32>
    %c0_17 = arith.constant 0 : index
    %c0_18 = arith.constant 0 : index
    %31 = vector.load %arg5[%c0_17, %c0_18] : memref<1x4xf32, #tpu.memory_space<vmem>>, vector<1x4xf32>
    %c0_19 = arith.constant 0 : index
    %c0_20 = arith.constant 0 : index
    %32 = vector.load %arg6[%c0_19, %c0_20] : memref<1x4xf32, #tpu.memory_space<vmem>>, vector<1x4xf32>
    %33 = vector.shape_cast %30 : vector<512x4xf32> to vector<2x256x4xf32>
    %cst_21 = arith.constant dense<0.000000e+00> : vector<2x4xf32>
    %34 = vector.multi_reduction <add>, %33, %cst_21 [1] : vector<2x256x4xf32> to vector<2x4xf32>
    %35 = vector.shape_cast %34 : vector<2x4xf32> to vector<2x1x4xf32>
    %cst_22 = arith.constant 2.560000e+02 : f32
    %36 = vector.broadcast %cst_22 : f32 to vector<2x1x4xf32>
    %37 = arith.divf %35, %36 : vector<2x1x4xf32>
    %38 = arith.mulf %33, %33 : vector<2x256x4xf32>
    %cst_23 = arith.constant dense<0.000000e+00> : vector<2x4xf32>
    %39 = vector.multi_reduction <add>, %38, %cst_23 [1] : vector<2x256x4xf32> to vector<2x4xf32>
    %40 = vector.shape_cast %39 : vector<2x4xf32> to vector<2x1x4xf32>
    %cst_24 = arith.constant 2.560000e+02 : f32
    %41 = vector.broadcast %cst_24 : f32 to vector<2x1x4xf32>
    %42 = arith.divf %40, %41 : vector<2x1x4xf32>
    %43 = arith.mulf %37, %37 : vector<2x1x4xf32>
    %44 = arith.subf %42, %43 : vector<2x1x4xf32>
    %45 = vector.broadcast %37 : vector<2x1x4xf32> to vector<2x256x4xf32>
    %46 = arith.subf %33, %45 : vector<2x256x4xf32>
    %cst_25 = arith.constant 9.99999974E-6 : f32
    %47 = vector.broadcast %cst_25 : f32 to vector<2x1x4xf32>
    %48 = arith.addf %44, %47 : vector<2x1x4xf32>
    %49 = math.rsqrt %48 : vector<2x1x4xf32>
    %50 = vector.broadcast %49 : vector<2x1x4xf32> to vector<2x256x4xf32>
    %51 = arith.mulf %46, %50 : vector<2x256x4xf32>
    %52 = vector.shape_cast %31 : vector<1x4xf32> to vector<1x1x4xf32>
    %53 = vector.broadcast %52 : vector<1x1x4xf32> to vector<2x256x4xf32>
    %54 = arith.mulf %51, %53 : vector<2x256x4xf32>
    %55 = vector.shape_cast %32 : vector<1x4xf32> to vector<1x1x4xf32>
    %56 = vector.broadcast %55 : vector<1x1x4xf32> to vector<2x256x4xf32>
    %57 = arith.addf %54, %56 : vector<2x256x4xf32>
    %cst_26 = arith.constant 0.000000e+00 : f32
    %58 = vector.broadcast %cst_26 : f32 to vector<2x256x4xf32>
    %59 = arith.maximumf %57, %58 : vector<2x256x4xf32>
    %cst_27 = arith.constant 0.000000e+00 : bf16
    %60 = vector.broadcast %cst_27 : bf16 to vector<2x1x18x4xbf16>
    %cst_28 = arith.constant 0.000000e+00 : bf16
    %61 = vector.broadcast %cst_28 : bf16 to vector<2x18x1x4xbf16>
    %c0_29 = arith.constant 0 : index
    %c0_30 = arith.constant 0 : index
    %c0_31 = arith.constant 0 : index
    %c0_32 = arith.constant 0 : index
    %62 = vector.load %arg11[%c0_29, %c0_30, %c0_31, %c0_32] : memref<2x18x18x4xbf16, #tpu.memory_space<vmem>>, vector<2x1x18x4xbf16>
    tpu.vector_store %arg11[%c0_29, %c0_30, %c0_31, %c0_32], %60 {strides = array<i32>} : memref<2x18x18x4xbf16, #tpu.memory_space<vmem>>, vector<2x1x18x4xbf16>,
    %c0_33 = arith.constant 0 : index
    %c17 = arith.constant 17 : index
    %c0_34 = arith.constant 0 : index
    %c0_35 = arith.constant 0 : index
    %63 = vector.load %arg11[%c0_33, %c17, %c0_34, %c0_35] : memref<2x18x18x4xbf16, #tpu.memory_space<vmem>>, vector<2x1x18x4xbf16>
    tpu.vector_store %arg11[%c0_33, %c17, %c0_34, %c0_35], %60 {strides = array<i32>} : memref<2x18x18x4xbf16, #tpu.memory_space<vmem>>, vector<2x1x18x4xbf16>,
    %c0_36 = arith.constant 0 : index
    %c0_37 = arith.constant 0 : index
    %c0_38 = arith.constant 0 : index
    %c0_39 = arith.constant 0 : index
    %64 = vector.load %arg11[%c0_36, %c0_37, %c0_38, %c0_39] : memref<2x18x18x4xbf16, #tpu.memory_space<vmem>>, vector<2x18x1x4xbf16>
    tpu.vector_store %arg11[%c0_36, %c0_37, %c0_38, %c0_39], %61 {strides = array<i32>} : memref<2x18x18x4xbf16, #tpu.memory_space<vmem>>, vector<2x18x1x4xbf16>,
    %c0_40 = arith.constant 0 : index
    %c0_41 = arith.constant 0 : index
    %c17_42 = arith.constant 17 : index
    %c0_43 = arith.constant 0 : index
    %65 = vector.load %arg11[%c0_40, %c0_41, %c17_42, %c0_43] : memref<2x18x18x4xbf16, #tpu.memory_space<vmem>>, vector<2x18x1x4xbf16>
    tpu.vector_store %arg11[%c0_40, %c0_41, %c17_42, %c0_43], %61 {strides = array<i32>} : memref<2x18x18x4xbf16, #tpu.memory_space<vmem>>, vector<2x18x1x4xbf16>,
    %66 = vector.shape_cast %59 : vector<2x256x4xf32> to vector<2x16x16x4xf32>
    %67 = arith.truncf %66 : vector<2x16x16x4xf32> to vector<2x16x16x4xbf16>
    %c0_44 = arith.constant 0 : index
    %c1 = arith.constant 1 : index
    %c1_45 = arith.constant 1 : index
    %c0_46 = arith.constant 0 : index
    %68 = vector.load %arg11[%c0_44, %c1, %c1_45, %c0_46] : memref<2x18x18x4xbf16, #tpu.memory_space<vmem>>, vector<2x16x16x4xbf16>
    tpu.vector_store %arg11[%c0_44, %c1, %c1_45, %c0_46], %67 {strides = array<i32>} : memref<2x18x18x4xbf16, #tpu.memory_space<vmem>>, vector<2x16x16x4xbf16>,
    %c0_47 = arith.constant 0 : index
    %c0_48 = arith.constant 0 : index
    %c0_49 = arith.constant 0 : index
    %c0_50 = arith.constant 0 : index
    %69 = vector.load %arg11[%c0_47, %c0_48, %c0_49, %c0_50] : memref<2x18x18x4xbf16, #tpu.memory_space<vmem>>, vector<2x18x18x4xbf16>
    %70 = vector.extract_strided_slice %69 {offsets = [0, 0, 0, 0], sizes = [2, 16, 16, 4], strides = [1, 1, 1, 1]} : vector<2x18x18x4xbf16> to vector<2x16x16x4xbf16>
    %71 = vector.shape_cast %70 : vector<2x16x16x4xbf16> to vector<512x4xbf16>
    %c0_51 = arith.constant 0 : index
    %c0_52 = arith.constant 0 : index
    %72 = vector.load %arg10[%c0_51, %c0_52] : memref<512x36xbf16, #tpu.memory_space<vmem>>, vector<512x4xbf16>
    tpu.vector_store %arg10[%c0_51, %c0_52], %71 {strides = array<i32>} : memref<512x36xbf16, #tpu.memory_space<vmem>>, vector<512x4xbf16>,
    %73 = vector.extract_strided_slice %69 {offsets = [0, 0, 1, 0], sizes = [2, 16, 16, 4], strides = [1, 1, 1, 1]} : vector<2x18x18x4xbf16> to vector<2x16x16x4xbf16>
    %74 = vector.shape_cast %73 : vector<2x16x16x4xbf16> to vector<512x4xbf16>
    %c0_53 = arith.constant 0 : index
    %c4_54 = arith.constant 4 : index
    %75 = vector.load %arg10[%c0_53, %c4_54] : memref<512x36xbf16, #tpu.memory_space<vmem>>, vector<512x4xbf16>
    tpu.vector_store %arg10[%c0_53, %c4_54], %74 {strides = array<i32>} : memref<512x36xbf16, #tpu.memory_space<vmem>>, vector<512x4xbf16>,
    %76 = vector.extract_strided_slice %69 {offsets = [0, 0, 2, 0], sizes = [2, 16, 16, 4], strides = [1, 1, 1, 1]} : vector<2x18x18x4xbf16> to vector<2x16x16x4xbf16>
    %77 = vector.shape_cast %76 : vector<2x16x16x4xbf16> to vector<512x4xbf16>
    %c0_55 = arith.constant 0 : index
    %c8_56 = arith.constant 8 : index
    %78 = vector.load %arg10[%c0_55, %c8_56] : memref<512x36xbf16, #tpu.memory_space<vmem>>, vector<512x4xbf16>
    tpu.vector_store %arg10[%c0_55, %c8_56], %77 {strides = array<i32>} : memref<512x36xbf16, #tpu.memory_space<vmem>>, vector<512x4xbf16>,
    %79 = vector.extract_strided_slice %69 {offsets = [0, 1, 0, 0], sizes = [2, 16, 16, 4], strides = [1, 1, 1, 1]} : vector<2x18x18x4xbf16> to vector<2x16x16x4xbf16>
    %80 = vector.shape_cast %79 : vector<2x16x16x4xbf16> to vector<512x4xbf16>
    %c0_57 = arith.constant 0 : index
    %c12_58 = arith.constant 12 : index
    %81 = vector.load %arg10[%c0_57, %c12_58] : memref<512x36xbf16, #tpu.memory_space<vmem>>, vector<512x4xbf16>
    tpu.vector_store %arg10[%c0_57, %c12_58], %80 {strides = array<i32>} : memref<512x36xbf16, #tpu.memory_space<vmem>>, vector<512x4xbf16>,
    %82 = vector.extract_strided_slice %69 {offsets = [0, 1, 1, 0], sizes = [2, 16, 16, 4], strides = [1, 1, 1, 1]} : vector<2x18x18x4xbf16> to vector<2x16x16x4xbf16>
    %83 = vector.shape_cast %82 : vector<2x16x16x4xbf16> to vector<512x4xbf16>
    %c0_59 = arith.constant 0 : index
    %c16_60 = arith.constant 16 : index
    %84 = vector.load %arg10[%c0_59, %c16_60] : memref<512x36xbf16, #tpu.memory_space<vmem>>, vector<512x4xbf16>
    tpu.vector_store %arg10[%c0_59, %c16_60], %83 {strides = array<i32>} : memref<512x36xbf16, #tpu.memory_space<vmem>>, vector<512x4xbf16>,
    %85 = vector.extract_strided_slice %69 {offsets = [0, 1, 2, 0], sizes = [2, 16, 16, 4], strides = [1, 1, 1, 1]} : vector<2x18x18x4xbf16> to vector<2x16x16x4xbf16>
    %86 = vector.shape_cast %85 : vector<2x16x16x4xbf16> to vector<512x4xbf16>
    %c0_61 = arith.constant 0 : index
    %c20_62 = arith.constant 20 : index
    %87 = vector.load %arg10[%c0_61, %c20_62] : memref<512x36xbf16, #tpu.memory_space<vmem>>, vector<512x4xbf16>
    tpu.vector_store %arg10[%c0_61, %c20_62], %86 {strides = array<i32>} : memref<512x36xbf16, #tpu.memory_space<vmem>>, vector<512x4xbf16>,
    %88 = vector.extract_strided_slice %69 {offsets = [0, 2, 0, 0], sizes = [2, 16, 16, 4], strides = [1, 1, 1, 1]} : vector<2x18x18x4xbf16> to vector<2x16x16x4xbf16>
    %89 = vector.shape_cast %88 : vector<2x16x16x4xbf16> to vector<512x4xbf16>
    %c0_63 = arith.constant 0 : index
    %c24_64 = arith.constant 24 : index
    %90 = vector.load %arg10[%c0_63, %c24_64] : memref<512x36xbf16, #tpu.memory_space<vmem>>, vector<512x4xbf16>
    tpu.vector_store %arg10[%c0_63, %c24_64], %89 {strides = array<i32>} : memref<512x36xbf16, #tpu.memory_space<vmem>>, vector<512x4xbf16>,
    %91 = vector.extract_strided_slice %69 {offsets = [0, 2, 1, 0], sizes = [2, 16, 16, 4], strides = [1, 1, 1, 1]} : vector<2x18x18x4xbf16> to vector<2x16x16x4xbf16>
    %92 = vector.shape_cast %91 : vector<2x16x16x4xbf16> to vector<512x4xbf16>
    %c0_65 = arith.constant 0 : index
    %c28_66 = arith.constant 28 : index
    %93 = vector.load %arg10[%c0_65, %c28_66] : memref<512x36xbf16, #tpu.memory_space<vmem>>, vector<512x4xbf16>
    tpu.vector_store %arg10[%c0_65, %c28_66], %92 {strides = array<i32>} : memref<512x36xbf16, #tpu.memory_space<vmem>>, vector<512x4xbf16>,
    %94 = vector.extract_strided_slice %69 {offsets = [0, 2, 2, 0], sizes = [2, 16, 16, 4], strides = [1, 1, 1, 1]} : vector<2x18x18x4xbf16> to vector<2x16x16x4xbf16>
    %95 = vector.shape_cast %94 : vector<2x16x16x4xbf16> to vector<512x4xbf16>
    %c0_67 = arith.constant 0 : index
    %c32_68 = arith.constant 32 : index
    %96 = vector.load %arg10[%c0_67, %c32_68] : memref<512x36xbf16, #tpu.memory_space<vmem>>, vector<512x4xbf16>
    tpu.vector_store %arg10[%c0_67, %c32_68], %95 {strides = array<i32>} : memref<512x36xbf16, #tpu.memory_space<vmem>>, vector<512x4xbf16>,
    %c0_69 = arith.constant 0 : index
    %c0_70 = arith.constant 0 : index
    %97 = vector.load %arg10[%c0_69, %c0_70] : memref<512x36xbf16, #tpu.memory_space<vmem>>, vector<512x36xbf16>
    %c0_71 = arith.constant 0 : index
    %c0_72 = arith.constant 0 : index
    %98 = vector.load %arg4[%c0_71, %c0_72] : memref<36x4xbf16, #tpu.memory_space<vmem>>, vector<36x4xbf16>
    %cst_73 = arith.constant dense<0.000000e+00> : vector<512x4xf32>
    %99 = tpu.matmul %97, %98, %cst_73 {dimension_numbers = #tpu.dot_dimension_numbers<[1], [0], [0], [1], [0, 0, 1, 1], [], []>} : vector<512x36xbf16>, vector<36x4xbf16>, vector<512x4xf32> -> vector<512x4xf32>
    %c0_74 = arith.constant 0 : index
    %c0_75 = arith.constant 0 : index
    %100 = vector.load %arg7[%c0_74, %c0_75] : memref<1x4xf32, #tpu.memory_space<vmem>>, vector<1x4xf32>
    %c0_76 = arith.constant 0 : index
    %c0_77 = arith.constant 0 : index
    %101 = vector.load %arg8[%c0_76, %c0_77] : memref<1x4xf32, #tpu.memory_space<vmem>>, vector<1x4xf32>
    %102 = vector.shape_cast %99 : vector<512x4xf32> to vector<2x256x4xf32>
    %cst_78 = arith.constant dense<0.000000e+00> : vector<2x4xf32>
    %103 = vector.multi_reduction <add>, %102, %cst_78 [1] : vector<2x256x4xf32> to vector<2x4xf32>
    %104 = vector.shape_cast %103 : vector<2x4xf32> to vector<2x1x4xf32>
    %cst_79 = arith.constant 2.560000e+02 : f32
    %105 = vector.broadcast %cst_79 : f32 to vector<2x1x4xf32>
    %106 = arith.divf %104, %105 : vector<2x1x4xf32>
    %107 = arith.mulf %102, %102 : vector<2x256x4xf32>
    %cst_80 = arith.constant dense<0.000000e+00> : vector<2x4xf32>
    %108 = vector.multi_reduction <add>, %107, %cst_80 [1] : vector<2x256x4xf32> to vector<2x4xf32>
    %109 = vector.shape_cast %108 : vector<2x4xf32> to vector<2x1x4xf32>
    %cst_81 = arith.constant 2.560000e+02 : f32
    %110 = vector.broadcast %cst_81 : f32 to vector<2x1x4xf32>
    %111 = arith.divf %109, %110 : vector<2x1x4xf32>
    %112 = arith.mulf %106, %106 : vector<2x1x4xf32>
    %113 = arith.subf %111, %112 : vector<2x1x4xf32>
    %114 = vector.broadcast %106 : vector<2x1x4xf32> to vector<2x256x4xf32>
    %115 = arith.subf %102, %114 : vector<2x256x4xf32>
    %cst_82 = arith.constant 9.99999974E-6 : f32
    %116 = vector.broadcast %cst_82 : f32 to vector<2x1x4xf32>
    %117 = arith.addf %113, %116 : vector<2x1x4xf32>
    %118 = math.rsqrt %117 : vector<2x1x4xf32>
    %119 = vector.broadcast %118 : vector<2x1x4xf32> to vector<2x256x4xf32>
    %120 = arith.mulf %115, %119 : vector<2x256x4xf32>
    %121 = vector.shape_cast %100 : vector<1x4xf32> to vector<1x1x4xf32>
    %122 = vector.broadcast %121 : vector<1x1x4xf32> to vector<2x256x4xf32>
    %123 = arith.mulf %120, %122 : vector<2x256x4xf32>
    %124 = vector.shape_cast %101 : vector<1x4xf32> to vector<1x1x4xf32>
    %125 = vector.broadcast %124 : vector<1x1x4xf32> to vector<2x256x4xf32>
    %126 = arith.addf %123, %125 : vector<2x256x4xf32>
    %c0_83 = arith.constant 0 : index
    %c0_84 = arith.constant 0 : index
    %c0_85 = arith.constant 0 : index
    %c0_86 = arith.constant 0 : index
    %127 = vector.load %arg2[%c0_83, %c0_84, %c0_85, %c0_86] : memref<2x16x16x4xf32, #tpu.memory_space<vmem>>, vector<2x16x16x4xf32>
    %128 = vector.shape_cast %126 : vector<2x256x4xf32> to vector<2x16x16x4xf32>
    %129 = arith.addf %127, %128 : vector<2x16x16x4xf32>
    %c0_87 = arith.constant 0 : index
    %c0_88 = arith.constant 0 : index
    %c0_89 = arith.constant 0 : index
    %c0_90 = arith.constant 0 : index
    %130 = vector.load %arg9[%c0_87, %c0_88, %c0_89, %c0_90] : memref<2x16x16x4xf32, #tpu.memory_space<vmem>>, vector<2x16x16x4xf32>
    tpu.vector_store %arg9[%c0_87, %c0_88, %c0_89, %c0_90], %129 {strides = array<i32>} : memref<2x16x16x4xf32, #tpu.memory_space<vmem>>, vector<2x16x16x4xf32>,
    return
  }
  func.func @transform_0(%arg0: i32) -> (i32, i32, i32, i32) {
    %c0_i32 = arith.constant 0 : i32
    %c0_i32_0 = arith.constant 0 : i32
    %c0_i32_1 = arith.constant 0 : i32
    %c0_i32_2 = arith.constant 0 : i32
    return %arg0, %c0_i32, %c0_i32_0, %c0_i32_1 : i32, i32, i32, i32
  }
  func.func @transform_1(%arg0: i32) -> (i32, i32, i32, i32) {
    %c0_i32 = arith.constant 0 : i32
    %c0_i32_0 = arith.constant 0 : i32
    %c0_i32_1 = arith.constant 0 : i32
    %c0_i32_2 = arith.constant 0 : i32
    return %arg0, %c0_i32, %c0_i32_0, %c0_i32_1 : i32, i32, i32, i32
  }
  func.func @transform_2(%arg0: i32) -> (i32, i32) {
    %c0_i32 = arith.constant 0 : i32
    %c0_i32_0 = arith.constant 0 : i32
    %c0_i32_1 = arith.constant 0 : i32
    return %c0_i32, %c0_i32_0 : i32, i32
  }
  func.func @transform_3(%arg0: i32) -> (i32, i32) {
    %c0_i32 = arith.constant 0 : i32
    %c0_i32_0 = arith.constant 0 : i32
    %c0_i32_1 = arith.constant 0 : i32
    return %c0_i32, %c0_i32_0 : i32, i32
  }
  func.func @transform_4(%arg0: i32) -> (i32, i32) {
    %c0_i32 = arith.constant 0 : i32
    %c0_i32_0 = arith.constant 0 : i32
    %c0_i32_1 = arith.constant 0 : i32
    return %c0_i32, %c0_i32_0 : i32, i32
  }
  func.func @transform_5(%arg0: i32) -> (i32, i32) {
    %c0_i32 = arith.constant 0 : i32
    %c0_i32_0 = arith.constant 0 : i32
    %c0_i32_1 = arith.constant 0 : i32
    return %c0_i32, %c0_i32_0 : i32, i32
  }
  func.func @transform_6(%arg0: i32) -> (i32, i32) {
    %c0_i32 = arith.constant 0 : i32
    %c0_i32_0 = arith.constant 0 : i32
    %c0_i32_1 = arith.constant 0 : i32
    return %c0_i32, %c0_i32_0 : i32, i32
  }
  func.func @transform_7(%arg0: i32) -> (i32, i32) {
    %c0_i32 = arith.constant 0 : i32
    %c0_i32_0 = arith.constant 0 : i32
    %c0_i32_1 = arith.constant 0 : i32
    return %c0_i32, %c0_i32_0 : i32, i32
  }
  func.func @transform_8(%arg0: i32) -> (i32, i32, i32, i32) {
    %c0_i32 = arith.constant 0 : i32
    %c0_i32_0 = arith.constant 0 : i32
    %c0_i32_1 = arith.constant 0 : i32
    %c0_i32_2 = arith.constant 0 : i32
    return %arg0, %c0_i32, %c0_i32_0, %c0_i32_1 : i32, i32, i32, i32
  }
}

</mosaic_0001>

<bundles_post_ra>
// kernel: tpu_custom_call.1
= control target key start
LH: loop header
LB: loop body
LE: loop exit
PB: predicated region body
PF: predicated region fallthrough
CT: control target
= control target key end

     0   :  { %vm363_vm0 = vsmask.f32 3328  ;;  %vm364_vm1 = vsmask.f32 7440  ;;  %v17949_v26 = vmov 0  ;;  %s10112_s29 = smov 4   ;;  %s17633_s0 = inlined_call_operand.vmem [shape: bf16[2,18,18,4], index: 0, kind: input, shape index: {}]   ;;  %s17634_s2 = inlined_call_operand.vmem [shape: bf16[36,4], index: 2, kind: input, shape index: {}]   ;;  %s17635_s4 = inlined_call_operand.vmem [shape: f32[1,4], index: 4, kind: input, shape index: {}]   ;;  %s17636_s5 = inlined_call_operand.vmem [shape: f32[1,4], index: 5, kind: input, shape index: {}]   ;;  %s17637_s3 = inlined_call_operand.vmem [shape: bf16[36,4], index: 3, kind: input, shape index: {}]   ;;  %s17638_s6 = inlined_call_operand.vmem [shape: f32[1,4], index: 6, kind: input, shape index: {}]   ;;  %s17639_s7 = inlined_call_operand.vmem [shape: f32[1,4], index: 7, kind: input, shape index: {}]   ;;  %s17640_s1 = inlined_call_operand.vmem [shape: f32[2,16,16,4], index: 1, kind: input, shape index: {}]   ;;  %s17641_s8 = inlined_call_operand.vmem [shape: f32[2,16,16,4], index: 8, kind: output, shape index: {}]  }
   0x1   :  { %v30_v0 = vld [vmem:[%s17633_s0] sm:$0xf]  ;;  %v31_v1 = vld [vmem:[%s17633_s0 + $0x4] sm:$0xf]  ;;  %v32_v2 = vld [vmem:[%s17633_s0 + $0x8] sm:$0x1] }
   0x2   :  { %v367_v3 = vshrl.u32 %v30_v0, 16  ;;  %v370_v4 = vshll.u32 %v30_v0, 16  ;;  %v376_v5 = vshll.u32 %v31_v1, 16  ;;  %v380_v6 = vshrl.u32 %v31_v1, 16  ;;  %v36_v7 = vld [vmem:[%s17633_s0 + $0x18] sm:$0xf]  ;;  %vm10192_vm2 = vmor %vm363_vm0, %vm364_vm1 }
   0x3   :  { %v386_v8 = vshll.u32 %v32_v2, 16  ;;  %v37_v9 = vld [vmem:[%s17633_s0 + $0x1c] sm:$0xf]  ;;  %v38_v10 = vld [vmem:[%s17633_s0 + $0x20] sm:$0x1]  ;;  %v415_v11 = vshrl.u32 %v36_v7, 16 }
   0x4   :  { %v369_v12 = vrot.slane %v367_v3, 4  ;;  %v372_v13 = vrot.slane %v370_v4, 5  ;;  %v378_v14 = vrot.slane %v376_v5, 5  ;;  %v382_v15 = vrot.slane %v380_v6, 4  ;;  %v33_v16 = vld [vmem:[%s17633_s0 + $0xc] sm:$0xf] }
   0x5   :  { %v388_v17 = vrot.slane %v386_v8, 5  ;;  %v417_v18 = vrot.slane %v415_v11, 4  ;;  %v418_v19 = vshll.u32 %v36_v7, 16  ;;  %v424_v20 = vshll.u32 %v37_v9, 16  ;;  %v34_v25 = vld [vmem:[%s17633_s0 + $0x10] sm:$0xf] }
   0x6   :  { %v373_v21 = vor.u32 %v372_v13, %v369_v12  ;;  %v383_v22 = vor.u32 %v382_v15, %v378_v14  ;;  %v428_v23 = vshrl.u32 %v37_v9, 16  ;;  %v434_v24 = vshll.u32 %v38_v10, 16  ;;  %v35_v35 = vld [vmem:[%s17633_s0 + $0x14] sm:$0x1]  ;;  %v39_v40 = vld [vmem:[%s17633_s0 + $0x24] sm:$0xf] }
   0x7   :  { %v17950_v26 = vsel %vm10192_vm2, 4294967295, %v17949_v26  ;;  %v420_v27 = vrot.slane %v418_v19, 5  ;;  %v426_v28 = vrot.slane %v424_v20, 5  ;;  %v391_v29 = vshrl.u32 %v33_v16, 16  ;;  %v40_v45 = vld [vmem:[%s17633_s0 + $0x28] sm:$0xf] }
   0x8   :  { %17951 = vst [vmem:[#allocation4_spill] sm:$0xff] %v17950_v26  ;;  %v394_v30 = vshll.u32 %v33_v16, 16  ;;  %v374_v31 = vrot.slane %v373_v21, 4  ;;  %v384_v32 = vrot.slane %v383_v22, 4  ;;  %v430_v33 = vrot.slane %v428_v23, 4  ;;  %s10113_s15 = smov 8  }
   0x9   :  { %v436_v34 = vrot.slane %v434_v24, 5  ;;  %v421_v36 = vor.u32 %v420_v27, %v417_v18  ;;  %v393_v37 = vrot.slane %v391_v29, 4  ;;  %v400_v39 = vshll.u32 %v34_v25, 16  ;;  %v41_v53 = vld [vmem:[%s17633_s0 + $0x2c] sm:$0x1]  ;;  %s10114_s16 = smov 12  }
   0xa   :  { %v396_v38 = vrot.slane %v394_v30, 5  ;;  %v379_v41 = vsel %vm10192_vm2, %v374_v31, %v378_v14  ;;  %v389_v42 = vsel %vm10192_vm2, %v384_v32, %v388_v17  ;;  %v431_v43 = vor.u32 %v430_v33, %v426_v28  ;;  %v42_v59 = vld [vmem:[%s17633_s0 + $0x30] sm:$0xf]  ;;  %v43_v0 = vld [vmem:[%s17633_s0 + $0x34] sm:$0xf]  ;;  %s10115_s17 = smov 16  }
   0xb   :  { %v404_v44 = vshrl.u32 %v34_v25, 16  ;;  %v9249_v46 = vcombine.low %v379_v41, %v389_v42  ;;  %v422_v47 = vrot.slane %v421_v36, 4  ;;  %v402_v49 = vrot.slane %v400_v39, 5  ;;  %v44_v8 = vld [vmem:[%s17633_s0 + $0x38] sm:$0x1]  ;;  %s10116_s20 = smov 20  }
   0xc   :  { %v397_v48 = vor.u32 %v396_v38, %v393_v37  ;;  %v432_v50 = vrot.slane %v431_v43, 4  ;;  %v410_v52 = vshll.u32 %v35_v35, 16  ;;  %v439_v54 = vshrl.u32 %v39_v40, 16  ;;  %v45_v14 = vld [vmem:[%s17633_s0 + $0x3c] sm:$0xf]  ;;  %s10117_s23 = smov 24  }
   0xd   :  { %v406_v51 = vrot.slane %v404_v44, 4  ;;  %1230 = vrot.lane.b32.xlu0 %v9249_v46, %s10112_s29  ;;  %v427_v55 = vsel %vm10192_vm2, %v422_v47, %v426_v28  ;;  %v442_v57 = vshll.u32 %v39_v40, 16  ;;  %v448_v58 = vshll.u32 %v40_v45, 16  ;;  %v46_v19 = vld [vmem:[%s17633_s0 + $0x40] sm:$0xf]  ;;  %s10118_s26 = smov 28  }
   0xe   :  { %v398_v56 = vrot.slane %v397_v48, 4  ;;  %v437_v60 = vsel %vm10192_vm2, %v432_v50, %v436_v34  ;;  %v412_v62 = vrot.slane %v410_v52, 5  ;;  %v441_v63 = vrot.slane %v439_v54, 4  ;;  %v47_v31 = vld [vmem:[%s17633_s0 + $0x44] sm:$0x1] }
   0xf   :  { %v407_v61 = vor.u32 %v406_v51, %v402_v49  ;;  %v10223_v1 = vcombine.low %v427_v55, %v437_v60  ;;  %v444_v3 = vrot.slane %v442_v57, 5  ;;  %v450_v4 = vrot.slane %v448_v58, 5  ;;  %v48_v34 = vld [vmem:[%s17633_s0 + $0x48] sm:$0xf]  ;;  %v49_v46 = vld [vmem:[%s17633_s0 + $0x4c] sm:$0xf] }
  0x10   :  { %v403_v2 = vsel %vm10192_vm2, %v398_v56, %v402_v49  ;;  %v452_v6 = vshrl.u32 %v40_v45, 16  ;;  %v458_v7 = vshll.u32 %v41_v53, 16  ;;  %v463_v9 = vshrl.u32 %v42_v59, 16  ;;  %v50_v52 = vld [vmem:[%s17633_s0 + $0x50] sm:$0x1] }
  0x11   :  { %17952 = vst [vmem:[#allocation5_spill] sm:$0xff] %v10223_v1  ;;  %v408_v5 = vrot.slane %v407_v61, 4  ;;  %1234 = vrot.lane.b32.xlu1 %v10223_v1, %s10112_s29  ;;  %v445_v10 = vor.u32 %v444_v3, %v441_v63  ;;  %v466_v11 = vshll.u32 %v42_v59, 16  ;;  %v472_v12 = vshll.u32 %v43_v0, 16  ;;  %v51_v53 = vld [vmem:[%s17633_s0 + $0x54] sm:$0xf] }
  0x12   :  { %v476_v13 = vshrl.u32 %v43_v0, 16  ;;  %v454_v16 = vrot.slane %v452_v6, 4  ;;  %v460_v17 = vrot.slane %v458_v7, 5  ;;  %v465_v18 = vrot.slane %v463_v9, 4  ;;  %v53_v7 = vld [vmem:[%s17633_s0 + $0x5c] sm:$0x1] }
  0x13   :  { %v413_v15 = vsel %vm10192_vm2, %v408_v5, %v412_v62  ;;  %v446_v21 = vrot.slane %v445_v10, 4  ;;  %v468_v22 = vrot.slane %v466_v11, 5  ;;  %v474_v23 = vrot.slane %v472_v12, 5 }
  0x14   :  { %v10240_v20 = vcombine.low %v403_v2, %v413_v15  ;;  %v455_v24 = vor.u32 %v454_v16, %v450_v4  ;;  %v478_v25 = vrot.slane %v476_v13, 4  ;;  %v482_v27 = vshll.u32 %v44_v8, 16  ;;  %v52_v2 = vld [vmem:[%s17633_s0 + $0x58] sm:$0xf]  ;;  %v54_v13 = vld [vmem:[%s17633_s0 + $0x60] sm:$0xf] }
  0x15   :  { %v487_v28 = vshrl.u32 %v45_v14, 16  ;;  %v451_v29 = vsel %vm10192_vm2, %v446_v21, %v450_v4  ;;  %v469_v30 = vor.u32 %v468_v22, %v465_v18  ;;  %v490_v32 = vshll.u32 %v45_v14, 16 }
  0x16   :  { %17953 = vst [vmem:[#allocation6_spill] sm:$0xff] %v10240_v20  ;;  %1232 = vrot.lane.b32.xlu0 %v10240_v20, %s10112_s29  ;;  %v496_v33 = vshll.u32 %v46_v19, 16  ;;  %v456_v35 = vrot.slane %v455_v24, 4  ;;  %v479_v36 = vor.u32 %v478_v25, %v474_v23  ;;  %v484_v37 = vrot.slane %v482_v27, 5 }
  0x17   :  { %v489_v38 = vrot.slane %v487_v28, 4  ;;  %v470_v39 = vrot.slane %v469_v30, 4  ;;  %v492_v40 = vrot.slane %v490_v32, 5  ;;  %v500_v42 = vshrl.u32 %v46_v19, 16  ;;  %v56_v28 = vld [vmem:[%s17633_s0 + $0x68] sm:$0x1] }
  0x18   :  { %v498_v41 = vrot.slane %v496_v33, 5  ;;  %v461_v43 = vsel %vm10192_vm2, %v456_v35, %v460_v17  ;;  %v480_v44 = vrot.slane %v479_v36, 4  ;;  %v506_v45 = vshll.u32 %v47_v31, 16 }
  0x19   :  { %v511_v47 = vshrl.u32 %v48_v34, 16  ;;  %v10257_v48 = vcombine.low %v451_v29, %v461_v43  ;;  %v475_v49 = vsel %vm10192_vm2, %v470_v39, %v474_v23  ;;  %v493_v50 = vor.u32 %v492_v40, %v489_v38  ;;  %v55_v23 = vld [vmem:[%s17633_s0 + $0x64] sm:$0xf]  ;;  %v57_v38 = vld [vmem:[%s17633_s0 + $0x6c] sm:$0xf] }
  0x1a   :  { %v502_v51 = vrot.slane %v500_v42, 4  ;;  %v485_v54 = vsel %vm10192_vm2, %v480_v44, %v484_v37  ;;  %v508_v55 = vrot.slane %v506_v45, 5  ;;  %v514_v57 = vshll.u32 %v48_v34, 16  ;;  %v58_v43 = vld [vmem:[%s17633_s0 + $0x70] sm:$0xf] }
  0x1b   :  { %17954 = vst [vmem:[#allocation7_spill] sm:$0xff] %v10257_v48  ;;  %v513_v56 = vrot.slane %v511_v47, 4  ;;  %1236 = vrot.lane.b32.xlu1 %v10257_v48, %s10112_s29  ;;  %v10271_v58 = vcombine.low %v475_v49, %v485_v54  ;;  %v494_v59 = vrot.slane %v493_v50, 4  ;;  %v520_v61 = vshll.u32 %v49_v46, 16 }
  0x1c   :  { %v503_v60 = vor.u32 %v502_v51, %v498_v41  ;;  %v516_v62 = vrot.slane %v514_v57, 5  ;;  %v524_v63 = vshrl.u32 %v49_v46, 16  ;;  %v530_v0 = vshll.u32 %v50_v52, 16  ;;  %v59_v52 = vld [vmem:[%s17633_s0 + $0x74] sm:$0x1] }
  0x1d   :  { %17955 = vst [vmem:[#allocation8_spill] sm:$0xff] %v10271_v58  ;;  %v535_v3 = vshrl.u32 %v51_v53, 16  ;;  %1238 = vrot.lane.b32.xlu0 %v10271_v58, %s10112_s29  ;;  %v499_v4 = vsel %vm10192_vm2, %v494_v59, %v498_v41  ;;  %v522_v6 = vrot.slane %v520_v61, 5  ;;  %v538_v8 = vshll.u32 %v51_v53, 16  ;;  %v60_v59 = vld [vmem:[%s17633_s0 + $0x78] sm:$0xf] }
  0x1e   :  { %v504_v5 = vrot.slane %v503_v60, 4  ;;  %v517_v9 = vor.u32 %v516_v62, %v513_v56  ;;  %v526_v10 = vrot.slane %v524_v63, 4  ;;  %v532_v11 = vrot.slane %v530_v0, 5  ;;  %v61_v0 = vld [vmem:[%s17633_s0 + $0x7c] sm:$0xf] }
  0x1f   :  { %v537_v12 = vrot.slane %v535_v3, 4  ;;  %v540_v15 = vrot.slane %v538_v8, 5  ;;  %v544_v16 = vshll.u32 %v52_v2, 16  ;;  %v548_v17 = vshrl.u32 %v52_v2, 16 }
  0x20   :  { %v509_v14 = vsel %vm10192_vm2, %v504_v5, %v508_v55  ;;  %v518_v19 = vrot.slane %v517_v9, 4  ;;  %v527_v21 = vor.u32 %v526_v10, %v522_v6  ;;  %v554_v22 = vshll.u32 %v53_v7, 16 }
  0x21   :  { %v10288_v18 = vcombine.low %v499_v4, %v509_v14  ;;  %v541_v24 = vor.u32 %v540_v15, %v537_v12  ;;  %v546_v25 = vrot.slane %v544_v16, 5  ;;  %v550_v27 = vrot.slane %v548_v17, 4  ;;  %v63_v15 = vld [vmem:[%s17633_s0 + $0x84] sm:$0xf] }
  0x22   :  { %v559_v29 = vshrl.u32 %v54_v13, 16  ;;  %v523_v30 = vsel %vm10192_vm2, %v518_v19, %v522_v6  ;;  %v528_v31 = vrot.slane %v527_v21, 4  ;;  %v556_v32 = vrot.slane %v554_v22, 5  ;;  %v64_v22 = vld [vmem:[%s17633_s0 + $0x88] sm:$0xf] }
  0x23   :  { %17956 = vst [vmem:[#allocation9_spill] sm:$0xff] %v10288_v18  ;;  %1240 = vrot.lane.b32.xlu1 %v10288_v18, %s10112_s29  ;;  %v562_v33 = vshll.u32 %v54_v13, 16  ;;  %v542_v34 = vrot.slane %v541_v24, 4  ;;  %v551_v35 = vor.u32 %v550_v27, %v546_v25  ;;  %v568_v37 = vshll.u32 %v55_v23, 16  ;;  %v62_v13 = vld [vmem:[%s17633_s0 + $0x80] sm:$0x1] }
  0x24   :  { %v561_v36 = vrot.slane %v559_v29, 4  ;;  %v533_v39 = vsel %vm10192_vm2, %v528_v31, %v532_v11  ;;  %v572_v41 = vshrl.u32 %v55_v23, 16  ;;  %v578_v42 = vshll.u32 %v56_v28, 16 }
  0x25   :  { %v564_v40 = vrot.slane %v562_v33, 5  ;;  %v10308_v44 = vcombine.low %v523_v30, %v533_v39  ;;  %v547_v45 = vsel %vm10192_vm2, %v542_v34, %v546_v25  ;;  %v552_v46 = vrot.slane %v551_v35, 4  ;;  %v65_v34 = vld [vmem:[%s17633_s0 + $0x8c] sm:$0x1] }
  0x26   :  { %v570_v47 = vrot.slane %v568_v37, 5  ;;  %v574_v50 = vrot.slane %v572_v41, 4  ;;  %v580_v51 = vrot.slane %v578_v42, 5  ;;  %v583_v53 = vshrl.u32 %v57_v38, 16  ;;  %v66_v37 = vld [vmem:[%s17633_s0 + $0x90] sm:$0xf] }
  0x27   :  { %17957 = vst [vmem:[#allocation10_spill] sm:$0xff] %v10308_v44  ;;  %v565_v49 = vor.u32 %v564_v40, %v561_v36  ;;  %1242 = vrot.lane.b32.xlu0 %v10308_v44, %s10112_s29  ;;  %v557_v54 = vsel %vm10192_vm2, %v552_v46, %v556_v32  ;;  %v586_v55 = vshll.u32 %v57_v38, 16  ;;  %v592_v56 = vshll.u32 %v58_v43, 16  ;;  %v67_v42 = vld [vmem:[%s17633_s0 + $0x94] sm:$0xf] }
  0x28   :  { %v596_v57 = vshrl.u32 %v58_v43, 16  ;;  %v10322_v60 = vcombine.low %v547_v45, %v557_v54  ;;  %v575_v62 = vor.u32 %v574_v50, %v570_v47  ;;  %v585_v63 = vrot.slane %v583_v53, 4 }
  0x29   :  { %v566_v61 = vrot.slane %v565_v49, 4  ;;  %v588_v2 = vrot.slane %v586_v55, 5  ;;  %v594_v3 = vrot.slane %v592_v56, 5  ;;  %v602_v5 = vshll.u32 %v59_v52, 16  ;;  %v68_v52 = vld [vmem:[%s17633_s0 + $0x98] sm:$0x1] }
  0x2a   :  { %17958 = vst [vmem:[#allocation11_spill] sm:$0xff] %v10322_v60  ;;  %v598_v4 = vrot.slane %v596_v57, 4  ;;  %1244 = vrot.lane.b32.xlu1 %v10322_v60, %s10112_s29  ;;  %v576_v7 = vrot.slane %v575_v62, 4  ;;  %v607_v8 = vshrl.u32 %v60_v59, 16  ;;  %v610_v9 = vshll.u32 %v60_v59, 16 }
  0x2b   :  { %v571_v6 = vsel %vm10192_vm2, %v566_v61, %v570_v47  ;;  %v589_v10 = vor.u32 %v588_v2, %v585_v63  ;;  %v604_v12 = vrot.slane %v602_v5, 5  ;;  %v616_v14 = vshll.u32 %v61_v0, 16  ;;  %v69_v59 = vld [vmem:[%s17633_s0 + $0x9c] sm:$0xf] }
  0x2c   :  { %v599_v11 = vor.u32 %v598_v4, %v594_v3  ;;  %v581_v16 = vsel %vm10192_vm2, %v576_v7, %v580_v51  ;;  %v609_v17 = vrot.slane %v607_v8, 4  ;;  %v612_v19 = vrot.slane %v610_v9, 5 }
  0x2d   :  { %v620_v21 = vshrl.u32 %v61_v0, 16  ;;  %v10342_v23 = vcombine.low %v571_v6, %v581_v16  ;;  %v590_v24 = vrot.slane %v589_v10, 4  ;;  %v618_v27 = vrot.slane %v616_v14, 5  ;;  %v70_v6 = vld [vmem:[%s17633_s0 + $0xa0] sm:$0xf] }
  0x2e   :  { %v600_v25 = vrot.slane %v599_v11, 4  ;;  %v613_v28 = vor.u32 %v612_v19, %v609_v17  ;;  %v626_v30 = vshll.u32 %v62_v13, 16  ;;  %v631_v31 = vshrl.u32 %v63_v15, 16  ;;  %v71_v14 = vld [vmem:[%s17633_s0 + $0xa4] sm:$0x1] }
  0x2f   :  { %17959 = vst [vmem:[#allocation12_spill] sm:$0xff] %v10342_v23  ;;  %v622_v29 = vrot.slane %v620_v21, 4  ;;  %1246 = vrot.lane.b32.xlu0 %v10342_v23, %s10112_s29  ;;  %v595_v32 = vsel %vm10192_vm2, %v590_v24, %v594_v3  ;;  %v634_v35 = vshll.u32 %v63_v15, 16  ;;  %v640_v36 = vshll.u32 %v64_v22, 16 }
  0x30   :  { %v605_v33 = vsel %vm10192_vm2, %v600_v25, %v604_v12  ;;  %v614_v39 = vrot.slane %v613_v28, 4  ;;  %v628_v41 = vrot.slane %v626_v30, 5  ;;  %v633_v43 = vrot.slane %v631_v31, 4 }
  0x31   :  { %v10356_v38 = vcombine.low %v595_v32, %v605_v33  ;;  %v623_v40 = vor.u32 %v622_v29, %v618_v27  ;;  %v636_v45 = vrot.slane %v634_v35, 5  ;;  %v642_v46 = vrot.slane %v640_v36, 5  ;;  %v10395_v29 = vld [vmem:[%s17633_s0 + $0xac] sm:$0xf] }
  0x32   :  { %v644_v47 = vshrl.u32 %v64_v22, 16  ;;  %v619_v49 = vsel %vm10192_vm2, %v614_v39, %v618_v27  ;;  %v650_v51 = vshll.u32 %v65_v34, 16  ;;  %v655_v53 = vshrl.u32 %v66_v37, 16  ;;  %v10388_v22 = vld [vmem:[%s17633_s0 + $0xa8] sm:$0xf] }
  0x33   :  { %17960 = vst [vmem:[#allocation13_spill] sm:$0xff] %v10356_v38  ;;  %1248 = vrot.lane.b32.xlu1 %v10356_v38, %s10112_s29  ;;  %v624_v50 = vrot.slane %v623_v40, 4  ;;  %v637_v54 = vor.u32 %v636_v45, %v633_v43  ;;  %v658_v56 = vshll.u32 %v66_v37, 16  ;;  %v664_v57 = vshll.u32 %v67_v42, 16  ;;  %v10404_v37 = vld [vmem:[%s17633_s0 + $0xb0] sm:$0x1] }
  0x34   :  { %v646_v55 = vrot.slane %v644_v47, 4  ;;  %v652_v62 = vrot.slane %v650_v51, 5  ;;  %v657_v63 = vrot.slane %v655_v53, 4  ;;  %v668_v0 = vshrl.u32 %v67_v42, 16  ;;  %v10416_v45 = vld [vmem:[%s17633_s0 + $0xb4] sm:$0xf] }
  0x35   :  { %v629_v61 = vsel %vm10192_vm2, %v624_v50, %v628_v41  ;;  %v638_v3 = vrot.slane %v637_v54, 4  ;;  %v660_v5 = vrot.slane %v658_v56, 5  ;;  %v666_v7 = vrot.slane %v664_v57, 5  ;;  %v10423_v51 = vld [vmem:[%s17633_s0 + $0xb8] sm:$0xf] }
  0x36   :  { %v10373_v2 = vcombine.low %v619_v49, %v629_v61  ;;  %v647_v4 = vor.u32 %v646_v55, %v642_v46  ;;  %v670_v8 = vrot.slane %v668_v0, 4  ;;  %v674_v9 = vshll.u32 %v68_v52, 16 }
  0x37   :  { %v679_v10 = vshrl.u32 %v69_v59, 16  ;;  %v643_v11 = vsel %vm10192_vm2, %v638_v3, %v642_v46  ;;  %v661_v13 = vor.u32 %v660_v5, %v657_v63  ;;  %v682_v15 = vshll.u32 %v69_v59, 16  ;;  %v10434_v59 = vld [vmem:[%s17633_s0 + $0xbc] sm:$0x1]  ;;  %v10442_v5 = vld [vmem:[%s17633_s0 + $0xd8] sm:$0xf] }
  0x38   :  { %17961 = vst [vmem:[#allocation14_spill] sm:$0xff] %v10373_v2  ;;  %1250 = vrot.lane.b32.xlu0 %v10373_v2, %s10112_s29  ;;  %v648_v12 = vrot.slane %v647_v4, 4  ;;  %v671_v16 = vor.u32 %v670_v8, %v666_v7  ;;  %v676_v17 = vrot.slane %v674_v9, 5  ;;  %v688_v21 = vshll.u32 %v70_v6, 16 }
  0x39   :  { %v681_v19 = vrot.slane %v679_v10, 4  ;;  %v662_v25 = vrot.slane %v661_v13, 4  ;;  %v684_v27 = vrot.slane %v682_v15, 5  ;;  %v692_v28 = vshrl.u32 %v70_v6, 16  ;;  %v10450_v10 = vld [vmem:[%s17633_s0 + $0xdc] sm:$0xf] }
  0x3a   :  { %v653_v24 = vsel %vm10192_vm2, %v648_v12, %v652_v62  ;;  %v672_v31 = vrot.slane %v671_v16, 4  ;;  %v690_v32 = vrot.slane %v688_v21, 5  ;;  %v698_v33 = vshll.u32 %v71_v14, 16 }
  0x3b   :  { %v10397_v30 = vcombine.low %v643_v11, %v653_v24  ;;  %v667_v34 = vsel %vm10192_vm2, %v662_v25, %v666_v7  ;;  %v685_v35 = vor.u32 %v684_v27, %v681_v19  ;;  %v694_v36 = vrot.slane %v692_v28, 4  ;;  %v10463_v25 = vld [vmem:[%s17633_s0 + $0xe0] sm:$0x1] }
  0x3c   :  { %v703_v39 = vshrl.u32 %v10388_v22, 16  ;;  %v677_v40 = vsel %vm10192_vm2, %v672_v31, %v676_v17  ;;  %v700_v41 = vrot.slane %v698_v33, 5  ;;  %v706_v42 = vshll.u32 %v10388_v22, 16 }
  0x3d   :  { %17962 = vst [vmem:[#allocation15_spill] sm:$0xff] %v10397_v30  ;;  %1252 = vrot.lane.b32.xlu1 %v10397_v30, %s10112_s29  ;;  %v712_v43 = vshll.u32 %v10395_v29, 16  ;;  %v10418_v46 = vcombine.low %v667_v34, %v677_v40  ;;  %v686_v47 = vrot.slane %v685_v35, 4  ;;  %v695_v49 = vor.u32 %v694_v36, %v690_v32  ;;  %v10470_v35 = vld [vmem:[%s17633_s0 + $0xe4] sm:$0xf] }
  0x3e   :  { %v705_v50 = vrot.slane %v703_v39, 4  ;;  %v708_v52 = vrot.slane %v706_v42, 5  ;;  %v716_v54 = vshrl.u32 %v10395_v29, 16  ;;  %v722_v55 = vshll.u32 %v10404_v37, 16  ;;  %v10478_v42 = vld [vmem:[%s17633_s0 + $0xe8] sm:$0xf] }
  0x3f   :  { %17963 = vst [vmem:[#allocation16_spill] sm:$0xff] %v10418_v46  ;;  %v714_v53 = vrot.slane %v712_v43, 5  ;;  %1254 = vrot.lane.b32.xlu0 %v10418_v46, %s10112_s29  ;;  %v691_v56 = vsel %vm10192_vm2, %v686_v47, %v690_v32  ;;  %v696_v57 = vrot.slane %v695_v49, 4  ;;  %v727_v61 = vshrl.u32 %v10416_v45, 16 }
  0x40   :  { %v730_v62 = vshll.u32 %v10416_v45, 16  ;;  %v709_v63 = vor.u32 %v708_v52, %v705_v50  ;;  %v718_v0 = vrot.slane %v716_v54, 4  ;;  %v724_v3 = vrot.slane %v722_v55, 5  ;;  %v10488_v54 = vld [vmem:[%s17633_s0 + $0xec] sm:$0x1] }
  0x41   :  { %v736_v4 = vshll.u32 %v10423_v51, 16  ;;  %v701_v6 = vsel %vm10192_vm2, %v696_v57, %v700_v41  ;;  %v729_v7 = vrot.slane %v727_v61, 4  ;;  %v740_v9 = vshrl.u32 %v10423_v51, 16 }
  0x42   :  { %v732_v8 = vrot.slane %v730_v62, 5  ;;  %v10452_v11 = vcombine.low %v691_v56, %v701_v6  ;;  %v710_v12 = vrot.slane %v709_v63, 4  ;;  %v719_v13 = vor.u32 %v718_v0, %v714_v53  ;;  %v10501_v0 = vld [vmem:[%s17633_s0 + $0xf0] sm:$0xf] }
  0x43   :  { %v738_v14 = vrot.slane %v736_v4, 5  ;;  %v742_v16 = vrot.slane %v740_v9, 4  ;;  %v746_v17 = vshll.u32 %v10434_v59, 16  ;;  %v751_v19 = vshrl.u32 %v10442_v5, 16 }
  0x44   :  { %17964 = vst [vmem:[#allocation17_spill] sm:$0xff] %v10452_v11  ;;  %v733_v15 = vor.u32 %v732_v8, %v729_v7  ;;  %1256 = vrot.lane.b32.xlu1 %v10452_v11, %s10112_s29  ;;  %v715_v21 = vsel %vm10192_vm2, %v710_v12, %v714_v53  ;;  %v720_v24 = vrot.slane %v719_v13, 4  ;;  %v754_v27 = vshll.u32 %v10442_v5, 16  ;;  %v10508_v8 = vld [vmem:[%s17633_s0 + $0xf4] sm:$0xf] }
  0x45   :  { %v760_v28 = vshll.u32 %v10450_v10, 16  ;;  %v743_v32 = vor.u32 %v742_v16, %v738_v14  ;;  %v748_v33 = vrot.slane %v746_v17, 5  ;;  %v753_v34 = vrot.slane %v751_v19, 4 }
  0x46   :  { %v734_v31 = vrot.slane %v733_v15, 4  ;;  %v725_v36 = vsel %vm10192_vm2, %v720_v24, %v724_v3  ;;  %v756_v39 = vrot.slane %v754_v27, 5  ;;  %v764_v41 = vshrl.u32 %v10450_v10, 16 }
  0x47   :  { %v762_v40 = vrot.slane %v760_v28, 5  ;;  %v10480_v43 = vcombine.low %v715_v21, %v725_v36  ;;  %v744_v49 = vrot.slane %v743_v32, 4  ;;  %v770_v50 = vshll.u32 %v10463_v25, 16  ;;  %v10520_v28 = vld [vmem:[%s17633_s0 + $0xf8] sm:$0x1] }
  0x48   :  { %v739_v47 = vsel %vm10192_vm2, %v734_v31, %v738_v14  ;;  %v757_v52 = vor.u32 %v756_v39, %v753_v34  ;;  %v766_v53 = vrot.slane %v764_v41, 4  ;;  %v775_v55 = vshrl.u32 %v10470_v35, 16  ;;  %v10526_v32 = vld [vmem:[%s17633_s0 + $0xfc] sm:$0xf] }
  0x49   :  { %17965 = vst [vmem:[#allocation18_spill] sm:$0xff] %v10480_v43  ;;  %v778_v56 = vshll.u32 %v10470_v35, 16  ;;  %1258 = vrot.lane.b32.xlu0 %v10480_v43, %s10112_s29  ;;  %v749_v57 = vsel %vm10192_vm2, %v744_v49, %v748_v33  ;;  %v772_v61 = vrot.slane %v770_v50, 5  ;;  %v784_v62 = vshll.u32 %v10478_v42, 16 }
  0x4a   :  { %v788_v63 = vshrl.u32 %v10478_v42, 16  ;;  %v10503_v3 = vcombine.low %v739_v47, %v749_v57  ;;  %v758_v4 = vrot.slane %v757_v52, 4  ;;  %v767_v6 = vor.u32 %v766_v53, %v762_v40 }
  0x4b   :  { %v777_v7 = vrot.slane %v775_v55, 4  ;;  %v780_v9 = vrot.slane %v778_v56, 5  ;;  %v786_v12 = vrot.slane %v784_v62, 5  ;;  %v794_v14 = vshll.u32 %v10488_v54, 16  ;;  %v10546_v62 = vld [vmem:[%s17633_s0 + $0x104] sm:$0x1] }
  0x4c   :  { %17966 = vst [vmem:[#allocation19_spill] sm:$0xff] %v10503_v3  ;;  %v790_v13 = vrot.slane %v788_v63, 4  ;;  %1260 = vrot.lane.b32.xlu1 %v10503_v3, %s10112_s29  ;;  %v763_v15 = vsel %vm10192_vm2, %v758_v4, %v762_v40  ;;  %v768_v16 = vrot.slane %v767_v6, 4  ;;  %v799_v17 = vshrl.u32 %v10501_v0, 16  ;;  %v10534_v40 = vld [vmem:[%s17633_s0 + $0x100] sm:$0xf] }
  0x4d   :  { %v802_v19 = vshll.u32 %v10501_v0, 16  ;;  %v781_v21 = vor.u32 %v780_v9, %v777_v7  ;;  %v796_v27 = vrot.slane %v794_v14, 5  ;;  %v808_v31 = vshll.u32 %v10508_v8, 16  ;;  %v10553_v6 = vld [vmem:[%s17633_s0 + $0x108] sm:$0xf] }
  0x4e   :  { %v791_v24 = vor.u32 %v790_v13, %v786_v12  ;;  %v773_v33 = vsel %vm10192_vm2, %v768_v16, %v772_v61  ;;  %v801_v34 = vrot.slane %v799_v17, 4  ;;  %v812_v39 = vshrl.u32 %v10508_v8, 16  ;;  %v10560_v14 = vld [vmem:[%s17633_s0 + $0x10c] sm:$0xf] }
  0x4f   :  { %v804_v36 = vrot.slane %v802_v19, 5  ;;  %v9265_v41 = vcombine.low %v763_v15, %v773_v33  ;;  %v782_v47 = vrot.slane %v781_v21, 4  ;;  %v810_v50 = vrot.slane %v808_v31, 5  ;;  %v10571_v31 = vld [vmem:[%s17633_s0 + $0x110] sm:$0x1] }
  0x50   :  { %v792_v49 = vrot.slane %v791_v24, 4  ;;  %v814_v53 = vrot.slane %v812_v39, 4  ;;  %v818_v55 = vshll.u32 %v10520_v28, 16  ;;  %v823_v56 = vshrl.u32 %v10526_v32, 16 }
  0x51   :  { %v805_v52 = vor.u32 %v804_v36, %v801_v34  ;;  %1262 = vrot.lane.b32.xlu0 %v9265_v41, %s10112_s29  ;;  %v787_v57 = vsel %vm10192_vm2, %v782_v47, %v786_v12  ;;  %v826_v63 = vshll.u32 %v10526_v32, 16  ;;  %v832_v4 = vshll.u32 %v10534_v40, 16  ;;  %v10579_v47 = vld [vmem:[%s17633_s0 + $0x114] sm:$0xf] }
  0x52   :  { %v797_v61 = vsel %vm10192_vm2, %v792_v49, %v796_v27  ;;  %v815_v12 = vor.u32 %v814_v53, %v810_v50  ;;  %v820_v13 = vrot.slane %v818_v55, 5  ;;  %v825_v15 = vrot.slane %v823_v56, 4 }
  0x53   :  { %v10555_v7 = vcombine.low %v787_v57, %v797_v61  ;;  %v806_v9 = vrot.slane %v805_v52, 4  ;;  %v828_v16 = vrot.slane %v826_v63, 5  ;;  %v834_v17 = vrot.slane %v832_v4, 5  ;;  %v10589_v63 = vld [vmem:[%s17633_s0 + $0x118] sm:$0xf] }
  0x54   :  { %v836_v19 = vshrl.u32 %v10534_v40, 16  ;;  %v816_v24 = vrot.slane %v815_v12, 4  ;;  %v842_v27 = vshll.u32 %v10546_v62, 16  ;;  %v847_v33 = vshrl.u32 %v10553_v6, 16 }
  0x55   :  { %17967 = vst [vmem:[#allocation20_spill] sm:$0xff] %v10555_v7  ;;  %1264 = vrot.lane.b32.xlu1 %v10555_v7, %s10112_s29  ;;  %v811_v21 = vsel %vm10192_vm2, %v806_v9, %v810_v50  ;;  %v829_v34 = vor.u32 %v828_v16, %v825_v15  ;;  %v850_v39 = vshll.u32 %v10553_v6, 16  ;;  %v856_v41 = vshll.u32 %v10560_v14, 16 }
  0x56   :  { %v838_v36 = vrot.slane %v836_v19, 4  ;;  %v821_v49 = vsel %vm10192_vm2, %v816_v24, %v820_v13  ;;  %v844_v50 = vrot.slane %v842_v27, 5  ;;  %v849_v52 = vrot.slane %v847_v33, 4 }
  0x57   :  { %v860_v53 = vshrl.u32 %v10560_v14, 16  ;;  %v10584_v55 = vcombine.low %v811_v21, %v821_v49  ;;  %v830_v56 = vrot.slane %v829_v34, 4  ;;  %v852_v61 = vrot.slane %v850_v39, 5  ;;  %v10600_v21 = vld [vmem:[%s17633_s0 + $0x11c] sm:$0x1] }
  0x58   :  { %v839_v57 = vor.u32 %v838_v36, %v834_v17  ;;  %v858_v4 = vrot.slane %v856_v41, 5  ;;  %v866_v12 = vshll.u32 %v10571_v31, 16  ;;  %v871_v13 = vshrl.u32 %v10579_v47, 16  ;;  %v10607_v39 = vld [vmem:[%s17633_s0 + $0x120] sm:$0xf] }
  0x59   :  { %17968 = vst [vmem:[#allocation21_spill] sm:$0xff] %v10584_v55  ;;  %v862_v9 = vrot.slane %v860_v53, 4  ;;  %1266 = vrot.lane.b32.xlu0 %v10584_v55, %s10112_s29  ;;  %v835_v15 = vsel %vm10192_vm2, %v830_v56, %v834_v17  ;;  %v853_v19 = vor.u32 %v852_v61, %v849_v52  ;;  %v874_v24 = vshll.u32 %v10579_v47, 16  ;;  %v10615_v53 = vld [vmem:[%s17633_s0 + $0x124] sm:$0xf] }
  0x5a   :  { %v840_v16 = vrot.slane %v839_v57, 4  ;;  %v868_v33 = vrot.slane %v866_v12, 5  ;;  %v873_v34 = vrot.slane %v871_v13, 4  ;;  %v880_v36 = vshll.u32 %v10589_v63, 16 }
  0x5b   :  { %v863_v27 = vor.u32 %v862_v9, %v858_v4  ;;  %v854_v41 = vrot.slane %v853_v19, 4  ;;  %v876_v49 = vrot.slane %v874_v24, 5  ;;  %v884_v52 = vshrl.u32 %v10589_v63, 16 }
  0x5c   :  { %v845_v17 = vsel %vm10192_vm2, %v840_v16, %v844_v50  ;;  %v882_v61 = vrot.slane %v880_v36, 5  ;;  %v890_v9 = vshll.u32 %v10600_v21, 16  ;;  %v10625_v16 = vld [vmem:[%s17633_s0 + $0x128] sm:$0x1]  ;;  %v895_v19 = vshrl.u32 %v10607_v39, 16 }
  0x5d   :  { %v10617_v56 = vcombine.low %v835_v15, %v845_v17  ;;  %v864_v57 = vrot.slane %v863_v27, 4  ;;  %v859_v12 = vsel %vm10192_vm2, %v854_v41, %v858_v4  ;;  %v877_v13 = vor.u32 %v876_v49, %v873_v34  ;;  %v10637_v34 = vld [vmem:[%s17633_s0 + $0x12c] sm:$0xf] }
  0x5e   :  { %v886_v50 = vrot.slane %v884_v52, 4  ;;  %v892_v24 = vrot.slane %v890_v9, 5  ;;  %v898_v27 = vshll.u32 %v10607_v39, 16  ;;  %v904_v4 = vshll.u32 %v10615_v53, 16  ;;  %v10644_v52 = vld [vmem:[%s17633_s0 + $0x130] sm:$0xf] }
  0x5f   :  { %17969 = vst [vmem:[#allocation22_spill] sm:$0xff] %v10617_v56  ;;  %1268 = vrot.lane.b32.xlu1 %v10617_v56, %s10112_s29  ;;  %v869_v15 = vsel %vm10192_vm2, %v864_v57, %v868_v33  ;;  %v878_v17 = vrot.slane %v877_v13, 4  ;;  %v897_v49 = vrot.slane %v895_v19, 4  ;;  %v908_v9 = vshrl.u32 %v10615_v53, 16 }
  0x60   :  { %v10639_v36 = vcombine.low %v859_v12, %v869_v15  ;;  %v887_v41 = vor.u32 %v886_v50, %v882_v61  ;;  %v900_v33 = vrot.slane %v898_v27, 5  ;;  %v906_v57 = vrot.slane %v904_v4, 5  ;;  %v10655_v50 = vld [vmem:[%s17633_s0 + $0x134] sm:$0x1] }
  0x61   :  { %v914_v56 = vshll.u32 %v10625_v16, 16  ;;  %v883_v12 = vsel %vm10192_vm2, %v878_v17, %v882_v61  ;;  %v919_v19 = vshrl.u32 %v10637_v34, 16  ;;  %v922_v15 = vshll.u32 %v10637_v34, 16 }
  0x62   :  { %17970 = vst [vmem:[#allocation23_spill] sm:$0xff] %v10639_v36  ;;  %1270 = vrot.lane.b32.xlu0 %v10639_v36, %s10112_s29  ;;  %v888_v13 = vrot.slane %v887_v41, 4  ;;  %v901_v27 = vor.u32 %v900_v33, %v897_v49  ;;  %v910_v4 = vrot.slane %v908_v9, 4  ;;  %v928_v7 = vshll.u32 %v10644_v52, 16  ;;  %v10663_v36 = vld [vmem:[%s17633_s0 + $0x138] sm:$0xf] }
  0x63   :  { %v916_v55 = vrot.slane %v914_v56, 5  ;;  %v921_v17 = vrot.slane %v919_v19, 4  ;;  %v924_v41 = vrot.slane %v922_v15, 5  ;;  %v932_v3 = vshrl.u32 %v10644_v52, 16  ;;  %v10671_v49 = vld [vmem:[%s17633_s0 + $0x13c] sm:$0xf] }
  0x64   :  { %v893_v61 = vsel %vm10192_vm2, %v888_v13, %v892_v24  ;;  %v902_v33 = vrot.slane %v901_v27, 4  ;;  %v911_v9 = vor.u32 %v910_v4, %v906_v57  ;;  %v930_v43 = vrot.slane %v928_v7, 5 }
  0x65   :  { %v10673_v56 = vcombine.low %v883_v12, %v893_v61  ;;  %v925_v11 = vor.u32 %v924_v41, %v921_v17  ;;  %v934_v46 = vrot.slane %v932_v3, 4  ;;  %v938_v30 = vshll.u32 %v10655_v50, 16  ;;  %v10684_v12 = vld [vmem:[%s17633_s0 + $0x140] sm:$0x1]  ;;  %v10691_v17 = vld [vmem:[%s17633_s0 + $0x144] sm:$0xf] }
  0x66   :  { %v943_v24 = vshrl.u32 %v10663_v36, 16  ;;  %v907_v13 = vsel %vm10192_vm2, %v902_v33, %v906_v57  ;;  %v912_v19 = vrot.slane %v911_v9, 4  ;;  %v946_v7 = vshll.u32 %v10663_v36, 16 }
  0x67   :  { %17971 = vst [vmem:[#allocation24_spill] sm:$0xff] %v10673_v56  ;;  %1272 = vrot.lane.b32.xlu1 %v10673_v56, %s10112_s29  ;;  %v952_v3 = vshll.u32 %v10671_v49, 16  ;;  %v926_v15 = vrot.slane %v925_v11, 4  ;;  %v935_v27 = vor.u32 %v934_v46, %v930_v43  ;;  %v940_v4 = vrot.slane %v938_v30, 5  ;;  %v10699_v56 = vld [vmem:[%s17633_s0 + $0x148] sm:$0xf] }
  0x68   :  { %v945_v61 = vrot.slane %v943_v24, 4  ;;  %v917_v57 = vsel %vm10192_vm2, %v912_v19, %v916_v55  ;;  %v948_v41 = vrot.slane %v946_v7, 5  ;;  %v956_v9 = vshrl.u32 %v10671_v49, 16  ;;  %v10709_v55 = vld [vmem:[%s17633_s0 + $0x14c] sm:$0x1] }
  0x69   :  { %v954_v33 = vrot.slane %v952_v3, 5  ;;  %v10701_v46 = vcombine.low %v907_v13, %v917_v57  ;;  %v931_v30 = vsel %vm10192_vm2, %v926_v15, %v930_v43  ;;  %v936_v11 = vrot.slane %v935_v27, 4  ;;  %v10722_v27 = vld [vmem:[%s17633_s0 + $0x150] sm:$0xf] }
  0x6a   :  { %v962_v24 = vshll.u32 %v10684_v12, 16  ;;  %v949_v2 = vor.u32 %v948_v41, %v945_v61  ;;  %v958_v38 = vrot.slane %v956_v9, 4  ;;  %v967_v19 = vshrl.u32 %v10691_v17, 16 }
  0x6b   :  { %17972 = vst [vmem:[#allocation25_spill] sm:$0xff] %v10701_v46  ;;  %v970_v7 = vshll.u32 %v10691_v17, 16  ;;  %1274 = vrot.lane.b32.xlu0 %v10701_v46, %s10112_s29  ;;  %v941_v43 = vsel %vm10192_vm2, %v936_v11, %v940_v4  ;;  %v976_v3 = vshll.u32 %v10699_v56, 16  ;;  %v980_v15 = vshrl.u32 %v10699_v56, 16  ;;  %v10729_v46 = vld [vmem:[%s17633_s0 + $0x154] sm:$0xf] }
  0x6c   :  { %v964_v13 = vrot.slane %v962_v24, 5  ;;  %v10724_v61 = vcombine.low %v931_v30, %v941_v43  ;;  %v950_v57 = vrot.slane %v949_v2, 4  ;;  %v959_v41 = vor.u32 %v958_v38, %v954_v33  ;;  %17974 = vst [vmem:[#allocation27_spill] sm:$0xff] %v10729_v46 }
  0x6d   :  { %v969_v9 = vrot.slane %v967_v19, 4  ;;  %v972_v4 = vrot.slane %v970_v7, 5  ;;  %v978_v11 = vrot.slane %v976_v3, 5  ;;  %v982_v24 = vrot.slane %v980_v15, 4  ;;  %v10741_v7 = vld [vmem:[%s17633_s0 + $0x158] sm:$0x1] }
  0x6e   :  { %17973 = vst [vmem:[#allocation26_spill] sm:$0xff] %v10724_v61  ;;  %v986_v23 = vshll.u32 %v10709_v55, 16  ;;  %1276 = vrot.lane.b32.xlu1 %v10724_v61, %s10112_s29  ;;  %v955_v30 = vsel %vm10192_vm2, %v950_v57, %v954_v33  ;;  %v960_v43 = vrot.slane %v959_v41, 4  ;;  %v991_v38 = vshrl.u32 %v10722_v27, 16  ;;  %17975 = vst [vmem:[#allocation28_spill] sm:$0xff] %v10741_v7 }
  0x6f   :  { %v994_v2 = vshll.u32 %v10722_v27, 16  ;;  %v973_v19 = vor.u32 %v972_v4, %v969_v9  ;;  %v983_v60 = vor.u32 %v982_v24, %v978_v11  ;;  %v1000_v3 = vshll.u32 %v10729_v46, 16  ;;  %v10747_v15 = vld [vmem:[%s17633_s0 + $0x15c] sm:$0xf] }
  0x70   :  { %v988_v44 = vrot.slane %v986_v23, 5  ;;  %17976 = vst [vmem:[#allocation29_spill] sm:$0xff] %v10747_v15  ;;  %v965_v33 = vsel %vm10192_vm2, %v960_v43, %v964_v13  ;;  %v993_v57 = vrot.slane %v991_v38, 4  ;;  %v1004_v9 = vshrl.u32 %v10729_v46, 16  ;;  %v10755_v23 = vld [vmem:[%s17633_s0 + $0x160] sm:$0xf] }
  0x71   :  { %v996_v41 = vrot.slane %v994_v2, 5  ;;  %17977 = vst [vmem:[#allocation30_spill] sm:$0xff] %v10755_v23  ;;  %v10757_v4 = vcombine.low %v955_v30, %v965_v33  ;;  %v974_v24 = vrot.slane %v973_v19, 4  ;;  %v984_v61 = vrot.slane %v983_v60, 4  ;;  %v10770_v60 = vld [vmem:[%s17633_s0 + $0x164] sm:$0x1] }
  0x72   :  { %v1002_v18 = vrot.slane %v1000_v3, 5  ;;  %v1006_v48 = vrot.slane %v1004_v9, 4  ;;  %v1010_v1 = vshll.u32 %v10741_v7, 16  ;;  %v1015_v13 = vshrl.u32 %v10747_v15, 16  ;;  %17979 = vst [vmem:[#allocation32_spill] sm:$0xff] %v10770_v60 }
  0x73   :  { %17978 = vst [vmem:[#allocation31_spill] sm:$0xff] %v10757_v4  ;;  %v997_v58 = vor.u32 %v996_v41, %v993_v57  ;;  %1278 = vrot.lane.b32.xlu0 %v10757_v4, %s10112_s29  ;;  %v979_v43 = vsel %vm10192_vm2, %v974_v24, %v978_v11  ;;  %v989_v38 = vsel %vm10192_vm2, %v984_v61, %v988_v44  ;;  %v1018_v30 = vshll.u32 %v10747_v15, 16  ;;  %v10777_v19 = vld [vmem:[%s17633_s0 + $0x168] sm:$0xf]  ;;  %v10784_v44 = vld [vmem:[%s17633_s0 + $0x16c] sm:$0xf] }
  0x74   :  { %v1024_v2 = vshll.u32 %v10755_v23, 16  ;;  %17980 = vst [vmem:[#allocation33_spill] sm:$0xff] %v10777_v19  ;;  %v10779_v3 = vcombine.low %v979_v43, %v989_v38  ;;  %v1007_v33 = vor.u32 %v1006_v48, %v1002_v18  ;;  %v1012_v57 = vrot.slane %v1010_v1, 5  ;;  %17982 = vst [vmem:[#allocation35_spill] sm:$0xff] %v10784_v44  ;;  %v10795_v1 = vld [vmem:[%s17633_s0 + $0x170] sm:$0x1] }
  0x75   :  { %v998_v11 = vrot.slane %v997_v58, 4  ;;  %v1017_v61 = vrot.slane %v1015_v13, 4  ;;  %v1020_v41 = vrot.slane %v1018_v30, 5  ;;  %v1028_v24 = vshrl.u32 %v10755_v23, 16  ;;  %17983 = vst [vmem:[#allocation36_spill] sm:$0xff] %v10795_v1 }
  0x76   :  { %17981 = vst [vmem:[#allocation34_spill] sm:$0xff] %v10779_v3  ;;  %v1026_v9 = vrot.slane %v1024_v2, 5  ;;  %1280 = vrot.lane.b32.xlu1 %v10779_v3, %s10112_s29  ;;  %v1008_v38 = vrot.slane %v1007_v33, 4  ;;  %v1034_v48 = vshll.u32 %v10770_v60, 16  ;;  %v1039_v58 = vshrl.u32 %v10777_v19, 16 }
  0x77   :  { %v1003_v43 = vsel %vm10192_vm2, %v998_v11, %v1002_v18  ;;  %v1021_v13 = vor.u32 %v1020_v41, %v1017_v61  ;;  %v1030_v30 = vrot.slane %v1028_v24, 4  ;;  %v1042_v2 = vshll.u32 %v10777_v19, 16  ;;  %v10803_v18 = vld [vmem:[%s17633_s0 + $0x174] sm:$0xf]  ;;  %v10813_v19 = vld [vmem:[%s17633_s0 + $0x178] sm:$0xf] }
  0x78   :  { %v1048_v4 = vshll.u32 %v10784_v44, 16  ;;  %17984 = vst [vmem:[#allocation37_spill] sm:$0xff] %v10803_v18  ;;  %v1013_v11 = vsel %vm10192_vm2, %v1008_v38, %v1012_v57  ;;  %v1036_v33 = vrot.slane %v1034_v48, 5  ;;  %v1041_v3 = vrot.slane %v1039_v58, 4  ;;  %17986 = vst [vmem:[#allocation39_spill] sm:$0xff] %v10813_v19 }
  0x79   :  { %v1052_v20 = vshrl.u32 %v10784_v44, 16  ;;  %v10808_v60 = vcombine.low %v1003_v43, %v1013_v11  ;;  %v1022_v61 = vrot.slane %v1021_v13, 4  ;;  %v1031_v41 = vor.u32 %v1030_v30, %v1026_v9  ;;  %v10824_v58 = vld [vmem:[%s17633_s0 + $0x17c] sm:$0x1]  ;;  %v10831_v11 = vld [vmem:[%s17633_s0 + $0x180] sm:$0xf] }
  0x7a   :  { %v1044_v24 = vrot.slane %v1042_v2, 5  ;;  %v1050_v23 = vrot.slane %v1048_v4, 5  ;;  %v1058_v7 = vshll.u32 %v10795_v1, 16  ;;  %v1063_v57 = vshrl.u32 %v10803_v18, 16  ;;  %17987 = vst [vmem:[#allocation40_spill] sm:$0xff] %v10824_v58  ;;  %17988 = vst [vmem:[#allocation41_spill] sm:$0xff] %v10831_v11 }
  0x7b   :  { %17985 = vst [vmem:[#allocation38_spill] sm:$0xff] %v10808_v60  ;;  %v1054_v15 = vrot.slane %v1052_v20, 4  ;;  %1282 = vrot.lane.b32.xlu0 %v10808_v60, %s10112_s29  ;;  %v1027_v43 = vsel %vm10192_vm2, %v1022_v61, %v1026_v9  ;;  %v1032_v38 = vrot.slane %v1031_v41, 4  ;;  %v1066_v4 = vshll.u32 %v10803_v18, 16 }
  0x7c   :  { %v1045_v48 = vor.u32 %v1044_v24, %v1041_v3  ;;  %v1060_v13 = vrot.slane %v1058_v7, 5  ;;  %v1065_v30 = vrot.slane %v1063_v57, 4  ;;  %v1072_v2 = vshll.u32 %v10813_v19, 16 }
  0x7d   :  { %v1055_v20 = vor.u32 %v1054_v15, %v1050_v23  ;;  %v1037_v3 = vsel %vm10192_vm2, %v1032_v38, %v1036_v33  ;;  %v1068_v61 = vrot.slane %v1066_v4, 5  ;;  %v1076_v41 = vshrl.u32 %v10813_v19, 16  ;;  %v10839_v15 = vld [vmem:[%s17633_s0 + $0x184] sm:$0xf]  ;;  %v10849_v38 = vld [vmem:[%s17633_s0 + $0x188] sm:$0x1] }
  0x7e   :  { %v1046_v9 = vrot.slane %v1045_v48, 4  ;;  %17989 = vst [vmem:[#allocation42_spill] sm:$0xff] %v10839_v15  ;;  %v10841_v7 = vcombine.low %v1027_v43, %v1037_v3  ;;  %v1074_v57 = vrot.slane %v1072_v2, 5  ;;  %v1082_v60 = vshll.u32 %v10824_v58, 16  ;;  %17991 = vst [vmem:[#allocation44_spill] sm:$0xff] %v10849_v38 }
  0x7f   :  { %v1056_v24 = vrot.slane %v1055_v20, 4  ;;  %v1069_v1 = vor.u32 %v1068_v61, %v1065_v30  ;;  %v1078_v33 = vrot.slane %v1076_v41, 4  ;;  %v1087_v48 = vshrl.u32 %v10831_v11, 16  ;;  %v10861_v30 = vld [vmem:[%s17633_s0 + $0x18c] sm:$0xf] }
  0x80   :  { %17990 = vst [vmem:[#allocation43_spill] sm:$0xff] %v10841_v7  ;;  %v1051_v18 = vsel %vm10192_vm2, %v1046_v9, %v1050_v23  ;;  %1284 = vrot.lane.b32.xlu1 %v10841_v7, %s10112_s29  ;;  %v1084_v4 = vrot.slane %v1082_v60, 5  ;;  %v1090_v20 = vshll.u32 %v10831_v11, 16  ;;  %v1096_v23 = vshll.u32 %v10839_v15, 16  ;;  %17992 = vst [vmem:[#allocation45_spill] sm:$0xff] %v10861_v30 }
  0x81   :  { %v1061_v43 = vsel %vm10192_vm2, %v1056_v24, %v1060_v13  ;;  %v1070_v3 = vrot.slane %v1069_v1, 4  ;;  %v1079_v9 = vor.u32 %v1078_v33, %v1074_v57  ;;  %v1089_v61 = vrot.slane %v1087_v48, 4  ;;  %v10868_v41 = vld [vmem:[%s17633_s0 + $0x190] sm:$0xf]  ;;  %v9960_v19 = vld [vmem:[%s17633_s0 + $0x14] sm:$0x1] }
  0x82   :  { %v10863_v2 = vcombine.low %v1051_v18, %v1061_v43  ;;  %17994 = vst [vmem:[#allocation47_spill] sm:$0xff] %v10868_v41  ;;  %v1092_v60 = vrot.slane %v1090_v20, 5  ;;  %v1098_v13 = vrot.slane %v1096_v23, 5  ;;  %v1100_v24 = vshrl.u32 %v10839_v15, 16  ;;  %v10881_v20 = vld [vmem:[%s17633_s0 + $0x194] sm:$0x1] }
  0x83   :  { %v1106_v7 = vshll.u32 %v10849_v38, 16  ;;  %v1075_v18 = vsel %vm10192_vm2, %v1070_v3, %v1074_v57  ;;  %v1080_v1 = vrot.slane %v1079_v9, 4  ;;  %v1111_v33 = vshrl.u32 %v10861_v30, 16  ;;  %17995 = vst [vmem:[#allocation48_spill] sm:$0xff] %v10881_v20 }
  0x84   :  { %17993 = vst [vmem:[#allocation46_spill] sm:$0xff] %v10863_v2  ;;  %1286 = vrot.lane.b32.xlu0 %v10863_v2, %s10112_s29  ;;  %v1114_v48 = vshll.u32 %v10861_v30, 16  ;;  %v1093_v43 = vor.u32 %v1092_v60, %v1089_v61  ;;  %v1102_v11 = vrot.slane %v1100_v24, 4  ;;  %v1120_v23 = vshll.u32 %v10868_v41, 16 }
  0x85   :  { %v1108_v58 = vrot.slane %v1106_v7, 5  ;;  %v1085_v2 = vsel %vm10192_vm2, %v1080_v1, %v1084_v4  ;;  %v1113_v38 = vrot.slane %v1111_v33, 4  ;;  %v1124_v3 = vshrl.u32 %v10868_v41, 16 }
  0x86   :  { %v1116_v57 = vrot.slane %v1114_v48, 5  ;;  %v10887_v9 = vcombine.low %v1075_v18, %v1085_v2  ;;  %v1094_v30 = vrot.slane %v1093_v43, 4  ;;  %v1103_v61 = vor.u32 %v1102_v11, %v1098_v13  ;;  %v10897_v2 = vld [vmem:[%s17633_s0] sm:$0xf] }
  0x87   :  { %v1122_v60 = vrot.slane %v1120_v23, 5  ;;  %v1126_v24 = vrot.slane %v1124_v3, 4  ;;  %v1130_v15 = vshll.u32 %v10881_v20, 16  ;;  %vm1391_vm3 = vcmask 1042432   ;;  %v9957_v23 = vld [vmem:[%s17633_s0 + $0x8] sm:$0x1] }
  0x88   :  { %17996 = vst [vmem:[#allocation49_spill] sm:$0xff] %v10887_v9  ;;  %v1117_v7 = vor.u32 %v1116_v57, %v1113_v38  ;;  %1288 = vrot.lane.b32.xlu1 %v10887_v9, %s10112_s29  ;;  %v1099_v4 = vsel %vm10192_vm2, %v1094_v30, %v1098_v13  ;;  %v1104_v1 = vrot.slane %v1103_v61, 4  ;;  %vm1392_vm4 = vcmask 1046532   ;;  %v10907_v30 = vld [vmem:[%s17633_s0 + $0x4] sm:$0xf] }
  0x89   :  { %v9281_v11 = vrot.slane %v10897_v2, 9  ;;  %v1127_v18 = vor.u32 %v1126_v24, %v1122_v60  ;;  %v1132_v33 = vrot.slane %v1130_v15, 5  ;;  %vm10900_vm5 = vmor %vm1391_vm3, %vm1392_vm4  ;;  %v17997_v48 = vmov 0  ;;  %v10918_v15 = vld [vmem:[%s17633_s0 + $0xc] sm:$0xf] }
  0x8a   :  { %v1118_v38 = vrot.slane %v1117_v7, 4  ;;  %v17998_v48 = vsel %vm10900_vm5, 4294967295, %v17997_v48  ;;  %v1396_v13 = vrot.slane %v10907_v30, 5  ;;  %v1109_v43 = vsel %vm10192_vm2, %v1104_v1, %v1108_v58  ;;  %18000 = vst [vmem:[#allocation51_spill] sm:$0xff] %v10918_v15  ;;  %v10924_v61 = vld [vmem:[%s17633_s0 + $0x10] sm:$0xf] }
  0x8b   :  { %17999 = vst [vmem:[#allocation50_spill] sm:$0xff] %v17998_v48  ;;  %v1399_v57 = vrot.slane %v9957_v23, 5  ;;  %v9282_v3 = vrot.slane %v10918_v15, 9  ;;  %18001 = vst [vmem:[#allocation52_spill] sm:$0xff] %v10924_v61  ;;  %v1403_v7 = vrot.slane %v10924_v61, 5  ;;  %v10927_v58 = vcombine.low %v1099_v4, %v1109_v43 }
  0x8c   :  { %v1123_v24 = vsel %vm10192_vm2, %v1118_v38, %v1122_v60  ;;  %v1128_v1 = vrot.slane %v1127_v18, 4  ;;  %v1397_v23 = vsel %vm10900_vm5, %v9281_v11, %v1396_v13  ;;  %v1398_v9 = vrot.slane %v1396_v13, 4  ;;  %v10945_v4 = vld [vmem:[%s17633_s0 + $0x18] sm:$0xf]  ;;  %v10951_v38 = vld [vmem:[%s17633_s0 + $0x1c] sm:$0xf] }
  0x8d   :  { %18002 = vst [vmem:[#allocation53_spill] sm:$0xff] %v10927_v58  ;;  %v1404_v20 = vsel %vm10900_vm5, %v9282_v3, %v1403_v7  ;;  %v1405_v41 = vrot.slane %v1403_v7, 4  ;;  %v1406_v44 = vrot.slane %v9960_v19, 5  ;;  %1290 = vrot.lane.b32.xlu0 %v10927_v58, %s10112_s29  ;;  %v9283_v11 = vrot.slane %v10945_v4, 9  ;;  %v9963_v18 = vld [vmem:[%s17633_s0 + $0x20] sm:$0x1] }
  0x8e   :  { %v1133_v60 = vsel %vm10192_vm2, %v1128_v1, %v1132_v33  ;;  %v1410_v19 = vrot.slane %v10951_v38, 5  ;;  %v1413_v13 = vrot.slane %v9963_v18, 5  ;;  %v1400_v43 = vsel %vm10900_vm5, %v1398_v9, %v1399_v57  ;;  %v10966_v7 = vld [vmem:[%s17633_s0 + $0x24] sm:$0xf]  ;;  %v9966_v9 = vld [vmem:[%s17633_s0 + $0x2c] sm:$0x1] }
  0x8f   :  { %v10957_v33 = vcombine.low %v1123_v24, %v1133_v60  ;;  %v1407_v3 = vsel %vm10900_vm5, %v1405_v41, %v1406_v44  ;;  %18004 = vst [vmem:[#allocation55_spill] sm:$0xff] %v10966_v7  ;;  %v9284_v1 = vrot.slane %v10966_v7, 9  ;;  %v9313_v58 = vcombine.low %v1397_v23, %v1400_v43  ;;  %v10978_v44 = vld [vmem:[%s17633_s0 + $0x28] sm:$0xf]  ;;  %v10987_v57 = vld [vmem:[%s17633_s0 + $0x30] sm:$0xf] }
  0x90   :  { %v10969_v26 = vcombine.low %v1404_v20, %v1407_v3  ;;  %v1411_v24 = vsel %vm10900_vm5, %v9283_v11, %v1410_v19  ;;  %v1412_v60 = vrot.slane %v1410_v19, 4  ;;  %18006 = vst [vmem:[#allocation57_spill] sm:$0xff] %v10978_v44  ;;  %v1417_v41 = vrot.slane %v10978_v44, 5  ;;  %18007 = vst [vmem:[#allocation58_spill] sm:$0xff] %v10987_v57  ;;  %v10993_v11 = vld [vmem:[%s17633_s0 + $0x34] sm:$0xf] }
  0x91   :  { %18003 = vst [vmem:[#allocation54_spill] sm:$0xff] %v10957_v33  ;;  %1292 = vrot.lane.b32.xlu1 %v10957_v33, %s10112_s29  ;;  %v1420_v20 = vrot.slane %v9966_v9, 5  ;;  %v9285_v23 = vrot.slane %v10987_v57, 9  ;;  %18008 = vst [vmem:[#allocation59_spill] sm:$0xff] %v10993_v11  ;;  %v1424_v19 = vrot.slane %v10993_v11, 5  ;;  %1714 = vrot.lane.b32.xlu0 %v9313_v58, %s10113_s15  ;;  %vm330_vm6 = vcmask 31744  }
  0x92   :  { %18005 = vst [vmem:[#allocation56_spill] sm:$0xff] %v10969_v26  ;;  %v1414_v18 = vsel %vm10900_vm5, %v1412_v60, %v1413_v13  ;;  %v9969_v43 = vld [vmem:[%s17633_s0 + $0x38] sm:$0x1]  ;;  %v11005_v9 = vld [vmem:[%s17633_s0 + $0x3c] sm:$0xf]  ;;  %v1418_v60 = vsel %vm10900_vm5, %v9284_v1, %v1417_v41  ;;  %vm1326_vm7 = vcmask 64544  }
  0x93   :  { %v1427_v3 = vrot.slane %v9969_v43, 5  ;;  %18009 = vst [vmem:[#allocation60_spill] sm:$0xff] %v11005_v9  ;;  %v9286_v33 = vrot.slane %v11005_v9, 9  ;;  %v11011_v57 = vld [vmem:[%s17633_s0 + $0x40] sm:$0xf]  ;;  %v11014_v13 = vcombine.low %v1411_v24, %v1414_v18  ;;  %v1419_v43 = vrot.slane %v1417_v41, 4 }
  0x94   :  { %18010 = vst [vmem:[#allocation61_spill] sm:$0xff] %v11011_v57  ;;  %v1431_v58 = vrot.slane %v11011_v57, 5  ;;  %v1425_v11 = vsel %vm10900_vm5, %v9285_v23, %v1424_v19  ;;  %v1426_v7 = vrot.slane %v1424_v19, 4  ;;  %v9972_v15 = vld [vmem:[%s17633_s0 + $0x44] sm:$0x1]  ;;  %vm17786_vm8 = vcmask 1041408  }
  0x95   :  { %18011 = vst [vmem:[#allocation62_spill] sm:$0xff] %v11014_v13  ;;  %v1434_v61 = vrot.slane %v9972_v15, 5  ;;  %1716 = vrot.lane.b32.xlu1 %v10969_v26, %s10113_s15  ;;  %v1421_v1 = vsel %vm10900_vm5, %v1419_v43, %v1420_v20  ;;  %v11032_v24 = vld [vmem:[%s17633_s0 + $0x48] sm:$0xf]  ;;  %v9975_v23 = vld [vmem:[%s17633_s0 + $0x50] sm:$0x1]  ;;  %1718 = vrot.lane.b32.xlu0 %v11014_v13, %s10113_s15 }
  0x96   :  { %v1432_v9 = vsel %vm10900_vm5, %v9286_v33, %v1431_v58  ;;  %v1433_v44 = vrot.slane %v1431_v58, 4  ;;  %18012 = vst [vmem:[#allocation63_spill] sm:$0xff] %v11032_v24  ;;  %v9287_v41 = vrot.slane %v11032_v24, 9  ;;  %v11038_v33 = vld [vmem:[%s17633_s0 + $0x4c] sm:$0xf]  ;;  %v1441_v19 = vrot.slane %v9975_v23, 5  ;;  %v11058_v24 = vpop.permute.xlu0 %1230 }
  0x97   :  { %18013 = vst [vmem:[#allocation64_spill] sm:$0xff] %v11038_v33  ;;  %v1438_v15 = vrot.slane %v11038_v33, 5  ;;  %v11046_v20 = vcombine.low %v1418_v60, %v1421_v1  ;;  %v1428_v18 = vsel %vm10900_vm5, %v1426_v7, %v1427_v3  ;;  %v11055_v43 = vld [vmem:[%s17633_s0 + $0x54] sm:$0xf]  ;;  %18016 = vst [vmem:[#allocation67_spill] sm:$0xff] %v11058_v24  ;;  %vm17785_vm9 = vcmask 97344  }
  0x98   :  { %v1435_v58 = vsel %vm10900_vm5, %v1433_v44, %v1434_v61  ;;  %18015 = vst [vmem:[#allocation66_spill] sm:$0xff] %v11055_v43  ;;  %v9288_v26 = vrot.slane %v11055_v43, 9  ;;  %v11060_v23 = vcombine.low %v1425_v11, %v1428_v18  ;;  %v11069_v61 = vld [vmem:[%s17633_s0 + $0x58] sm:$0xf]  ;;  %v9978_v3 = vld [vmem:[%s17633_s0 + $0x5c] sm:$0x1]  ;;  %v11087_v18 = vpop.permute.xlu1 %1234 }
  0x99   :  { %18014 = vst [vmem:[#allocation65_spill] sm:$0xff] %v11046_v20  ;;  %v11062_v13 = vcombine.low %v1432_v9, %v1435_v58  ;;  %v1439_v60 = vsel %vm10900_vm5, %v9287_v41, %v1438_v15  ;;  %v1440_v7 = vrot.slane %v1438_v15, 4  ;;  %18019 = vst [vmem:[#allocation70_spill] sm:$0xff] %v11069_v61  ;;  %v1445_v44 = vrot.slane %v11069_v61, 5  ;;  %v11078_v11 = vld [vmem:[%s17633_s0 + $0x60] sm:$0xf]  ;;  %1720 = vrot.lane.b32.xlu1 %v11046_v20, %s10113_s15 }
  0x9a   :  { %18017 = vst [vmem:[#allocation68_spill] sm:$0xff] %v11060_v23  ;;  %v1448_v1 = vrot.slane %v9978_v3, 5  ;;  %18020 = vst [vmem:[#allocation71_spill] sm:$0xff] %v11078_v11  ;;  %v9289_v9 = vrot.slane %v11078_v11, 9  ;;  %v11084_v41 = vld [vmem:[%s17633_s0 + $0x64] sm:$0xf]  ;;  %1722 = vrot.lane.b32.xlu0 %v11060_v23, %s10113_s15 }
  0x9b   :  { %18018 = vst [vmem:[#allocation69_spill] sm:$0xff] %v11062_v13  ;;  %18021 = vst [vmem:[#allocation72_spill] sm:$0xff] %v11084_v41  ;;  %v1452_v15 = vrot.slane %v11084_v41, 5  ;;  %v1442_v58 = vsel %vm10900_vm5, %v1440_v7, %v1441_v19  ;;  %v9981_v3 = vld [vmem:[%s17633_s0 + $0x68] sm:$0x1]  ;;  %v1446_v7 = vsel %vm10900_vm5, %v9288_v26, %v1445_v44  ;;  %vm1949_vm10 = vcmask 130144  }
  0x9c   :  { %18022 = vst [vmem:[#allocation73_spill] sm:$0xff] %v11087_v18  ;;  %v1455_v11 = vrot.slane %v9981_v3, 5  ;;  %v11099_v43 = vld [vmem:[%s17633_s0 + $0x6c] sm:$0xf]  ;;  %v11105_v61 = vld [vmem:[%s17633_s0 + $0x70] sm:$0xf]  ;;  %v11110_v19 = vcombine.low %v1439_v60, %v1442_v58 }
  0x9d   :  { %18023 = vst [vmem:[#allocation74_spill] sm:$0xff] %v11099_v43  ;;  %v9290_v41 = vrot.slane %v11099_v43, 9  ;;  %18024 = vst [vmem:[#allocation75_spill] sm:$0xff] %v11105_v61  ;;  %v1459_v20 = vrot.slane %v11105_v61, 5  ;;  %v1447_v3 = vrot.slane %v1445_v44, 4  ;;  %v1453_v33 = vsel %vm10900_vm5, %v9289_v9, %v1452_v15  ;;  %1724 = vrot.lane.b32.xlu1 %v11062_v13, %s10113_s15 }
  0x9e   :  { %18025 = vst [vmem:[#allocation76_spill] sm:$0xff] %v11110_v19  ;;  %v1454_v43 = vrot.slane %v1452_v15, 4  ;;  %v9984_v18 = vld [vmem:[%s17633_s0 + $0x74] sm:$0x1]  ;;  %v11124_v60 = vld [vmem:[%s17633_s0 + $0x78] sm:$0xf]  ;;  %1726 = vrot.lane.b32.xlu0 %v11110_v19, %s10113_s15 }
  0x9f   :  { %v1461_v57 = vrot.slane %v1459_v20, 4  ;;  %v1462_v24 = vrot.slane %v9984_v18, 5  ;;  %v1449_v61 = vsel %vm10900_vm5, %v1447_v3, %v1448_v1  ;;  %18026 = vst [vmem:[#allocation77_spill] sm:$0xff] %v11124_v60  ;;  %v9291_v26 = vrot.slane %v11124_v60, 9  ;;  %v11130_v44 = vld [vmem:[%s17633_s0 + $0x7c] sm:$0xf]  ;;  %v11136_v1 = vpop.permute.xlu0 %1232 }
  0xa0   :  { %18027 = vst [vmem:[#allocation78_spill] sm:$0xff] %v11130_v44  ;;  %v1466_v9 = vrot.slane %v11130_v44, 5  ;;  %v9987_v15 = vld [vmem:[%s17633_s0 + $0x80] sm:$0x1]  ;;  %18028 = vst [vmem:[#allocation79_spill] sm:$0xff] %v11136_v1  ;;  %v11140_v58 = vcombine.low %v1446_v7, %v1449_v61  ;;  %v1456_v3 = vsel %vm10900_vm5, %v1454_v43, %v1455_v11  ;;  %v1460_v23 = vsel %vm10900_vm5, %v9290_v41, %v1459_v20  ;;  %v11160_v20 = vpop.permute.xlu1 %1236 }
  0xa1   :  { %v1469_v18 = vrot.slane %v9987_v15, 5  ;;  %v11149_v60 = vld [vmem:[%s17633_s0 + $0x84] sm:$0xf]  ;;  %v11154_v44 = vcombine.low %v1453_v33, %v1456_v3  ;;  %v1463_v61 = vsel %vm10900_vm5, %v1461_v57, %v1462_v24  ;;  %18032 = vst [vmem:[#allocation83_spill] sm:$0xff] %v11160_v20  ;;  %v11165_v41 = vld [vmem:[%s17633_s0 + $0x88] sm:$0xf] }
  0xa2   :  { %18029 = vst [vmem:[#allocation80_spill] sm:$0xff] %v11140_v58  ;;  %18030 = vst [vmem:[#allocation81_spill] sm:$0xff] %v11149_v60  ;;  %v9292_v15 = vrot.slane %v11149_v60, 9  ;;  %v1467_v43 = vsel %vm10900_vm5, %v9291_v26, %v1466_v9  ;;  %v1468_v11 = vrot.slane %v1466_v9, 4  ;;  %v1473_v7 = vrot.slane %v11165_v41, 5  ;;  %1728 = vrot.lane.b32.xlu1 %v11140_v58, %s10113_s15 }
  0xa3   :  { %18031 = vst [vmem:[#allocation82_spill] sm:$0xff] %v11154_v44  ;;  %18033 = vst [vmem:[#allocation84_spill] sm:$0xff] %v11165_v41  ;;  %v9990_v33 = vld [vmem:[%s17633_s0 + $0x8c] sm:$0x1]  ;;  %v11174_v57 = vld [vmem:[%s17633_s0 + $0x90] sm:$0xf]  ;;  %1730 = vrot.lane.b32.xlu0 %v11154_v44, %s10113_s15 }
  0xa4   :  { %v1476_v3 = vrot.slane %v9990_v33, 5  ;;  %18034 = vst [vmem:[#allocation85_spill] sm:$0xff] %v11174_v57  ;;  %v9293_v24 = vrot.slane %v11174_v57, 9  ;;  %v11180_v26 = vld [vmem:[%s17633_s0 + $0x94] sm:$0xf]  ;;  %v1470_v19 = vsel %vm10900_vm5, %v1468_v11, %v1469_v18  ;;  %v11202_v18 = vcombine.low %v1460_v23, %v1463_v61  ;;  %v11215_v61 = vpop.permute.xlu0 %1238 }
  0xa5   :  { %18035 = vst [vmem:[#allocation86_spill] sm:$0xff] %v11180_v26  ;;  %v1480_v9 = vrot.slane %v11180_v26, 5  ;;  %v9993_v33 = vld [vmem:[%s17633_s0 + $0x98] sm:$0x1]  ;;  %v11191_v60 = vld [vmem:[%s17633_s0 + $0x9c] sm:$0xf]  ;;  %v11204_v11 = vcombine.low %v1467_v43, %v1470_v19 }
  0xa6   :  { %v1483_v13 = vrot.slane %v9993_v33, 5  ;;  %18036 = vst [vmem:[#allocation87_spill] sm:$0xff] %v11191_v60  ;;  %v9294_v57 = vrot.slane %v11191_v60, 9  ;;  %v11197_v41 = vld [vmem:[%s17633_s0 + $0xa0] sm:$0xf]  ;;  %v1474_v33 = vsel %vm10900_vm5, %v9292_v15, %v1473_v7  ;;  %v1475_v20 = vrot.slane %v1473_v7, 4  ;;  %1732 = vrot.lane.b32.xlu1 %v11202_v18, %s10113_s15 }
  0xa7   :  { %18037 = vst [vmem:[#allocation88_spill] sm:$0xff] %v11197_v41  ;;  %v1487_v26 = vrot.slane %v11197_v41, 5  ;;  %v1481_v60 = vsel %vm10900_vm5, %v9293_v24, %v1480_v9  ;;  %v1482_v1 = vrot.slane %v1480_v9, 4  ;;  %v9996_v58 = vld [vmem:[%s17633_s0 + $0xa4] sm:$0x1]  ;;  %v9295_v15 = vrot.slane %v10388_v22, 9  ;;  %v11229_v41 = vpop.permute.xlu1 %1240  ;;  %1734 = vrot.lane.b32.xlu0 %v11204_v11, %s10113_s15 }
  0xa8   :  { %v1490_v23 = vrot.slane %v9996_v58, 5  ;;  %v1477_v19 = vsel %vm10900_vm5, %v1475_v20, %v1476_v3  ;;  %v1494_v43 = vrot.slane %v10395_v29, 5  ;;  %v1497_v7 = vrot.slane %v10404_v37, 5 }
  0xa9   :  { %v1489_v46 = vrot.slane %v1487_v26, 4  ;;  %v11222_v44 = vcombine.low %v1474_v33, %v1477_v19  ;;  %v1484_v24 = vsel %vm10900_vm5, %v1482_v1, %v1483_v13  ;;  %v1488_v9 = vsel %vm10900_vm5, %v9294_v57, %v1487_v26 }
  0xaa   :  { %v9296_v58 = vrot.slane %v10416_v45, 9  ;;  %v11233_v22 = vcombine.low %v1481_v60, %v1484_v24  ;;  %v1495_v37 = vsel %vm10900_vm5, %v9295_v15, %v1494_v43  ;;  %v1496_v20 = vrot.slane %v1494_v43, 4 }
  0xab   :  { %v1491_v29 = vsel %vm10900_vm5, %v1489_v46, %v1490_v23  ;;  %v1501_v13 = vrot.slane %v10423_v51, 5  ;;  %v1504_v45 = vrot.slane %v10434_v59, 5  ;;  %v9297_v1 = vrot.slane %v10442_v5, 9  ;;  %v11256_v5 = vpop.permute.xlu0 %1242  ;;  %1736 = vrot.lane.b32.xlu1 %v11222_v44, %s10113_s15  ;;  %v11270_v24 = vpop.permute.xlu1 %1244 }
  0xac   :  { %v1508_v3 = vrot.slane %v10450_v10, 5  ;;  %v1498_v60 = vsel %vm10900_vm5, %v1496_v20, %v1497_v7  ;;  %v1511_v46 = vrot.slane %v10463_v25, 5  ;;  %v9298_v57 = vrot.slane %v10470_v35, 9  ;;  %1738 = vrot.lane.b32.xlu0 %v11233_v22, %s10113_s15 }
  0xad   :  { %v1515_v26 = vrot.slane %v10478_v42, 5  ;;  %v11250_v33 = vcombine.low %v1488_v9, %v1491_v29  ;;  %v11252_v23 = vcombine.low %v1495_v37, %v1498_v60  ;;  %v1502_v51 = vsel %vm10900_vm5, %v9296_v58, %v1501_v13 }
  0xae   :  { %v1503_v59 = vrot.slane %v1501_v13, 4  ;;  %v1509_v10 = vsel %vm10900_vm5, %v9297_v1, %v1508_v3  ;;  %v1510_v25 = vrot.slane %v1508_v3, 4  ;;  %v1518_v42 = vrot.slane %v10488_v54, 5 }
  0xaf   :  { %v1517_v35 = vrot.slane %v1515_v26, 4  ;;  %v9299_v15 = vrot.slane %v10501_v0, 9  ;;  %v1522_v43 = vrot.slane %v10508_v8, 5  ;;  %v1525_v7 = vrot.slane %v10520_v28, 5  ;;  %1740 = vrot.lane.b32.xlu1 %v11250_v33, %s10113_s15 }
  0xb0   :  { %v1505_v19 = vsel %vm10900_vm5, %v1503_v59, %v1504_v45  ;;  %v1512_v58 = vsel %vm10900_vm5, %v1510_v25, %v1511_v46  ;;  %v1516_v54 = vsel %vm10900_vm5, %v9298_v57, %v1515_v26  ;;  %v9300_v29 = vrot.slane %v10526_v32, 9  ;;  %1742 = vrot.lane.b32.xlu0 %v11252_v23, %s10113_s15  ;;  %v11296_v57 = vpop.permute.xlu0 %1246 }
  0xb1   :  { %v11272_v9 = vcombine.low %v1502_v51, %v1505_v19  ;;  %v9329_v37 = vcombine.low %v1509_v10, %v1512_v58  ;;  %v1519_v0 = vsel %vm10900_vm5, %v1517_v35, %v1518_v42  ;;  %v1523_v8 = vsel %vm10900_vm5, %v9299_v15, %v1522_v43 }
  0xb2   :  { %v1524_v28 = vrot.slane %v1522_v43, 4  ;;  %v1529_v20 = vrot.slane %v10534_v40, 5  ;;  %v1532_v13 = vrot.slane %v10546_v62, 5  ;;  %v9301_v45 = vrot.slane %v10553_v6, 9 }
  0xb3   :  { %v1536_v1 = vrot.slane %v10560_v14, 5  ;;  %v1539_v3 = vrot.slane %v10571_v31, 5  ;;  %v9302_v60 = vrot.slane %v10579_v47, 9  ;;  %v1543_v46 = vrot.slane %v10589_v63, 5  ;;  %v11307_v47 = vpop.permute.xlu1 %1248  ;;  %1744 = vrot.lane.b32.xlu1 %v11272_v9, %s10113_s15 }
  0xb4   :  { %v1526_v32 = vsel %vm10900_vm5, %v1524_v28, %v1525_v7  ;;  %v11298_v40 = vcombine.low %v1516_v54, %v1519_v0  ;;  %v1530_v6 = vsel %vm10900_vm5, %v9300_v29, %v1529_v20  ;;  %v1531_v14 = vrot.slane %v1529_v20, 4  ;;  %1746 = vrot.lane.b32.xlu0 %v9329_v37, %s10113_s15  ;;  %v11334_v37 = vpop.permute.xlu0 %1250 }
  0xb5   :  { %v11300_v62 = vcombine.low %v1523_v8, %v1526_v32  ;;  %v1537_v26 = vsel %vm10900_vm5, %v9301_v45, %v1536_v1  ;;  %v1538_v51 = vrot.slane %v1536_v1, 4  ;;  %v1545_v59 = vrot.slane %v1543_v46, 4 }
  0xb6   :  { %v1546_v31 = vrot.slane %v10600_v21, 5  ;;  %v1533_v63 = vsel %vm10900_vm5, %v1531_v14, %v1532_v13  ;;  %v9303_v10 = vrot.slane %v10607_v39, 9  ;;  %v1550_v25 = vrot.slane %v10615_v53, 5 }
  0xb7   :  { %18038 = vst [vmem:[#allocation89_spill] sm:$0xff] %v11300_v62  ;;  %v1553_v35 = vrot.slane %v10625_v16, 5  ;;  %v11317_v42 = vcombine.low %v1530_v6, %v1533_v63  ;;  %v1540_v21 = vsel %vm10900_vm5, %v1538_v51, %v1539_v3  ;;  %v1544_v19 = vsel %vm10900_vm5, %v9302_v60, %v1543_v46  ;;  %1748 = vrot.lane.b32.xlu1 %v11298_v40, %s10113_s15  ;;  %v11351_v20 = vpop.permute.xlu1 %1252  ;;  %v18048_v63 = vld [vmem:[#allocation29_spill] sm:$0xff] }
  0xb8   :  { %v9304_v15 = vrot.slane %v10637_v34, 9  ;;  %v11324_v43 = vcombine.low %v1537_v26, %v1540_v21  ;;  %v1547_v39 = vsel %vm10900_vm5, %v1545_v59, %v1546_v31  ;;  %v1551_v53 = vsel %vm10900_vm5, %v9303_v10, %v1550_v25  ;;  %1750 = vrot.lane.b32.xlu0 %v11300_v62, %s10113_s15  ;;  %v18045_v26 = vld [vmem:[#allocation27_spill] sm:$0xff]  ;;  %v11381_v59 = vpop.permute.xlu0 %1254  ;;  %v18050_v21 = vld [vmem:[#allocation32_spill] sm:$0xff] }
  0xb9   :  { %18039 = vst [vmem:[#allocation90_spill] sm:$0xff] %v11317_v42  ;;  %v1552_v16 = vrot.slane %v1550_v25, 4  ;;  %v1557_v7 = vrot.slane %v10644_v52, 5  ;;  %v1560_v58 = vrot.slane %v10655_v50, 5  ;;  %v9305_v54 = vrot.slane %v10663_v36, 9  ;;  %v18046_v31 = vld [vmem:[#allocation67_spill] sm:$0xff] }
  0xba   :  { %18040 = vst [vmem:[#allocation91_spill] sm:$0xff] %v11324_v43  ;;  %v1564_v29 = vrot.slane %v10671_v49, 5  ;;  %v1567_v0 = vrot.slane %v10684_v12, 5  ;;  %v9306_v8 = vrot.slane %v10691_v17, 9  ;;  %v1571_v52 = vrot.slane %v10699_v56, 5  ;;  %v18049_v25 = vld [vmem:[#allocation30_spill] sm:$0xff] }
  0xbb   :  { %v1554_v34 = vsel %vm10900_vm5, %v1552_v16, %v1553_v35  ;;  %v11345_v36 = vcombine.low %v1544_v19, %v1547_v39  ;;  %v1558_v49 = vsel %vm10900_vm5, %v9304_v15, %v1557_v7  ;;  %v1559_v28 = vrot.slane %v1557_v7, 4  ;;  %1752 = vrot.lane.b32.xlu1 %v11317_v42, %s10113_s15  ;;  %v18051_v15 = vld [vmem:[#allocation73_spill] sm:$0xff]  ;;  %v18052_v16 = vld [vmem:[#allocation52_spill] sm:$0xff]  ;;  %v18053_v7 = vld [vmem:[#allocation51_spill] sm:$0xff] }
  0xbc   :  { %v11347_v50 = vcombine.low %v1551_v53, %v1554_v34  ;;  %v1565_v12 = vsel %vm10900_vm5, %v9305_v54, %v1564_v29  ;;  %v1566_v13 = vrot.slane %v1564_v29, 4  ;;  %v1573_v45 = vrot.slane %v1571_v52, 4  ;;  %1754 = vrot.lane.b32.xlu0 %v11324_v43, %s10113_s15  ;;  %v18054_v54 = vld [vmem:[#allocation57_spill] sm:$0xff]  ;;  %v18055_v29 = vld [vmem:[#allocation55_spill] sm:$0xff]  ;;  %v18079_v43 = vld [vmem:[#allocation72_spill] sm:$0xff] }
  0xbd   :  { %18041 = vst [vmem:[#allocation92_spill] sm:$0xff] %v11345_v36  ;;  %v1574_v1 = vrot.slane %v10709_v55, 5  ;;  %v1561_v32 = vsel %vm10900_vm5, %v1559_v28, %v1560_v58  ;;  %v9217_v3 = vcombine.low %v10897_v2, %v10907_v30  ;;  %v1572_v6 = vsel %vm10900_vm5, %v9306_v8, %v1571_v52 }
  0xbe   :  { %18042 = vst [vmem:[#allocation93_spill] sm:$0xff] %v11347_v50  ;;  %v11362_v60 = vcombine.low %v1558_v49, %v1561_v32  ;;  %v1568_v46 = vsel %vm10900_vm5, %v1566_v13, %v1567_v0  ;;  %v11370_v55 = vcombine.low %v10945_v4, %v10951_v38  ;;  %v9307_v30 = vrot.slane %v10722_v27, 9  ;;  %v18047_v4 = vld [vmem:[#allocation28_spill] sm:$0xff]  ;;  %v11403_v0 = vpop.permute.xlu1 %1256  ;;  %v18056_v49 = vld [vmem:[#allocation33_spill] sm:$0xff] }
  0xbf   :  { %v11374_v14 = vcombine.low %v1565_v12, %v1568_v46  ;;  %v1575_v2 = vsel %vm10900_vm5, %v1573_v45, %v1574_v1  ;;  %331 = vst.msk [vmem:[#allocation2] sm:$0xff] %vm330_vm6, %v9217_v3  ;;  %v1578_v51 = vrot.slane %v18045_v26, 5  ;;  %v1581_v38 = vrot.slane %v18047_v4, 5  ;;  %1756 = vrot.lane.b32.xlu1 %v11345_v36, %s10113_s15  ;;  %v18057_v12 = vld [vmem:[#allocation35_spill] sm:$0xff]  ;;  %v18058_v1 = vld [vmem:[#allocation36_spill] sm:$0xff]  ;;  %v18059_v3 = vld [vmem:[#allocation37_spill] sm:$0xff] }
  0xc0   :  { %18043 = vst [vmem:[#allocation94_spill] sm:$0xff] %v11362_v60  ;;  %1327 = vst.msk [vmem:[#allocation2] sm:$0xff] %vm1326_vm7, %v18046_v31  ;;  %v9308_v10 = vrot.slane %v18048_v63, 9  ;;  %v1585_v35 = vrot.slane %v18049_v25, 5  ;;  %v1588_v19 = vrot.slane %v18050_v21, 5  ;;  %v11397_v58 = vcombine.low %v18053_v7, %v18052_v16  ;;  %1758 = vrot.lane.b32.xlu0 %v11347_v50, %s10113_s15  ;;  %v18065_v7 = vld [vmem:[#allocation59_spill] sm:$0xff] }
  0xc1   :  { %18044 = vst [vmem:[#allocation95_spill] sm:$0xff] %v11374_v14  ;;  %333 = vst.msk [vmem:[#allocation2 + $0x10] sm:$0xff] %vm330_vm6, %v11370_v55  ;;  %v1579_v39 = vsel %vm10900_vm5, %v9307_v30, %v1578_v51  ;;  %v1580_v53 = vrot.slane %v1578_v51, 4  ;;  %v11401_v34 = vcombine.low %v18055_v29, %v18054_v54  ;;  %v9309_v28 = vrot.slane %v18056_v49, 9  ;;  %v18060_v30 = vld [vmem:[#allocation39_spill] sm:$0xff]  ;;  %v18066_v54 = vld [vmem:[#allocation58_spill] sm:$0xff] }
  0xc2   :  { %1329 = vst.msk [vmem:[#allocation2 + $0x10] sm:$0xff] %vm1326_vm7, %v18051_v15  ;;  %v1586_v8 = vsel %vm10900_vm5, %v9308_v10, %v1585_v35  ;;  %v1587_v52 = vrot.slane %v1585_v35, 4  ;;  %v1592_v13 = vrot.slane %v18057_v12, 5  ;;  %v1595_v32 = vrot.slane %v18058_v1, 5  ;;  %v18063_v35 = vld [vmem:[#allocation83_spill] sm:$0xff]  ;;  %v18078_v50 = vld [vmem:[#allocation66_spill] sm:$0xff] }
  0xc3   :  { %v1582_v45 = vsel %vm10900_vm5, %v1580_v53, %v1581_v38  ;;  %332 = vst.msk [vmem:[#allocation2 + $0x8] sm:$0xff] %vm330_vm6, %v11397_v58  ;;  %334 = vst.msk [vmem:[#allocation2 + $0x18] sm:$0xff] %vm330_vm6, %v11401_v34  ;;  %v9310_v46 = vrot.slane %v18059_v3, 9  ;;  %v1599_v51 = vrot.slane %v18060_v30, 5  ;;  %v11422_v31 = vcombine.low %v1572_v6, %v1575_v2  ;;  %v18062_v38 = vld [vmem:[#allocation79_spill] sm:$0xff]  ;;  %v18064_v6 = vld [vmem:[#allocation40_spill] sm:$0xff]  ;;  %1760 = vrot.lane.b32.xlu1 %v11362_v60, %s10113_s15 }
  0xc4   :  { %v11424_v4 = vcombine.low %v1579_v39, %v1582_v45  ;;  %v1589_v10 = vsel %vm10900_vm5, %v1587_v52, %v1588_v19  ;;  %1328 = vst.msk [vmem:[#allocation2 + $0x8] sm:$0xff] %vm1326_vm7, %v18062_v38  ;;  %1330 = vst.msk [vmem:[#allocation2 + $0x18] sm:$0xff] %vm1326_vm7, %v18063_v35  ;;  %v1594_v21 = vrot.slane %v1592_v13, 4  ;;  %v1593_v53 = vsel %vm10900_vm5, %v9309_v28, %v1592_v13  ;;  %v11437_v39 = vpop.permute.xlu0 %1258  ;;  %v18068_v52 = vld [vmem:[#allocation60_spill] sm:$0xff]  ;;  %v18069_v28 = vld [vmem:[#allocation41_spill] sm:$0xff] }
  0xc5   :  { %v11432_v15 = vcombine.low %v1586_v8, %v1589_v10  ;;  %v1601_v16 = vrot.slane %v1599_v51, 4  ;;  %v1602_v2 = vrot.slane %v18064_v6, 5  ;;  %v11445_v29 = vcombine.low %v18066_v54, %v18065_v7  ;;  %v18067_v8 = vld [vmem:[#allocation61_spill] sm:$0xff]  ;;  %1762 = vrot.lane.b32.xlu0 %v11374_v14, %s10113_s15  ;;  %v18071_v35 = vld [vmem:[#allocation44_spill] sm:$0xff]  ;;  %v11460_v6 = vpop.permute.xlu1 %1260  ;;  %v18077_v60 = vld [vmem:[#allocation70_spill] sm:$0xff] }
  0xc6   :  { %18061 = vst [vmem:[#allocation27_spill] sm:$0xff] %v11424_v4  ;;  %v1596_v19 = vsel %vm10900_vm5, %v1594_v21, %v1595_v32  ;;  %v11449_v45 = vcombine.low %v18068_v52, %v18067_v8  ;;  %v9311_v13 = vrot.slane %v18069_v28, 9  ;;  %v1600_v1 = vsel %vm10900_vm5, %v9310_v46, %v1599_v51  ;;  %v18070_v32 = vld [vmem:[#allocation42_spill] sm:$0xff]  ;;  %v18072_v54 = vld [vmem:[#allocation45_spill] sm:$0xff]  ;;  %v18073_v46 = vld [vmem:[#allocation47_spill] sm:$0xff] }
  0xc7   :  { %v1603_v10 = vsel %vm10900_vm5, %v1601_v16, %v1602_v2  ;;  %v1606_v38 = vrot.slane %v18070_v32, 5  ;;  %v1609_v21 = vrot.slane %v18071_v35, 5  ;;  %v11462_v7 = vcombine.low %v1593_v53, %v1596_v19  ;;  %335 = vst.msk [vmem:[#allocation2 + $0x20] sm:$0xff] %vm330_vm6, %v11445_v29  ;;  %v18074_v52 = vld [vmem:[#allocation48_spill] sm:$0xff]  ;;  %v18076_v35 = vld [vmem:[#allocation63_spill] sm:$0xff]  ;;  %1764 = vrot.lane.b32.xlu1 %v11422_v31, %s10113_s15 }
  0xc8   :  { %336 = vst.msk [vmem:[#allocation2 + $0x28] sm:$0xff] %vm330_vm6, %v11449_v45  ;;  %v9312_v8 = vrot.slane %v18072_v54, 9  ;;  %v1613_v51 = vrot.slane %v18073_v46, 5  ;;  %v1616_v16 = vrot.slane %v18074_v52, 5  ;;  %v18075_v19 = vld [vmem:[#allocation64_spill] sm:$0xff]  ;;  %v11483_v36 = vcombine.low %v18078_v50, %v18077_v60  ;;  %v18083_v60 = vld [vmem:[#allocation78_spill] sm:$0xff] }
  0xc9   :  { %1331 = vst.msk [vmem:[#allocation2 + $0x20] sm:$0xff] %vm1326_vm7, %v11215_v61  ;;  %1332 = vst.msk [vmem:[#allocation2 + $0x28] sm:$0xff] %vm1326_vm7, %v11229_v41  ;;  %v1607_v53 = vsel %vm10900_vm5, %v9311_v13, %v1606_v38  ;;  %v1608_v2 = vrot.slane %v1606_v38, 4  ;;  %v11479_v14 = vcombine.low %v18076_v35, %v18075_v19  ;;  %v11487_v52 = vcombine.low %v1600_v1, %v1603_v10  ;;  %v18080_v41 = vld [vmem:[#allocation71_spill] sm:$0xff]  ;;  %v18082_v38 = vld [vmem:[#allocation74_spill] sm:$0xff] }
  0xca   :  { %v1615_v61 = vrot.slane %v1613_v51, 4  ;;  %v11491_v42 = vcombine.low %v18080_v41, %v18079_v43  ;;  %v18081_v13 = vld [vmem:[#allocation75_spill] sm:$0xff]  ;;  %1766 = vrot.lane.b32.xlu0 %v11424_v4, %s10113_s15  ;;  %338 = vst.msk [vmem:[#allocation2 + $0x38] sm:$0xff] %vm330_vm6, %v11483_v36  ;;  %v18084_v1 = vld [vmem:[#allocation77_spill] sm:$0xff]  ;;  %v18085_v10 = vld [vmem:[#allocation84_spill] sm:$0xff]  ;;  %v1263_v4 = vpop.permute.xlu0 %1262  ;;  %vm2132_vm11 = vcmask 162944  }
  0xcb   :  { %v11495_v62 = vcombine.low %v18082_v38, %v18081_v13  ;;  %v1610_v50 = vsel %vm10900_vm5, %v1608_v2, %v1609_v21  ;;  %337 = vst.msk [vmem:[#allocation2 + $0x30] sm:$0xff] %vm330_vm6, %v11479_v14  ;;  %v11507_v43 = vcombine.low %v18084_v1, %v18083_v60  ;;  %v18086_v19 = vld [vmem:[#allocation81_spill] sm:$0xff]  ;;  %v18087_v41 = vld [vmem:[#allocation86_spill] sm:$0xff]  ;;  %v11521_v2 = vsel %vm10900_vm5, %v9312_v8, %v1613_v51  ;;  %v18089_v60 = vld [vmem:[#allocation88_spill] sm:$0xff] }
  0xcc   :  { %v11511_v35 = vcombine.low %v18086_v19, %v18085_v10  ;;  %v18088_v13 = vld [vmem:[#allocation85_spill] sm:$0xff]  ;;  %v11517_v21 = vcombine.low %v1607_v53, %v1610_v50  ;;  %1333 = vst.msk [vmem:[#allocation2 + $0x30] sm:$0xff] %vm1326_vm7, %v11256_v5  ;;  %1334 = vst.msk [vmem:[#allocation2 + $0x38] sm:$0xff] %vm1326_vm7, %v11270_v24  ;;  %v18090_v1 = vld [vmem:[#allocation87_spill] sm:$0xff]  ;;  %v11545_v24 = vsel %vm10900_vm5, %v1615_v61, %v1616_v16  ;;  %1768 = vrot.lane.b32.xlu1 %v11432_v15, %s10113_s15  ;;  %vm2283_vm12 = vcmask 195744  }
  0xcd   :  { %v11515_v38 = vcombine.low %v18088_v13, %v18087_v41  ;;  %339 = vst.msk [vmem:[#allocation2 + $0x40] sm:$0xff] %vm330_vm6, %v11491_v42  ;;  %340 = vst.msk [vmem:[#allocation2 + $0x48] sm:$0xff] %vm330_vm6, %v11495_v62  ;;  %v11533_v53 = vcombine.low %v18090_v1, %v18089_v60  ;;  %v9997_v8 = vld [vmem:[%s17633_s0 + $0xa8] sm:$0xf]  ;;  %v9998_v5 = vld [vmem:[%s17633_s0 + $0xac] sm:$0xf]  ;;  %v1265_v60 = vpop.permute.xlu1 %1264 }
  0xce   :  { %v11541_v51 = vcombine.low %v9997_v8, %v9998_v5  ;;  %1335 = vst.msk [vmem:[#allocation2 + $0x40] sm:$0xff] %vm1326_vm7, %v11296_v57  ;;  %1336 = vst.msk [vmem:[#allocation2 + $0x48] sm:$0xff] %vm1326_vm7, %v11307_v47  ;;  %v9999_v16 = vld [vmem:[%s17633_s0 + $0xb4] sm:$0xf]  ;;  %v10000_v57 = vld [vmem:[%s17633_s0 + $0xb8] sm:$0xf]  ;;  %1770 = vrot.lane.b32.xlu0 %v11462_v7, %s10113_s15 }
  0xcf   :  { %341 = vst.msk [vmem:[#allocation2 + $0x50] sm:$0xff] %vm330_vm6, %v11507_v43  ;;  %342 = vst.msk [vmem:[#allocation2 + $0x58] sm:$0xff] %vm330_vm6, %v11511_v35  ;;  %v11563_v61 = vcombine.low %v9999_v16, %v10000_v57  ;;  %v10001_v47 = vld [vmem:[%s17633_s0 + $0xd8] sm:$0xf]  ;;  %v10002_v50 = vld [vmem:[%s17633_s0 + $0xdc] sm:$0xf] }
  0xd0   :  { %343 = vst.msk [vmem:[#allocation2 + $0x60] sm:$0xff] %vm330_vm6, %v11515_v38  ;;  %v9233_v10 = vcombine.low %v10001_v47, %v10002_v50  ;;  %v10003_v19 = vld [vmem:[%s17633_s0 + $0xe4] sm:$0xf]  ;;  %v10004_v41 = vld [vmem:[%s17633_s0 + $0xe8] sm:$0xf]  ;;  %344 = vst.msk [vmem:[#allocation2 + $0x68] sm:$0xff] %vm330_vm6, %v11533_v53  ;;  %1772 = vrot.lane.b32.xlu1 %v11487_v52, %s10113_s15 }
  0xd1   :  { %v11577_v13 = vcombine.low %v10003_v19, %v10004_v41  ;;  %1337 = vst.msk [vmem:[#allocation2 + $0x50] sm:$0xff] %vm1326_vm7, %v11334_v37  ;;  %1338 = vst.msk [vmem:[#allocation2 + $0x58] sm:$0xff] %vm1326_vm7, %v11351_v20  ;;  %v10005_v1 = vld [vmem:[%s17633_s0 + $0xf0] sm:$0xf]  ;;  %v10006_v37 = vld [vmem:[%s17633_s0 + $0xf4] sm:$0xf] }
  0xd2   :  { %1339 = vst.msk [vmem:[#allocation2 + $0x60] sm:$0xff] %vm1326_vm7, %v11381_v59  ;;  %v11597_v8 = vcombine.low %v10005_v1, %v10006_v37  ;;  %v10007_v20 = vld [vmem:[%s17633_s0 + $0xfc] sm:$0xf]  ;;  %v10008_v59 = vld [vmem:[%s17633_s0 + $0x100] sm:$0xf]  ;;  %1340 = vst.msk [vmem:[#allocation2 + $0x68] sm:$0xff] %vm1326_vm7, %v11403_v0  ;;  %1774 = vrot.lane.b32.xlu0 %v11517_v21, %s10113_s15 }
  0xd3   :  { %345 = vst.msk [vmem:[#allocation2 + $0x70] sm:$0xff] %vm330_vm6, %v11541_v51  ;;  %v11605_v5 = vcombine.low %v10007_v20, %v10008_v59  ;;  %v10009_v16 = vld [vmem:[%s17633_s0 + $0x108] sm:$0xf]  ;;  %v10010_v57 = vld [vmem:[%s17633_s0 + $0x10c] sm:$0xf]  ;;  %346 = vst.msk [vmem:[#allocation2 + $0x78] sm:$0xff] %vm330_vm6, %v11563_v61 }
  0xd4   :  { %v11613_v47 = vcombine.low %v10009_v16, %v10010_v57  ;;  %v10011_v50 = vld [vmem:[%s17633_s0 + $0x114] sm:$0xf]  ;;  %v10012_v19 = vld [vmem:[%s17633_s0 + $0x118] sm:$0xf]  ;;  %1341 = vst.msk [vmem:[#allocation2 + $0x70] sm:$0xff] %vm1326_vm7, %v11437_v39  ;;  %1342 = vst.msk [vmem:[#allocation2 + $0x78] sm:$0xff] %vm1326_vm7, %v11460_v6  ;;  %v11688_v6 = vcombine.low %v18059_v3, %v18060_v30 }
  0xd5   :  { %v11621_v41 = vcombine.low %v10011_v50, %v10012_v19  ;;  %347 = vst.msk [vmem:[#allocation2 + $0x80] sm:$0xff] %vm330_vm6, %v9233_v10  ;;  %348 = vst.msk [vmem:[#allocation2 + $0x88] sm:$0xff] %vm330_vm6, %v11577_v13  ;;  %v10013_v1 = vld [vmem:[%s17633_s0 + $0x120] sm:$0xf]  ;;  %v10014_v37 = vld [vmem:[%s17633_s0 + $0x124] sm:$0xf]  ;;  %v11660_v50 = vcombine.low %v10691_v17, %v10699_v56  ;;  %v11676_v56 = vcombine.low %v10722_v27, %v18045_v26 }
  0xd6   :  { %v11640_v0 = vcombine.low %v10013_v1, %v10014_v37  ;;  %v10015_v39 = vld [vmem:[%s17633_s0 + $0x12c] sm:$0xf]  ;;  %v10016_v10 = vld [vmem:[%s17633_s0 + $0x130] sm:$0xf]  ;;  %v10017_v59 = vld [vmem:[%s17633_s0 + $0x138] sm:$0xf]  ;;  %v11680_v17 = vcombine.low %v18048_v63, %v18049_v25  ;;  %v11700_v27 = vcombine.low %v18069_v28, %v18070_v32  ;;  %v11704_v26 = vcombine.low %v18072_v54, %v18073_v46  ;;  %v1269_v25 = vpop.permute.xlu1 %1268  ;;  %1853 = vrot.lane.b32.xlu0 %v11397_v58, %s10114_s16 }
  0xd7   :  { %v11648_v20 = vcombine.low %v10015_v39, %v10016_v10  ;;  %v10018_v16 = vld [vmem:[%s17633_s0 + $0x13c] sm:$0xf]  ;;  %1343 = vst.msk [vmem:[#allocation2 + $0x80] sm:$0xff] %vm1326_vm7, %v1263_v4  ;;  %1344 = vst.msk [vmem:[#allocation2 + $0x88] sm:$0xff] %vm1326_vm7, %v1265_v60  ;;  %v11684_v4 = vcombine.low %v18056_v49, %v18057_v12  ;;  %v1267_v60 = vpop.permute.xlu0 %1266  ;;  %v11710_v63 = vcombine.low %v11521_v2, %v11545_v24  ;;  %v18091_v32 = vld [vmem:[#allocation6_spill] sm:$0xff]  ;;  %vm2422_vm13 = vcmask 228544  }
  0xd8   :  { %v11656_v57 = vcombine.low %v10017_v59, %v10018_v16  ;;  %349 = vst.msk [vmem:[#allocation2 + $0x90] sm:$0xff] %vm330_vm6, %v11597_v8  ;;  %350 = vst.msk [vmem:[#allocation2 + $0x98] sm:$0xff] %vm330_vm6, %v11605_v5  ;;  %v9929_v54 = vld [vmem:[%s17634_s2] sm:$0xff]   ;;  %v18092_v46 = vld [vmem:[#allocation5_spill] sm:$0xff]  ;;  %vm2605_vm14 = vcmask 261344   ;;  %vm17788_vm15 = vcmask 294144  }
  0xd9   :  { %351 = vst.msk [vmem:[#allocation2 + $0xa0] sm:$0xff] %vm330_vm6, %v11613_v47  ;;  %352 = vst.msk [vmem:[#allocation2 + $0xa8] sm:$0xff] %vm330_vm6, %v11621_v41  ;;  %1776 = vrot.lane.b32.xlu1 %v11710_v63, %s10113_s15  ;;  %9777 = vmatprep.subr.bf16.mxu0 %v9929_v54  ;;  %v18093_v24 = vld [vmem:[#allocation56_spill] sm:$0xff]  ;;  %v9930_v19 = vld [vmem:[%s17634_s2 + $0x8] sm:$0xff]   ;;  %vm17787_vm0 = vcmask 293888   ;;  %vm3921_vm1 = vcmask 24576  }
  0xda   :  { %353 = vst.msk [vmem:[#allocation2 + $0xb0] sm:$0xff] %vm330_vm6, %v11640_v0  ;;  %354 = vst.msk [vmem:[#allocation2 + $0xb8] sm:$0xff] %vm330_vm6, %v11648_v20  ;;  %1857 = vrot.lane.b32.xlu0 %v11401_v34, %s10114_s16  ;;  %v1273_v12 = vpop.permute.xlu1 %1272  ;;  %9778 = vmatpush3.bf16.msra.mxu0 %v9929_v54  ;;  %v18094_v1 = vld [vmem:[#allocation62_spill] sm:$0xff]  ;;  %v9931_v39 = vld [vmem:[%s17634_s2 + $0x10] ss:$0 sps:$4 sm:$0x33]  }
  0xdb   :  { %355 = vst.msk [vmem:[#allocation2 + $0xc0] sm:$0xff] %vm330_vm6, %v11656_v57  ;;  %356 = vst.msk [vmem:[#allocation2 + $0xc8] sm:$0xff] %vm330_vm6, %v11660_v50  ;;  %v1271_v49 = vpop.permute.xlu0 %1270  ;;  %9779 = vmatprep.subr.bf16.mxu0 %v9930_v19  ;;  %v2940_v59 = vsel %vm17786_vm8, %v9931_v39, 0  ;;  %s10119_s2 = smov 32   ;;  %v18099_v54 = vld [vmem:[#allocation9_spill] sm:$0xff] }
  0xdc   :  { %1345 = vst.msk [vmem:[#allocation2 + $0x90] sm:$0xff] %vm1326_vm7, %v1267_v60  ;;  %1346 = vst.msk [vmem:[#allocation2 + $0x98] sm:$0xff] %vm1326_vm7, %v1269_v25  ;;  %v18097_v25 = vld [vmem:[#allocation8_spill] sm:$0xff]  ;;  %vm3934_vm3 = vsmask.f32 256 }
  0xdd   :  { %357 = vst.msk [vmem:[#allocation2 + $0xd0] sm:$0xff] %vm330_vm6, %v11676_v56  ;;  %358 = vst.msk [vmem:[#allocation2 + $0xd8] sm:$0xff] %vm330_vm6, %v11680_v17  ;;  %1855 = vrot.lane.b32.xlu1 %v11370_v55, %s10114_s16 }
  0xde   :  { %359 = vst.msk [vmem:[#allocation2 + $0xe0] sm:$0xff] %vm330_vm6, %v11684_v4  ;;  %360 = vst.msk [vmem:[#allocation2 + $0xe8] sm:$0xff] %vm330_vm6, %v11688_v6  ;;  %1861 = vrot.lane.b32.xlu0 %v11449_v45, %s10114_s16  ;;  %9780 = vmatpush3.bf16.msra.mxu0 %v9930_v19  ;;  %v18101_v19 = vld [vmem:[#allocation10_spill] sm:$0xff] }
  0xdf   :  { %361 = vst.msk [vmem:[#allocation2 + $0xf0] sm:$0xff] %vm330_vm6, %v11700_v27  ;;  %362 = vst.msk [vmem:[#allocation2 + $0xf8] sm:$0xff] %vm330_vm6, %v11704_v26  ;;  %v1275_v58 = vpop.permute.xlu0 %1274  ;;  %9917 = vmatprep.subr.msk.bf16.mxu0 %vm17786_vm8, %v9931_v39  ;;  %v18102_v39 = vld [vmem:[#allocation76_spill] sm:$0xff] }
  0xe0   :  { %1347 = vst.msk [vmem:[#allocation2 + $0xa0] sm:$0xff] %vm1326_vm7, %v1271_v49  ;;  %1348 = vst.msk [vmem:[#allocation2 + $0xa8] sm:$0xff] %vm1326_vm7, %v1273_v12  ;;  %v1277_v3 = vpop.permute.xlu1 %1276 }
  0xe1   :  { %1859 = vrot.lane.b32.xlu1 %v11445_v29, %s10114_s16  ;;  %1349 = vst.msk [vmem:[#allocation2 + $0xb0] sm:$0xff] %vm1326_vm7, %v1275_v58  ;;  %1350 = vst.msk [vmem:[#allocation2 + $0xb8] sm:$0xff] %vm1326_vm7, %v1277_v3  ;;  %v18098_v58 = vld [vmem:[#allocation68_spill] sm:$0xff] }
  0xe2   :  { %1865 = vrot.lane.b32.xlu0 %v11483_v36, %s10114_s16  ;;  %9782 = vmatpush3.bf16.msra.mxu0 %v2940_v59  ;;  %vm12170_vm4 = vmand %vm3921_vm1, %vm3934_vm3 }
  0xe5   :  { %1863 = vrot.lane.b32.xlu1 %v11479_v14, %s10114_s16  ;;  %v1279_v30 = vpop.permute.xlu0 %1278 }
  0xe6   :  { %1869 = vrot.lane.b32.xlu0 %v11495_v62, %s10114_s16  ;;  %1351 = vst.msk [vmem:[#allocation2 + $0xc0] sm:$0xff] %vm1326_vm7, %v1279_v30 }
  0xe8   :  { %v1281_v28 = vpop.permute.xlu1 %1280 }
  0xe9   :  { %1867 = vrot.lane.b32.xlu1 %v11491_v42, %s10114_s16  ;;  %1352 = vst.msk [vmem:[#allocation2 + $0xc8] sm:$0xff] %vm1326_vm7, %v1281_v28 }
  0xea   :  { %1873 = vrot.lane.b32.xlu0 %v11511_v35, %s10114_s16 }
  0xed   :  { %1871 = vrot.lane.b32.xlu1 %v11507_v43, %s10114_s16  ;;  %v1283_v2 = vpop.permute.xlu0 %1282 }
  0xee   :  { %1877 = vrot.lane.b32.xlu0 %v11533_v53, %s10114_s16  ;;  %1353 = vst.msk [vmem:[#allocation2 + $0xd0] sm:$0xff] %vm1326_vm7, %v1283_v2 }
  0xf1   :  { %1875 = vrot.lane.b32.xlu1 %v11515_v38, %s10114_s16 }
  0xf2   :  { %2038 = vrot.lane.b32.xlu0 %v18092_v46, %s10115_s17  ;;  %v1285_v37 = vpop.permute.xlu1 %1284 }
  0xf3   :  { %1354 = vst.msk [vmem:[#allocation2 + $0xd8] sm:$0xff] %vm1326_vm7, %v1285_v37 }
  0xf5   :  { %2036 = vrot.lane.b32.xlu1 %v18091_v32, %s10115_s17 }
  0xf6   :  { %2189 = vrot.lane.b32.xlu0 %v18094_v1, %s10116_s20  ;;  %v1287_v10 = vpop.permute.xlu0 %1286 }
  0xf7   :  { %1355 = vst.msk [vmem:[#allocation2 + $0xe0] sm:$0xff] %vm1326_vm7, %v1287_v10 }
  0xf9   :  { %2187 = vrot.lane.b32.xlu1 %v18093_v24, %s10116_s20 }
  0xfa   :  { %2328 = vrot.lane.b32.xlu0 %v11401_v34, %s10117_s23  ;;  %v1289_v16 = vpop.permute.xlu1 %1288  ;;  %v18096_v34 = vld [vmem:[#allocation65_spill] sm:$0xff] }
  0xfb   :  { %1356 = vst.msk [vmem:[#allocation2 + $0xe8] sm:$0xff] %vm1326_vm7, %v1289_v16 }
  0xfd   :  { %2326 = vrot.lane.b32.xlu1 %v11370_v55, %s10117_s23  ;;  %v18095_v55 = vld [vmem:[#allocation7_spill] sm:$0xff] }
  0xfe   :  { %2511 = vrot.lane.b32.xlu0 %v18095_v55, %s10118_s26 }
  0xff   :  { %v1291_v60 = vpop.permute.xlu0 %1290 }
 0x100   :  { %1357 = vst.msk [vmem:[#allocation2 + $0xf0] sm:$0xff] %vm1326_vm7, %v1291_v60 }
 0x101   :  { %2509 = vrot.lane.b32.xlu1 %v18092_v46, %s10118_s26 }
 0x102   :  { %2662 = vrot.lane.b32.xlu0 %v18096_v34, %s10119_s2 }
 0x103   :  { %v1293_v49 = vpop.permute.xlu1 %1292  ;;  %v1715_v12 = vpop.permute.xlu0 %1714 }
 0x104   :  { %1358 = vst.msk [vmem:[#allocation2 + $0xf8] sm:$0xff] %vm1326_vm7, %v1293_v49 }
 0x105   :  { %2660 = vrot.lane.b32.xlu1 %v18094_v1, %s10119_s2  ;;  %1811 = vst.msk [vmem:[#allocation2] sm:$0xff] %vm17785_vm9, %v1715_v12  ;;  %v18105_v12 = vld [vmem:[#allocation12_spill] sm:$0xff] }
 0x106   :  { %2042 = vrot.lane.b32.xlu0 %v18097_v25, %s10115_s17 }
 0x107   :  { %v1717_v3 = vpop.permute.xlu1 %1716  ;;  %v1719_v30 = vpop.permute.xlu0 %1718 }
 0x108   :  { %1812 = vst.msk [vmem:[#allocation2 + $0x8] sm:$0xff] %vm17785_vm9, %v1717_v3  ;;  %1813 = vst.msk [vmem:[#allocation2 + $0x10] sm:$0xff] %vm17785_vm9, %v1719_v30  ;;  %v18106_v30 = vld [vmem:[#allocation82_spill] sm:$0xff] }
 0x109   :  { %2040 = vrot.lane.b32.xlu1 %v18095_v55, %s10115_s17 }
 0x10a   :  { %2193 = vrot.lane.b32.xlu0 %v18098_v58, %s10116_s20 }
 0x10b   :  { %v1721_v28 = vpop.permute.xlu1 %1720 }
 0x10c   :  { %1814 = vst.msk [vmem:[#allocation2 + $0x18] sm:$0xff] %vm17785_vm9, %v1721_v28  ;;  %v1723_v32 = vpop.permute.xlu0 %1722 }
 0x10d   :  { %2191 = vrot.lane.b32.xlu1 %v18096_v34, %s10116_s20  ;;  %1815 = vst.msk [vmem:[#allocation2 + $0x20] sm:$0xff] %vm17785_vm9, %v1723_v32  ;;  %v18103_v34 = vld [vmem:[#allocation11_spill] sm:$0xff] }
 0x10e   :  { %2332 = vrot.lane.b32.xlu0 %v11449_v45, %s10117_s23  ;;  %v18100_v45 = vld [vmem:[#allocation69_spill] sm:$0xff] }
 0x10f   :  { %v1725_v46 = vpop.permute.xlu1 %1724 }
 0x110   :  { %1816 = vst.msk [vmem:[#allocation2 + $0x28] sm:$0xff] %vm17785_vm9, %v1725_v46 }
 0x111   :  { %2330 = vrot.lane.b32.xlu1 %v11445_v29, %s10117_s23  ;;  %v1727_v29 = vpop.permute.xlu0 %1726 }
 0x112   :  { %2515 = vrot.lane.b32.xlu0 %v18099_v54, %s10118_s26  ;;  %1817 = vst.msk [vmem:[#allocation2 + $0x30] sm:$0xff] %vm17785_vm9, %v1727_v29  ;;  %v18107_v29 = vld [vmem:[#allocation13_spill] sm:$0xff] }
 0x114   :  { %v1729_v2 = vpop.permute.xlu1 %1728 }
 0x115   :  { %2513 = vrot.lane.b32.xlu1 %v18097_v25, %s10118_s26  ;;  %1818 = vst.msk [vmem:[#allocation2 + $0x38] sm:$0xff] %vm17785_vm9, %v1729_v2  ;;  %v1731_v24 = vpop.permute.xlu0 %1730 }
 0x116   :  { %2666 = vrot.lane.b32.xlu0 %v18100_v45, %s10119_s2  ;;  %1819 = vst.msk [vmem:[#allocation2 + $0x40] sm:$0xff] %vm17785_vm9, %v1731_v24  ;;  %v18108_v24 = vld [vmem:[#allocation14_spill] sm:$0xff] }
 0x118   :  { %v1733_v1 = vpop.permute.xlu1 %1732 }
 0x119   :  { %2664 = vrot.lane.b32.xlu1 %v18098_v58, %s10119_s2  ;;  %1820 = vst.msk [vmem:[#allocation2 + $0x48] sm:$0xff] %vm17785_vm9, %v1733_v1  ;;  %v1735_v37 = vpop.permute.xlu0 %1734 }
 0x11a   :  { %2046 = vrot.lane.b32.xlu0 %v18101_v19, %s10115_s17  ;;  %1821 = vst.msk [vmem:[#allocation2 + $0x50] sm:$0xff] %vm17785_vm9, %v1735_v37 }
 0x11d   :  { %2044 = vrot.lane.b32.xlu1 %v18099_v54, %s10115_s17  ;;  %v1737_v10 = vpop.permute.xlu1 %1736 }
 0x11e   :  { %2197 = vrot.lane.b32.xlu0 %v18102_v39, %s10116_s20  ;;  %1822 = vst.msk [vmem:[#allocation2 + $0x58] sm:$0xff] %vm17785_vm9, %v1737_v10  ;;  %v1739_v59 = vpop.permute.xlu0 %1738 }
 0x11f   :  { %1823 = vst.msk [vmem:[#allocation2 + $0x60] sm:$0xff] %vm17785_vm9, %v1739_v59  ;;  %v18109_v59 = vld [vmem:[#allocation15_spill] sm:$0xff] }
 0x121   :  { %2195 = vrot.lane.b32.xlu1 %v18100_v45, %s10116_s20  ;;  %v1741_v55 = vpop.permute.xlu1 %1740 }
 0x122   :  { %2336 = vrot.lane.b32.xlu0 %v11483_v36, %s10117_s23  ;;  %1824 = vst.msk [vmem:[#allocation2 + $0x68] sm:$0xff] %vm17785_vm9, %v1741_v55  ;;  %v1743_v16 = vpop.permute.xlu0 %1742  ;;  %v18104_v36 = vld [vmem:[#allocation80_spill] sm:$0xff] }
 0x123   :  { %1825 = vst.msk [vmem:[#allocation2 + $0x70] sm:$0xff] %vm17785_vm9, %v1743_v16 }
 0x125   :  { %2334 = vrot.lane.b32.xlu1 %v11479_v14, %s10117_s23  ;;  %v1745_v60 = vpop.permute.xlu1 %1744 }
 0x126   :  { %2519 = vrot.lane.b32.xlu0 %v18103_v34, %s10118_s26  ;;  %1826 = vst.msk [vmem:[#allocation2 + $0x78] sm:$0xff] %vm17785_vm9, %v1745_v60  ;;  %v1747_v14 = vpop.permute.xlu0 %1746 }
 0x127   :  { %1827 = vst.msk [vmem:[#allocation2 + $0x80] sm:$0xff] %vm17785_vm9, %v1747_v14 }
 0x129   :  { %2517 = vrot.lane.b32.xlu1 %v18101_v19, %s10118_s26  ;;  %v1749_v25 = vpop.permute.xlu1 %1748 }
 0x12a   :  { %2670 = vrot.lane.b32.xlu0 %v18104_v36, %s10119_s2  ;;  %1828 = vst.msk [vmem:[#allocation2 + $0x88] sm:$0xff] %vm17785_vm9, %v1749_v25  ;;  %v1751_v49 = vpop.permute.xlu0 %1750 }
 0x12b   :  { %1829 = vst.msk [vmem:[#allocation2 + $0x90] sm:$0xff] %vm17785_vm9, %v1751_v49  ;;  %v18111_v49 = vld [vmem:[#allocation17_spill] sm:$0xff] }
 0x12d   :  { %2668 = vrot.lane.b32.xlu1 %v18102_v39, %s10119_s2  ;;  %v1753_v58 = vpop.permute.xlu1 %1752 }
 0x12e   :  { %2050 = vrot.lane.b32.xlu0 %v18105_v12, %s10115_s17  ;;  %1830 = vst.msk [vmem:[#allocation2 + $0x98] sm:$0xff] %vm17785_vm9, %v1753_v58  ;;  %v1755_v3 = vpop.permute.xlu0 %1754 }
 0x12f   :  { %1831 = vst.msk [vmem:[#allocation2 + $0xa0] sm:$0xff] %vm17785_vm9, %v1755_v3  ;;  %v11960_v3 = vld [vmem:[%s17633_s0 + $0xc4] sm:$0xf] }
 0x131   :  { %2048 = vrot.lane.b32.xlu1 %v18103_v34, %s10115_s17  ;;  %v1757_v28 = vpop.permute.xlu1 %1756  ;;  %v18110_v34 = vld [vmem:[#allocation16_spill] sm:$0xff] }
 0x132   :  { %2201 = vrot.lane.b32.xlu0 %v18106_v30, %s10116_s20  ;;  %1832 = vst.msk [vmem:[#allocation2 + $0xa8] sm:$0xff] %vm17785_vm9, %v1757_v28  ;;  %v1759_v32 = vpop.permute.xlu0 %1758 }
 0x133   :  { %1833 = vst.msk [vmem:[#allocation2 + $0xb0] sm:$0xff] %vm17785_vm9, %v1759_v32 }
 0x135   :  { %2199 = vrot.lane.b32.xlu1 %v18104_v36, %s10116_s20  ;;  %v1761_v54 = vpop.permute.xlu1 %1760 }
 0x136   :  { %2340 = vrot.lane.b32.xlu0 %v11495_v62, %s10117_s23  ;;  %1834 = vst.msk [vmem:[#allocation2 + $0xb8] sm:$0xff] %vm17785_vm9, %v1761_v54 }
 0x137   :  { %v1763_v46 = vpop.permute.xlu0 %1762 }
 0x138   :  { %1835 = vst.msk [vmem:[#allocation2 + $0xc0] sm:$0xff] %vm17785_vm9, %v1763_v46  ;;  %v18112_v46 = vld [vmem:[#allocation18_spill] sm:$0xff] }
 0x139   :  { %2338 = vrot.lane.b32.xlu1 %v11491_v42, %s10117_s23  ;;  %v1765_v45 = vpop.permute.xlu1 %1764 }
 0x13a   :  { %2523 = vrot.lane.b32.xlu0 %v18107_v29, %s10118_s26  ;;  %1836 = vst.msk [vmem:[#allocation2 + $0xc8] sm:$0xff] %vm17785_vm9, %v1765_v45  ;;  %v1992_v45 = vshll.u32 %v11960_v3, 16 }
 0x13c   :  { %v1767_v42 = vpop.permute.xlu0 %1766 }
 0x13d   :  { %2521 = vrot.lane.b32.xlu1 %v18105_v12, %s10118_s26  ;;  %1837 = vst.msk [vmem:[#allocation2 + $0xd0] sm:$0xff] %vm17785_vm9, %v1767_v42 }
 0x13e   :  { %2674 = vrot.lane.b32.xlu0 %v11202_v18, %s10119_s2  ;;  %v1769_v62 = vpop.permute.xlu1 %1768 }
 0x13f   :  { %1838 = vst.msk [vmem:[#allocation2 + $0xd8] sm:$0xff] %vm17785_vm9, %v1769_v62 }
 0x140   :  { %v1771_v2 = vpop.permute.xlu0 %1770 }
 0x141   :  { %2672 = vrot.lane.b32.xlu1 %v18106_v30, %s10119_s2  ;;  %1839 = vst.msk [vmem:[#allocation2 + $0xe0] sm:$0xff] %vm17785_vm9, %v1771_v2 }
 0x142   :  { %2054 = vrot.lane.b32.xlu0 %v18108_v24, %s10115_s17  ;;  %v1773_v19 = vpop.permute.xlu1 %1772 }
 0x143   :  { %1840 = vst.msk [vmem:[#allocation2 + $0xe8] sm:$0xff] %vm17785_vm9, %v1773_v19  ;;  %v1994_v19 = vrot.slane %v1992_v45, 5 }
 0x144   :  { %v1775_v1 = vpop.permute.xlu0 %1774 }
 0x145   :  { %2052 = vrot.lane.b32.xlu1 %v18107_v29, %s10115_s17  ;;  %1841 = vst.msk [vmem:[#allocation2 + $0xf0] sm:$0xff] %vm17785_vm9, %v1775_v1  ;;  %v1996_v29 = vshrl.u32 %v11960_v3, 16 }
 0x146   :  { %2205 = vrot.lane.b32.xlu0 %v11204_v11, %s10116_s20 }
 0x147   :  { %v1998_v1 = vrot.slane %v1996_v29, 4 }
 0x148   :  { %v1854_v39 = vpop.permute.xlu0 %1853 }
 0x149   :  { %2203 = vrot.lane.b32.xlu1 %v11202_v18, %s10116_s20  ;;  %1950 = vst.msk [vmem:[#allocation2] sm:$0xff] %vm1949_vm10, %v1854_v39 }
 0x14a   :  { %2344 = vrot.lane.b32.xlu0 %v11511_v35, %s10117_s23 }
 0x14b   :  { %v1777_v37 = vpop.permute.xlu1 %1776 }
 0x14c   :  { %1842 = vst.msk [vmem:[#allocation2 + $0xf8] sm:$0xff] %vm17785_vm9, %v1777_v37  ;;  %v1858_v18 = vpop.permute.xlu0 %1857  ;;  %vm4044_vm9 = vsmask.f32 7938 }
 0x14d   :  { %2342 = vrot.lane.b32.xlu1 %v11507_v43, %s10117_s23  ;;  %1952 = vst.msk [vmem:[#allocation2 + $0x10] sm:$0xff] %vm1949_vm10, %v1858_v18  ;;  %v1999_v18 = vor.u32 %v1998_v1, %v1994_v19  ;;  %vm12185_vm8 = vmand %vm3921_vm1, %vm4044_vm9 }
 0x14e   :  { %2527 = vrot.lane.b32.xlu0 %v18109_v59, %s10118_s26 }
 0x14f   :  { %v1856_v10 = vpop.permute.xlu1 %1855 }
 0x150   :  { %1951 = vst.msk [vmem:[#allocation2 + $0x8] sm:$0xff] %vm1949_vm10, %v1856_v10  ;;  %v1862_v43 = vpop.permute.xlu0 %1861 }
 0x151   :  { %2525 = vrot.lane.b32.xlu1 %v18108_v24, %s10118_s26  ;;  %1954 = vst.msk [vmem:[#allocation2 + $0x20] sm:$0xff] %vm1949_vm10, %v1862_v43  ;;  %v11995_v43 = vld [vmem:[%s17633_s0 + $0xd0] sm:$0xf] }
 0x152   :  { %2678 = vrot.lane.b32.xlu0 %v11222_v44, %s10119_s2 }
 0x153   :  { %v1860_v55 = vpop.permute.xlu1 %1859 }
 0x154   :  { %1953 = vst.msk [vmem:[#allocation2 + $0x18] sm:$0xff] %vm1949_vm10, %v1860_v55  ;;  %v1866_v16 = vpop.permute.xlu0 %1865 }
 0x155   :  { %2676 = vrot.lane.b32.xlu1 %v11204_v11, %s10119_s2  ;;  %1956 = vst.msk [vmem:[#allocation2 + $0x30] sm:$0xff] %vm1949_vm10, %v1866_v16 }
 0x156   :  { %2058 = vrot.lane.b32.xlu0 %v18110_v34, %s10115_s17 }
 0x157   :  { %v1864_v35 = vpop.permute.xlu1 %1863 }
 0x158   :  { %1955 = vst.msk [vmem:[#allocation2 + $0x28] sm:$0xff] %vm1949_vm10, %v1864_v35  ;;  %v1870_v11 = vpop.permute.xlu0 %1869 }
 0x159   :  { %2056 = vrot.lane.b32.xlu1 %v18109_v59, %s10115_s17  ;;  %1958 = vst.msk [vmem:[#allocation2 + $0x40] sm:$0xff] %vm1949_vm10, %v1870_v11 }
 0x15a   :  { %2209 = vrot.lane.b32.xlu0 %v11233_v22, %s10116_s20 }
 0x15b   :  { %v1868_v60 = vpop.permute.xlu1 %1867 }
 0x15c   :  { %1957 = vst.msk [vmem:[#allocation2 + $0x38] sm:$0xff] %vm1949_vm10, %v1868_v60  ;;  %v1874_v36 = vpop.permute.xlu0 %1873  ;;  %v2000_v60 = vrot.slane %v1999_v18, 4 }
 0x15d   :  { %2207 = vrot.lane.b32.xlu1 %v11222_v44, %s10116_s20  ;;  %1960 = vst.msk [vmem:[#allocation2 + $0x50] sm:$0xff] %vm1949_vm10, %v1874_v36 }
 0x15e   :  { %2348 = vrot.lane.b32.xlu0 %v11533_v53, %s10117_s23 }
 0x15f   :  { %v1872_v14 = vpop.permute.xlu1 %1871 }
 0x160   :  { %1959 = vst.msk [vmem:[#allocation2 + $0x48] sm:$0xff] %vm1949_vm10, %v1872_v14  ;;  %v1878_v44 = vpop.permute.xlu0 %1877 }
 0x161   :  { %2346 = vrot.lane.b32.xlu1 %v11515_v38, %s10117_s23  ;;  %1962 = vst.msk [vmem:[#allocation2 + $0x60] sm:$0xff] %vm1949_vm10, %v1878_v44  ;;  %v2469_v44 = vshrl.u32 %v11995_v43, 16 }
 0x162   :  { %2531 = vrot.lane.b32.xlu0 %v18111_v49, %s10118_s26 }
 0x163   :  { %v1876_v25 = vpop.permute.xlu1 %1875 }
 0x164   :  { %1961 = vst.msk [vmem:[#allocation2 + $0x58] sm:$0xff] %vm1949_vm10, %v1876_v25  ;;  %v2039_v38 = vpop.permute.xlu0 %2038  ;;  %v2169_v25 = vrot.slane %v11960_v3, 5 }
 0x165   :  { %2529 = vrot.lane.b32.xlu1 %v18110_v34, %s10118_s26  ;;  %2134 = vst.msk [vmem:[#allocation2 + $0x8] sm:$0xff] %vm2132_vm11, %v2039_v38  ;;  %v18113_v34 = vld [vmem:[#allocation19_spill] sm:$0xff] }
 0x166   :  { %2682 = vrot.lane.b32.xlu0 %v11250_v33, %s10119_s2 }
 0x167   :  { %v2037_v12 = vpop.permute.xlu1 %2036 }
 0x168   :  { %2133 = vst.msk [vmem:[#allocation2] sm:$0xff] %vm2132_vm11, %v2037_v12  ;;  %v2190_v58 = vpop.permute.xlu0 %2189 }
 0x169   :  { %2680 = vrot.lane.b32.xlu1 %v11233_v22, %s10119_s2  ;;  %2285 = vst.msk [vmem:[#allocation2 + $0x8] sm:$0xff] %vm2283_vm12, %v2190_v58  ;;  %v11953_v22 = vld [vmem:[%s17633_s0 + $0xc0] sm:$0xf] }
 0x16a   :  { %2060 = vrot.lane.b32.xlu0 %v18111_v49, %s10115_s17  ;;  %v1983_v32 = vshrl.u32 %v11953_v22, 16  ;;  %v1986_v54 = vshll.u32 %v11953_v22, 16  ;;  %v2465_v49 = vshll.u32 %v11995_v43, 16 }
 0x16b   :  { %v2188_v53 = vpop.permute.xlu1 %2187 }
 0x16c   :  { %2284 = vst.msk [vmem:[#allocation2] sm:$0xff] %vm2283_vm12, %v2188_v53  ;;  %v2329_v28 = vpop.permute.xlu0 %2328  ;;  %v1985_v2 = vrot.slane %v1983_v32, 4  ;;  %v1988_v24 = vrot.slane %v1986_v54, 5  ;;  %v9349_v54 = vrot.slane %v11953_v22, 9 }
 0x16d   :  { %1879 = vrot.lane.b32.xlu1 %v11541_v51, %s10114_s16  ;;  %2424 = vst.msk [vmem:[#allocation2 + $0x8] sm:$0xff] %vm2422_vm13, %v2329_v28 }
 0x16e   :  { %2211 = vrot.lane.b32.xlu0 %v11250_v33, %s10116_s20  ;;  %v80_v33 = vld [vmem:[%s17633_s0 + $0xc8] sm:$0x1]  ;;  %v1989_v10 = vor.u32 %v1988_v24, %v1985_v2  ;;  %v83_v24 = vld [vmem:[%s17633_s0 + $0xd4] sm:$0x1] }
 0x16f   :  { %v2327_v30 = vpop.permute.xlu1 %2326  ;;  %v2002_v59 = vshll.u32 %v80_v33, 16  ;;  %v2172_v45 = vrot.slane %v80_v33, 5 }
 0x170   :  { %2423 = vst.msk [vmem:[#allocation2] sm:$0xff] %vm2422_vm13, %v2327_v30  ;;  %v2512_v62 = vpop.permute.xlu0 %2511  ;;  %v1990_v16 = vrot.slane %v1989_v10, 4  ;;  %v9345_v30 = vcombine.low %v11953_v22, %v11960_v3  ;;  %v2171_v3 = vrot.slane %v2169_v25, 4 }
 0x171   :  { %2062 = vrot.lane.b32.xlu1 %v18112_v46, %s10115_s17  ;;  %2607 = vst.msk [vmem:[#allocation2 + $0x8] sm:$0xff] %vm2605_vm14, %v2512_v62  ;;  %v2004_v11 = vrot.slane %v2002_v59, 5  ;;  %v2471_v62 = vrot.slane %v2469_v44, 4 }
 0x172   :  { %2350 = vrot.lane.b32.xlu0 %v11541_v51, %s10117_s23  ;;  %v11990_v51 = vld [vmem:[%s17633_s0 + $0xcc] sm:$0xf]  ;;  %v2173_v33 = vsel %vm10900_vm5, %v2171_v3, %v2172_v45 }
 0x173   :  { %v2510_v42 = vpop.permute.xlu1 %2509  ;;  %v2456_v14 = vshrl.u32 %v11990_v51, 16  ;;  %v2459_v36 = vshll.u32 %v11990_v51, 16  ;;  %v2005_v32 = vsel %vm10192_vm2, %v2000_v60, %v2004_v11 }
 0x174   :  { %2606 = vst.msk [vmem:[#allocation2] sm:$0xff] %vm2605_vm14, %v2510_v42  ;;  %v2663_v39 = vpop.permute.xlu0 %2662  ;;  %v2467_v42 = vrot.slane %v2465_v49, 5  ;;  %v2645_v49 = vrot.slane %v83_v24, 5 }
 0x175   :  { %2213 = vrot.lane.b32.xlu1 %v11252_v23, %s10116_s20  ;;  %2758 = vst.msk [vmem:[#allocation2 + $0x8] sm:$0xff] %vm17788_vm15, %v2663_v39  ;;  %v2461_v29 = vrot.slane %v2459_v36, 5  ;;  %v2475_v39 = vshll.u32 %v83_v24, 16  ;;  %v18116_v24 = vld [vmem:[#allocation21_spill] sm:$0xff] }
 0x176   :  { %2533 = vrot.lane.b32.xlu0 %v18112_v46, %s10118_s26  ;;  %v2458_v46 = vrot.slane %v2456_v14, 4  ;;  %v9353_v14 = vcombine.low %v11990_v51, %v11995_v43 }
 0x177   :  { %v2661_v37 = vpop.permute.xlu1 %2660 }
 0x178   :  { %2757 = vst.msk [vmem:[#allocation2] sm:$0xff] %vm17788_vm15, %v2661_v37  ;;  %v2043_v35 = vpop.permute.xlu0 %2042  ;;  %v2462_v1 = vor.u32 %v2461_v29, %v2458_v46  ;;  %v2472_v37 = vor.u32 %v2471_v62, %v2467_v42 }
 0x179   :  { %2352 = vrot.lane.b32.xlu1 %v11563_v61, %s10117_s23  ;;  %2136 = vst.msk [vmem:[#allocation2 + $0x18] sm:$0xff] %vm2132_vm11, %v2043_v35 }
 0x17a   :  { %2684 = vrot.lane.b32.xlu0 %v11252_v23, %s10119_s2  ;;  %v1995_v23 = vsel %vm10192_vm2, %v1990_v16, %v1994_v19  ;;  %v2473_v35 = vrot.slane %v2472_v37, 4  ;;  %v2477_v16 = vrot.slane %v2475_v39, 5  ;;  %v18118_v39 = vld [vmem:[#allocation22_spill] sm:$0xff] }
 0x17b   :  { %v2041_v55 = vpop.permute.xlu1 %2040  ;;  %v9347_v22 = vcombine.low %v1995_v23, %v2005_v32 }
 0x17c   :  { %2135 = vst.msk [vmem:[#allocation2 + $0x10] sm:$0xff] %vm2132_vm11, %v2041_v55  ;;  %v2194_v53 = vpop.permute.xlu0 %2193  ;;  %v2790_v58 = vld [vmem:[#allocation2 + $0x8] sm:$0xff]  ;;  %v2463_v55 = vrot.slane %v2462_v1, 4 }
 0x17d   :  { %2535 = vrot.lane.b32.xlu1 %v18113_v34, %s10118_s26  ;;  %2287 = vst.msk [vmem:[#allocation2 + $0x18] sm:$0xff] %vm2283_vm12, %v2194_v53 }
 0x17e   :  { %1881 = vrot.lane.b32.xlu0 %v11563_v61, %s10114_s16  ;;  %v2170_v61 = vsel %vm10900_vm5, %v9349_v54, %v2169_v25  ;;  %v2468_v36 = vsel %vm10192_vm2, %v2463_v55, %v2467_v42  ;;  %v9357_v25 = vrot.slane %v11990_v51, 9  ;;  %v18115_v42 = vld [vmem:[#allocation20_spill] sm:$0xff] }
 0x17f   :  { %v2192_v12 = vpop.permute.xlu1 %2191  ;;  %v2789_v38 = vld [vmem:[#allocation2] sm:$0xff]  ;;  %v9351_v59 = vcombine.low %v2170_v61, %v2173_v33 }
 0x180   :  { %2286 = vst.msk [vmem:[#allocation2 + $0x10] sm:$0xff] %vm2283_vm12, %v2192_v12  ;;  %9783 = vmatprep.mubr.msk.bf16.mxu0 %vm17787_vm0, %v2789_v38  ;;  %v2333_v19 = vpop.permute.xlu0 %2332 }
 0x181   :  { %2686 = vrot.lane.b32.xlu1 %v11272_v9, %s10119_s2  ;;  %9784 = vmatmul.mubr.msk.bf16.vlgmr.msra.gmra.mrb[0].mxu0 %vm17787_vm0, %v2790_v58  ;;  %2426 = vst.msk [vmem:[#allocation2 + $0x18] sm:$0xff] %vm2422_vm13, %v2333_v19 }
 0x182   :  { %2064 = vrot.lane.b32.xlu0 %v18113_v34, %s10115_s17  ;;  %v2642_v34 = vrot.slane %v11995_v43, 5 }
 0x183   :  { %v2331_v2 = vpop.permute.xlu1 %2330 }
 0x184   :  { %2425 = vst.msk [vmem:[#allocation2 + $0x10] sm:$0xff] %vm2422_vm13, %v2331_v2  ;;  %v2516_v18 = vpop.permute.xlu0 %2515  ;;  %v2644_v44 = vrot.slane %v2642_v34, 4  ;;  %v2643_v53 = vsel %vm10900_vm5, %v9357_v25, %v2642_v34 }
 0x185   :  { %1883 = vrot.lane.b32.xlu1 %v9345_v30, %s10114_s16  ;;  %2609 = vst.msk [vmem:[#allocation2 + $0x18] sm:$0xff] %vm2605_vm14, %v2516_v18 }
 0x186   :  { %2215 = vrot.lane.b32.xlu0 %v11272_v9, %s10116_s20  ;;  %v2478_v9 = vsel %vm10192_vm2, %v2473_v35, %v2477_v16  ;;  %v2646_v58 = vsel %vm10900_vm5, %v2644_v44, %v2645_v49 }
 0x187   :  { %v2514_v10 = vpop.permute.xlu1 %2513  ;;  %v9355_v43 = vcombine.low %v2468_v36, %v2478_v9  ;;  %v9359_v54 = vcombine.low %v2643_v53, %v2646_v58  ;;  %v18121_v9 = vld [vmem:[#allocation91_spill] sm:$0xff]  ;;  %v18123_v53 = vld [vmem:[#allocation92_spill] sm:$0xff] }
 0x188   :  { %2608 = vst.msk [vmem:[#allocation2 + $0x10] sm:$0xff] %vm2605_vm14, %v2514_v10  ;;  %v2667_v11 = vpop.permute.xlu0 %2666 }
 0x189   :  { %2066 = vrot.lane.b32.xlu1 %v9347_v22, %s10115_s17  ;;  %2760 = vst.msk [vmem:[#allocation2 + $0x18] sm:$0xff] %vm17788_vm15, %v2667_v11 }
 0x18a   :  { %2354 = vrot.lane.b32.xlu0 %v9345_v30, %s10117_s23 }
 0x18b   :  { %v2665_v60 = vpop.permute.xlu1 %2664 }
 0x18c   :  { %2759 = vst.msk [vmem:[#allocation2 + $0x10] sm:$0xff] %vm17788_vm15, %v2665_v60  ;;  %v2047_v38 = vpop.permute.xlu0 %2046  ;;  %v18120_v60 = vld [vmem:[#allocation23_spill] sm:$0xff] }
 0x18d   :  { %2217 = vrot.lane.b32.xlu1 %v9351_v59, %s10116_s20  ;;  %2138 = vst.msk [vmem:[#allocation2 + $0x28] sm:$0xff] %vm2132_vm11, %v2047_v38  ;;  %v18122_v38 = vld [vmem:[#allocation24_spill] sm:$0xff] }
 0x18e   :  { %2537 = vrot.lane.b32.xlu0 %v9347_v22, %s10118_s26  ;;  %v18117_v22 = vld [vmem:[#allocation89_spill] sm:$0xff] }
 0x18f   :  { %v2045_v12 = vpop.permute.xlu1 %2044 }
 0x190   :  { %2137 = vst.msk [vmem:[#allocation2 + $0x20] sm:$0xff] %vm2132_vm11, %v2045_v12  ;;  %v2198_v23 = vpop.permute.xlu0 %2197  ;;  %v2792_v32 = vld [vmem:[#allocation2 + $0x18] sm:$0xff] }
 0x191   :  { %2356 = vrot.lane.b32.xlu1 %v9353_v14, %s10117_s23  ;;  %2289 = vst.msk [vmem:[#allocation2 + $0x28] sm:$0xff] %vm2283_vm12, %v2198_v23 }
 0x192   :  { %2688 = vrot.lane.b32.xlu0 %v9351_v59, %s10119_s2  ;;  %v18119_v59 = vld [vmem:[#allocation90_spill] sm:$0xff] }
 0x193   :  { %v2196_v51 = vpop.permute.xlu1 %2195  ;;  %v2791_v30 = vld [vmem:[#allocation2 + $0x10] sm:$0xff] }
 0x194   :  { %2288 = vst.msk [vmem:[#allocation2 + $0x20] sm:$0xff] %vm2283_vm12, %v2196_v51  ;;  %9787 = vmatprep.mubr.msk.bf16.mxu0 %vm17787_vm0, %v2791_v30  ;;  %v2337_v29 = vpop.permute.xlu0 %2336 }
 0x195   :  { %2539 = vrot.lane.b32.xlu1 %v9355_v43, %s10118_s26  ;;  %9788 = vmatmul.mubr.msk.bf16.gmra.mrb[4].mxu0 %vm17787_vm0, %v2792_v32  ;;  %2428 = vst.msk [vmem:[#allocation2 + $0x28] sm:$0xff] %vm2422_vm13, %v2337_v29 }
 0x196   :  { %1885 = vrot.lane.b32.xlu0 %v11577_v13, %s10114_s16 }
 0x197   :  { %v2335_v46 = vpop.permute.xlu1 %2334 }
 0x198   :  { %2427 = vst.msk [vmem:[#allocation2 + $0x20] sm:$0xff] %vm2422_vm13, %v2335_v46  ;;  %v2520_v45 = vpop.permute.xlu0 %2519 }
 0x199   :  { %2690 = vrot.lane.b32.xlu1 %v9359_v54, %s10119_s2  ;;  %2611 = vst.msk [vmem:[#allocation2 + $0x28] sm:$0xff] %vm2605_vm14, %v2520_v45  ;;  %v18124_v54 = vld [vmem:[#allocation25_spill] sm:$0xff] }
 0x19a   :  { %2068 = vrot.lane.b32.xlu0 %v18115_v42, %s10115_s17  ;;  %v3942_v42 = vld [vmem:[#allocation3 + $0x18] sm:$0x1] }
 0x19b   :  { %v2518_v3 = vpop.permute.xlu1 %2517 }
 0x19c   :  { %2610 = vst.msk [vmem:[#allocation2 + $0x20] sm:$0xff] %vm2605_vm14, %v2518_v3  ;;  %v2671_v2 = vpop.permute.xlu0 %2670  ;;  %v18125_v3 = vld [vmem:[#allocation93_spill] sm:$0xff] }
 0x19d   :  { %1887 = vrot.lane.b32.xlu1 %v11597_v8, %s10114_s16  ;;  %2762 = vst.msk [vmem:[#allocation2 + $0x28] sm:$0xff] %vm17788_vm15, %v2671_v2  ;;  %v18126_v2 = vmov 0 }
 0x19e   :  { %2219 = vrot.lane.b32.xlu0 %v11298_v40, %s10116_s20  ;;  %v18127_v2 = vsel %vm12170_vm4, 4294967295, %v18126_v2 }
 0x19f   :  { %v2669_v62 = vpop.permute.xlu1 %2668  ;;  %18128 = vst [vmem:[#allocation67_spill] sm:$0xff] %v18127_v2 }
 0x1a0   :  { %2761 = vst.msk [vmem:[#allocation2 + $0x20] sm:$0xff] %vm17788_vm15, %v2669_v62  ;;  %v2051_v19 = vpop.permute.xlu0 %2050 }
 0x1a1   :  { %2070 = vrot.lane.b32.xlu1 %v18116_v24, %s10115_s17  ;;  %2140 = vst.msk [vmem:[#allocation2 + $0x38] sm:$0xff] %vm2132_vm11, %v2051_v19  ;;  %v4052_v19 = vld [vmem:[#allocation3 + $0x20] sm:$0x1] }
 0x1a2   :  { %2358 = vrot.lane.b32.xlu0 %v11597_v8, %s10117_s23 }
 0x1a3   :  { %v2049_v13 = vpop.permute.xlu1 %2048 }
 0x1a4   :  { %2139 = vst.msk [vmem:[#allocation2 + $0x30] sm:$0xff] %vm2132_vm11, %v2049_v13  ;;  %v2202_v33 = vpop.permute.xlu0 %2201  ;;  %v2794_v40 = vld [vmem:[#allocation2 + $0x28] sm:$0xff] }
 0x1a5   :  { %2221 = vrot.lane.b32.xlu1 %v18117_v22, %s10116_s20  ;;  %2291 = vst.msk [vmem:[#allocation2 + $0x38] sm:$0xff] %vm2283_vm12, %v2202_v33 }
 0x1a6   :  { %2541 = vrot.lane.b32.xlu0 %v18116_v24, %s10118_s26  ;;  %v3939_v24 = vld [vmem:[#allocation3 + $0xc] sm:$0x1] }
 0x1a7   :  { %v2200_v1 = vpop.permute.xlu1 %2199  ;;  %v2793_v61 = vld [vmem:[#allocation2 + $0x20] sm:$0xff]  ;;  %v3940_v13 = vsel %vm12170_vm4, 0, %v3939_v24  ;;  %v4064_v24 = vld [vmem:[#allocation3 + $0x50] sm:$0x1] }
 0x1a8   :  { %2290 = vst.msk [vmem:[#allocation2 + $0x30] sm:$0xff] %vm2283_vm12, %v2200_v1  ;;  %9791 = vmatprep.mubr.msk.bf16.mxu0 %vm17787_vm0, %v2793_v61  ;;  %v2341_v8 = vpop.permute.xlu0 %2340  ;;  %3941 = vst [vmem:[#allocation3 + $0xc] sm:$0x1] %v3940_v13  ;;  %v4053_v61 = vsel %vm12185_vm8, 0, %v4052_v19  ;;  %v4065_v13 = vsel %vm12185_vm8, 0, %v4064_v24 }
 0x1a9   :  { %2360 = vrot.lane.b32.xlu1 %v11605_v5, %s10117_s23  ;;  %9792 = vmatmul.mubr.msk.bf16.gmra.mrb[8].mxu0 %vm17787_vm0, %v2794_v40  ;;  %2430 = vst.msk [vmem:[#allocation2 + $0x38] sm:$0xff] %vm2422_vm13, %v2341_v8  ;;  %4054 = vst [vmem:[#allocation3 + $0x20] sm:$0x1] %v4053_v61  ;;  %v18132_v40 = vld [vmem:[#allocation26_spill] sm:$0xff]  ;;  %v18138_v61 = vld [vmem:[#allocation27_spill] sm:$0xff] }
 0x1aa   :  { %2692 = vrot.lane.b32.xlu0 %v18117_v22, %s10119_s2  ;;  %v18129_v22 = vmov 0  ;;  %4066 = vst [vmem:[#allocation3 + $0x50] sm:$0x1] %v4065_v13 }
 0x1ab   :  { %v2339_v37 = vpop.permute.xlu1 %2338  ;;  %v18130_v22 = vsel %vm12185_vm8, 4294967295, %v18129_v22 }
 0x1ac   :  { %2429 = vst.msk [vmem:[#allocation2 + $0x30] sm:$0xff] %vm2422_vm13, %v2339_v37  ;;  %v2524_v18 = vpop.permute.xlu0 %2523  ;;  %18131 = vst [vmem:[#allocation28_spill] sm:$0xff] %v18130_v22  ;;  %v4049_v37 = vld [vmem:[#allocation3 + $0x14] sm:$0x1] }
 0x1ad   :  { %2543 = vrot.lane.b32.xlu1 %v18118_v39, %s10118_s26  ;;  %2613 = vst.msk [vmem:[#allocation2 + $0x38] sm:$0xff] %vm2605_vm14, %v2524_v18  ;;  %v4050_v8 = vsel %vm12185_vm8, 0, %v4049_v37  ;;  %v18133_v18 = vld [vmem:[#allocation94_spill] sm:$0xff] }
 0x1ae   :  { %1889 = vrot.lane.b32.xlu0 %v11605_v5, %s10114_s16  ;;  %4051 = vst [vmem:[#allocation3 + $0x14] sm:$0x1] %v4050_v8 }
 0x1af   :  { %v2522_v10 = vpop.permute.xlu1 %2521 }
 0x1b0   :  { %2612 = vst.msk [vmem:[#allocation2 + $0x30] sm:$0xff] %vm2605_vm14, %v2522_v10  ;;  %v2675_v35 = vpop.permute.xlu0 %2674 }
 0x1b1   :  { %2694 = vrot.lane.b32.xlu1 %v18119_v59, %s10119_s2  ;;  %2764 = vst.msk [vmem:[#allocation2 + $0x38] sm:$0xff] %vm17788_vm15, %v2675_v35 }
 0x1b2   :  { %2072 = vrot.lane.b32.xlu0 %v18118_v39, %s10115_s17 }
 0x1b3   :  { %v2673_v55 = vpop.permute.xlu1 %2672 }
 0x1b4   :  { %2763 = vst.msk [vmem:[#allocation2 + $0x30] sm:$0xff] %vm17788_vm15, %v2673_v55  ;;  %v2055_v34 = vpop.permute.xlu0 %2054 }
 0x1b5   :  { %1891 = vrot.lane.b32.xlu1 %v11613_v47, %s10114_s16  ;;  %2142 = vst.msk [vmem:[#allocation2 + $0x48] sm:$0xff] %vm2132_vm11, %v2055_v34 }
 0x1b6   :  { %2223 = vrot.lane.b32.xlu0 %v18119_v59, %s10116_s20 }
 0x1b7   :  { %v2053_v16 = vpop.permute.xlu1 %2052 }
 0x1b8   :  { %2141 = vst.msk [vmem:[#allocation2 + $0x40] sm:$0xff] %vm2132_vm11, %v2053_v16  ;;  %v2206_v14 = vpop.permute.xlu0 %2205  ;;  %v2796_v36 = vld [vmem:[#allocation2 + $0x38] sm:$0xff] }
 0x1b9   :  { %2074 = vrot.lane.b32.xlu1 %v18120_v60, %s10115_s17  ;;  %2293 = vst.msk [vmem:[#allocation2 + $0x48] sm:$0xff] %vm2283_vm12, %v2206_v14 }
 0x1ba   :  { %2362 = vrot.lane.b32.xlu0 %v11613_v47, %s10117_s23 }
 0x1bb   :  { %v2204_v5 = vpop.permute.xlu1 %2203  ;;  %v2795_v11 = vld [vmem:[#allocation2 + $0x30] sm:$0xff] }
 0x1bc   :  { %2292 = vst.msk [vmem:[#allocation2 + $0x40] sm:$0xff] %vm2283_vm12, %v2204_v5  ;;  %9795 = vmatprep.mubr.msk.bf16.mxu0 %vm17787_vm0, %v2795_v11  ;;  %v2345_v44 = vpop.permute.xlu0 %2344  ;;  %v3948_v11 = vld [vmem:[#allocation3 + $0x30] sm:$0x1] }
 0x1bd   :  { %2225 = vrot.lane.b32.xlu1 %v18121_v9, %s10116_s20  ;;  %9796 = vmatmul.mubr.msk.bf16.gmra.mrb[12].mxu0 %vm17787_vm0, %v2796_v36  ;;  %2432 = vst.msk [vmem:[#allocation2 + $0x48] sm:$0xff] %vm2422_vm13, %v2345_v44  ;;  %v3949_v36 = vsel %vm12170_vm4, 0, %v3948_v11  ;;  %v4058_v44 = vld [vmem:[#allocation3 + $0x38] sm:$0x1] }
 0x1be   :  { %2545 = vrot.lane.b32.xlu0 %v18120_v60, %s10118_s26  ;;  %v18134_v60 = vld [vmem:[#allocation31_spill] sm:$0xff]  ;;  %3950 = vst [vmem:[#allocation3 + $0x30] sm:$0x1] %v3949_v36 }
 0x1bf   :  { %v2343_v25 = vpop.permute.xlu1 %2342 }
 0x1c0   :  { %2431 = vst.msk [vmem:[#allocation2 + $0x40] sm:$0xff] %vm2422_vm13, %v2343_v25  ;;  %v2528_v12 = vpop.permute.xlu0 %2527  ;;  %v3945_v25 = vld [vmem:[#allocation3 + $0x24] sm:$0x1] }
 0x1c1   :  { %2364 = vrot.lane.b32.xlu1 %v11621_v41, %s10117_s23  ;;  %2615 = vst.msk [vmem:[#allocation2 + $0x48] sm:$0xff] %vm2605_vm14, %v2528_v12  ;;  %v4059_v12 = vsel %vm12185_vm8, 0, %v4058_v44 }
 0x1c2   :  { %2696 = vrot.lane.b32.xlu0 %v18121_v9, %s10119_s2  ;;  %v18135_v9 = vld [vmem:[#allocation95_spill] sm:$0xff]  ;;  %4060 = vst [vmem:[#allocation3 + $0x38] sm:$0x1] %v4059_v12 }
 0x1c3   :  { %v2526_v49 = vpop.permute.xlu1 %2525 }
 0x1c4   :  { %2614 = vst.msk [vmem:[#allocation2 + $0x40] sm:$0xff] %vm2605_vm14, %v2526_v49  ;;  %v2679_v43 = vpop.permute.xlu0 %2678  ;;  %v3946_v49 = vsel %vm12170_vm4, 0, %v3945_v25  ;;  %v4067_v25 = vld [vmem:[#allocation3 + $0x5c] sm:$0x1] }
 0x1c5   :  { %2547 = vrot.lane.b32.xlu1 %v18122_v38, %s10118_s26  ;;  %2766 = vst.msk [vmem:[#allocation2 + $0x48] sm:$0xff] %vm17788_vm15, %v2679_v43  ;;  %3947 = vst [vmem:[#allocation3 + $0x24] sm:$0x1] %v3946_v49  ;;  %v4055_v43 = vld [vmem:[#allocation3 + $0x2c] sm:$0x1]  ;;  %v4068_v44 = vsel %vm12185_vm8, 0, %v4067_v25 }
 0x1c6   :  { %1893 = vrot.lane.b32.xlu0 %v11621_v41, %s10114_s16  ;;  %4069 = vst [vmem:[#allocation3 + $0x5c] sm:$0x1] %v4068_v44  ;;  %v3969_v25 = vld [vmem:[#allocation3 + $0x84] sm:$0x1]  ;;  %v4082_v44 = vld [vmem:[#allocation3 + $0x98] sm:$0x1] }
 0x1c7   :  { %v2677_v47 = vpop.permute.xlu1 %2676 }
 0x1c8   :  { %2765 = vst.msk [vmem:[#allocation2 + $0x40] sm:$0xff] %vm17788_vm15, %v2677_v47  ;;  %v2059_v51 = vpop.permute.xlu0 %2058 }
 0x1c9   :  { %2698 = vrot.lane.b32.xlu1 %v18123_v53, %s10119_s2  ;;  %2144 = vst.msk [vmem:[#allocation2 + $0x58] sm:$0xff] %vm2132_vm11, %v2059_v51  ;;  %v18136_v51 = vld [vmem:[#allocation34_spill] sm:$0xff] }
 0x1ca   :  { %2076 = vrot.lane.b32.xlu0 %v18122_v38, %s10115_s17 }
 0x1cb   :  { %v2057_v58 = vpop.permute.xlu1 %2056 }
 0x1cc   :  { %2143 = vst.msk [vmem:[#allocation2 + $0x50] sm:$0xff] %vm2132_vm11, %v2057_v58  ;;  %v2210_v32 = vpop.permute.xlu0 %2209  ;;  %v2798_v41 = vld [vmem:[#allocation2 + $0x48] sm:$0xff] }
 0x1cd   :  { %1895 = vrot.lane.b32.xlu1 %v11640_v0, %s10114_s16  ;;  %2295 = vst.msk [vmem:[#allocation2 + $0x58] sm:$0xff] %vm2283_vm12, %v2210_v32 }
 0x1ce   :  { %2227 = vrot.lane.b32.xlu0 %v18123_v53, %s10116_s20 }
 0x1cf   :  { %v2208_v30 = vpop.permute.xlu1 %2207  ;;  %v2797_v23 = vld [vmem:[#allocation2 + $0x40] sm:$0xff] }
 0x1d0   :  { %2294 = vst.msk [vmem:[#allocation2 + $0x50] sm:$0xff] %vm2283_vm12, %v2208_v30  ;;  %9799 = vmatprep.mubr.msk.bf16.mxu0 %vm17787_vm0, %v2797_v23  ;;  %v2349_v29 = vpop.permute.xlu0 %2348 }
 0x1d1   :  { %2078 = vrot.lane.b32.xlu1 %v18124_v54, %s10115_s17  ;;  %9800 = vmatmul.mubr.msk.bf16.gmra.mrb[16].mxu0 %vm17787_vm0, %v2798_v41  ;;  %2434 = vst.msk [vmem:[#allocation2 + $0x58] sm:$0xff] %vm2422_vm13, %v2349_v29 }
 0x1d2   :  { %2366 = vrot.lane.b32.xlu0 %v11640_v0, %s10117_s23  ;;  %v3943_v0 = vsel %vm12170_vm4, 0, %v3942_v42  ;;  %v18137_v42 = vld [vmem:[#allocation38_spill] sm:$0xff] }
 0x1d3   :  { %v2347_v46 = vpop.permute.xlu1 %2346  ;;  %3944 = vst [vmem:[#allocation3 + $0x18] sm:$0x1] %v3943_v0 }
 0x1d4   :  { %2433 = vst.msk [vmem:[#allocation2 + $0x50] sm:$0xff] %vm2422_vm13, %v2347_v46  ;;  %v2532_v62 = vpop.permute.xlu0 %2531 }
 0x1d5   :  { %2229 = vrot.lane.b32.xlu1 %v18125_v3, %s10116_s20  ;;  %2617 = vst.msk [vmem:[#allocation2 + $0x58] sm:$0xff] %vm2605_vm14, %v2532_v62  ;;  %v3951_v62 = vld [vmem:[#allocation3 + $0x3c] sm:$0x1] }
 0x1d6   :  { %2549 = vrot.lane.b32.xlu0 %v18124_v54, %s10118_s26  ;;  %v3952_v0 = vsel %vm12170_vm4, 0, %v3951_v62 }
 0x1d7   :  { %v2530_v45 = vpop.permute.xlu1 %2529  ;;  %3953 = vst [vmem:[#allocation3 + $0x3c] sm:$0x1] %v3952_v0 }
 0x1d8   :  { %2616 = vst.msk [vmem:[#allocation2 + $0x50] sm:$0xff] %vm2605_vm14, %v2530_v45  ;;  %v2683_v33 = vpop.permute.xlu0 %2682 }
 0x1d9   :  { %2368 = vrot.lane.b32.xlu1 %v11648_v20, %s10117_s23  ;;  %2768 = vst.msk [vmem:[#allocation2 + $0x58] sm:$0xff] %vm17788_vm15, %v2683_v33  ;;  %v4061_v33 = vld [vmem:[#allocation3 + $0x44] sm:$0x1] }
 0x1da   :  { %2700 = vrot.lane.b32.xlu0 %v18125_v3, %s10119_s2  ;;  %v3954_v3 = vld [vmem:[#allocation3 + $0x48] sm:$0x1] }
 0x1db   :  { %v2681_v1 = vpop.permute.xlu1 %2680  ;;  %v3955_v45 = vsel %vm12170_vm4, 0, %v3954_v3  ;;  %v12355_v3 = vld [vmem:[%s17633_s0 + $0x198] sm:$0xf] }
 0x1dc   :  { %2767 = vst.msk [vmem:[#allocation2 + $0x50] sm:$0xff] %vm17788_vm15, %v2681_v1  ;;  %v2061_v10 = vpop.permute.xlu0 %2060  ;;  %3956 = vst [vmem:[#allocation3 + $0x48] sm:$0x1] %v3955_v45  ;;  %v2007_v62 = vshrl.u32 %v12355_v3, 16  ;;  %v2010_v24 = vshll.u32 %v12355_v3, 16 }
 0x1dd   :  { %2551 = vrot.lane.b32.xlu1 %v18132_v40, %s10118_s26  ;;  %2145 = vst.msk [vmem:[#allocation2 + $0x60] sm:$0xff] %vm2132_vm11, %v2061_v10 }
 0x1de   :  { %1897 = vrot.lane.b32.xlu0 %v11648_v20, %s10114_s16 }
 0x1df   :  { %v1880_v39 = vpop.permute.xlu1 %1879 }
 0x1e0   :  { %1963 = vst.msk [vmem:[#allocation2 + $0x68] sm:$0xff] %vm1949_vm10, %v1880_v39  ;;  %v2212_v35 = vpop.permute.xlu0 %2211  ;;  %v2800_v16 = vld [vmem:[#allocation2 + $0x58] sm:$0xff]  ;;  %v18139_v39 = vld [vmem:[#allocation43_spill] sm:$0xff] }
 0x1e1   :  { %2702 = vrot.lane.b32.xlu1 %v18133_v18, %s10119_s2  ;;  %2296 = vst.msk [vmem:[#allocation2 + $0x60] sm:$0xff] %vm2283_vm12, %v2212_v35 }
 0x1e2   :  { %2080 = vrot.lane.b32.xlu0 %v18132_v40, %s10115_s17 }
 0x1e3   :  { %v2063_v59 = vpop.permute.xlu1 %2062  ;;  %v2799_v55 = vld [vmem:[#allocation2 + $0x50] sm:$0xff] }
 0x1e4   :  { %2146 = vst.msk [vmem:[#allocation2 + $0x68] sm:$0xff] %vm2132_vm11, %v2063_v59  ;;  %9803 = vmatprep.mubr.msk.bf16.mxu0 %vm17787_vm0, %v2799_v55  ;;  %v2351_v20 = vpop.permute.xlu0 %2350 }
 0x1e5   :  { %1899 = vrot.lane.b32.xlu1 %v11656_v57, %s10114_s16  ;;  %9804 = vmatmul.mubr.msk.bf16.gmra.mrb[20].mxu0 %vm17787_vm0, %v2800_v16  ;;  %2435 = vst.msk [vmem:[#allocation2 + $0x60] sm:$0xff] %vm2422_vm13, %v2351_v20  ;;  %v3960_v16 = vld [vmem:[#allocation3 + $0x60] sm:$0x1] }
 0x1e6   :  { %2231 = vrot.lane.b32.xlu0 %v18133_v18, %s10116_s20  ;;  %v3961_v20 = vsel %vm12170_vm4, 0, %v3960_v16  ;;  %v12408_v16 = vld [vmem:[%s17633_s0 + $0x1a8] sm:$0xf] }
 0x1e7   :  { %v2214_v34 = vpop.permute.xlu1 %2213  ;;  %3962 = vst [vmem:[#allocation3 + $0x60] sm:$0x1] %v3961_v20 }
 0x1e8   :  { %2297 = vst.msk [vmem:[#allocation2 + $0x68] sm:$0xff] %vm2283_vm12, %v2214_v34  ;;  %v2534_v14 = vpop.permute.xlu0 %2533 }
 0x1e9   :  { %2082 = vrot.lane.b32.xlu1 %v18134_v60, %s10115_s17  ;;  %2618 = vst.msk [vmem:[#allocation2 + $0x60] sm:$0xff] %vm2605_vm14, %v2534_v14 }
 0x1ea   :  { %2370 = vrot.lane.b32.xlu0 %v11656_v57, %s10117_s23  ;;  %v4056_v57 = vsel %vm12185_vm8, 0, %v4055_v43 }
 0x1eb   :  { %v2353_v5 = vpop.permute.xlu1 %2352  ;;  %4057 = vst [vmem:[#allocation3 + $0x2c] sm:$0x1] %v4056_v57  ;;  %v18141_v57 = vld [vmem:[#allocation49_spill] sm:$0xff] }
 0x1ec   :  { %2436 = vst.msk [vmem:[#allocation2 + $0x68] sm:$0xff] %vm2422_vm13, %v2353_v5  ;;  %v2685_v47 = vpop.permute.xlu0 %2684  ;;  %v4070_v5 = vld [vmem:[#allocation3 + $0x68] sm:$0x1] }
 0x1ed   :  { %2233 = vrot.lane.b32.xlu1 %v18135_v9, %s10116_s20  ;;  %2769 = vst.msk [vmem:[#allocation2 + $0x60] sm:$0xff] %vm17788_vm15, %v2685_v47  ;;  %v4071_v11 = vsel %vm12185_vm8, 0, %v4070_v5 }
 0x1ee   :  { %2553 = vrot.lane.b32.xlu0 %v18134_v60, %s10118_s26  ;;  %v3957_v60 = vld [vmem:[#allocation3 + $0x54] sm:$0x1]  ;;  %4072 = vst [vmem:[#allocation3 + $0x68] sm:$0x1] %v4071_v11 }
 0x1ef   :  { %v2536_v38 = vpop.permute.xlu1 %2535 }
 0x1f0   :  { %2619 = vst.msk [vmem:[#allocation2 + $0x68] sm:$0xff] %vm2605_vm14, %v2536_v38  ;;  %v1882_v58 = vpop.permute.xlu0 %1881 }
 0x1f1   :  { %2372 = vrot.lane.b32.xlu1 %v11660_v50, %s10117_s23  ;;  %1964 = vst.msk [vmem:[#allocation2 + $0x70] sm:$0xff] %vm1949_vm10, %v1882_v58 }
 0x1f2   :  { %2704 = vrot.lane.b32.xlu0 %v18135_v9, %s10119_s2  ;;  %v18140_v9 = vld [vmem:[#allocation46_spill] sm:$0xff] }
 0x1f3   :  { %v2687_v53 = vpop.permute.xlu1 %2686 }
 0x1f4   :  { %2770 = vst.msk [vmem:[#allocation2 + $0x68] sm:$0xff] %vm17788_vm15, %v2687_v53  ;;  %v2065_v23 = vpop.permute.xlu0 %2064  ;;  %v2801_v32 = vld [vmem:[#allocation2 + $0x60] sm:$0xff]  ;;  %v3966_v53 = vld [vmem:[#allocation3 + $0x78] sm:$0x1] }
 0x1f5   :  { %2555 = vrot.lane.b32.xlu1 %v18136_v51, %s10118_s26  ;;  %2147 = vst.msk [vmem:[#allocation2 + $0x70] sm:$0xff] %vm2132_vm11, %v2065_v23  ;;  %9807 = vmatprep.mubr.msk.bf16.mxu0 %vm17787_vm0, %v2801_v32  ;;  %v3963_v23 = vld [vmem:[#allocation3 + $0x6c] sm:$0x1]  ;;  %v4076_v32 = vld [vmem:[#allocation3 + $0x80] sm:$0x1] }
 0x1f6   :  { %1901 = vrot.lane.b32.xlu0 %v11660_v50, %s10114_s16 }
 0x1f7   :  { %v1884_v30 = vpop.permute.xlu1 %1883 }
 0x1f8   :  { %1965 = vst.msk [vmem:[#allocation2 + $0x78] sm:$0xff] %vm1949_vm10, %v1884_v30  ;;  %v2216_v46 = vpop.permute.xlu0 %2215  ;;  %v3967_v30 = vsel %vm12170_vm4, 0, %v3966_v53 }
 0x1f9   :  { %2706 = vrot.lane.b32.xlu1 %v11422_v31, %s10119_s2  ;;  %2298 = vst.msk [vmem:[#allocation2 + $0x70] sm:$0xff] %vm2283_vm12, %v2216_v46  ;;  %3968 = vst [vmem:[#allocation3 + $0x78] sm:$0x1] %v3967_v30 }
 0x1fa   :  { %2084 = vrot.lane.b32.xlu0 %v18136_v51, %s10115_s17 }
 0x1fb   :  { %v2067_v41 = vpop.permute.xlu1 %2066  ;;  %v2802_v54 = vld [vmem:[#allocation2 + $0x68] sm:$0xff] }
 0x1fc   :  { %2148 = vst.msk [vmem:[#allocation2 + $0x78] sm:$0xff] %vm2132_vm11, %v2067_v41  ;;  %9808 = vmatmul.mubr.msk.bf16.gmra.mrb[24].mxu0 %vm17787_vm0, %v2802_v54  ;;  %v2355_v50 = vpop.permute.xlu0 %2354  ;;  %v4077_v41 = vsel %vm12185_vm8, 0, %v4076_v32  ;;  %v4079_v32 = vld [vmem:[#allocation3 + $0x8c] sm:$0x1] }
 0x1fd   :  { %1903 = vrot.lane.b32.xlu1 %v11676_v56, %s10114_s16  ;;  %2437 = vst.msk [vmem:[#allocation2 + $0x70] sm:$0xff] %vm2422_vm13, %v2355_v50  ;;  %4078 = vst [vmem:[#allocation3 + $0x80] sm:$0x1] %v4077_v41  ;;  %v4073_v50 = vld [vmem:[#allocation3 + $0x74] sm:$0x1] }
 0x1fe   :  { %2235 = vrot.lane.b32.xlu0 %v11422_v31, %s10116_s20  ;;  %v4062_v31 = vsel %vm12185_vm8, 0, %v4061_v33  ;;  %v4074_v45 = vsel %vm12185_vm8, 0, %v4073_v50  ;;  %v2009_v33 = vrot.slane %v2007_v62, 4 }
 0x1ff   :  { %v2218_v29 = vpop.permute.xlu1 %2217  ;;  %4063 = vst [vmem:[#allocation3 + $0x44] sm:$0x1] %v4062_v31  ;;  %4075 = vst [vmem:[#allocation3 + $0x74] sm:$0x1] %v4074_v45  ;;  %v2012_v31 = vrot.slane %v2010_v24, 5 }
 0x200   :  { %2299 = vst.msk [vmem:[#allocation2 + $0x78] sm:$0xff] %vm2283_vm12, %v2218_v29  ;;  %v2538_v1 = vpop.permute.xlu0 %2537 }
 0x201   :  { %2086 = vrot.lane.b32.xlu1 %v18137_v42, %s10115_s17  ;;  %2620 = vst.msk [vmem:[#allocation2 + $0x70] sm:$0xff] %vm2605_vm14, %v2538_v1  ;;  %v18142_v1 = vld [vmem:[#allocation53_spill] sm:$0xff] }
 0x202   :  { %2374 = vrot.lane.b32.xlu0 %v11676_v56, %s10117_s23 }
 0x203   :  { %v2357_v19 = vpop.permute.xlu1 %2356 }
 0x204   :  { %2438 = vst.msk [vmem:[#allocation2 + $0x78] sm:$0xff] %vm2422_vm13, %v2357_v19  ;;  %v2689_v37 = vpop.permute.xlu0 %2688 }
 0x205   :  { %2237 = vrot.lane.b32.xlu1 %v18138_v61, %s10116_s20  ;;  %2771 = vst.msk [vmem:[#allocation2 + $0x70] sm:$0xff] %vm17788_vm15, %v2689_v37 }
 0x206   :  { %2557 = vrot.lane.b32.xlu0 %v18137_v42, %s10118_s26 }
 0x207   :  { %v2540_v40 = vpop.permute.xlu1 %2539 }
 0x208   :  { %2621 = vst.msk [vmem:[#allocation2 + $0x78] sm:$0xff] %vm2605_vm14, %v2540_v40  ;;  %v1886_v56 = vpop.permute.xlu0 %1885 }
 0x209   :  { %2376 = vrot.lane.b32.xlu1 %v11680_v17, %s10117_s23  ;;  %1966 = vst.msk [vmem:[#allocation2 + $0x80] sm:$0xff] %vm1949_vm10, %v1886_v56  ;;  %v12388_v56 = vld [vmem:[%s17633_s0 + $0x1a0] sm:$0x1] }
 0x20a   :  { %2708 = vrot.lane.b32.xlu0 %v18138_v61, %s10119_s2 }
 0x20b   :  { %v2691_v8 = vpop.permute.xlu1 %2690 }
 0x20c   :  { %2772 = vst.msk [vmem:[#allocation2 + $0x78] sm:$0xff] %vm17788_vm15, %v2691_v8  ;;  %v2069_v18 = vpop.permute.xlu0 %2068  ;;  %v2803_v59 = vld [vmem:[#allocation2 + $0x70] sm:$0xff] }
 0x20d   :  { %2559 = vrot.lane.b32.xlu1 %v18139_v39, %s10118_s26  ;;  %2149 = vst.msk [vmem:[#allocation2 + $0x80] sm:$0xff] %vm2132_vm11, %v2069_v18  ;;  %9811 = vmatprep.mubr.msk.bf16.mxu0 %vm17787_vm0, %v2803_v59  ;;  %v2026_v59 = vshll.u32 %v12388_v56, 16 }
 0x20e   :  { %1905 = vrot.lane.b32.xlu0 %v11680_v17, %s10114_s16  ;;  %v3958_v17 = vsel %vm12170_vm4, 0, %v3957_v60 }
 0x20f   :  { %v1888_v10 = vpop.permute.xlu1 %1887  ;;  %3959 = vst [vmem:[#allocation3 + $0x54] sm:$0x1] %v3958_v17  ;;  %v2028_v5 = vrot.slane %v2026_v59, 5 }
 0x210   :  { %1967 = vst.msk [vmem:[#allocation2 + $0x88] sm:$0xff] %vm1949_vm10, %v1888_v10  ;;  %v2220_v34 = vpop.permute.xlu0 %2219 }
 0x211   :  { %2710 = vrot.lane.b32.xlu1 %v11432_v15, %s10119_s2  ;;  %2300 = vst.msk [vmem:[#allocation2 + $0x80] sm:$0xff] %vm2283_vm12, %v2220_v34  ;;  %v3972_v34 = vld [vmem:[#allocation3 + $0x90] sm:$0x1] }
 0x212   :  { %2088 = vrot.lane.b32.xlu0 %v18139_v39, %s10115_s17  ;;  %v2013_v39 = vor.u32 %v2012_v31, %v2009_v33  ;;  %v3973_v11 = vsel %vm12170_vm4, 0, %v3972_v34 }
 0x213   :  { %v2071_v55 = vpop.permute.xlu1 %2070  ;;  %v2804_v35 = vld [vmem:[#allocation2 + $0x78] sm:$0xff]  ;;  %3974 = vst [vmem:[#allocation3 + $0x90] sm:$0x1] %v3973_v11 }
 0x214   :  { %2150 = vst.msk [vmem:[#allocation2 + $0x88] sm:$0xff] %vm2132_vm11, %v2071_v55  ;;  %9812 = vmatmul.mubr.msk.bf16.gmra.mrb[28].mxu0 %vm17787_vm0, %v2804_v35  ;;  %v2359_v36 = vpop.permute.xlu0 %2358  ;;  %v2014_v35 = vrot.slane %v2013_v39, 4  ;;  %v3975_v11 = vld [vmem:[#allocation3 + $0x9c] sm:$0x1] }
 0x215   :  { %1907 = vrot.lane.b32.xlu1 %v11684_v4, %s10114_s16  ;;  %2439 = vst.msk [vmem:[#allocation2 + $0x80] sm:$0xff] %vm2422_vm13, %v2359_v36 }
 0x216   :  { %2239 = vrot.lane.b32.xlu0 %v11432_v15, %s10116_s20 }
 0x217   :  { %v2222_v14 = vpop.permute.xlu1 %2221 }
 0x218   :  { %2301 = vst.msk [vmem:[#allocation2 + $0x88] sm:$0xff] %vm2283_vm12, %v2222_v14  ;;  %v2542_v12 = vpop.permute.xlu0 %2541  ;;  %v18143_v14 = vld [vmem:[#allocation54_spill] sm:$0xff] }
 0x219   :  { %2090 = vrot.lane.b32.xlu1 %v18140_v9, %s10115_s17  ;;  %2622 = vst.msk [vmem:[#allocation2 + $0x80] sm:$0xff] %vm2605_vm14, %v2542_v12  ;;  %v2489_v12 = vshll.u32 %v12408_v16, 16 }
 0x21a   :  { %2378 = vrot.lane.b32.xlu0 %v11684_v4, %s10117_s23 }
 0x21b   :  { %v2361_v49 = vpop.permute.xlu1 %2360  ;;  %v2491_v41 = vrot.slane %v2489_v12, 5 }
 0x21c   :  { %2440 = vst.msk [vmem:[#allocation2 + $0x88] sm:$0xff] %vm2422_vm13, %v2361_v49  ;;  %v2693_v15 = vpop.permute.xlu0 %2692  ;;  %v2493_v49 = vshrl.u32 %v12408_v16, 16 }
 0x21d   :  { %2241 = vrot.lane.b32.xlu1 %v11462_v7, %s10116_s20  ;;  %2773 = vst.msk [vmem:[#allocation2 + $0x80] sm:$0xff] %vm17788_vm15, %v2693_v15  ;;  %v4083_v15 = vsel %vm12185_vm8, 0, %v4082_v44 }
 0x21e   :  { %2561 = vrot.lane.b32.xlu0 %v18140_v9, %s10118_s26  ;;  %4084 = vst [vmem:[#allocation3 + $0x98] sm:$0x1] %v4083_v15 }
 0x21f   :  { %v2544_v38 = vpop.permute.xlu1 %2543 }
 0x220   :  { %2623 = vst.msk [vmem:[#allocation2 + $0x88] sm:$0xff] %vm2605_vm14, %v2544_v38  ;;  %v1890_v43 = vpop.permute.xlu0 %1889  ;;  %v3970_v38 = vsel %vm12170_vm4, 0, %v3969_v25  ;;  %v3976_v25 = vsel %vm12170_vm4, 0, %v3975_v11  ;;  %v4094_v11 = vld [vmem:[#allocation3 + $0xc8] sm:$0x1] }
 0x221   :  { %2380 = vrot.lane.b32.xlu1 %v11688_v6, %s10117_s23  ;;  %1968 = vst.msk [vmem:[#allocation2 + $0x90] sm:$0xff] %vm1949_vm10, %v1890_v43  ;;  %3971 = vst [vmem:[#allocation3 + $0x84] sm:$0x1] %v3970_v38 }
 0x222   :  { %2712 = vrot.lane.b32.xlu0 %v11462_v7, %s10119_s2  ;;  %v3964_v7 = vsel %vm12170_vm4, 0, %v3963_v23  ;;  %3977 = vst [vmem:[#allocation3 + $0x9c] sm:$0x1] %v3976_v25 }
 0x223   :  { %v2695_v47 = vpop.permute.xlu1 %2694  ;;  %3965 = vst [vmem:[#allocation3 + $0x6c] sm:$0x1] %v3964_v7  ;;  %v2179_v7 = vrot.slane %v12388_v56, 5 }
 0x224   :  { %2774 = vst.msk [vmem:[#allocation2 + $0x88] sm:$0xff] %vm17788_vm15, %v2695_v47  ;;  %v2073_v58 = vpop.permute.xlu0 %2072  ;;  %v2805_v51 = vld [vmem:[#allocation2 + $0x80] sm:$0xff] }
 0x225   :  { %2563 = vrot.lane.b32.xlu1 %v18141_v57, %s10118_s26  ;;  %2151 = vst.msk [vmem:[#allocation2 + $0x90] sm:$0xff] %vm2132_vm11, %v2073_v58  ;;  %9815 = vmatprep.mubr.msk.bf16.mxu0 %vm17787_vm0, %v2805_v51  ;;  %v9350_v58 = vrot.slane %v12355_v3, 9 }
 0x226   :  { %1909 = vrot.lane.b32.xlu0 %v11688_v6, %s10114_s16  ;;  %v12363_v6 = vld [vmem:[%s17633_s0 + $0x19c] sm:$0xf] }
 0x227   :  { %v1892_v4 = vpop.permute.xlu1 %1891  ;;  %v2020_v13 = vshrl.u32 %v12363_v6, 16  ;;  %v2016_v19 = vshll.u32 %v12363_v6, 16  ;;  %v2176_v17 = vrot.slane %v12363_v6, 5 }
 0x228   :  { %1969 = vst.msk [vmem:[#allocation2 + $0x98] sm:$0xff] %vm1949_vm10, %v1892_v4  ;;  %v2224_v29 = vpop.permute.xlu0 %2223 }
 0x229   :  { %2714 = vrot.lane.b32.xlu1 %v11487_v52, %s10119_s2  ;;  %2302 = vst.msk [vmem:[#allocation2 + $0x90] sm:$0xff] %vm2283_vm12, %v2224_v29  ;;  %v12380_v37 = vrot.slane %v2016_v19, 5  ;;  %v2022_v8 = vrot.slane %v2020_v13, 4  ;;  %v2178_v51 = vrot.slane %v2176_v17, 4 }
 0x22a   :  { %2092 = vrot.lane.b32.xlu0 %v18141_v57, %s10115_s17 }
 0x22b   :  { %v2075_v54 = vpop.permute.xlu1 %2074  ;;  %v2806_v46 = vld [vmem:[#allocation2 + $0x88] sm:$0xff]  ;;  %v2023_v18 = vor.u32 %v2022_v8, %v12380_v37  ;;  %v2019_v4 = vsel %vm10192_vm2, %v2014_v35, %v12380_v37  ;;  %v2180_v62 = vsel %vm10900_vm5, %v2178_v51, %v2179_v7 }
 0x22c   :  { %2152 = vst.msk [vmem:[#allocation2 + $0x98] sm:$0xff] %vm2132_vm11, %v2075_v54  ;;  %9816 = vmatmul.mubr.msk.bf16.gmra.mrb[32].mxu0 %vm17787_vm0, %v2806_v46  ;;  %v2363_v0 = vpop.permute.xlu0 %2362  ;;  %v2495_v54 = vrot.slane %v2493_v49, 4  ;;  %v4080_v46 = vsel %vm12185_vm8, 0, %v4079_v32 }
 0x22d   :  { %1911 = vrot.lane.b32.xlu1 %v11700_v27, %s10114_s16  ;;  %2441 = vst.msk [vmem:[#allocation2 + $0x90] sm:$0xff] %vm2422_vm13, %v2363_v0  ;;  %v2024_v60 = vrot.slane %v2023_v18, 4  ;;  %4081 = vst [vmem:[#allocation3 + $0x8c] sm:$0x1] %v4080_v46 }
 0x22e   :  { %2243 = vrot.lane.b32.xlu0 %v11487_v52, %s10116_s20  ;;  %v2496_v24 = vor.u32 %v2495_v54, %v2491_v41 }
 0x22f   :  { %v2226_v42 = vpop.permute.xlu1 %2225  ;;  %v2029_v53 = vsel %vm10192_vm2, %v2024_v60, %v2028_v5 }
 0x230   :  { %2303 = vst.msk [vmem:[#allocation2 + $0x98] sm:$0xff] %vm2283_vm12, %v2226_v42  ;;  %v2546_v40 = vpop.permute.xlu0 %2545  ;;  %v2177_v42 = vsel %vm10900_vm5, %v9350_v58, %v2176_v17  ;;  %v2497_v33 = vrot.slane %v2496_v24, 4  ;;  %v4085_v58 = vld [vmem:[#allocation3 + $0xa4] sm:$0x1] }
 0x231   :  { %2094 = vrot.lane.b32.xlu1 %v18142_v1, %s10115_s17  ;;  %2624 = vst.msk [vmem:[#allocation2 + $0x90] sm:$0xff] %vm2605_vm14, %v2546_v40  ;;  %v2649_v40 = vrot.slane %v12408_v16, 5 }
 0x232   :  { %2382 = vrot.lane.b32.xlu0 %v11700_v27, %s10117_s23  ;;  %v12403_v27 = vld [vmem:[%s17633_s0 + $0x1a4] sm:$0xf] }
 0x233   :  { %v2365_v61 = vpop.permute.xlu1 %2364  ;;  %v2480_v36 = vshrl.u32 %v12403_v27, 16  ;;  %v2483_v9 = vshll.u32 %v12403_v27, 16  ;;  %v9354_v56 = vcombine.low %v12403_v27, %v12408_v16  ;;  %v9358_v39 = vrot.slane %v12403_v27, 9  ;;  %v3978_v27 = vld [vmem:[#allocation3 + $0xa8] sm:$0x1] }
 0x234   :  { %2442 = vst.msk [vmem:[#allocation2 + $0x98] sm:$0xff] %vm2422_vm13, %v2365_v61  ;;  %v2697_v10 = vpop.permute.xlu0 %2696  ;;  %v3979_v60 = vsel %vm12170_vm4, 0, %v3978_v27  ;;  %v3981_v27 = vld [vmem:[#allocation3 + $0xb4] sm:$0x1] }
 0x235   :  { %2245 = vrot.lane.b32.xlu1 %v11517_v21, %s10116_s20  ;;  %2775 = vst.msk [vmem:[#allocation2 + $0x90] sm:$0xff] %vm17788_vm15, %v2697_v10  ;;  %v2482_v30 = vrot.slane %v2480_v36, 4  ;;  %v2485_v23 = vrot.slane %v2483_v9, 5  ;;  %v2651_v10 = vrot.slane %v2649_v40, 4  ;;  %v2650_v16 = vsel %vm10900_vm5, %v9358_v39, %v2649_v40  ;;  %3980 = vst [vmem:[#allocation3 + $0xa8] sm:$0x1] %v3979_v60 }
 0x236   :  { %2565 = vrot.lane.b32.xlu0 %v18142_v1, %s10118_s26  ;;  %v9352_v1 = vcombine.low %v2177_v42, %v2180_v62 }
 0x237   :  { %v2548_v52 = vpop.permute.xlu1 %2547  ;;  %v2486_v45 = vor.u32 %v2485_v23, %v2482_v30  ;;  %v4086_v30 = vsel %vm12185_vm8, 0, %v4085_v58 }
 0x238   :  { %2625 = vst.msk [vmem:[#allocation2 + $0x98] sm:$0xff] %vm2605_vm14, %v2548_v52  ;;  %v1894_v20 = vpop.permute.xlu0 %1893  ;;  %4087 = vst [vmem:[#allocation3 + $0xa4] sm:$0x1] %v4086_v30 }
 0x239   :  { %2384 = vrot.lane.b32.xlu1 %v11704_v26, %s10117_s23  ;;  %1970 = vst.msk [vmem:[#allocation2 + $0xa0] sm:$0xff] %vm1949_vm10, %v1894_v20  ;;  %v2487_v61 = vrot.slane %v2486_v45, 4 }
 0x23a   :  { %2716 = vrot.lane.b32.xlu0 %v11517_v21, %s10119_s2  ;;  %v9346_v21 = vcombine.low %v12355_v3, %v12363_v6  ;;  %v137_v3 = vld [vmem:[%s17633_s0 + $0x1ac] sm:$0x1] }
 0x23b   :  { %v2699_v55 = vpop.permute.xlu1 %2698  ;;  %v2499_v0 = vshll.u32 %v137_v3, 16  ;;  %v2492_v52 = vsel %vm10192_vm2, %v2487_v61, %v2491_v41  ;;  %v2652_v18 = vrot.slane %v137_v3, 5 }
 0x23c   :  { %2776 = vst.msk [vmem:[#allocation2 + $0x98] sm:$0xff] %vm17788_vm15, %v2699_v55  ;;  %v2077_v43 = vpop.permute.xlu0 %2076  ;;  %v2807_v57 = vld [vmem:[#allocation2 + $0x90] sm:$0xff] }
 0x23d   :  { %2567 = vrot.lane.b32.xlu1 %v18143_v14, %s10118_s26  ;;  %2153 = vst.msk [vmem:[#allocation2 + $0xa0] sm:$0xff] %vm2132_vm11, %v2077_v43  ;;  %9819 = vmatprep.mubr.msk.bf16.mxu0 %vm17787_vm0, %v2807_v57  ;;  %v2501_v31 = vrot.slane %v2499_v0, 5  ;;  %v2653_v34 = vsel %vm10900_vm5, %v2651_v10, %v2652_v18 }
 0x23e   :  { %1913 = vrot.lane.b32.xlu0 %v11704_v26, %s10114_s16  ;;  %v9348_v26 = vcombine.low %v2019_v4, %v2029_v53  ;;  %v9360_v9 = vcombine.low %v2650_v16, %v2653_v34 }
 0x23f   :  { %v1896_v47 = vpop.permute.xlu1 %1895 }
 0x240   :  { %1971 = vst.msk [vmem:[#allocation2 + $0xa8] sm:$0xff] %vm1949_vm10, %v1896_v47  ;;  %v2228_v50 = vpop.permute.xlu0 %2227 }
 0x241   :  { %2718 = vrot.lane.b32.xlu1 %v11710_v63, %s10119_s2  ;;  %2304 = vst.msk [vmem:[#allocation2 + $0xa0] sm:$0xff] %vm2283_vm12, %v2228_v50 }
 0x242   :  { %2096 = vrot.lane.b32.xlu0 %v18143_v14, %s10115_s17  ;;  %v4088_v14 = vld [vmem:[#allocation3 + $0xb0] sm:$0x1] }
 0x243   :  { %v2079_v29 = vpop.permute.xlu1 %2078  ;;  %v2808_v6 = vld [vmem:[#allocation2 + $0x98] sm:$0xff]  ;;  %v4089_v44 = vsel %vm12185_vm8, 0, %v4088_v14 }
 0x244   :  { %2154 = vst.msk [vmem:[#allocation2 + $0xa8] sm:$0xff] %vm2132_vm11, %v2079_v29  ;;  %9820 = vmatmul.mubr.msk.bf16.gmra.mrb[36].mxu0 %vm17787_vm0, %v2808_v6  ;;  %v2367_v19 = vpop.permute.xlu0 %2366  ;;  %4090 = vst [vmem:[#allocation3 + $0xb0] sm:$0x1] %v4089_v44  ;;  %v4095_v44 = vsel %vm12185_vm8, 0, %v4094_v11 }
 0x245   :  { %1915 = vrot.lane.b32.xlu1 %v9346_v21, %s10114_s16  ;;  %2443 = vst.msk [vmem:[#allocation2 + $0xa0] sm:$0xff] %vm2422_vm13, %v2367_v19  ;;  %4096 = vst [vmem:[#allocation3 + $0xc8] sm:$0x1] %v4095_v44 }
 0x246   :  { %2247 = vrot.lane.b32.xlu0 %v11710_v63, %s10116_s20  ;;  %v2502_v63 = vsel %vm10192_vm2, %v2497_v33, %v2501_v31 }
 0x247   :  { %v2230_v13 = vpop.permute.xlu1 %2229  ;;  %v9356_v35 = vcombine.low %v2492_v52, %v2502_v63  ;;  %v3984_v52 = vld [vmem:[#allocation3 + $0xc0] sm:$0x1] }
 0x248   :  { %2305 = vst.msk [vmem:[#allocation2 + $0xa8] sm:$0xff] %vm2283_vm12, %v2230_v13  ;;  %v2550_v8 = vpop.permute.xlu0 %2549  ;;  %v3985_v34 = vsel %vm12170_vm4, 0, %v3984_v52 }
 0x249   :  { %2098 = vrot.lane.b32.xlu1 %v9348_v26, %s10115_s17  ;;  %2626 = vst.msk [vmem:[#allocation2 + $0xa0] sm:$0xff] %vm2605_vm14, %v2550_v8  ;;  %3986 = vst [vmem:[#allocation3 + $0xc0] sm:$0x1] %v3985_v34 }
 0x24a   :  { %2386 = vrot.lane.b32.xlu0 %v9346_v21, %s10117_s23 }
 0x24b   :  { %v2369_v37 = vpop.permute.xlu1 %2368 }
 0x24c   :  { %2444 = vst.msk [vmem:[#allocation2 + $0xa8] sm:$0xff] %vm2422_vm13, %v2369_v37  ;;  %v2701_v55 = vpop.permute.xlu0 %2700 }
 0x24d   :  { %2249 = vrot.lane.b32.xlu1 %v9352_v1, %s10116_s20  ;;  %2777 = vst.msk [vmem:[#allocation2 + $0xa0] sm:$0xff] %vm17788_vm15, %v2701_v55 }
 0x24e   :  { %2569 = vrot.lane.b32.xlu0 %v9348_v26, %s10118_s26 }
 0x24f   :  { %v2552_v59 = vpop.permute.xlu1 %2551 }
 0x250   :  { %2627 = vst.msk [vmem:[#allocation2 + $0xa8] sm:$0xff] %vm2605_vm14, %v2552_v59  ;;  %v1898_v5 = vpop.permute.xlu0 %1897 }
 0x251   :  { %2388 = vrot.lane.b32.xlu1 %v9354_v56, %s10117_s23  ;;  %1972 = vst.msk [vmem:[#allocation2 + $0xb0] sm:$0xff] %vm1949_vm10, %v1898_v5  ;;  %v3982_v5 = vsel %vm12170_vm4, 0, %v3981_v27 }
 0x252   :  { %2720 = vrot.lane.b32.xlu0 %v9352_v1, %s10119_s2  ;;  %3983 = vst [vmem:[#allocation3 + $0xb4] sm:$0x1] %v3982_v5 }
 0x253   :  { %v2703_v20 = vpop.permute.xlu1 %2702 }
 0x254   :  { %2778 = vst.msk [vmem:[#allocation2 + $0xa8] sm:$0xff] %vm17788_vm15, %v2703_v20  ;;  %v12486_v17 = vpop.f32.mrb[0].mxu0  ;;  %v2081_v4 = vpop.permute.xlu0 %2080  ;;  %v2809_v53 = vld [vmem:[#allocation2 + $0xa0] sm:$0xff] }
 0x255   :  { %2571 = vrot.lane.b32.xlu1 %v9356_v35, %s10118_s26  ;;  %v12490_v36 = vpop.f32.mrb[1].mxu0  ;;  %v3376_v47 = vmul.f32 %v12486_v17, %v12486_v17  ;;  %2155 = vst.msk [vmem:[#allocation2 + $0xb0] sm:$0xff] %vm2132_vm11, %v2081_v4  ;;  %9823 = vmatprep.mubr.msk.bf16.mxu0 %vm17787_vm0, %v2809_v53  ;;  %v3236_v23 = vsel %vm330_vm6, %v12486_v17, 0.0 }
 0x256   :  { %v3374_v49 = vmul.f32 %v12490_v36, %v12490_v36  ;;  %v12499_v12 = vpop.f32.mrb[2].mxu0  ;;  %v3233_v43 = vsel %vm330_vm6, %v12490_v36, 0.0 }
 0x257   :  { %v1900_v38 = vpop.permute.xlu1 %1899  ;;  %v12501_v15 = vpop.f32.mrb[3].mxu0  ;;  %v3377_v7 = vmul.f32 %v12499_v12, %v12499_v12  ;;  %v3441_v3 = vsel %vm330_vm6, %v3376_v47, 0.0  ;;  %v3238_v50 = vsel %vm330_vm6, %v12499_v12, 0.0 }
 0x258   :  { %1973 = vst.msk [vmem:[#allocation2 + $0xb8] sm:$0xff] %vm1949_vm10, %v1900_v38  ;;  %v3234_v57 = vsel %vm330_vm6, %v12501_v15, 0.0  ;;  %v3375_v21 = vmul.f32 %v12501_v15, %v12501_v15  ;;  %v3438_v32 = vsel %vm330_vm6, %v3374_v49, 0.0  ;;  %v2232_v26 = vpop.permute.xlu0 %2231 }
 0x259   :  { %2722 = vrot.lane.b32.xlu1 %v9360_v9, %s10119_s2  ;;  %v3235_v51 = vadd.f32 %v3234_v57, %v3233_v43  ;;  %2306 = vst.msk [vmem:[#allocation2 + $0xb0] sm:$0xff] %vm2283_vm12, %v2232_v26  ;;  %v3443_v62 = vsel %vm330_vm6, %v3377_v7, 0.0 }
 0x25a   :  { %v3439_v41 = vsel %vm330_vm6, %v3375_v21, 0.0 }
 0x25b   :  { %v3237_v54 = vadd.f32 %v3236_v23, %v3235_v51  ;;  %v3440_v46 = vadd.f32 %v3439_v41, %v3438_v32  ;;  %v2083_v29 = vpop.permute.xlu1 %2082  ;;  %v2810_v6 = vld [vmem:[#allocation2 + $0xa8] sm:$0xff] }
 0x25c   :  { %2156 = vst.msk [vmem:[#allocation2 + $0xb8] sm:$0xff] %vm2132_vm11, %v2083_v29  ;;  %9824 = vmatmul.mubr.msk.bf16.gmra.mrb[40].mxu0 %vm17787_vm0, %v2810_v6  ;;  %v2371_v13 = vpop.permute.xlu0 %2370 }
 0x25d   :  { %v3442_v45 = vadd.f32 %v3441_v3, %v3440_v46  ;;  %v3239_v42 = vadd.f32 %v3238_v50, %v3237_v54  ;;  %2445 = vst.msk [vmem:[#allocation2 + $0xb0] sm:$0xff] %vm2422_vm13, %v2371_v13 }
 0x25f   :  { %v2234_v24 = vpop.permute.xlu1 %2233  ;;  %v3444_v0 = vadd.f32 %v3443_v62, %v3442_v45 }
 0x260   :  { %2307 = vst.msk [vmem:[#allocation2 + $0xb8] sm:$0xff] %vm2283_vm12, %v2234_v24  ;;  %v2554_v1 = vpop.permute.xlu0 %2553 }
 0x261   :  { %2628 = vst.msk [vmem:[#allocation2 + $0xb0] sm:$0xff] %vm2605_vm14, %v2554_v1 }
 0x263   :  { %v2373_v19 = vpop.permute.xlu1 %2372 }
 0x264   :  { %2446 = vst.msk [vmem:[#allocation2 + $0xb8] sm:$0xff] %vm2422_vm13, %v2373_v19  ;;  %v2705_v33 = vpop.permute.xlu0 %2704 }
 0x265   :  { %2779 = vst.msk [vmem:[#allocation2 + $0xb0] sm:$0xff] %vm17788_vm15, %v2705_v33 }
 0x267   :  { %v2556_v61 = vpop.permute.xlu1 %2555 }
 0x268   :  { %2629 = vst.msk [vmem:[#allocation2 + $0xb8] sm:$0xff] %vm2605_vm14, %v2556_v61  ;;  %v12535_v31 = vpop.f32.mrb[4].mxu0  ;;  %v1902_v16 = vpop.permute.xlu0 %1901 }
 0x269   :  { %v12538_v40 = vpop.f32.mrb[5].mxu0  ;;  %v3380_v63 = vmul.f32 %v12535_v31, %v12535_v31  ;;  %1974 = vst.msk [vmem:[#allocation2 + $0xc0] sm:$0xff] %vm1949_vm10, %v1902_v16  ;;  %v3244_v14 = vsel %vm330_vm6, %v12535_v31, 0.0 }
 0x26a   :  { %v3240_v37 = vsel %vm330_vm6, %v12538_v40, 0.0  ;;  %v3378_v8 = vmul.f32 %v12538_v40, %v12538_v40  ;;  %v12544_v56 = vpop.f32.mrb[6].mxu0 }
 0x26b   :  { %v2707_v39 = vpop.permute.xlu1 %2706  ;;  %v3241_v10 = vadd.f32 %v3240_v37, %v3239_v42  ;;  %v12548_v18 = vpop.f32.mrb[7].mxu0  ;;  %v3381_v9 = vmul.f32 %v12544_v56, %v12544_v56  ;;  %v3449_v43 = vsel %vm330_vm6, %v3380_v63, 0.0  ;;  %v3246_v57 = vsel %vm330_vm6, %v12544_v56, 0.0 }
 0x26c   :  { %2780 = vst.msk [vmem:[#allocation2 + $0xb8] sm:$0xff] %vm17788_vm15, %v2707_v39  ;;  %v3445_v59 = vsel %vm330_vm6, %v3378_v8, 0.0  ;;  %v3242_v55 = vsel %vm330_vm6, %v12548_v18, 0.0  ;;  %v3379_v35 = vmul.f32 %v12548_v18, %v12548_v18  ;;  %v2085_v21 = vpop.permute.xlu0 %2084  ;;  %v2811_v4 = vld [vmem:[#allocation2 + $0xb0] sm:$0xff] }
 0x26d   :  { %v3446_v20 = vadd.f32 %v3445_v59, %v3444_v0  ;;  %v3243_v60 = vadd.f32 %v3242_v55, %v3241_v10  ;;  %2157 = vst.msk [vmem:[#allocation2 + $0xc0] sm:$0xff] %vm2132_vm11, %v2085_v21  ;;  %9827 = vmatprep.mubr.msk.bf16.mxu0 %vm17787_vm0, %v2811_v4  ;;  %v3451_v51 = vsel %vm330_vm6, %v3381_v9, 0.0 }
 0x26e   :  { %v3447_v25 = vsel %vm330_vm6, %v3379_v35, 0.0 }
 0x26f   :  { %v3245_v49 = vadd.f32 %v3244_v14, %v3243_v60  ;;  %v3448_v38 = vadd.f32 %v3447_v25, %v3446_v20  ;;  %v1904_v47 = vpop.permute.xlu1 %1903 }
 0x270   :  { %1975 = vst.msk [vmem:[#allocation2 + $0xc8] sm:$0xff] %vm1949_vm10, %v1904_v47  ;;  %v2236_v7 = vpop.permute.xlu0 %2235 }
 0x271   :  { %v3450_v53 = vadd.f32 %v3449_v43, %v3448_v38  ;;  %v3247_v58 = vadd.f32 %v3246_v57, %v3245_v49  ;;  %2308 = vst.msk [vmem:[#allocation2 + $0xc0] sm:$0xff] %vm2283_vm12, %v2236_v7 }
 0x273   :  { %v2087_v30 = vpop.permute.xlu1 %2086  ;;  %v2812_v23 = vld [vmem:[#allocation2 + $0xb8] sm:$0xff]  ;;  %v3452_v32 = vadd.f32 %v3451_v51, %v3450_v53 }
 0x274   :  { %2158 = vst.msk [vmem:[#allocation2 + $0xc8] sm:$0xff] %vm2132_vm11, %v2087_v30  ;;  %9828 = vmatmul.mubr.msk.bf16.gmra.mrb[44].mxu0 %vm17787_vm0, %v2812_v23  ;;  %v2375_v54 = vpop.permute.xlu0 %2374 }
 0x275   :  { %2447 = vst.msk [vmem:[#allocation2 + $0xc0] sm:$0xff] %vm2422_vm13, %v2375_v54 }
 0x277   :  { %v2238_v41 = vpop.permute.xlu1 %2237 }
 0x278   :  { %2309 = vst.msk [vmem:[#allocation2 + $0xc8] sm:$0xff] %vm2283_vm12, %v2238_v41  ;;  %v2558_v29 = vpop.permute.xlu0 %2557 }
 0x279   :  { %2630 = vst.msk [vmem:[#allocation2 + $0xc0] sm:$0xff] %vm2605_vm14, %v2558_v29 }
 0x27b   :  { %v2377_v46 = vpop.permute.xlu1 %2376 }
 0x27c   :  { %2448 = vst.msk [vmem:[#allocation2 + $0xc8] sm:$0xff] %vm2422_vm13, %v2377_v46  ;;  %v12581_v6 = vpop.f32.mrb[8].mxu0  ;;  %v2709_v61 = vpop.permute.xlu0 %2708 }
 0x27d   :  { %v12584_v3 = vpop.f32.mrb[9].mxu0  ;;  %v3384_v0 = vmul.f32 %v12581_v6, %v12581_v6  ;;  %2781 = vst.msk [vmem:[#allocation2 + $0xc0] sm:$0xff] %vm17788_vm15, %v2709_v61  ;;  %v3252_v8 = vsel %vm330_vm6, %v12581_v6, 0.0 }
 0x27e   :  { %v3248_v50 = vsel %vm330_vm6, %v12584_v3, 0.0  ;;  %v3382_v26 = vmul.f32 %v12584_v3, %v12584_v3  ;;  %v12590_v45 = vpop.f32.mrb[10].mxu0 }
 0x27f   :  { %v2560_v42 = vpop.permute.xlu1 %2559  ;;  %v3249_v62 = vadd.f32 %v3248_v50, %v3247_v58  ;;  %v12592_v24 = vpop.f32.mrb[11].mxu0  ;;  %v3385_v52 = vmul.f32 %v12590_v45, %v12590_v45  ;;  %v3457_v55 = vsel %vm330_vm6, %v3384_v0, 0.0  ;;  %v3254_v35 = vsel %vm330_vm6, %v12590_v45, 0.0 }
 0x280   :  { %2631 = vst.msk [vmem:[#allocation2 + $0xc8] sm:$0xff] %vm2605_vm14, %v2560_v42  ;;  %v3453_v13 = vsel %vm330_vm6, %v3382_v26, 0.0  ;;  %v3250_v19 = vsel %vm330_vm6, %v12592_v24, 0.0  ;;  %v3383_v1 = vmul.f32 %v12592_v24, %v12592_v24  ;;  %v1906_v16 = vpop.permute.xlu0 %1905 }
 0x281   :  { %v3454_v33 = vadd.f32 %v3453_v13, %v3452_v32  ;;  %v3251_v37 = vadd.f32 %v3250_v19, %v3249_v62  ;;  %1976 = vst.msk [vmem:[#allocation2 + $0xd0] sm:$0xff] %vm1949_vm10, %v1906_v16  ;;  %v3459_v20 = vsel %vm330_vm6, %v3385_v52, 0.0  ;;  %v4091_v13 = vld [vmem:[#allocation3 + $0xbc] sm:$0x1]  ;;  %v3996_v16 = vld [vmem:[#allocation3 + $0xf0] sm:$0x1] }
 0x282   :  { %v3455_v63 = vsel %vm330_vm6, %v3383_v1, 0.0 }
 0x283   :  { %v3253_v39 = vadd.f32 %v3252_v8, %v3251_v37  ;;  %v3456_v10 = vadd.f32 %v3455_v63, %v3454_v33  ;;  %v2711_v59 = vpop.permute.xlu1 %2710  ;;  %v4092_v33 = vsel %vm12185_vm8, 0, %v4091_v13 }
 0x284   :  { %2782 = vst.msk [vmem:[#allocation2 + $0xc8] sm:$0xff] %vm17788_vm15, %v2711_v59  ;;  %v2089_v11 = vpop.permute.xlu0 %2088  ;;  %v2813_v14 = vld [vmem:[#allocation2 + $0xc0] sm:$0xff]  ;;  %4093 = vst [vmem:[#allocation3 + $0xbc] sm:$0x1] %v4092_v33 }
 0x285   :  { %v3458_v34 = vadd.f32 %v3457_v55, %v3456_v10  ;;  %v3255_v27 = vadd.f32 %v3254_v35, %v3253_v39  ;;  %2159 = vst.msk [vmem:[#allocation2 + $0xd0] sm:$0xff] %vm2132_vm11, %v2089_v11  ;;  %9831 = vmatprep.mubr.msk.bf16.mxu0 %vm17787_vm0, %v2813_v14 }
 0x287   :  { %v1908_v60 = vpop.permute.xlu1 %1907  ;;  %v3460_v5 = vadd.f32 %v3459_v20, %v3458_v34  ;;  %v3993_v34 = vld [vmem:[#allocation3 + $0xe4] sm:$0x1] }
 0x288   :  { %1977 = vst.msk [vmem:[#allocation2 + $0xd8] sm:$0xff] %vm1949_vm10, %v1908_v60  ;;  %v2240_v44 = vpop.permute.xlu0 %2239  ;;  %v3997_v60 = vsel %vm12170_vm4, 0, %v3996_v16  ;;  %v4002_v16 = vld [vmem:[#allocation3 + $0x108] sm:$0x1] }
 0x289   :  { %2310 = vst.msk [vmem:[#allocation2 + $0xd0] sm:$0xff] %vm2283_vm12, %v2240_v44  ;;  %3998 = vst [vmem:[#allocation3 + $0xf0] sm:$0x1] %v3997_v60  ;;  %v4003_v60 = vsel %vm12170_vm4, 0, %v4002_v16 }
 0x28a   :  { %4004 = vst [vmem:[#allocation3 + $0x108] sm:$0x1] %v4003_v60 }
 0x28b   :  { %v2091_v9 = vpop.permute.xlu1 %2090  ;;  %v2814_v25 = vld [vmem:[#allocation2 + $0xc8] sm:$0xff] }
 0x28c   :  { %2160 = vst.msk [vmem:[#allocation2 + $0xd8] sm:$0xff] %vm2132_vm11, %v2091_v9  ;;  %9832 = vmatmul.mubr.msk.bf16.gmra.mrb[48].mxu0 %vm17787_vm0, %v2814_v25  ;;  %v2379_v38 = vpop.permute.xlu0 %2378  ;;  %v4106_v25 = vld [vmem:[#allocation3 + $0xf8] sm:$0x1] }
 0x28d   :  { %2449 = vst.msk [vmem:[#allocation2 + $0xd0] sm:$0xff] %vm2422_vm13, %v2379_v38 }
 0x28f   :  { %v2242_v49 = vpop.permute.xlu1 %2241 }
 0x290   :  { %2311 = vst.msk [vmem:[#allocation2 + $0xd8] sm:$0xff] %vm2283_vm12, %v2242_v49  ;;  %v12621_v47 = vpop.f32.mrb[12].mxu0  ;;  %v2562_v41 = vpop.permute.xlu0 %2561 }
 0x291   :  { %v12624_v43 = vpop.f32.mrb[13].mxu0  ;;  %v3388_v30 = vmul.f32 %v12621_v47, %v12621_v47  ;;  %2632 = vst.msk [vmem:[#allocation2 + $0xd0] sm:$0xff] %vm2605_vm14, %v2562_v41  ;;  %v3260_v29 = vsel %vm330_vm6, %v12621_v47, 0.0 }
 0x292   :  { %v3256_v57 = vsel %vm330_vm6, %v12624_v43, 0.0  ;;  %v3386_v21 = vmul.f32 %v12624_v43, %v12624_v43  ;;  %v12630_v4 = vpop.f32.mrb[14].mxu0 }
 0x293   :  { %v2381_v53 = vpop.permute.xlu1 %2380  ;;  %v3257_v58 = vadd.f32 %v3256_v57, %v3255_v27  ;;  %v12632_v51 = vpop.f32.mrb[15].mxu0  ;;  %v3389_v50 = vmul.f32 %v12630_v4, %v12630_v4  ;;  %v3465_v19 = vsel %vm330_vm6, %v3388_v30, 0.0  ;;  %v3262_v1 = vsel %vm330_vm6, %v12630_v4, 0.0 }
 0x294   :  { %2450 = vst.msk [vmem:[#allocation2 + $0xd8] sm:$0xff] %vm2422_vm13, %v2381_v53  ;;  %v3461_v23 = vsel %vm330_vm6, %v3386_v21, 0.0  ;;  %v3258_v32 = vsel %vm330_vm6, %v12632_v51, 0.0  ;;  %v3387_v7 = vmul.f32 %v12632_v51, %v12632_v51  ;;  %v2713_v61 = vpop.permute.xlu0 %2712  ;;  %v4107_v57 = vsel %vm12185_vm8, 0, %v4106_v25 }
 0x295   :  { %v3462_v54 = vadd.f32 %v3461_v23, %v3460_v5  ;;  %v3259_v46 = vadd.f32 %v3258_v32, %v3257_v58  ;;  %2783 = vst.msk [vmem:[#allocation2 + $0xd0] sm:$0xff] %vm17788_vm15, %v2713_v61  ;;  %v3467_v52 = vsel %vm330_vm6, %v3389_v50, 0.0  ;;  %v3994_v5 = vsel %vm12170_vm4, 0, %v3993_v34  ;;  %4108 = vst [vmem:[#allocation3 + $0xf8] sm:$0x1] %v4107_v57 }
 0x296   :  { %v3463_v26 = vsel %vm330_vm6, %v3387_v7, 0.0  ;;  %3995 = vst [vmem:[#allocation3 + $0xe4] sm:$0x1] %v3994_v5 }
 0x297   :  { %v3261_v42 = vadd.f32 %v3260_v29, %v3259_v46  ;;  %v3464_v62 = vadd.f32 %v3463_v26, %v3462_v54  ;;  %v2564_v0 = vpop.permute.xlu1 %2563 }
 0x298   :  { %2633 = vst.msk [vmem:[#allocation2 + $0xd8] sm:$0xff] %vm2605_vm14, %v2564_v0  ;;  %v1910_v10 = vpop.permute.xlu0 %1909 }
 0x299   :  { %v3466_v37 = vadd.f32 %v3465_v19, %v3464_v62  ;;  %v3263_v8 = vadd.f32 %v3262_v1, %v3261_v42  ;;  %1978 = vst.msk [vmem:[#allocation2 + $0xe0] sm:$0xff] %vm1949_vm10, %v1910_v10 }
 0x29b   :  { %v2715_v63 = vpop.permute.xlu1 %2714  ;;  %v3468_v39 = vadd.f32 %v3467_v52, %v3466_v37  ;;  %v4103_v37 = vld [vmem:[#allocation3 + $0xec] sm:$0x1] }
 0x29c   :  { %2784 = vst.msk [vmem:[#allocation2 + $0xd8] sm:$0xff] %vm17788_vm15, %v2715_v63  ;;  %v2093_v55 = vpop.permute.xlu0 %2092  ;;  %v2815_v35 = vld [vmem:[#allocation2 + $0xd0] sm:$0xff]  ;;  %v4104_v52 = vsel %vm12185_vm8, 0, %v4103_v37 }
 0x29d   :  { %2161 = vst.msk [vmem:[#allocation2 + $0xe0] sm:$0xff] %vm2132_vm11, %v2093_v55  ;;  %9835 = vmatprep.mubr.msk.bf16.mxu0 %vm17787_vm0, %v2815_v35  ;;  %4105 = vst [vmem:[#allocation3 + $0xec] sm:$0x1] %v4104_v52 }
 0x29f   :  { %v1912_v59 = vpop.permute.xlu1 %1911 }
 0x2a0   :  { %1979 = vst.msk [vmem:[#allocation2 + $0xe8] sm:$0xff] %vm1949_vm10, %v1912_v59  ;;  %v2244_v11 = vpop.permute.xlu0 %2243 }
 0x2a1   :  { %2312 = vst.msk [vmem:[#allocation2 + $0xe0] sm:$0xff] %vm2283_vm12, %v2244_v11 }
 0x2a3   :  { %v2095_v27 = vpop.permute.xlu1 %2094  ;;  %v2816_v20 = vld [vmem:[#allocation2 + $0xd8] sm:$0xff] }
 0x2a4   :  { %2162 = vst.msk [vmem:[#allocation2 + $0xe8] sm:$0xff] %vm2132_vm11, %v2095_v27  ;;  %9836 = vmatmul.mubr.msk.bf16.gmra.mrb[52].mxu0 %vm17787_vm0, %v2816_v20  ;;  %v12667_v14 = vpop.f32.mrb[16].mxu0  ;;  %v2383_v41 = vpop.permute.xlu0 %2382 }
 0x2a5   :  { %v12670_v9 = vpop.f32.mrb[17].mxu0  ;;  %v3392_v30 = vmul.f32 %v12667_v14, %v12667_v14  ;;  %2451 = vst.msk [vmem:[#allocation2 + $0xe0] sm:$0xff] %vm2422_vm13, %v2383_v41  ;;  %v3268_v29 = vsel %vm330_vm6, %v12667_v14, 0.0 }
 0x2a6   :  { %v3264_v44 = vsel %vm330_vm6, %v12670_v9, 0.0  ;;  %v3390_v49 = vmul.f32 %v12670_v9, %v12670_v9  ;;  %v12676_v38 = vpop.f32.mrb[18].mxu0 }
 0x2a7   :  { %v2246_v21 = vpop.permute.xlu1 %2245  ;;  %v3265_v53 = vadd.f32 %v3264_v44, %v3263_v8  ;;  %v12680_v58 = vpop.f32.mrb[19].mxu0  ;;  %v3393_v50 = vmul.f32 %v12676_v38, %v12676_v38  ;;  %v3473_v13 = vsel %vm330_vm6, %v3392_v30, 0.0  ;;  %v3270_v19 = vsel %vm330_vm6, %v12676_v38, 0.0 }
 0x2a8   :  { %2313 = vst.msk [vmem:[#allocation2 + $0xe8] sm:$0xff] %vm2283_vm12, %v2246_v21  ;;  %v3469_v23 = vsel %vm330_vm6, %v3390_v49, 0.0  ;;  %v3266_v32 = vsel %vm330_vm6, %v12680_v58, 0.0  ;;  %v3391_v7 = vmul.f32 %v12680_v58, %v12680_v58  ;;  %v2566_v1 = vpop.permute.xlu0 %2565 }
 0x2a9   :  { %v3470_v54 = vadd.f32 %v3469_v23, %v3468_v39  ;;  %v3267_v46 = vadd.f32 %v3266_v32, %v3265_v53  ;;  %2634 = vst.msk [vmem:[#allocation2 + $0xe0] sm:$0xff] %vm2605_vm14, %v2566_v1  ;;  %v3475_v8 = vsel %vm330_vm6, %v3393_v50, 0.0 }
 0x2aa   :  { %v3471_v26 = vsel %vm330_vm6, %v3391_v7, 0.0 }
 0x2ab   :  { %v3269_v42 = vadd.f32 %v3268_v29, %v3267_v46  ;;  %v3472_v62 = vadd.f32 %v3471_v26, %v3470_v54  ;;  %v2385_v0 = vpop.permute.xlu1 %2384 }
 0x2ac   :  { %2452 = vst.msk [vmem:[#allocation2 + $0xe8] sm:$0xff] %vm2422_vm13, %v2385_v0  ;;  %v2717_v10 = vpop.permute.xlu0 %2716 }
 0x2ad   :  { %v3474_v61 = vadd.f32 %v3473_v13, %v3472_v62  ;;  %v3271_v33 = vadd.f32 %v3270_v19, %v3269_v42  ;;  %2785 = vst.msk [vmem:[#allocation2 + $0xe0] sm:$0xff] %vm17788_vm15, %v2717_v10 }
 0x2af   :  { %v2568_v63 = vpop.permute.xlu1 %2567  ;;  %v3476_v39 = vadd.f32 %v3475_v8, %v3474_v61  ;;  %v3999_v61 = vld [vmem:[#allocation3 + $0xfc] sm:$0x1] }
 0x2b0   :  { %2635 = vst.msk [vmem:[#allocation2 + $0xe8] sm:$0xff] %vm2605_vm14, %v2568_v63  ;;  %v1914_v55 = vpop.permute.xlu0 %1913  ;;  %v4000_v8 = vsel %vm12170_vm4, 0, %v3999_v61 }
 0x2b1   :  { %1980 = vst.msk [vmem:[#allocation2 + $0xf0] sm:$0xff] %vm1949_vm10, %v1914_v55  ;;  %4001 = vst [vmem:[#allocation3 + $0xfc] sm:$0x1] %v4000_v8  ;;  %v4109_v8 = vld [vmem:[#allocation3 + $0x104] sm:$0x1] }
 0x2b3   :  { %v2719_v59 = vpop.permute.xlu1 %2718 }
 0x2b4   :  { %2786 = vst.msk [vmem:[#allocation2 + $0xe8] sm:$0xff] %vm17788_vm15, %v2719_v59  ;;  %v2097_v34 = vpop.permute.xlu0 %2096  ;;  %v2817_v20 = vld [vmem:[#allocation2 + $0xe0] sm:$0xff] }
 0x2b5   :  { %2163 = vst.msk [vmem:[#allocation2 + $0xf0] sm:$0xff] %vm2132_vm11, %v2097_v34  ;;  %9839 = vmatprep.mubr.msk.bf16.mxu0 %vm17787_vm0, %v2817_v20  ;;  %v4112_v34 = vld [vmem:[#allocation3 + $0x110] sm:$0x1] }
 0x2b7   :  { %v1916_v35 = vpop.permute.xlu1 %1915 }
 0x2b8   :  { %1981 = vst.msk [vmem:[#allocation2 + $0xf8] sm:$0xff] %vm1949_vm10, %v1916_v35  ;;  %v12709_v27 = vpop.f32.mrb[20].mxu0  ;;  %v2248_v41 = vpop.permute.xlu0 %2247 }
 0x2b9   :  { %v12714_v5 = vpop.f32.mrb[21].mxu0  ;;  %v3396_v30 = vmul.f32 %v12709_v27, %v12709_v27  ;;  %2314 = vst.msk [vmem:[#allocation2 + $0xf0] sm:$0xff] %vm2283_vm12, %v2248_v41  ;;  %v3276_v29 = vsel %vm330_vm6, %v12709_v27, 0.0 }
 0x2ba   :  { %v3272_v11 = vsel %vm330_vm6, %v12714_v5, 0.0  ;;  %v3394_v25 = vmul.f32 %v12714_v5, %v12714_v5  ;;  %v12721_v44 = vpop.f32.mrb[22].mxu0 }
 0x2bb   :  { %v2099_v49 = vpop.permute.xlu1 %2098  ;;  %v3273_v57 = vadd.f32 %v3272_v11, %v3271_v33  ;;  %v2818_v21 = vld [vmem:[#allocation2 + $0xe8] sm:$0xff]  ;;  %v12723_v53 = vpop.f32.mrb[23].mxu0  ;;  %v3397_v50 = vmul.f32 %v12721_v44, %v12721_v44  ;;  %v3481_v13 = vsel %vm330_vm6, %v3396_v30, 0.0  ;;  %v3278_v19 = vsel %vm330_vm6, %v12721_v44, 0.0 }
 0x2bc   :  { %2164 = vst.msk [vmem:[#allocation2 + $0xf8] sm:$0xff] %vm2132_vm11, %v2099_v49  ;;  %v3477_v23 = vsel %vm330_vm6, %v3394_v25, 0.0  ;;  %9840 = vmatmul.mubr.msk.bf16.gmra.mrb[56].mxu0 %vm17787_vm0, %v2818_v21  ;;  %v3274_v32 = vsel %vm330_vm6, %v12723_v53, 0.0  ;;  %v3395_v7 = vmul.f32 %v12723_v53, %v12723_v53  ;;  %v2387_v1 = vpop.permute.xlu0 %2386  ;;  %v4113_v11 = vsel %vm12185_vm8, 0, %v4112_v34 }
 0x2bd   :  { %v3478_v54 = vadd.f32 %v3477_v23, %v3476_v39  ;;  %v3275_v46 = vadd.f32 %v3274_v32, %v3273_v57  ;;  %2453 = vst.msk [vmem:[#allocation2 + $0xf0] sm:$0xff] %vm2422_vm13, %v2387_v1  ;;  %v3483_v52 = vsel %vm330_vm6, %v3397_v50, 0.0  ;;  %4114 = vst [vmem:[#allocation3 + $0x110] sm:$0x1] %v4113_v11 }
 0x2be   :  { %v3479_v26 = vsel %vm330_vm6, %v3395_v7, 0.0 }
 0x2bf   :  { %v3277_v42 = vadd.f32 %v3276_v29, %v3275_v46  ;;  %v3480_v62 = vadd.f32 %v3479_v26, %v3478_v54  ;;  %v2250_v0 = vpop.permute.xlu1 %2249 }
 0x2c0   :  { %2315 = vst.msk [vmem:[#allocation2 + $0xf8] sm:$0xff] %vm2283_vm12, %v2250_v0  ;;  %v2570_v10 = vpop.permute.xlu0 %2569 }
 0x2c1   :  { %v3482_v33 = vadd.f32 %v3481_v13, %v3480_v62  ;;  %v3279_v37 = vadd.f32 %v3278_v19, %v3277_v42  ;;  %2636 = vst.msk [vmem:[#allocation2 + $0xf0] sm:$0xff] %vm2605_vm14, %v2570_v10 }
 0x2c3   :  { %v2389_v63 = vpop.permute.xlu1 %2388  ;;  %v3484_v39 = vadd.f32 %v3483_v52, %v3482_v33  ;;  %v4110_v52 = vsel %vm12185_vm8, 0, %v4109_v8 }
 0x2c4   :  { %2454 = vst.msk [vmem:[#allocation2 + $0xf8] sm:$0xff] %vm2422_vm13, %v2389_v63  ;;  %v2721_v55 = vpop.permute.xlu0 %2720  ;;  %4111 = vst [vmem:[#allocation3 + $0x104] sm:$0x1] %v4110_v52 }
 0x2c5   :  { %2787 = vst.msk [vmem:[#allocation2 + $0xf0] sm:$0xff] %vm17788_vm15, %v2721_v55 }
 0x2c7   :  { %v2572_v59 = vpop.permute.xlu1 %2571 }
 0x2c8   :  { %2637 = vst.msk [vmem:[#allocation2 + $0xf8] sm:$0xff] %vm2605_vm14, %v2572_v59  ;;  %v4008_v59 = vld [vmem:[#allocation3 + $0x120] sm:$0x1] }
 0x2cb   :  { %v2723_v35 = vpop.permute.xlu1 %2722 }
 0x2cc   :  { %2788 = vst.msk [vmem:[#allocation2 + $0xf8] sm:$0xff] %vm17788_vm15, %v2723_v35  ;;  %v2819_v60 = vld [vmem:[#allocation2 + $0xf0] sm:$0xff] }
 0x2cd   :  { %9843 = vmatprep.mubr.msk.bf16.mxu0 %vm17787_vm0, %v2819_v60  ;;  %v4009_v60 = vsel %vm12170_vm4, 0, %v4008_v59 }
 0x2ce   :  { %4010 = vst [vmem:[#allocation3 + $0x120] sm:$0x1] %v4009_v60  ;;  %v4005_v60 = vld [vmem:[#allocation3 + $0x114] sm:$0x1] }
 0x2cf   :  { %v12753_v16 = vpop.f32.mrb[24].mxu0 }
 0x2d0   :  { %v12755_v20 = vpop.f32.mrb[25].mxu0  ;;  %v3400_v23 = vmul.f32 %v12753_v16, %v12753_v16  ;;  %v3284_v50 = vsel %vm330_vm6, %v12753_v16, 0.0 }
 0x2d1   :  { %v3280_v25 = vsel %vm330_vm6, %v12755_v20, 0.0  ;;  %v3398_v49 = vmul.f32 %v12755_v20, %v12755_v20  ;;  %v12763_v57 = vpop.f32.mrb[26].mxu0 }
 0x2d2   :  { %v3281_v21 = vadd.f32 %v3280_v25, %v3279_v37  ;;  %v12766_v30 = vpop.f32.mrb[27].mxu0  ;;  %v3401_v26 = vmul.f32 %v12763_v57, %v12763_v57  ;;  %v3489_v13 = vsel %vm330_vm6, %v3400_v23, 0.0  ;;  %v3286_v19 = vsel %vm330_vm6, %v12763_v57, 0.0 }
 0x2d3   :  { %v3485_v32 = vsel %vm330_vm6, %v3398_v49, 0.0  ;;  %v3282_v7 = vsel %vm330_vm6, %v12766_v30, 0.0  ;;  %v3399_v41 = vmul.f32 %v12766_v30, %v12766_v30  ;;  %v2820_v54 = vld [vmem:[#allocation2 + $0xf8] sm:$0xff] }
 0x2d4   :  { %v3486_v46 = vadd.f32 %v3485_v32, %v3484_v39  ;;  %v3283_v29 = vadd.f32 %v3282_v7, %v3281_v21  ;;  %9844 = vmatmul.mubr.msk.bf16.gmra.mrb[60].mxu0 %vm17787_vm0, %v2820_v54  ;;  %v3491_v33 = vsel %vm330_vm6, %v3401_v26, 0.0  ;;  %vm3918_vm0 = vcmask 27648  }
 0x2d5   :  { %v3487_v42 = vsel %vm330_vm6, %v3399_v41, 0.0  ;;  %v10120_v39 = vmov 0  }
 0x2d6   :  { %v3285_v62 = vadd.f32 %v3284_v50, %v3283_v29  ;;  %v3488_v0 = vadd.f32 %v3487_v42, %v3486_v46  ;;  %3919 = vst.msk [vmem:[#allocation3] sm:$0xf] %vm3918_vm0, %v10120_v39  ;;  %3920 = vst.msk [vmem:[#allocation3 + $0x4] sm:$0xf] %vm3918_vm0, %v10120_v39 }
 0x2d7   :  { %3922 = vst.msk [vmem:[#allocation3 + $0x8] sm:$0x1] %vm3921_vm1, %v10120_v39  ;;  %3925 = vst.msk [vmem:[#allocation3 + $0xe0] sm:$0x1] %vm3921_vm1, %v10120_v39 }
 0x2d8   :  { %v3490_v1 = vadd.f32 %v3489_v13, %v3488_v0  ;;  %v3287_v61 = vadd.f32 %v3286_v19, %v3285_v62  ;;  %3923 = vst.msk [vmem:[#allocation3 + $0xd8] sm:$0xf] %vm3918_vm0, %v10120_v39  ;;  %3924 = vst.msk [vmem:[#allocation3 + $0xdc] sm:$0xf] %vm3918_vm0, %v10120_v39 }
 0x2d9   :  { %3927 = vst.msk [vmem:[#allocation3 + $0xcc] sm:$0xf] %vm3918_vm0, %v10120_v39  ;;  %3928 = vst.msk [vmem:[#allocation3 + $0xd0] sm:$0xf] %vm3918_vm0, %v10120_v39 }
 0x2da   :  { %v3492_v37 = vadd.f32 %v3491_v33, %v3490_v1  ;;  %3929 = vst.msk [vmem:[#allocation3 + $0xd4] sm:$0x1] %vm3921_vm1, %v10120_v39  ;;  %3932 = vst.msk [vmem:[#allocation3 + $0x1ac] sm:$0x1] %vm3921_vm1, %v10120_v39  ;;  %vm4346_vm1 = vsmask.f32 4368 }
 0x2db   :  { %3930 = vst.msk [vmem:[#allocation3 + $0x1a4] sm:$0xf] %vm3918_vm0, %v10120_v39  ;;  %3931 = vst.msk [vmem:[#allocation3 + $0x1a8] sm:$0xf] %vm3918_vm0, %v10120_v39 }
 0x2dc   :  { %vm13013_vm15 = vmor %vm3934_vm3, %vm4346_vm1 }
 0x2dd   :  { %v3936_v42 = vld [vmem:[#allocation3] sm:$0x1]  ;;  %vm13033_vm3 = vmand %vm3918_vm0, %vm4044_vm9  ;;  %vm18477_vm9 = vcmask 1041408  }
 0x2de   :  { %v3937_v13 = vsel %vm12170_vm4, 0, %v3936_v42  ;;  %v4046_v8 = vld [vmem:[#allocation3 + $0x8] sm:$0x1] }
 0x2df   :  { %3938 = vst [vmem:[#allocation3] sm:$0x1] %v3937_v13  ;;  %v4047_v52 = vsel %vm12185_vm8, 0, %v4046_v8 }
 0x2e0   :  { %4048 = vst [vmem:[#allocation3 + $0x8] sm:$0x1] %v4047_v52 }
 0x2e7   :  { %v12787_v63 = vpop.f32.mrb[28].mxu0 }
 0x2e8   :  { %v12801_v10 = vpop.f32.mrb[29].mxu0  ;;  %v3404_v49 = vmul.f32 %v12787_v63, %v12787_v63  ;;  %v3292_v54 = vsel %vm330_vm6, %v12787_v63, 0.0 }
 0x2e9   :  { %v3288_v55 = vsel %vm330_vm6, %v12801_v10, 0.0  ;;  %v3402_v35 = vmul.f32 %v12801_v10, %v12801_v10  ;;  %v12807_v34 = vpop.f32.mrb[30].mxu0 }
 0x2ea   :  { %v3289_v11 = vadd.f32 %v3288_v55, %v3287_v61  ;;  %v12811_v25 = vpop.f32.mrb[31].mxu0  ;;  %v3405_v46 = vmul.f32 %v12807_v34, %v12807_v34  ;;  %v3497_v62 = vsel %vm330_vm6, %v3404_v49, 0.0  ;;  %v3294_v0 = vsel %vm330_vm6, %v12807_v34, 0.0 }
 0x2eb   :  { %v3493_v21 = vsel %vm330_vm6, %v3402_v35, 0.0  ;;  %v3290_v23 = vsel %vm330_vm6, %v12811_v25, 0.0  ;;  %v3403_v32 = vmul.f32 %v12811_v25, %v12811_v25  ;;  %v4006_v49 = vsel %vm12170_vm4, 0, %v4005_v60 }
 0x2ec   :  { %v3494_v7 = vadd.f32 %v3493_v21, %v3492_v37  ;;  %v3291_v41 = vadd.f32 %v3290_v23, %v3289_v11  ;;  %v3499_v61 = vsel %vm330_vm6, %v3405_v46, 0.0  ;;  %v5216_v11 = vld [vmem:[#allocation3 + $0x4] sm:$0xf]  ;;  %v5215_v21 = vld [vmem:[#allocation3] sm:$0xf] }
 0x2ed   :  { %v3495_v29 = vsel %vm330_vm6, %v3403_v32, 0.0  ;;  %v5557_v23 = vshll.u32 %v5216_v11, 16  ;;  %v5561_v32 = vshrl.u32 %v5216_v11, 16  ;;  %4007 = vst [vmem:[#allocation3 + $0x114] sm:$0x1] %v4006_v49  ;;  %v5551_v46 = vshll.u32 %v5215_v21, 16 }
 0x2ee   :  { %v3293_v50 = vadd.f32 %v3292_v54, %v3291_v41  ;;  %v3496_v26 = vadd.f32 %v3495_v29, %v3494_v7  ;;  %v5548_v54 = vshrl.u32 %v5215_v21, 16  ;;  %v4118_v29 = vld [vmem:[#allocation3 + $0x128] sm:$0x1] }
 0x2ef   :  { %v4119_v42 = vsel %vm12185_vm8, 0, %v4118_v29 }
 0x2f0   :  { %v3295_v19 = vadd.f32 %v3294_v0, %v3293_v50  ;;  %v3498_v1 = vadd.f32 %v3497_v62, %v3496_v26  ;;  %v12835_v50 = vrot.slane %v5557_v23, 5  ;;  %v5563_v26 = vrot.slane %v5561_v32, 4  ;;  %4120 = vst [vmem:[#allocation3 + $0x128] sm:$0x1] %v4119_v42 }
 0x2f1   :  { %v5550_v13 = vrot.slane %v5548_v54, 4 }
 0x2f2   :  { %v3296_v33 = vrot.slane %v3295_v19, 4  ;;  %v3500_v37 = vadd.f32 %v3499_v61, %v3498_v1  ;;  %v4115_v1 = vld [vmem:[#allocation3 + $0x11c] sm:$0x1]  ;;  %v5217_v61 = vld [vmem:[#allocation3 + $0x8] sm:$0x1] }
 0x2f4   :  { %v3297_v39 = vadd.f32 %v3296_v33, %v3295_v19  ;;  %v3501_v59 = vrot.slane %v3500_v37, 4  ;;  %v5553_v19 = vrot.slane %v5551_v46, 5  ;;  %v5564_v33 = vor.u32 %v5563_v26, %v12835_v50 }
 0x2f6   :  { %v3298_v55 = vrot.slane %v3297_v39, 2  ;;  %v3502_v35 = vadd.f32 %v3501_v59, %v3500_v37  ;;  %v4116_v37 = vsel %vm12185_vm8, 0, %v4115_v1  ;;  %v5567_v59 = vshll.u32 %v5217_v61, 16 }
 0x2f7   :  { %4117 = vst [vmem:[#allocation3 + $0x11c] sm:$0x1] %v4116_v37  ;;  %v5565_v49 = vrot.slane %v5564_v33, 4 }
 0x2f8   :  { %v3299_v7 = vadd.f32 %v3298_v55, %v3297_v39  ;;  %v3503_v41 = vrot.slane %v3502_v35, 2  ;;  %v5554_v39 = vor.u32 %v5553_v19, %v5550_v13  ;;  %v5569_v21 = vrot.slane %v5567_v59, 5 }
 0x2fa   :  { %v3300_v62 = vrot.slane %v3299_v7, 1  ;;  %v3504_v0 = vadd.f32 %v3503_v41, %v3502_v35  ;;  %v5555_v35 = vrot.slane %v5554_v39, 4 }
 0x2fc   :  { %v3301_v8 = vadd.f32 %v3300_v62, %v3299_v7  ;;  %v3505_v52 = vrot.slane %v3504_v0, 1 }
 0x2fe   :  { %v12842_v55 = vmul.f32 0.00390625, %v3301_v8  ;;  %v3506_v60 = vadd.f32 %v3505_v52, %v3504_v0  ;;  %v5570_v8 = vsel %vm10192_vm2, %v5565_v49, %v5569_v21 }
 0x2ff   :  { %v12844_v11 = vpop.f32.mrb[32].mxu0 }
 0x300   :  { %18144 = vst [vmem:[#allocation29_spill] sm:$0xff] %v12844_v11  ;;  %v3576_v23 = vmul.f32 0.00390625, %v3506_v60  ;;  %v3578_v32 = vmul.f32 %v12842_v55, %v12842_v55  ;;  %v3610_v41 = vsub.f32 %v12801_v10, %v12842_v55  ;;  %v3611_v7 = vsub.f32 %v12811_v25, %v12842_v55  ;;  %v12852_v54 = vpop.f32.mrb[33].mxu0 }
 0x301   :  { %18145 = vst [vmem:[#allocation30_spill] sm:$0xff] %v12852_v54  ;;  %v3582_v46 = vsub.f32 %v12490_v36, %v12842_v55  ;;  %v3583_v29 = vsub.f32 %v12501_v15, %v12842_v55  ;;  %v3584_v26 = vsub.f32 %v12486_v17, %v12842_v55  ;;  %v3585_v42 = vsub.f32 %v12499_v12, %v12842_v55  ;;  %v12862_v62 = vpop.f32.mrb[34].mxu0 }
 0x302   :  { %18146 = vst [vmem:[#allocation32_spill] sm:$0xff] %v12862_v62  ;;  %v3580_v10 = vsub.f32 %v3576_v23, %v3578_v32  ;;  %v3586_v25 = vsub.f32 %v12538_v40, %v12842_v55  ;;  %v3587_v0 = vsub.f32 %v12548_v18, %v12842_v55  ;;  %v3588_v36 = vsub.f32 %v12535_v31, %v12842_v55  ;;  %v12870_v13 = vpop.f32.mrb[35].mxu0 }
 0x303   :  { %18147 = vst [vmem:[#allocation73_spill] sm:$0xff] %v12870_v13  ;;  %v3589_v17 = vsub.f32 %v12544_v56, %v12842_v55  ;;  %v3590_v12 = vsub.f32 %v12584_v3, %v12842_v55  ;;  %v3591_v15 = vsub.f32 %v12592_v24, %v12842_v55  ;;  %v3592_v40 = vsub.f32 %v12581_v6, %v12842_v55 }
 0x304   :  { %v3646_v19 = vadd.f32 1e-05, %v3580_v10  ;;  %v3593_v18 = vsub.f32 %v12590_v45, %v12842_v55  ;;  %v3594_v31 = vsub.f32 %v12624_v43, %v12842_v55  ;;  %v3595_v1 = vsub.f32 %v12632_v51, %v12842_v55 }
 0x305   :  { %v3596_v56 = vsub.f32 %v12621_v47, %v12842_v55  ;;  %v3597_v3 = vsub.f32 %v12630_v4, %v12842_v55  ;;  %v3598_v24 = vsub.f32 %v12670_v9, %v12842_v55  ;;  %v3599_v6 = vsub.f32 %v12680_v58, %v12842_v55 }
 0x306   :  { %9947 = vrsqrt.f32 %v3646_v19  ;;  %v3302_v39 = vsel %vm330_vm6, %v12852_v54, 0.0  ;;  %v3406_v59 = vmul.f32 %v12852_v54, %v12852_v54  ;;  %v3303_v60 = vsel %vm330_vm6, %v12870_v13, 0.0 }
 0x307   :  { %v3408_v23 = vmul.f32 %v12844_v11, %v12844_v11  ;;  %v3304_v32 = vadd.f32 %v3303_v60, %v3302_v39  ;;  %v3407_v10 = vmul.f32 %v12870_v13, %v12870_v13  ;;  %v5560_v19 = vsel %vm10192_vm2, %v5555_v35, %v12835_v50  ;;  %v12946_v35 = vld [vmem:[%s17635_s4] ss:$0 sm:$0xff] }
 0x308   :  { %v3305_v52 = vsel %vm330_vm6, %v12844_v11, 0.0  ;;  %v3507_v37 = vsel %vm330_vm6, %v3406_v59, 0.0  ;;  %v9494_v58 = vcombine.low %v5560_v19, %v5570_v8  ;;  %v3307_v39 = vsel %vm330_vm6, %v12862_v62, 0.0 }
 0x309   :  { %v3306_v33 = vadd.f32 %v3305_v52, %v3304_v32  ;;  %v3508_v61 = vsel %vm330_vm6, %v3407_v10, 0.0  ;;  %v3510_v9 = vsel %vm330_vm6, %v3408_v23, 0.0  ;;  %v3409_v49 = vmul.f32 %v12862_v62, %v12862_v62 }
 0x30a   :  { %v3509_v60 = vadd.f32 %v3508_v61, %v3507_v37  ;;  %6411 = vrot.lane.b32.xlu0 %v9494_v58, %s10112_s29 }
 0x30b   :  { %v12940_v4 = vadd.f32 %v3307_v39, %v3306_v33  ;;  %v12955_v33 = vld [vmem:[%s17636_s5] ss:$0 sm:$0xff] }
 0x30c   :  { %v12950_v21 = vadd.f32 %v3510_v9, %v3509_v60 }
 0x310   :  { %v9948_v50 = vpop.eup %9947 }
 0x311   :  { %v3678_v8 = vmul.f32 %v9948_v50, %v3610_v41  ;;  %v3679_v52 = vmul.f32 %v9948_v50, %v3611_v7  ;;  %v3650_v61 = vmul.f32 %v9948_v50, %v3582_v46  ;;  %v3651_v37 = vmul.f32 %v9948_v50, %v3583_v29 }
 0x312   :  { %v3652_v58 = vmul.f32 %v9948_v50, %v3584_v26  ;;  %v3653_v59 = vmul.f32 %v9948_v50, %v3585_v42  ;;  %v3654_v23 = vmul.f32 %v9948_v50, %v3586_v25  ;;  %v3655_v32 = vmul.f32 %v9948_v50, %v3587_v0 }
 0x313   :  { %v3748_v10 = vmul.f32 %v12946_v35, %v3678_v8  ;;  %v3749_v19 = vmul.f32 %v12946_v35, %v3679_v52  ;;  %v3656_v39 = vmul.f32 %v9948_v50, %v3588_v36  ;;  %v3657_v9 = vmul.f32 %v9948_v50, %v3589_v17 }
 0x314   :  { %v3658_v60 = vmul.f32 %v9948_v50, %v3590_v12  ;;  %v3659_v41 = vmul.f32 %v9948_v50, %v3591_v15  ;;  %v3660_v7 = vmul.f32 %v9948_v50, %v3592_v40  ;;  %v3661_v46 = vmul.f32 %v9948_v50, %v3593_v18 }
 0x315   :  { %v3818_v29 = vadd.f32 %v12955_v33, %v3748_v10  ;;  %v3819_v47 = vadd.f32 %v12955_v33, %v3749_v19  ;;  %v3662_v51 = vmul.f32 %v9948_v50, %v3594_v31  ;;  %v3663_v43 = vmul.f32 %v9948_v50, %v3595_v1 }
 0x316   :  { %v3664_v26 = vmul.f32 %v9948_v50, %v3596_v56  ;;  %v3665_v42 = vmul.f32 %v9948_v50, %v3597_v3  ;;  %v3666_v25 = vmul.f32 %v9948_v50, %v3598_v24  ;;  %v3667_v0 = vmul.f32 %v9948_v50, %v3599_v6 }
 0x317   :  { %v3882_v45 = vmax.f32 %v3818_v29, 0.0  ;;  %v3883_v8 = vmax.f32 %v3819_v47, 0.0  ;;  %v18148_v36 = vsub.f32 %v12667_v14, %v12842_v55  ;;  %v18149_v12 = vsub.f32 %v12676_v38, %v12842_v55  ;;  %v12967_v40 = vpop.f32.mrb[36].mxu0 }
 0x318   :  { %18150 = vst [vmem:[#allocation52_spill] sm:$0xff] %v12967_v40  ;;  %v18151_v18 = vsub.f32 %v12714_v5, %v12842_v55  ;;  %v18152_v1 = vsub.f32 %v12723_v53, %v12842_v55  ;;  %v18153_v3 = vsub.f32 %v12709_v27, %v12842_v55  ;;  %v18154_v14 = vsub.f32 %v12721_v44, %v12842_v55  ;;  %v12981_v38 = vpop.f32.mrb[37].mxu0 }
 0x319   :  { %v3668_v17 = vmul.f32 %v9948_v50, %v18148_v36  ;;  %v3669_v15 = vmul.f32 %v9948_v50, %v18149_v12  ;;  %18155 = vst [vmem:[#allocation51_spill] sm:$0xff] %v12981_v38  ;;  %v9671_v47 = vpack.c.bf16 %v3882_v45, %v3882_v45  ;;  %v9672_v52 = vpack.c.bf16 %v3883_v8, %v3883_v8  ;;  %v12989_v29 = vpop.f32.mrb[38].mxu0 }
 0x31a   :  { %v3670_v31 = vmul.f32 %v9948_v50, %v18151_v18  ;;  %v3671_v56 = vmul.f32 %v9948_v50, %v18152_v1  ;;  %v3672_v24 = vmul.f32 %v9948_v50, %v18153_v3  ;;  %v3673_v6 = vmul.f32 %v9948_v50, %v18154_v14  ;;  %18158 = vst [vmem:[#allocation57_spill] sm:$0xff] %v12989_v29 }
 0x31b   :  { %v18156_v5 = vsub.f32 %v12755_v20, %v12842_v55  ;;  %v18157_v53 = vsub.f32 %v12766_v30, %v12842_v55  ;;  %v18159_v27 = vsub.f32 %v12753_v16, %v12842_v55  ;;  %v18160_v44 = vsub.f32 %v12763_v57, %v12842_v55  ;;  %v13003_v30 = vpop.f32.mrb[39].mxu0 }
 0x31c   :  { %v18161_v45 = vsub.f32 %v12787_v63, %v12842_v55  ;;  %v18162_v20 = vsub.f32 %v12807_v34, %v12842_v55  ;;  %18163 = vst [vmem:[#allocation55_spill] sm:$0xff] %v13003_v30  ;;  %v4587_v1 = vshrl.u32 %v9671_v47, 16  ;;  %v4595_v3 = vshrl.u32 %v9672_v52, 16 }
 0x31d   :  { %v3674_v10 = vmul.f32 %v9948_v50, %v18156_v5  ;;  %v3675_v19 = vmul.f32 %v9948_v50, %v18157_v53  ;;  %v3676_v36 = vmul.f32 %v9948_v50, %v18159_v27  ;;  %v3677_v12 = vmul.f32 %v9948_v50, %v18160_v44 }
 0x31e   :  { %v3680_v8 = vmul.f32 %v9948_v50, %v18161_v45  ;;  %v3681_v18 = vmul.f32 %v9948_v50, %v18162_v20  ;;  %v13006_v16 = vsel %vm330_vm6, %v3409_v49, 0.0  ;;  %v4598_v14 = vshll.u32 %v9672_v52, 16  ;;  %v5093_v50 = vld [vmem:[#allocation3 + $0xbc] sm:$0x1] }
 0x31f   :  { %v4590_v5 = vshll.u32 %v9671_v47, 16  ;;  %v3720_v57 = vmul.f32 %v12946_v35, %v3650_v61  ;;  %v3721_v53 = vmul.f32 %v12946_v35, %v3651_v37  ;;  %v4589_v63 = vrot.slane %v4587_v1, 7 }
 0x320   :  { %v4597_v27 = vrot.slane %v4595_v3, 7  ;;  %v3722_v44 = vmul.f32 %v12946_v35, %v3652_v58  ;;  %v3723_v34 = vmul.f32 %v12946_v35, %v3653_v59  ;;  %v18164_v55 = vmov 0 }
 0x321   :  { %v18165_v55 = vsel %vm13013_vm15, 4294967295, %v18164_v55  ;;  %v3724_v49 = vmul.f32 %v12946_v35, %v3654_v23  ;;  %v3725_v47 = vmul.f32 %v12946_v35, %v3655_v32  ;;  %v3726_v61 = vmul.f32 %v12946_v35, %v3656_v39 }
 0x322   :  { %18166 = vst [vmem:[#allocation33_spill] sm:$0xff] %v18165_v55  ;;  %v3727_v37 = vmul.f32 %v12946_v35, %v3657_v9  ;;  %v4593_v52 = vrot.slane %v4589_v63, 4  ;;  %v4600_v45 = vor.u32 %v4598_v14, %v4597_v27  ;;  %v4602_v20 = vrot.slane %v4597_v27, 4 }
 0x323   :  { %v3728_v58 = vmul.f32 %v12946_v35, %v3658_v60  ;;  %v4592_v59 = vor.u32 %v4590_v5, %v4589_v63  ;;  %v3729_v1 = vmul.f32 %v12946_v35, %v3659_v41  ;;  %v3730_v3 = vmul.f32 %v12946_v35, %v3660_v7  ;;  %v5089_v41 = vld [vmem:[#allocation3 + $0xb4] sm:$0xf] }
 0x324   :  { %v3731_v48 = vmul.f32 %v12946_v35, %v3661_v46  ;;  %v4601_v23 = vsel %vm13013_vm15, %v4593_v52, %v4600_v45  ;;  %v5094_v32 = vsel %vm12170_vm4, %v4602_v20, %v5093_v50  ;;  %v3732_v39 = vmul.f32 %v12946_v35, %v3662_v51 }
 0x325   :  { %v3733_v9 = vmul.f32 %v12946_v35, %v3663_v43  ;;  %v18167_v60 = vmov 0  ;;  %5092 = vst.msk [vmem:[#allocation3 + $0xb8] sm:$0xf] %vm3918_vm0, %v4601_v23  ;;  %5095 = vst [vmem:[#allocation3 + $0xbc] sm:$0x1] %v5094_v32  ;;  %v3734_v7 = vmul.f32 %v12946_v35, %v3664_v26  ;;  %v3735_v46 = vmul.f32 %v12946_v35, %v3665_v42 }
 0x326   :  { %v18168_v60 = vsel %vm13033_vm3, 4294967295, %v18167_v60  ;;  %v3736_v14 = vmul.f32 %v12946_v35, %v3666_v25  ;;  %v3737_v51 = vmul.f32 %v12946_v35, %v3667_v0  ;;  %v3738_v43 = vmul.f32 %v12946_v35, %v3668_v17 }
 0x327   :  { %18169 = vst [vmem:[#allocation35_spill] sm:$0xff] %v18168_v60  ;;  %v3739_v5 = vmul.f32 %v12946_v35, %v3669_v15  ;;  %v3740_v63 = vmul.f32 %v12946_v35, %v3670_v31  ;;  %v3741_v27 = vmul.f32 %v12946_v35, %v3671_v56  ;;  %v3742_v50 = vmul.f32 %v12946_v35, %v3672_v24 }
 0x328   :  { %v3743_v52 = vmul.f32 %v12946_v35, %v3673_v6  ;;  %v3744_v26 = vmul.f32 %v12946_v35, %v3674_v10  ;;  %v3745_v42 = vmul.f32 %v12946_v35, %v3675_v19  ;;  %v3746_v25 = vmul.f32 %v12946_v35, %v3676_v36 }
 0x329   :  { %v3747_v0 = vmul.f32 %v12946_v35, %v3677_v12  ;;  %v3750_v17 = vmul.f32 %v12946_v35, %v3680_v8  ;;  %v5090_v15 = vsel %vm13033_vm3, %v4592_v59, %v5089_v41  ;;  %v3751_v31 = vmul.f32 %v12946_v35, %v3681_v18 }
 0x32a   :  { %v13057_v56 = vadd.f32 %v12955_v33, %v3720_v57  ;;  %v13060_v24 = vadd.f32 %v12955_v33, %v3721_v53  ;;  %v13063_v6 = vadd.f32 %v12955_v33, %v3722_v44  ;;  %5091 = vst [vmem:[#allocation3 + $0xb4] sm:$0xf] %v5090_v15  ;;  %v13066_v10 = vadd.f32 %v12955_v33, %v3723_v34 }
 0x32b   :  { %v13069_v19 = vadd.f32 %v12955_v33, %v3724_v49  ;;  %v13072_v36 = vadd.f32 %v12955_v33, %v3725_v47  ;;  %v13075_v35 = vadd.f32 %v12955_v33, %v3726_v61  ;;  %v13078_v12 = vadd.f32 %v12955_v33, %v3727_v37 }
 0x32c   :  { %v13081_v8 = vadd.f32 %v12955_v33, %v3728_v58  ;;  %v13084_v18 = vadd.f32 %v12955_v33, %v3729_v1  ;;  %v13087_v57 = vadd.f32 %v12955_v33, %v3730_v3  ;;  %v13090_v53 = vadd.f32 %v12955_v33, %v3731_v48 }
 0x32d   :  { %v13093_v44 = vadd.f32 %v12955_v33, %v3732_v39  ;;  %v13096_v34 = vadd.f32 %v12955_v33, %v3733_v9  ;;  %v13099_v49 = vadd.f32 %v12955_v33, %v3734_v7  ;;  %v13102_v47 = vadd.f32 %v12955_v33, %v3735_v46 }
 0x32e   :  { %v13105_v61 = vadd.f32 %v12955_v33, %v3736_v14  ;;  %v13108_v37 = vadd.f32 %v12955_v33, %v3737_v51  ;;  %v13111_v48 = vadd.f32 %v12955_v33, %v3738_v43  ;;  %v13114_v45 = vadd.f32 %v12955_v33, %v3739_v5 }
 0x32f   :  { %v13117_v20 = vadd.f32 %v12955_v33, %v3740_v63  ;;  %v13120_v58 = vadd.f32 %v12955_v33, %v3741_v27  ;;  %v13123_v59 = vadd.f32 %v12955_v33, %v3742_v50  ;;  %v13126_v1 = vadd.f32 %v12955_v33, %v3743_v52 }
 0x330   :  { %v13129_v3 = vadd.f32 %v12955_v33, %v3744_v26  ;;  %v13132_v23 = vadd.f32 %v12955_v33, %v3745_v42  ;;  %v13135_v32 = vadd.f32 %v12955_v33, %v3746_v25  ;;  %v13138_v39 = vadd.f32 %v12955_v33, %v3747_v0 }
 0x331   :  { %v13141_v9 = vadd.f32 %v12955_v33, %v3750_v17  ;;  %v13144_v41 = vadd.f32 %v12955_v33, %v3751_v31  ;;  %v3854_v7 = vmax.f32 %v13057_v56, 0.0  ;;  %v3855_v46 = vmax.f32 %v13060_v24, 0.0  ;;  %v13155_v33 = vpop.f32.mrb[40].mxu0 }
 0x332   :  { %v3856_v14 = vmax.f32 %v13063_v6, 0.0  ;;  %v3857_v51 = vmax.f32 %v13066_v10, 0.0  ;;  %v3858_v43 = vmax.f32 %v13069_v19, 0.0  ;;  %v3859_v5 = vmax.f32 %v13072_v36, 0.0  ;;  %18170 = vst [vmem:[#allocation36_spill] sm:$0xff] %v13155_v33  ;;  %v13161_v0 = vpop.f32.mrb[41].mxu0 }
 0x333   :  { %v3860_v63 = vmax.f32 %v13075_v35, 0.0  ;;  %v3861_v27 = vmax.f32 %v13078_v12, 0.0  ;;  %v3862_v50 = vmax.f32 %v13081_v8, 0.0  ;;  %v3863_v52 = vmax.f32 %v13084_v18, 0.0  ;;  %18171 = vst [vmem:[#allocation37_spill] sm:$0xff] %v13161_v0  ;;  %v13167_v24 = vpop.f32.mrb[42].mxu0 }
 0x334   :  { %v3864_v26 = vmax.f32 %v13087_v57, 0.0  ;;  %v3865_v42 = vmax.f32 %v13090_v53, 0.0  ;;  %v3866_v25 = vmax.f32 %v13093_v44, 0.0  ;;  %v3867_v17 = vmax.f32 %v13096_v34, 0.0  ;;  %18172 = vst [vmem:[#allocation39_spill] sm:$0xff] %v13167_v24  ;;  %v13173_v35 = vpop.f32.mrb[43].mxu0 }
 0x335   :  { %v3868_v15 = vmax.f32 %v13099_v49, 0.0  ;;  %v3869_v31 = vmax.f32 %v13102_v47, 0.0  ;;  %v3870_v56 = vmax.f32 %v13105_v61, 0.0  ;;  %v3871_v6 = vmax.f32 %v13108_v37, 0.0  ;;  %18173 = vst [vmem:[#allocation79_spill] sm:$0xff] %v13173_v35 }
 0x336   :  { %v3872_v10 = vmax.f32 %v13111_v48, 0.0  ;;  %v3873_v19 = vmax.f32 %v13114_v45, 0.0  ;;  %v3874_v36 = vmax.f32 %v13117_v20, 0.0  ;;  %v3875_v12 = vmax.f32 %v13120_v58, 0.0 }
 0x337   :  { %v3876_v8 = vmax.f32 %v13123_v59, 0.0  ;;  %v3877_v18 = vmax.f32 %v13126_v1, 0.0  ;;  %v3878_v57 = vmax.f32 %v13129_v3, 0.0  ;;  %v3879_v53 = vmax.f32 %v13132_v23, 0.0 }
 0x338   :  { %v3880_v44 = vmax.f32 %v13135_v32, 0.0  ;;  %v3881_v34 = vmax.f32 %v13138_v39, 0.0  ;;  %v3884_v49 = vmax.f32 %v13141_v9, 0.0  ;;  %v3885_v47 = vmax.f32 %v13144_v41, 0.0 }
 0x339   :  { %v13186_v61 = vsel %vm330_vm6, %v12967_v40, 0.0  ;;  %v3412_v37 = vmul.f32 %v12967_v40, %v12967_v40  ;;  %v13190_v48 = vpack.c.bf16 %v3854_v7, %v3854_v7  ;;  %v13192_v45 = vpack.c.bf16 %v3855_v46, %v3855_v46 }
 0x33a   :  { %v13194_v20 = vpack.c.bf16 %v3856_v14, %v3856_v14  ;;  %v13196_v58 = vpack.c.bf16 %v3857_v51, %v3857_v51  ;;  %v13198_v59 = vpack.c.bf16 %v3858_v43, %v3858_v43  ;;  %v13203_v3 = vpack.c.bf16 %v3859_v5, %v3859_v5 }
 0x33b   :  { %v13201_v1 = vsel %vm330_vm6, %v3412_v37, 0.0  ;;  %v13205_v23 = vpack.c.bf16 %v3860_v63, %v3860_v63  ;;  %v13207_v32 = vpack.c.bf16 %v3861_v27, %v3861_v27  ;;  %v13209_v39 = vpack.c.bf16 %v3862_v50, %v3862_v50 }
 0x33c   :  { %v13211_v9 = vpack.c.bf16 %v3863_v52, %v3863_v52  ;;  %v13213_v41 = vpack.c.bf16 %v3864_v26, %v3864_v26  ;;  %v13215_v7 = vpack.c.bf16 %v3865_v42, %v3865_v42  ;;  %v13217_v46 = vpack.c.bf16 %v3866_v25, %v3866_v25 }
 0x33d   :  { %v13219_v14 = vpack.c.bf16 %v3867_v17, %v3867_v17  ;;  %v13221_v51 = vpack.c.bf16 %v3868_v15, %v3868_v15  ;;  %v13223_v43 = vpack.c.bf16 %v3869_v31, %v3869_v31  ;;  %v13225_v5 = vpack.c.bf16 %v3870_v56, %v3870_v56 }
 0x33e   :  { %v13227_v63 = vpack.c.bf16 %v3871_v6, %v3871_v6  ;;  %v13229_v27 = vpack.c.bf16 %v3872_v10, %v3872_v10  ;;  %v13231_v50 = vpack.c.bf16 %v3873_v19, %v3873_v19  ;;  %v13233_v52 = vpack.c.bf16 %v3874_v36, %v3874_v36 }
 0x33f   :  { %v13235_v26 = vpack.c.bf16 %v3875_v12, %v3875_v12  ;;  %v13237_v42 = vpack.c.bf16 %v3876_v8, %v3876_v8  ;;  %v13239_v25 = vpack.c.bf16 %v3877_v18, %v3877_v18  ;;  %v13241_v17 = vpack.c.bf16 %v3878_v57, %v3878_v57 }
 0x340   :  { %18174 = vst [vmem:[#allocation83_spill] sm:$0xff] %v13231_v50  ;;  %18175 = vst [vmem:[#allocation40_spill] sm:$0xff] %v13233_v52  ;;  %v13243_v15 = vpack.c.bf16 %v3879_v53, %v3879_v53  ;;  %v13245_v31 = vpack.c.bf16 %v3880_v44, %v3880_v44  ;;  %v13247_v56 = vpack.c.bf16 %v3881_v34, %v3881_v34  ;;  %v3309_v10 = vsel %vm330_vm6, %v12981_v38, 0.0 }
 0x341   :  { %18176 = vst [vmem:[#allocation59_spill] sm:$0xff] %v13235_v26  ;;  %18177 = vst [vmem:[#allocation58_spill] sm:$0xff] %v13237_v42  ;;  %v13249_v6 = vpack.c.bf16 %v3884_v49, %v3884_v49  ;;  %v3410_v19 = vmul.f32 %v12981_v38, %v12981_v38  ;;  %v3513_v36 = vadd.f32 %v13006_v16, %v12950_v21  ;;  %v4400_v34 = vshrl.u32 %v13205_v23, 16 }
 0x342   :  { %18178 = vst [vmem:[#allocation61_spill] sm:$0xff] %v13239_v25  ;;  %18179 = vst [vmem:[#allocation60_spill] sm:$0xff] %v13241_v17  ;;  %v13257_v12 = vpack.c.bf16 %v3885_v47, %v3885_v47  ;;  %v13260_v8 = vadd.f32 %v3309_v10, %v12940_v4  ;;  %v4383_v47 = vshrl.u32 %v13198_v59, 16  ;;  %v4417_v21 = vshrl.u32 %v13209_v39, 16 }
 0x343   :  { %18180 = vst [vmem:[#allocation41_spill] sm:$0xff] %v13243_v15  ;;  %18181 = vst [vmem:[#allocation42_spill] sm:$0xff] %v13245_v31  ;;  %v3514_v53 = vsel %vm330_vm6, %v3410_v19, 0.0  ;;  %v4391_v19 = vshrl.u32 %v13203_v3, 16  ;;  %v4425_v16 = vshrl.u32 %v13211_v9, 16  ;;  %v4434_v44 = vshrl.u32 %v13213_v41, 16 }
 0x344   :  { %18182 = vst [vmem:[#allocation44_spill] sm:$0xff] %v13247_v56  ;;  %18183 = vst [vmem:[#allocation45_spill] sm:$0xff] %v13249_v6  ;;  %v13268_v37 = vadd.f32 %v3514_v53, %v3513_v36  ;;  %v4408_v36 = vshrl.u32 %v13207_v32, 16  ;;  %v4442_v18 = vshrl.u32 %v13215_v7, 16  ;;  %v4451_v40 = vshrl.u32 %v13217_v46, 16 }
 0x345   :  { %18184 = vst [vmem:[#allocation47_spill] sm:$0xff] %v13257_v12  ;;  %v4459_v38 = vshrl.u32 %v13219_v14, 16  ;;  %v4468_v62 = vshrl.u32 %v13221_v51, 16  ;;  %v4476_v11 = vshrl.u32 %v13223_v43, 16  ;;  %v4485_v13 = vshrl.u32 %v13225_v5, 16 }
 0x346   :  { %v4493_v54 = vshrl.u32 %v13227_v63, 16  ;;  %v4502_v4 = vshrl.u32 %v13229_v27, 16  ;;  %v4510_v10 = vshrl.u32 %v13231_v50, 16  ;;  %v4519_v57 = vshrl.u32 %v13233_v52, 16 }
 0x347   :  { %v13301_v22 = vpop.f32.mrb[44].mxu0  ;;  %v4527_v0 = vshrl.u32 %v13235_v26, 16  ;;  %v4544_v60 = vshrl.u32 %v13239_v25, 16  ;;  %v4561_v55 = vshrl.u32 %v13243_v15, 16  ;;  %v4578_v28 = vshrl.u32 %v13247_v56, 16 }
 0x348   :  { %18185 = vst [vmem:[#allocation48_spill] sm:$0xff] %v13301_v22  ;;  %v13307_v35 = vpop.f32.mrb[45].mxu0  ;;  %v4536_v22 = vshrl.u32 %v13237_v42, 16  ;;  %v4604_v24 = vshrl.u32 %v13249_v6, 16  ;;  %v4612_v25 = vshrl.u32 %v13257_v12, 16  ;;  %v3413_v49 = vmul.f32 %v12989_v29, %v12989_v29 }
 0x349   :  { %18186 = vst [vmem:[#allocation64_spill] sm:$0xff] %v13307_v35  ;;  %v13313_v2 = vpop.f32.mrb[46].mxu0  ;;  %v4553_v35 = vshrl.u32 %v13241_v17, 16  ;;  %v13337_v53 = vsel %vm330_vm6, %v12989_v29, 0.0  ;;  %v18190_v26 = vshrl.u32 %v13190_v48, 16  ;;  %v18191_v42 = vshrl.u32 %v13192_v45, 16 }
 0x34a   :  { %18187 = vst [vmem:[#allocation63_spill] sm:$0xff] %v13313_v2  ;;  %v13319_v33 = vpop.f32.mrb[47].mxu0  ;;  %v4570_v2 = vshrl.u32 %v13245_v31, 16  ;;  %18189 = vst [vmem:[#allocation66_spill] sm:$0xff] %v13337_v53  ;;  %v18193_v6 = vshrl.u32 %v13194_v20, 16  ;;  %v18194_v17 = vshrl.u32 %v13196_v58, 16 }
 0x34b   :  { %18188 = vst [vmem:[#allocation70_spill] sm:$0xff] %v13319_v33  ;;  %v13341_v31 = vrot.slane %v18190_v26, 7  ;;  %v13345_v56 = vrot.slane %v18191_v42, 7  ;;  %v13348_v33 = vsel %vm330_vm6, %v3413_v49, 0.0  ;;  %v13358_v29 = vrot.slane %v4383_v47, 7 }
 0x34c   :  { %18192 = vst [vmem:[#allocation72_spill] sm:$0xff] %v13348_v33  ;;  %v13352_v15 = vrot.slane %v18193_v6, 7  ;;  %v13356_v12 = vrot.slane %v18194_v17, 7  ;;  %v13360_v53 = vrot.slane %v4391_v19, 7  ;;  %v13362_v26 = vrot.slane %v4400_v34, 7 }
 0x34d   :  { %v13364_v52 = vrot.slane %v4408_v36, 7  ;;  %v13366_v42 = vrot.slane %v4417_v21, 7  ;;  %v13368_v49 = vrot.slane %v4425_v16, 7  ;;  %v13370_v33 = vrot.slane %v4434_v44, 7 }
 0x34e   :  { %v13372_v6 = vrot.slane %v4442_v18, 7  ;;  %v13374_v50 = vrot.slane %v4451_v40, 7  ;;  %v13376_v17 = vrot.slane %v4459_v38, 7  ;;  %v13378_v47 = vrot.slane %v4468_v62, 7 }
 0x34f   :  { %v13380_v19 = vrot.slane %v4476_v11, 7  ;;  %v13382_v34 = vrot.slane %v4485_v13, 7  ;;  %v13384_v36 = vrot.slane %v4493_v54, 7  ;;  %v13386_v21 = vrot.slane %v4502_v4, 7 }
 0x350   :  { %v13388_v16 = vrot.slane %v4510_v10, 7  ;;  %v13390_v44 = vrot.slane %v4519_v57, 7  ;;  %v13392_v18 = vrot.slane %v4527_v0, 7  ;;  %v13394_v40 = vrot.slane %v4536_v22, 7 }
 0x351   :  { %18195 = vst [vmem:[#allocation71_spill] sm:$0xff] %v13384_v36  ;;  %v13396_v38 = vrot.slane %v4544_v60, 7  ;;  %v13398_v62 = vrot.slane %v4553_v35, 7  ;;  %v13400_v11 = vrot.slane %v4561_v55, 7  ;;  %v13402_v13 = vrot.slane %v4570_v2, 7 }
 0x352   :  { %18196 = vst [vmem:[#allocation75_spill] sm:$0xff] %v13388_v16  ;;  %18197 = vst [vmem:[#allocation74_spill] sm:$0xff] %v13392_v18  ;;  %v13404_v54 = vrot.slane %v4578_v28, 7  ;;  %v3311_v4 = vsel %vm330_vm6, %v13003_v30, 0.0  ;;  %v13408_v10 = vrot.slane %v4604_v24, 7  ;;  %v13410_v57 = vrot.slane %v4612_v25, 7 }
 0x353   :  { %18198 = vst [vmem:[#allocation78_spill] sm:$0xff] %v13396_v38  ;;  %18199 = vst [vmem:[#allocation77_spill] sm:$0xff] %v13400_v11  ;;  %v3312_v22 = vadd.f32 %v3311_v4, %v13260_v8  ;;  %v3411_v60 = vmul.f32 %v13003_v30, %v13003_v30  ;;  %v18202_v55 = vshll.u32 %v13190_v48, 16  ;;  %v18203_v2 = vshll.u32 %v13192_v45, 16 }
 0x354   :  { %18200 = vst [vmem:[#allocation84_spill] sm:$0xff] %v13404_v54  ;;  %18201 = vst [vmem:[#allocation81_spill] sm:$0xff] %v13410_v57  ;;  %v18205_v4 = vshll.u32 %v13194_v20, 16  ;;  %v18206_v45 = vshll.u32 %v13196_v58, 16  ;;  %v18209_v58 = vshll.u32 %v13205_v23, 16  ;;  %v18216_v23 = vshll.u32 %v13217_v46, 16 }
 0x355   :  { %v13418_v0 = vor.u32 %v18202_v55, %v13341_v31  ;;  %v13424_v35 = vor.u32 %v18203_v2, %v13345_v56  ;;  %v13428_v25 = vadd.f32 %v13186_v61, %v3312_v22  ;;  %v3516_v8 = vsel %vm330_vm6, %v3411_v60, 0.0 }
 0x356   :  { %v13434_v48 = vor.u32 %v18205_v4, %v13352_v15  ;;  %v3517_v28 = vadd.f32 %v3516_v8, %v13268_v37  ;;  %v13441_v2 = vor.u32 %v18206_v45, %v13356_v12  ;;  %v18207_v61 = vshll.u32 %v13198_v59, 16 }
 0x357   :  { %18204 = vst [vmem:[#allocation86_spill] sm:$0xff] %v13428_v25  ;;  %v18208_v60 = vshll.u32 %v13203_v3, 16  ;;  %v13459_v8 = vor.u32 %v18209_v58, %v13362_v26  ;;  %v4406_v59 = vrot.slane %v13362_v26, 4  ;;  %v18213_v58 = vshll.u32 %v13211_v9, 16 }
 0x358   :  { %v13447_v22 = vor.u32 %v18207_v61, %v13358_v29  ;;  %v13462_v45 = vadd.f32 %v13201_v1, %v3517_v28  ;;  %v18211_v61 = vshll.u32 %v13207_v32, 16  ;;  %v18214_v26 = vshll.u32 %v13213_v41, 16 }
 0x359   :  { %v13453_v4 = vor.u32 %v18208_v60, %v13360_v53  ;;  %v18212_v60 = vshll.u32 %v13209_v39, 16  ;;  %v4430_v1 = vor.u32 %v18213_v58, %v13368_v49  ;;  %v18215_v39 = vshll.u32 %v13215_v7, 16 }
 0x35a   :  { %18210 = vst [vmem:[#allocation85_spill] sm:$0xff] %v13462_v45  ;;  %v4413_v24 = vor.u32 %v18211_v61, %v13364_v52  ;;  %v13482_v32 = vor.u32 %v18214_v26, %v13370_v33  ;;  %v4440_v61 = vrot.slane %v13370_v33, 4  ;;  %v13492_v9 = vor.u32 %v18216_v23, %v13374_v50 }
 0x35b   :  { %v13472_v37 = vor.u32 %v18212_v60, %v13366_v42  ;;  %v4447_v60 = vor.u32 %v18215_v39, %v13372_v6  ;;  %v4457_v58 = vrot.slane %v13374_v50, 4  ;;  %v18217_v41 = vshll.u32 %v13219_v14, 16 }
 0x35c   :  { %v18218_v33 = vshll.u32 %v13221_v51, 16  ;;  %v4474_v39 = vrot.slane %v13378_v47, 4  ;;  %v18219_v46 = vshll.u32 %v13223_v43, 16  ;;  %v18221_v14 = vshll.u32 %v13225_v5, 16  ;;  %v18226_v5 = vld [vmem:[#allocation83_spill] sm:$0xff] }
 0x35d   :  { %v4464_v26 = vor.u32 %v18217_v41, %v13376_v17  ;;  %v4491_v28 = vrot.slane %v13382_v34, 4  ;;  %v18222_v51 = vshll.u32 %v13227_v63, 16  ;;  %v18224_v43 = vshll.u32 %v13229_v27, 16  ;;  %v18229_v63 = vld [vmem:[#allocation40_spill] sm:$0xff]  ;;  %v18232_v27 = vld [vmem:[#allocation59_spill] sm:$0xff] }
 0x35e   :  { %v13502_v7 = vor.u32 %v18218_v33, %v13378_v47  ;;  %v4481_v23 = vor.u32 %v18219_v46, %v13380_v19  ;;  %v13514_v41 = vor.u32 %v18221_v14, %v13382_v34  ;;  %v4508_v3 = vrot.slane %v13386_v21, 4 }
 0x35f   :  { %v13509_v50 = vpop.f32.mrb[48].mxu0  ;;  %v4498_v33 = vor.u32 %v18222_v51, %v13384_v36  ;;  %v13526_v46 = vor.u32 %v18224_v43, %v13386_v21  ;;  %v18227_v14 = vshll.u32 %v18226_v5, 16  ;;  %v18230_v51 = vshll.u32 %v18229_v63, 16  ;;  %v18235_v5 = vld [vmem:[#allocation58_spill] sm:$0xff]  ;;  %v18238_v63 = vld [vmem:[#allocation61_spill] sm:$0xff] }
 0x360   :  { %18220 = vst [vmem:[#allocation88_spill] sm:$0xff] %v13509_v50  ;;  %v13521_v20 = vpop.f32.mrb[49].mxu0  ;;  %v4525_v50 = vrot.slane %v13390_v44, 4  ;;  %v18233_v43 = vshll.u32 %v18232_v27, 16  ;;  %v18240_v27 = vld [vmem:[#allocation60_spill] sm:$0xff]  ;;  %v4559_v21 = vrot.slane %v13398_v62, 4 }
 0x361   :  { %18223 = vst [vmem:[#allocation87_spill] sm:$0xff] %v13521_v20  ;;  %18225 = vst [vmem:[#allocation6_spill] sm:$0xff] %v13526_v46  ;;  %v4515_v55 = vor.u32 %v18227_v14, %v13388_v16  ;;  %v13533_v30 = vpop.f32.mrb[50].mxu0  ;;  %v13538_v47 = vor.u32 %v18230_v51, %v13390_v44  ;;  %v18236_v14 = vshll.u32 %v18235_v5, 16  ;;  %v18239_v51 = vshll.u32 %v18238_v63, 16  ;;  %v18248_v44 = vld [vmem:[#allocation44_spill] sm:$0xff] }
 0x362   :  { %18228 = vst [vmem:[#allocation5_spill] sm:$0xff] %v13533_v30  ;;  %v4532_v20 = vor.u32 %v18233_v43, %v13392_v18  ;;  %v13545_v45 = vpop.f32.mrb[51].mxu0  ;;  %v4542_v30 = vrot.slane %v13394_v40, 4  ;;  %v18241_v43 = vshll.u32 %v18240_v27, 16  ;;  %v18249_v27 = vshll.u32 %v18248_v44, 16 }
 0x363   :  { %18231 = vst [vmem:[#allocation56_spill] sm:$0xff] %v13538_v47  ;;  %18234 = vst [vmem:[#allocation62_spill] sm:$0xff] %v13545_v45  ;;  %v13550_v34 = vor.u32 %v18236_v14, %v13394_v40  ;;  %v4549_v25 = vor.u32 %v18239_v51, %v13396_v38  ;;  %v18243_v45 = vld [vmem:[#allocation41_spill] sm:$0xff]  ;;  %v18245_v40 = vld [vmem:[#allocation42_spill] sm:$0xff]  ;;  %v4576_v51 = vrot.slane %v13402_v13, 4  ;;  %v18255_v46 = vrot.slane %v13341_v31, 4 }
 0x364   :  { %v13560_v47 = vor.u32 %v18241_v43, %v13398_v62  ;;  %v18244_v5 = vshll.u32 %v18243_v45, 16  ;;  %v18246_v18 = vshll.u32 %v18245_v40, 16  ;;  %v4583_v43 = vor.u32 %v18249_v27, %v13404_v54  ;;  %v13577_v62 = vld [vmem:[#allocation3 + $0x18] sm:$0xf]  ;;  %v13579_v38 = vld [vmem:[#allocation3 + $0xc] sm:$0xf] }
 0x365   :  { %18237 = vst [vmem:[#allocation7_spill] sm:$0xff] %v13550_v34  ;;  %v5002_v45 = vld [vmem:[#allocation3 + $0x20] sm:$0x1]  ;;  %v18250_v34 = vld [vmem:[#allocation45_spill] sm:$0xff]  ;;  %v13593_v54 = vld [vmem:[#allocation3 + $0x24] sm:$0xf]  ;;  %v4414_v27 = vsel %vm13013_vm15, %v4406_v59, %v4413_v24  ;;  %v4465_v24 = vsel %vm13013_vm15, %v4457_v58, %v4464_v26  ;;  %v4533_v58 = vsel %vm13013_vm15, %v4525_v50, %v4532_v20  ;;  %v4992_v50 = vsel %vm13033_vm3, %v13418_v0, %v13579_v38 }
 0x366   :  { %18242 = vst [vmem:[#allocation65_spill] sm:$0xff] %v13560_v47  ;;  %v4566_v14 = vor.u32 %v18244_v5, %v13400_v11  ;;  %v13570_v63 = vor.u32 %v18246_v18, %v13402_v13  ;;  %v4995_v5 = vld [vmem:[#allocation3 + $0x14] sm:$0x1]  ;;  %v18251_v11 = vshll.u32 %v18250_v34, 16  ;;  %v4610_v18 = vrot.slane %v13408_v10, 4  ;;  %v18253_v13 = vld [vmem:[#allocation47_spill] sm:$0xff] }
 0x367   :  { %v13591_v47 = vld [vmem:[#allocation3 + $0x30] sm:$0xf]  ;;  %v5016_v16 = vld [vmem:[#allocation3 + $0x38] sm:$0x1]  ;;  %v13612_v31 = vld [vmem:[#allocation3 + $0x48] sm:$0xf] }
 0x368   :  { %18247 = vst [vmem:[#allocation8_spill] sm:$0xff] %v13570_v63  ;;  %v13584_v40 = vor.u32 %v18251_v11, %v13408_v10  ;;  %v18254_v63 = vshll.u32 %v18253_v13, 16  ;;  %v4363_v11 = vsel %vm13013_vm15, %v18255_v46, %v13424_v35  ;;  %v18257_v10 = vrot.slane %v13352_v15, 4  ;;  %v18259_v35 = vld [vmem:[#allocation36_spill] sm:$0xff]  ;;  %5015 = vst.msk [vmem:[#allocation3 + $0x34] sm:$0xf] %vm3918_vm0, %v4414_v27 }
 0x369   :  { %v13618_v15 = vmul.f32 %v18259_v35, %v18259_v35  ;;  %4994 = vst.msk [vmem:[#allocation3 + $0x10] sm:$0xf] %vm3918_vm0, %v4363_v11  ;;  %v5030_v59 = vld [vmem:[#allocation3 + $0x50] sm:$0x1]  ;;  %v5023_v46 = vld [vmem:[#allocation3 + $0x44] sm:$0x1] }
 0x36a   :  { %18252 = vst [vmem:[#allocation68_spill] sm:$0xff] %v13584_v40  ;;  %v4617_v44 = vor.u32 %v18254_v63, %v13410_v57  ;;  %v4380_v34 = vsel %vm13013_vm15, %v18257_v10, %v13441_v2  ;;  %v18258_v63 = vrot.slane %v13358_v29, 4  ;;  %v5009_v57 = vld [vmem:[#allocation3 + $0x2c] sm:$0x1]  ;;  %v13614_v40 = vld [vmem:[#allocation3 + $0x3c] sm:$0xf] }
 0x36b   :  { %v18260_v2 = vrot.slane %v13366_v42, 4  ;;  %5001 = vst.msk [vmem:[#allocation3 + $0x1c] sm:$0xf] %vm3918_vm0, %v4380_v34  ;;  %v13632_v42 = vld [vmem:[#allocation3 + $0x60] sm:$0xf]  ;;  %v18267_v10 = vrot.slane %v13368_v49, 4 }
 0x36c   :  { %v4397_v13 = vsel %vm13013_vm15, %v18258_v63, %v13453_v4  ;;  %v4448_v4 = vsel %vm13013_vm15, %v4440_v61, %v4447_v60  ;;  %v4499_v61 = vsel %vm13013_vm15, %v4491_v28, %v4498_v33  ;;  %v4516_v60 = vsel %vm13013_vm15, %v4508_v3, %v4515_v55  ;;  %5036 = vst.msk [vmem:[#allocation3 + $0x58] sm:$0xf] %vm3918_vm0, %v4465_v24  ;;  %v5033_v26 = vld [vmem:[#allocation3 + $0x54] sm:$0xf]  ;;  %v5044_v27 = vld [vmem:[#allocation3 + $0x68] sm:$0x1] }
 0x36d   :  { %v4431_v29 = vsel %vm13013_vm15, %v18260_v2, %v4430_v1  ;;  %5008 = vst.msk [vmem:[#allocation3 + $0x28] sm:$0xf] %vm3918_vm0, %v4397_v13  ;;  %v4482_v1 = vsel %vm13013_vm15, %v4474_v39, %v4481_v23  ;;  %5029 = vst.msk [vmem:[#allocation3 + $0x4c] sm:$0xf] %vm3918_vm0, %v4448_v4  ;;  %v5037_v11 = vld [vmem:[#allocation3 + $0x5c] sm:$0x1]  ;;  %v4550_v39 = vsel %vm13013_vm15, %v4542_v30, %v4549_v25 }
 0x36e   :  { %5022 = vst.msk [vmem:[#allocation3 + $0x40] sm:$0xf] %vm3918_vm0, %v4431_v29  ;;  %v4567_v28 = vsel %vm13013_vm15, %v4559_v21, %v4566_v14  ;;  %v4584_v55 = vsel %vm13013_vm15, %v4576_v51, %v4583_v43  ;;  %v4618_v20 = vsel %vm13013_vm15, %v4610_v18, %v4617_v44  ;;  %5043 = vst.msk [vmem:[#allocation3 + $0x64] sm:$0xf] %vm3918_vm0, %v4482_v1  ;;  %v5054_v3 = vld [vmem:[#allocation3 + $0x78] sm:$0xf] }
 0x36f   :  { %5050 = vst.msk [vmem:[#allocation3 + $0x70] sm:$0xf] %vm3918_vm0, %v4499_v61  ;;  %5057 = vst.msk [vmem:[#allocation3 + $0x7c] sm:$0xf] %vm3918_vm0, %v4516_v60  ;;  %v5047_v23 = vld [vmem:[#allocation3 + $0x6c] sm:$0xf]  ;;  %v4999_v51 = vsel %vm13033_vm3, %v13434_v48, %v13577_v62  ;;  %v5006_v48 = vsel %vm13033_vm3, %v13447_v22, %v13593_v54  ;;  %v5034_v34 = vsel %vm13033_vm3, %v13492_v9, %v5033_v26 }
 0x370   :  { %5064 = vst.msk [vmem:[#allocation3 + $0x88] sm:$0xf] %vm3918_vm0, %v4533_v58  ;;  %v5058_v30 = vld [vmem:[#allocation3 + $0x80] sm:$0x1]  ;;  %v18262_v33 = vrot.slane %v13345_v56, 4  ;;  %v18264_v43 = vrot.slane %v13356_v12, 4 }
 0x371   :  { %5071 = vst.msk [vmem:[#allocation3 + $0x94] sm:$0xf] %vm3918_vm0, %v4550_v39  ;;  %5078 = vst.msk [vmem:[#allocation3 + $0xa0] sm:$0xf] %vm3918_vm0, %v4567_v28  ;;  %v5051_v56 = vld [vmem:[#allocation3 + $0x74] sm:$0x1] }
 0x372   :  { %v4996_v14 = vsel %vm12170_vm4, %v18262_v33, %v4995_v5  ;;  %v5003_v18 = vsel %vm12170_vm4, %v18264_v43, %v5002_v45  ;;  %5085 = vst.msk [vmem:[#allocation3 + $0xac] sm:$0xf] %vm3918_vm0, %v4584_v55  ;;  %5099 = vst.msk [vmem:[#allocation3 + $0xc4] sm:$0xf] %vm3918_vm0, %v4618_v20  ;;  %v5068_v38 = vld [vmem:[#allocation3 + $0x90] sm:$0xf]  ;;  %v5013_v45 = vsel %vm13033_vm3, %v13459_v8, %v13591_v47 }
 0x373   :  { %v5061_v0 = vld [vmem:[#allocation3 + $0x84] sm:$0xf]  ;;  %v18265_v12 = vrot.slane %v13360_v53, 4  ;;  %v18266_v5 = vrot.slane %v13364_v52, 4  ;;  %4993 = vst [vmem:[#allocation3 + $0xc] sm:$0xf] %v4992_v50  ;;  %v5024_v52 = vsel %vm12170_vm4, %v18267_v10, %v5023_v46 }
 0x374   :  { %4997 = vst [vmem:[#allocation3 + $0x14] sm:$0x1] %v4996_v14  ;;  %5000 = vst [vmem:[#allocation3 + $0x18] sm:$0xf] %v4999_v51  ;;  %v5072_v54 = vld [vmem:[#allocation3 + $0x98] sm:$0x1] }
 0x375   :  { %v5010_v62 = vsel %vm12170_vm4, %v18265_v12, %v5009_v57  ;;  %v5017_v44 = vsel %vm12170_vm4, %v18266_v5, %v5016_v16  ;;  %5004 = vst [vmem:[#allocation3 + $0x20] sm:$0x1] %v5003_v18  ;;  %v5065_v22 = vld [vmem:[#allocation3 + $0x8c] sm:$0x1]  ;;  %v5082_v53 = vld [vmem:[#allocation3 + $0xa8] sm:$0xf]  ;;  %v5020_v57 = vsel %vm13033_vm3, %v13472_v37, %v13614_v40  ;;  %v5027_v16 = vsel %vm13033_vm3, %v13482_v32, %v13612_v31 }
 0x376   :  { %v18268_v8 = vrot.slane %v13372_v6, 4  ;;  %5007 = vst [vmem:[#allocation3 + $0x24] sm:$0xf] %v5006_v48  ;;  %5011 = vst [vmem:[#allocation3 + $0x2c] sm:$0x1] %v5010_v62  ;;  %v18269_v63 = vrot.slane %v13376_v17, 4  ;;  %v5041_v6 = vsel %vm13033_vm3, %v13502_v7, %v13632_v42  ;;  %v5048_v17 = vsel %vm13033_vm3, %v13514_v41, %v5047_v23 }
 0x377   :  { %5014 = vst [vmem:[#allocation3 + $0x30] sm:$0xf] %v5013_v45  ;;  %5018 = vst [vmem:[#allocation3 + $0x38] sm:$0x1] %v5017_v44  ;;  %v5075_v37 = vld [vmem:[#allocation3 + $0x9c] sm:$0xf] }
 0x378   :  { %v5031_v47 = vsel %vm12170_vm4, %v18268_v8, %v5030_v59  ;;  %v5086_v40 = vld [vmem:[#allocation3 + $0xb0] sm:$0x1]  ;;  %v5079_v49 = vld [vmem:[#allocation3 + $0xa4] sm:$0x1]  ;;  %v5038_v32 = vsel %vm12170_vm4, %v18269_v63, %v5037_v11  ;;  %v18270_v13 = vrot.slane %v13380_v19, 4  ;;  %v18271_v29 = vld [vmem:[#allocation71_spill] sm:$0xff] }
 0x379   :  { %5021 = vst [vmem:[#allocation3 + $0x3c] sm:$0xf] %v5020_v57  ;;  %5025 = vst [vmem:[#allocation3 + $0x44] sm:$0x1] %v5024_v52  ;;  %v5096_v9 = vld [vmem:[#allocation3 + $0xc0] sm:$0xf] }
 0x37a   :  { %v5045_v31 = vsel %vm12170_vm4, %v18270_v13, %v5044_v27  ;;  %5028 = vst [vmem:[#allocation3 + $0x48] sm:$0xf] %v5027_v16  ;;  %5032 = vst [vmem:[#allocation3 + $0x50] sm:$0x1] %v5031_v47  ;;  %v5100_v2 = vld [vmem:[#allocation3 + $0xc8] sm:$0x1] }
 0x37b   :  { %v18272_v4 = vrot.slane %v18271_v29, 4  ;;  %v18273_v24 = vld [vmem:[#allocation6_spill] sm:$0xff]  ;;  %v18274_v59 = vld [vmem:[#allocation75_spill] sm:$0xff]  ;;  %5035 = vst [vmem:[#allocation3 + $0x54] sm:$0xf] %v5034_v34  ;;  %v18276_v1 = vld [vmem:[#allocation56_spill] sm:$0xff] }
 0x37c   :  { %v5055_v19 = vsel %vm13033_vm3, %v18273_v24, %v5054_v3  ;;  %v18275_v46 = vrot.slane %v18274_v59, 4  ;;  %5039 = vst [vmem:[#allocation3 + $0x5c] sm:$0x1] %v5038_v32  ;;  %5042 = vst [vmem:[#allocation3 + $0x60] sm:$0xf] %v5041_v6  ;;  %v5062_v41 = vsel %vm13033_vm3, %v18276_v1, %v5061_v0  ;;  %v18277_v61 = vld [vmem:[#allocation74_spill] sm:$0xff] }
 0x37d   :  { %v5052_v7 = vsel %vm12170_vm4, %v18272_v4, %v5051_v56  ;;  %5046 = vst [vmem:[#allocation3 + $0x68] sm:$0x1] %v5045_v31  ;;  %v18278_v60 = vrot.slane %v18277_v61, 4  ;;  %v18279_v26 = vld [vmem:[#allocation7_spill] sm:$0xff]  ;;  %v18280_v11 = vld [vmem:[#allocation78_spill] sm:$0xff]  ;;  %v18282_v55 = vld [vmem:[#allocation65_spill] sm:$0xff] }
 0x37e   :  { %v5059_v42 = vsel %vm12170_vm4, %v18275_v46, %v5058_v30  ;;  %v5069_v27 = vsel %vm13033_vm3, %v18279_v26, %v5068_v38  ;;  %v18281_v39 = vrot.slane %v18280_v11, 4  ;;  %5049 = vst [vmem:[#allocation3 + $0x6c] sm:$0xf] %v5048_v17  ;;  %5053 = vst [vmem:[#allocation3 + $0x74] sm:$0x1] %v5052_v7  ;;  %v5076_v20 = vsel %vm13033_vm3, %v18282_v55, %v5075_v37  ;;  %v18283_v3 = vld [vmem:[#allocation77_spill] sm:$0xff] }
 0x37f   :  { %v5066_v58 = vsel %vm12170_vm4, %v18278_v60, %v5065_v22  ;;  %5056 = vst [vmem:[#allocation3 + $0x78] sm:$0xf] %v5055_v19  ;;  %5060 = vst [vmem:[#allocation3 + $0x80] sm:$0x1] %v5059_v42  ;;  %v18284_v23 = vrot.slane %v18283_v3, 4  ;;  %v18285_v50 = vld [vmem:[#allocation8_spill] sm:$0xff] }
 0x380   :  { %v5073_v28 = vsel %vm12170_vm4, %v18281_v39, %v5072_v54  ;;  %v5083_v33 = vsel %vm13033_vm3, %v18285_v50, %v5082_v53  ;;  %v18286_v14 = vld [vmem:[#allocation84_spill] sm:$0xff]  ;;  %5063 = vst [vmem:[#allocation3 + $0x84] sm:$0xf] %v5062_v41  ;;  %5067 = vst [vmem:[#allocation3 + $0x8c] sm:$0x1] %v5066_v58  ;;  %v18289_v38 = vld [vmem:[#allocation81_spill] sm:$0xff] }
 0x381   :  { %v5080_v30 = vsel %vm12170_vm4, %v18284_v23, %v5079_v49  ;;  %v18287_v51 = vrot.slane %v18286_v14, 4  ;;  %5070 = vst [vmem:[#allocation3 + $0x90] sm:$0xf] %v5069_v27  ;;  %5074 = vst [vmem:[#allocation3 + $0x98] sm:$0x1] %v5073_v28  ;;  %v18288_v18 = vld [vmem:[#allocation68_spill] sm:$0xff] }
 0x382   :  { %v5097_v56 = vsel %vm13033_vm3, %v18288_v18, %v5096_v9  ;;  %v18290_v0 = vrot.slane %v18289_v38, 4  ;;  %v18291_v12 = vld [vmem:[#allocation86_spill] sm:$0xff]  ;;  %v18293_v5 = vld [vmem:[#allocation37_spill] sm:$0xff]  ;;  %5077 = vst [vmem:[#allocation3 + $0x9c] sm:$0xf] %v5076_v20  ;;  %v3321_v22 = vsel %vm330_vm6, %v18259_v35, 0.0 }
 0x383   :  { %v5087_v43 = vsel %vm12170_vm4, %v18287_v51, %v5086_v40  ;;  %v18292_v62 = vld [vmem:[#allocation66_spill] sm:$0xff]  ;;  %v3317_v44 = vsel %vm330_vm6, %v18293_v5, 0.0  ;;  %5081 = vst [vmem:[#allocation3 + $0xa4] sm:$0x1] %v5080_v30  ;;  %5084 = vst [vmem:[#allocation3 + $0xa8] sm:$0xf] %v5083_v33  ;;  %v3414_v57 = vmul.f32 %v18293_v5, %v18293_v5 }
 0x384   :  { %v5101_v48 = vsel %vm12170_vm4, %v18290_v0, %v5100_v2  ;;  %v3316_v45 = vadd.f32 %v18292_v62, %v18291_v12  ;;  %5088 = vst [vmem:[#allocation3 + $0xb0] sm:$0x1] %v5087_v43  ;;  %v13777_v54 = vld [vmem:[#allocation3 + $0x1c] sm:$0xf]  ;;  %v3526_v53 = vsel %vm330_vm6, %v13618_v15, 0.0  ;;  %v18295_v52 = vld [vmem:[#allocation72_spill] sm:$0xff] }
 0x385   :  { %v18294_v10 = vld [vmem:[#allocation85_spill] sm:$0xff]  ;;  %5098 = vst [vmem:[#allocation3 + $0xc0] sm:$0xf] %v5097_v56  ;;  %5102 = vst [vmem:[#allocation3 + $0xc8] sm:$0x1] %v5101_v48  ;;  %v18296_v37 = vld [vmem:[#allocation79_spill] sm:$0xff] }
 0x386   :  { %v3521_v16 = vadd.f32 %v18295_v52, %v18294_v10  ;;  %v13787_v8 = vld [vmem:[#allocation3 + $0x18] sm:$0xf]  ;;  %v3318_v47 = vadd.f32 %v3317_v44, %v3316_v45  ;;  %v3319_v40 = vsel %vm330_vm6, %v18296_v37, 0.0  ;;  %v3415_v49 = vmul.f32 %v18296_v37, %v18296_v37  ;;  %v5223_v34 = vld [vmem:[#allocation3 + $0x20] sm:$0x1]  ;;  %v18297_v32 = vld [vmem:[#allocation39_spill] sm:$0xff] }
 0x387   :  { %v5596_v15 = vshrl.u32 %v13787_v8, 16  ;;  %v3522_v63 = vsel %vm330_vm6, %v3414_v57, 0.0  ;;  %v13797_v6 = vmul.f32 %v18297_v32, %v18297_v32  ;;  %v5599_v13 = vshll.u32 %v13787_v8, 16  ;;  %v13801_v9 = vld [vmem:[#allocation3 + $0xc] sm:$0xf]  ;;  %v13814_v28 = vpop.f32.mrb[52].mxu0 }
 0x388   :  { %v5605_v31 = vshll.u32 %v13777_v54, 16  ;;  %v3523_v2 = vadd.f32 %v3522_v63, %v3521_v16  ;;  %v3320_v17 = vadd.f32 %v3319_v40, %v3318_v47  ;;  %v3524_v29 = vsel %vm330_vm6, %v3415_v49, 0.0  ;;  %v13804_v7 = vld [vmem:[#allocation3 + $0x10] sm:$0xf]  ;;  %v5220_v41 = vld [vmem:[#allocation3 + $0x14] sm:$0x1] }
 0x389   :  { %v5598_v4 = vrot.slane %v5596_v15, 4  ;;  %v5601_v24 = vrot.slane %v5599_v13, 5  ;;  %v5609_v59 = vshrl.u32 %v13777_v54, 16  ;;  %v5615_v46 = vshll.u32 %v5223_v34, 16  ;;  %v13812_v39 = vld [vmem:[#allocation3 + $0x30] sm:$0xf] }
 0x38a   :  { %v5607_v19 = vrot.slane %v5605_v31, 5  ;;  %v13807_v42 = vadd.f32 %v3321_v22, %v3320_v17  ;;  %v3525_v1 = vadd.f32 %v3524_v29, %v3523_v2  ;;  %v5572_v61 = vshrl.u32 %v13801_v9, 16  ;;  %v13819_v30 = vld [vmem:[#allocation3 + $0x34] sm:$0xf]  ;;  %v13821_v50 = vpop.f32.mrb[53].mxu0 }
 0x38b   :  { %v5575_v60 = vshll.u32 %v13801_v9, 16  ;;  %v5602_v58 = vor.u32 %v5601_v24, %v5598_v4  ;;  %v5611_v26 = vrot.slane %v5609_v59, 4  ;;  %v5617_v27 = vrot.slane %v5615_v46, 5  ;;  %v13823_v18 = vpop.f32.mrb[54].mxu0  ;;  %v5229_v0 = vld [vmem:[#allocation3 + $0x38] sm:$0x1] }
 0x38c   :  { %v5581_v11 = vshll.u32 %v13804_v7, 16  ;;  %v13816_v55 = vadd.f32 %v3526_v53, %v3525_v1  ;;  %v5574_v20 = vrot.slane %v5572_v61, 4  ;;  %v5585_v23 = vshrl.u32 %v13804_v7, 16  ;;  %v13827_v62 = vpop.f32.mrb[55].mxu0  ;;  %v13832_v40 = vld [vmem:[#allocation3 + $0x24] sm:$0xf] }
 0x38d   :  { %v5577_v3 = vrot.slane %v5575_v60, 5  ;;  %v5603_v33 = vrot.slane %v5602_v58, 4  ;;  %v5612_v14 = vor.u32 %v5611_v26, %v5607_v19  ;;  %v5591_v43 = vshll.u32 %v5220_v41, 16  ;;  %v13837_v13 = vld [vmem:[#allocation3 + $0x28] sm:$0xf] }
 0x38e   :  { %v5583_v51 = vrot.slane %v5581_v11, 5  ;;  %v5587_v38 = vrot.slane %v5585_v23, 4  ;;  %v5644_v48 = vshrl.u32 %v13812_v39, 16  ;;  %v5647_v12 = vshll.u32 %v13812_v39, 16  ;;  %v13851_v58 = vld [vmem:[#allocation3 + $0x48] sm:$0xf] }
 0x38f   :  { %v5578_v56 = vor.u32 %v5577_v3, %v5574_v20  ;;  %v5608_v44 = vsel %vm10192_vm2, %v5603_v33, %v5607_v19  ;;  %v5613_v22 = vrot.slane %v5612_v14, 4  ;;  %v5593_v53 = vrot.slane %v5591_v43, 5  ;;  %v5226_v19 = vld [vmem:[#allocation3 + $0x2c] sm:$0x1] }
 0x390   :  { %v5653_v57 = vshll.u32 %v13819_v30, 16  ;;  %v5588_v52 = vor.u32 %v5587_v38, %v5583_v51  ;;  %v5646_v16 = vrot.slane %v5644_v48, 4  ;;  %v5649_v47 = vrot.slane %v5647_v12, 5  ;;  %v13855_v3 = vld [vmem:[#allocation3 + $0x4c] sm:$0xf] }
 0x391   :  { %v5579_v10 = vrot.slane %v5578_v56, 4  ;;  %v5618_v49 = vsel %vm10192_vm2, %v5613_v22, %v5617_v27  ;;  %v5657_v15 = vshrl.u32 %v13819_v30, 16  ;;  %v5663_v63 = vshll.u32 %v5229_v0, 16  ;;  %v5235_v38 = vld [vmem:[#allocation3 + $0x50] sm:$0x1] }
 0x392   :  { %v5655_v34 = vrot.slane %v5653_v57, 5  ;;  %v13839_v31 = vcombine.low %v5608_v44, %v5618_v49  ;;  %v5589_v17 = vrot.slane %v5588_v52, 4  ;;  %v5650_v29 = vor.u32 %v5649_v47, %v5646_v16  ;;  %v13865_v57 = vld [vmem:[#allocation3 + $0x3c] sm:$0xf]  ;;  %v13869_v49 = vld [vmem:[#allocation3 + $0x40] sm:$0xf] }
 0x393   :  { %v5584_v2 = vsel %vm10192_vm2, %v5579_v10, %v5583_v51  ;;  %v5659_v4 = vrot.slane %v5657_v15, 4  ;;  %v5665_v24 = vrot.slane %v5663_v63, 5  ;;  %v5620_v59 = vshrl.u32 %v13832_v40, 16 }
 0x394   :  { %18299 = vst [vmem:[#allocation9_spill] sm:$0xff] %v13839_v31  ;;  %v5623_v46 = vshll.u32 %v13832_v40, 16  ;;  %6415 = vrot.lane.b32.xlu0 %v13839_v31, %s10112_s29  ;;  %v5594_v1 = vsel %vm10192_vm2, %v5589_v17, %v5593_v53  ;;  %v5651_v41 = vrot.slane %v5650_v29, 4  ;;  %v5629_v61 = vshll.u32 %v13837_v13, 16 }
 0x395   :  { %v5633_v60 = vshrl.u32 %v13837_v13, 16  ;;  %v13853_v26 = vcombine.low %v5584_v2, %v5594_v1  ;;  %v5660_v27 = vor.u32 %v5659_v4, %v5655_v34  ;;  %v5622_v11 = vrot.slane %v5620_v59, 4 }
 0x396   :  { %v5625_v20 = vrot.slane %v5623_v46, 5  ;;  %v5656_v23 = vsel %vm10192_vm2, %v5651_v41, %v5655_v34  ;;  %v5631_v33 = vrot.slane %v5629_v61, 5  ;;  %v5639_v51 = vshll.u32 %v5226_v19, 16  ;;  %v5232_v46 = vld [vmem:[#allocation3 + $0x44] sm:$0x1] }
 0x397   :  { %18300 = vst [vmem:[#allocation69_spill] sm:$0xff] %v13853_v26  ;;  %v5635_v14 = vrot.slane %v5633_v60, 4  ;;  %6413 = vrot.lane.b32.xlu1 %v13853_v26, %s10112_s29  ;;  %v5661_v43 = vrot.slane %v5660_v27, 4  ;;  %v5692_v0 = vshrl.u32 %v13851_v58, 16  ;;  %v5695_v48 = vshll.u32 %v13851_v58, 16 }
 0x398   :  { %v5626_v56 = vor.u32 %v5625_v20, %v5622_v11  ;;  %v5641_v44 = vrot.slane %v5639_v51, 5  ;;  %v5701_v22 = vshll.u32 %v13855_v3, 16  ;;  %v5705_v53 = vshrl.u32 %v13855_v3, 16  ;;  %v13882_v61 = vld [vmem:[#allocation3 + $0x60] sm:$0xf] }
 0x399   :  { %v5636_v12 = vor.u32 %v5635_v14, %v5631_v33  ;;  %v5666_v10 = vsel %vm10192_vm2, %v5661_v43, %v5665_v24  ;;  %v5694_v16 = vrot.slane %v5692_v0, 4  ;;  %v5697_v47 = vrot.slane %v5695_v48, 5 }
 0x39a   :  { %v5627_v52 = vrot.slane %v5626_v56, 4  ;;  %v13871_v34 = vcombine.low %v5656_v23, %v5666_v10  ;;  %v5703_v63 = vrot.slane %v5701_v22, 5  ;;  %v5707_v2 = vrot.slane %v5705_v53, 4  ;;  %v13886_v23 = vld [vmem:[#allocation3 + $0x64] sm:$0xf] }
 0x39b   :  { %v5637_v15 = vrot.slane %v5636_v12, 4  ;;  %v5698_v29 = vor.u32 %v5697_v47, %v5694_v16  ;;  %v5711_v4 = vshll.u32 %v5235_v38, 16  ;;  %v5668_v19 = vshrl.u32 %v13865_v57, 16  ;;  %v5241_v53 = vld [vmem:[#allocation3 + $0x68] sm:$0x1] }
 0x39c   :  { %18301 = vst [vmem:[#allocation10_spill] sm:$0xff] %v13871_v34  ;;  %v5632_v17 = vsel %vm10192_vm2, %v5627_v52, %v5631_v33  ;;  %6419 = vrot.lane.b32.xlu0 %v13871_v34, %s10112_s29  ;;  %v5708_v59 = vor.u32 %v5707_v2, %v5703_v63  ;;  %v5671_v1 = vshll.u32 %v13865_v57, 16  ;;  %v5677_v41 = vshll.u32 %v13869_v49, 16  ;;  %v13898_v52 = vld [vmem:[#allocation3 + $0x54] sm:$0xf] }
 0x39d   :  { %v5642_v24 = vsel %vm10192_vm2, %v5637_v15, %v5641_v44  ;;  %v5699_v27 = vrot.slane %v5698_v29, 4  ;;  %v5713_v11 = vrot.slane %v5711_v4, 5  ;;  %v5670_v20 = vrot.slane %v5668_v19, 4  ;;  %v13902_v2 = vld [vmem:[#allocation3 + $0x58] sm:$0xf] }
 0x39e   :  { %v13884_v60 = vcombine.low %v5632_v17, %v5642_v24  ;;  %v5709_v33 = vrot.slane %v5708_v59, 4  ;;  %v5673_v14 = vrot.slane %v5671_v1, 5  ;;  %v5679_v51 = vrot.slane %v5677_v41, 5  ;;  %v13904_v17 = vpop.f32.mrb[56].mxu0 }
 0x39f   :  { %v5681_v43 = vshrl.u32 %v13869_v49, 16  ;;  %v5704_v56 = vsel %vm10192_vm2, %v5699_v27, %v5703_v63  ;;  %v5687_v38 = vshll.u32 %v5232_v46, 16  ;;  %v5740_v0 = vshrl.u32 %v13882_v61, 16  ;;  %v13907_v59 = vpop.f32.mrb[57].mxu0 }
 0x3a0   :  { %18302 = vst [vmem:[#allocation76_spill] sm:$0xff] %v13884_v60  ;;  %6417 = vrot.lane.b32.xlu1 %v13884_v60, %s10112_s29  ;;  %v5743_v48 = vshll.u32 %v13882_v61, 16  ;;  %v5714_v12 = vsel %vm10192_vm2, %v5709_v33, %v5713_v11  ;;  %v5674_v44 = vor.u32 %v5673_v14, %v5670_v20  ;;  %v5749_v10 = vshll.u32 %v13886_v23, 16  ;;  %v13913_v11 = vpop.f32.mrb[58].mxu0 }
 0x3a1   :  { %v5683_v22 = vrot.slane %v5681_v43, 4  ;;  %v13900_v16 = vcombine.low %v5704_v56, %v5714_v12  ;;  %v5689_v47 = vrot.slane %v5687_v38, 5  ;;  %v5742_v15 = vrot.slane %v5740_v0, 4  ;;  %v5238_v43 = vld [vmem:[#allocation3 + $0x5c] sm:$0x1]  ;;  %v13918_v38 = vpop.f32.mrb[59].mxu0 }
 0x3a2   :  { %v5745_v63 = vrot.slane %v5743_v48, 5  ;;  %v5675_v29 = vrot.slane %v5674_v44, 4  ;;  %v5751_v19 = vrot.slane %v5749_v10, 5  ;;  %v5753_v24 = vshrl.u32 %v13886_v23, 16 }
 0x3a3   :  { %18303 = vst [vmem:[#allocation11_spill] sm:$0xff] %v13900_v16  ;;  %v5684_v4 = vor.u32 %v5683_v22, %v5679_v51  ;;  %6423 = vrot.lane.b32.xlu0 %v13900_v16, %s10112_s29  ;;  %v5759_v1 = vshll.u32 %v5241_v53, 16  ;;  %v5716_v41 = vshrl.u32 %v13898_v52, 16  ;;  %v5719_v27 = vshll.u32 %v13898_v52, 16  ;;  %v13920_v22 = vld [vmem:[#allocation3 + $0x78] sm:$0xf] }
 0x3a4   :  { %v5746_v46 = vor.u32 %v5745_v63, %v5742_v15  ;;  %v5680_v20 = vsel %vm10192_vm2, %v5675_v29, %v5679_v51  ;;  %v5755_v14 = vrot.slane %v5753_v24, 4  ;;  %v5725_v56 = vshll.u32 %v13902_v2, 16  ;;  %v13925_v63 = vld [vmem:[#allocation3 + $0x7c] sm:$0xf] }
 0x3a5   :  { %v5685_v33 = vrot.slane %v5684_v4, 4  ;;  %v5761_v48 = vrot.slane %v5759_v1, 5  ;;  %v5718_v12 = vrot.slane %v5716_v41, 4  ;;  %v5721_v44 = vrot.slane %v5719_v27, 5  ;;  %v5247_v27 = vld [vmem:[#allocation3 + $0x80] sm:$0x1] }
 0x3a6   :  { %v5747_v0 = vrot.slane %v5746_v46, 4  ;;  %v5756_v10 = vor.u32 %v5755_v14, %v5751_v19  ;;  %v5727_v15 = vrot.slane %v5725_v56, 5  ;;  %v5729_v51 = vshrl.u32 %v13902_v2, 16 }
 0x3a7   :  { %v5690_v53 = vsel %vm10192_vm2, %v5685_v33, %v5689_v47  ;;  %v5722_v24 = vor.u32 %v5721_v44, %v5718_v12  ;;  %v5735_v46 = vshll.u32 %v5238_v43, 16  ;;  %v5788_v16 = vshrl.u32 %v13920_v22, 16  ;;  %v13941_v44 = vld [vmem:[#allocation3 + $0x70] sm:$0xf] }
 0x3a8   :  { %v13927_v29 = vcombine.low %v5680_v20, %v5690_v53  ;;  %v5752_v4 = vsel %vm10192_vm2, %v5747_v0, %v5751_v19  ;;  %v5757_v1 = vrot.slane %v5756_v10, 4  ;;  %v5731_v41 = vrot.slane %v5729_v51, 4  ;;  %v13937_v53 = vld [vmem:[#allocation3 + $0x6c] sm:$0xf] }
 0x3a9   :  { %v5791_v47 = vshll.u32 %v13920_v22, 16  ;;  %v5723_v33 = vrot.slane %v5722_v24, 4  ;;  %v5737_v14 = vrot.slane %v5735_v46, 5  ;;  %v5797_v20 = vshll.u32 %v13925_v63, 16 }
 0x3aa   :  { %18304 = vst [vmem:[#allocation80_spill] sm:$0xff] %v13927_v29  ;;  %6421 = vrot.lane.b32.xlu1 %v13927_v29, %s10112_s29  ;;  %v5801_v56 = vshrl.u32 %v13925_v63, 16  ;;  %v5762_v19 = vsel %vm10192_vm2, %v5757_v1, %v5761_v48  ;;  %v5732_v43 = vor.u32 %v5731_v41, %v5727_v15  ;;  %v5790_v0 = vrot.slane %v5788_v16, 4  ;;  %v5244_v16 = vld [vmem:[#allocation3 + $0x74] sm:$0x1] }
 0x3ab   :  { %v5793_v12 = vrot.slane %v5791_v47, 5  ;;  %v13943_v10 = vcombine.low %v5752_v4, %v5762_v19  ;;  %v5728_v51 = vsel %vm10192_vm2, %v5723_v33, %v5727_v15  ;;  %v5799_v24 = vrot.slane %v5797_v20, 5 }
 0x3ac   :  { %v5803_v46 = vrot.slane %v5801_v56, 4  ;;  %v5733_v29 = vrot.slane %v5732_v43, 4  ;;  %v5807_v60 = vshll.u32 %v5247_v27, 16  ;;  %v5764_v26 = vshrl.u32 %v13937_v53, 16  ;;  %v4014_v27 = vld [vmem:[#allocation3 + $0x138] sm:$0x1] }
 0x3ad   :  { %18305 = vst [vmem:[#allocation12_spill] sm:$0xff] %v13943_v10  ;;  %v5794_v34 = vor.u32 %v5793_v12, %v5790_v0  ;;  %6427 = vrot.lane.b32.xlu0 %v13943_v10, %s10112_s29  ;;  %v5767_v1 = vshll.u32 %v13937_v53, 16  ;;  %v5773_v4 = vshll.u32 %v13941_v44, 16  ;;  %v5777_v41 = vshrl.u32 %v13941_v44, 16 }
 0x3ae   :  { %v5804_v48 = vor.u32 %v5803_v46, %v5799_v24  ;;  %v5738_v15 = vsel %vm10192_vm2, %v5733_v29, %v5737_v14  ;;  %v5809_v33 = vrot.slane %v5807_v60, 5  ;;  %v5766_v20 = vrot.slane %v5764_v26, 4  ;;  %v4011_v14 = vld [vmem:[#allocation3 + $0x12c] sm:$0x1] }
 0x3af   :  { %v5795_v47 = vrot.slane %v5794_v34, 4  ;;  %v13955_v56 = vcombine.low %v5728_v51, %v5738_v15  ;;  %v5769_v43 = vrot.slane %v5767_v1, 5  ;;  %v5775_v0 = vrot.slane %v5773_v4, 5  ;;  %v13974_v1 = vld [vmem:[#allocation3 + $0x90] sm:$0xf] }
 0x3b0   :  { %v5805_v19 = vrot.slane %v5804_v48, 4  ;;  %v3323_v12 = vsel %vm330_vm6, %v18297_v32, 0.0  ;;  %v5779_v10 = vrot.slane %v5777_v41, 4  ;;  %v5783_v31 = vshll.u32 %v5244_v16, 16  ;;  %v18309_v15 = vld [vmem:[#allocation64_spill] sm:$0xff] }
 0x3b1   :  { %18306 = vst [vmem:[#allocation82_spill] sm:$0xff] %v13955_v56  ;;  %v5800_v46 = vsel %vm10192_vm2, %v5795_v47, %v5799_v24  ;;  %v3528_v29 = vsel %vm330_vm6, %v13797_v6, 0.0  ;;  %6425 = vrot.lane.b32.xlu1 %v13955_v56, %s10112_s29  ;;  %v5770_v34 = vor.u32 %v5769_v43, %v5766_v20  ;;  %v4015_v60 = vsel %vm12170_vm4, 0, %v4014_v27  ;;  %v18308_v24 = vld [vmem:[#allocation48_spill] sm:$0xff]  ;;  %v5253_v43 = vld [vmem:[#allocation3 + $0x98] sm:$0x1] }
 0x3b2   :  { %v5810_v26 = vsel %vm10192_vm2, %v5805_v19, %v5809_v33  ;;  %v5780_v48 = vor.u32 %v5779_v10, %v5775_v0  ;;  %v3420_v16 = vmul.f32 %v18308_v24, %v18308_v24  ;;  %4016 = vst [vmem:[#allocation3 + $0x138] sm:$0x1] %v4015_v60  ;;  %v3324_v6 = vadd.f32 %v3323_v12, %v13807_v42  ;;  %v13980_v20 = vld [vmem:[#allocation3 + $0x94] sm:$0xf] }
 0x3b3   :  { %v13969_v51 = vcombine.low %v5800_v46, %v5810_v26  ;;  %v5771_v4 = vrot.slane %v5770_v34, 4  ;;  %v5785_v41 = vrot.slane %v5783_v31, 5  ;;  %v3325_v47 = vsel %vm330_vm6, %v18309_v15, 0.0  ;;  %v13992_v34 = vld [vmem:[#allocation3 + $0x84] sm:$0xf] }
 0x3b4   :  { %v3418_v33 = vmul.f32 %v18309_v15, %v18309_v15  ;;  %v5781_v10 = vrot.slane %v5780_v48, 4  ;;  %v3326_v27 = vadd.f32 %v3325_v47, %v3324_v6  ;;  %v3529_v19 = vadd.f32 %v3528_v29, %v13816_v55  ;;  %18310 = vst [vmem:[#allocation14_spill] sm:$0xff] %v13992_v34  ;;  %v14000_v48 = vld [vmem:[#allocation3 + $0x88] sm:$0xf] }
 0x3b5   :  { %18307 = vst [vmem:[#allocation13_spill] sm:$0xff] %v13969_v51  ;;  %6431 = vrot.lane.b32.xlu0 %v13969_v51, %s10112_s29  ;;  %v4012_v42 = vsel %vm12170_vm4, 0, %v4011_v14  ;;  %v5776_v31 = vsel %vm10192_vm2, %v5771_v4, %v5775_v0  ;;  %v5836_v46 = vshrl.u32 %v13974_v1, 16  ;;  %v5839_v26 = vshll.u32 %v13974_v1, 16  ;;  %18311 = vst [vmem:[#allocation15_spill] sm:$0xff] %v14000_v48 }
 0x3b6   :  { %v3530_v12 = vsel %vm330_vm6, %v3418_v33, 0.0  ;;  %4013 = vst [vmem:[#allocation3 + $0x12c] sm:$0x1] %v4012_v42  ;;  %v5786_v60 = vsel %vm10192_vm2, %v5781_v10, %v5785_v41  ;;  %v5845_v29 = vshll.u32 %v13980_v20, 16  ;;  %v5849_v14 = vshrl.u32 %v13980_v20, 16 }
 0x3b7   :  { %v13996_v55 = vadd.f32 %v3530_v12, %v3529_v19  ;;  %v14002_v0 = vcombine.low %v5776_v31, %v5786_v60  ;;  %v5838_v6 = vrot.slane %v5836_v46, 4  ;;  %v5841_v4 = vrot.slane %v5839_v26, 5  ;;  %v5250_v33 = vld [vmem:[#allocation3 + $0x8c] sm:$0x1]  ;;  %v14010_v31 = vpop.f32.mrb[60].mxu0 }
 0x3b8   :  { %v5855_v47 = vshll.u32 %v5253_v43, 16  ;;  %v5847_v42 = vrot.slane %v5845_v29, 5  ;;  %v5851_v51 = vrot.slane %v5849_v14, 4  ;;  %v5812_v56 = vshrl.u32 %v13992_v34, 16  ;;  %18313 = vst [vmem:[#allocation17_spill] sm:$0xff] %v14010_v31  ;;  %v14012_v14 = vpop.f32.mrb[61].mxu0 }
 0x3b9   :  { %18312 = vst [vmem:[#allocation16_spill] sm:$0xff] %v14002_v0  ;;  %v5815_v41 = vshll.u32 %v13992_v34, 16  ;;  %6429 = vrot.lane.b32.xlu1 %v14002_v0, %s10112_s29  ;;  %v5842_v10 = vor.u32 %v5841_v4, %v5838_v6  ;;  %v5821_v19 = vshll.u32 %v14000_v48, 16  ;;  %v5825_v12 = vshrl.u32 %v14000_v48, 16  ;;  %v4124_v29 = vld [vmem:[#allocation3 + $0x140] sm:$0x1] }
 0x3ba   :  { %v5852_v46 = vor.u32 %v5851_v51, %v5847_v42  ;;  %v5814_v26 = vrot.slane %v5812_v56, 4  ;;  %v5831_v60 = vshll.u32 %v5250_v33, 16  ;;  %v3329_v25 = vsel %vm330_vm6, %v18308_v24, 0.0  ;;  %v14016_v6 = vpop.f32.mrb[62].mxu0  ;;  %v4121_v51 = vld [vmem:[#allocation3 + $0x134] sm:$0x1] }
 0x3bb   :  { %v5817_v43 = vrot.slane %v5815_v41, 5  ;;  %v5843_v36 = vrot.slane %v5842_v10, 4  ;;  %v5823_v15 = vrot.slane %v5821_v19, 5  ;;  %v5827_v0 = vrot.slane %v5825_v12, 4  ;;  %18314 = vst [vmem:[#allocation18_spill] sm:$0xff] %v14016_v6  ;;  %v14019_v56 = vpop.f32.mrb[63].mxu0 }
 0x3bc   :  { %v3534_v4 = vsel %vm330_vm6, %v3420_v16, 0.0  ;;  %v5853_v32 = vrot.slane %v5852_v46, 4  ;;  %v5857_v35 = vrot.slane %v5855_v47, 5  ;;  %v4125_v24 = vsel %vm12185_vm8, 0, %v4124_v29  ;;  %v18316_v10 = vld [vmem:[#allocation70_spill] sm:$0xff] }
 0x3bd   :  { %v5818_v37 = vor.u32 %v5817_v43, %v5814_v26  ;;  %v5848_v33 = vsel %vm10192_vm2, %v5843_v36, %v5847_v42  ;;  %v5828_v41 = vor.u32 %v5827_v0, %v5823_v15  ;;  %v3327_v19 = vsel %vm330_vm6, %v18316_v10, 0.0  ;;  %v14027_v12 = vld [vmem:[#allocation3 + $0xa8] sm:$0xf]  ;;  %4126 = vst [vmem:[#allocation3 + $0x140] sm:$0x1] %v4125_v24 }
 0x3be   :  { %18317 = vst [vmem:[#allocation19_spill] sm:$0xff] %v14027_v12  ;;  %v5858_v16 = vsel %vm10192_vm2, %v5853_v32, %v5857_v35  ;;  %v5833_v46 = vrot.slane %v5831_v60, 5  ;;  %v3328_v26 = vadd.f32 %v3327_v19, %v3326_v27  ;;  %v14031_v43 = vld [vmem:[#allocation3 + $0xac] sm:$0xf]  ;;  %v3419_v0 = vmul.f32 %v18316_v10, %v18316_v10  ;;  %v5259_v35 = vld [vmem:[#allocation3 + $0xb0] sm:$0x1] }
 0x3bf   :  { %v5819_v47 = vrot.slane %v5818_v37, 4  ;;  %18318 = vst [vmem:[#allocation20_spill] sm:$0xff] %v14031_v43  ;;  %v14033_v6 = vcombine.low %v5848_v33, %v5858_v16  ;;  %v5829_v36 = vrot.slane %v5828_v41, 4  ;;  %v4122_v42 = vsel %vm12185_vm8, 0, %v4121_v51  ;;  %v14045_v24 = vld [vmem:[#allocation3 + $0x9c] sm:$0xf] }
 0x3c0   :  { %v14041_v31 = vadd.f32 %v3329_v25, %v3328_v26  ;;  %4123 = vst [vmem:[#allocation3 + $0x134] sm:$0x1] %v4122_v42  ;;  %v5884_v37 = vshrl.u32 %v14027_v12, 16  ;;  %v5887_v32 = vshll.u32 %v14027_v12, 16  ;;  %18320 = vst [vmem:[#allocation89_spill] sm:$0xff] %v14045_v24  ;;  %v3532_v60 = vsel %vm330_vm6, %v3419_v0, 0.0 }
 0x3c1   :  { %18319 = vst [vmem:[#allocation21_spill] sm:$0xff] %v14033_v6  ;;  %v5824_v29 = vsel %vm10192_vm2, %v5819_v47, %v5823_v15  ;;  %6435 = vrot.lane.b32.xlu0 %v14033_v6, %s10112_s29  ;;  %v5834_v27 = vsel %vm10192_vm2, %v5829_v36, %v5833_v46  ;;  %v5893_v15 = vshll.u32 %v14031_v43, 16  ;;  %v5897_v25 = vshrl.u32 %v14031_v43, 16  ;;  %v14054_v51 = vld [vmem:[#allocation3 + $0xa0] sm:$0xf] }
 0x3c2   :  { %18321 = vst [vmem:[#allocation22_spill] sm:$0xff] %v14054_v51  ;;  %v14056_v33 = vcombine.low %v5824_v29, %v5834_v27  ;;  %v3533_v41 = vadd.f32 %v3532_v60, %v13996_v55  ;;  %v5886_v19 = vrot.slane %v5884_v37, 4  ;;  %v5889_v16 = vrot.slane %v5887_v32, 5  ;;  %v5256_v6 = vld [vmem:[#allocation3 + $0xa4] sm:$0x1] }
 0x3c3   :  { %v5895_v47 = vrot.slane %v5893_v15, 5  ;;  %v5899_v26 = vrot.slane %v5897_v25, 4  ;;  %v5903_v42 = vshll.u32 %v5259_v35, 16  ;;  %v5860_v46 = vshrl.u32 %v14045_v24, 16  ;;  %v14064_v27 = vld [vmem:[#allocation3 + $0xb4] sm:$0xf] }
 0x3c4   :  { %18322 = vst [vmem:[#allocation90_spill] sm:$0xff] %v14056_v33  ;;  %6433 = vrot.lane.b32.xlu1 %v14056_v33, %s10112_s29  ;;  %v3535_v36 = vadd.f32 %v3534_v4, %v3533_v41  ;;  %v5890_v0 = vor.u32 %v5889_v16, %v5886_v19  ;;  %v5863_v10 = vshll.u32 %v14045_v24, 16  ;;  %v5869_v29 = vshll.u32 %v14054_v51, 16  ;;  %18323 = vst [vmem:[#allocation23_spill] sm:$0xff] %v14064_v27  ;;  %v14067_v35 = vld [vmem:[#allocation3 + $0xb8] sm:$0xf] }
 0x3c5   :  { %v5900_v55 = vor.u32 %v5899_v26, %v5895_v47  ;;  %v5905_v37 = vrot.slane %v5903_v42, 5  ;;  %v5862_v32 = vrot.slane %v5860_v46, 4  ;;  %v5873_v60 = vshrl.u32 %v14054_v51, 16  ;;  %v18324_v16 = vld [vmem:[#allocation63_spill] sm:$0xff] }
 0x3c6   :  { %v5891_v15 = vrot.slane %v5890_v0, 4  ;;  %v5865_v25 = vrot.slane %v5863_v10, 5  ;;  %v5871_v12 = vrot.slane %v5869_v29, 5  ;;  %v5879_v43 = vshll.u32 %v5256_v6, 16  ;;  %v5262_v6 = vld [vmem:[#allocation3 + $0xbc] sm:$0x1] }
 0x3c7   :  { %v5901_v33 = vrot.slane %v5900_v55, 4  ;;  %v5875_v4 = vrot.slane %v5873_v60, 4  ;;  %v5908_v41 = vshrl.u32 %v14064_v27, 16  ;;  %v5911_v19 = vshll.u32 %v14064_v27, 16  ;;  %v4020_v60 = vld [vmem:[#allocation3 + $0x150] sm:$0x1] }
 0x3c8   :  { %v3421_v24 = vmul.f32 %v18324_v16, %v18324_v16  ;;  %v5896_v26 = vsel %vm10192_vm2, %v5891_v15, %v5895_v47  ;;  %v5866_v42 = vor.u32 %v5865_v25, %v5862_v32  ;;  %v5917_v46 = vshll.u32 %v14067_v35, 16 }
 0x3c9   :  { %v5906_v10 = vsel %vm10192_vm2, %v5901_v33, %v5905_v37  ;;  %v5876_v0 = vor.u32 %v5875_v4, %v5871_v12  ;;  %v5910_v29 = vrot.slane %v5908_v41, 4  ;;  %v5913_v55 = vrot.slane %v5911_v19, 5 }
 0x3ca   :  { %v14078_v51 = vcombine.low %v5896_v26, %v5906_v10  ;;  %v5867_v27 = vrot.slane %v5866_v42, 4  ;;  %v5919_v34 = vrot.slane %v5917_v46, 5  ;;  %v5921_v48 = vshrl.u32 %v14067_v35, 16 }
 0x3cb   :  { %v3331_v47 = vsel %vm330_vm6, %v18324_v16, 0.0  ;;  %v5877_v32 = vrot.slane %v5876_v0, 4  ;;  %v5881_v15 = vrot.slane %v5879_v43, 5  ;;  %v5914_v25 = vor.u32 %v5913_v55, %v5910_v29  ;;  %v4017_v43 = vld [vmem:[#allocation3 + $0x144] sm:$0x1]  ;;  %v18327_v29 = vld [vmem:[#allocation87_spill] sm:$0xff] }
 0x3cc   :  { %18325 = vst [vmem:[#allocation91_spill] sm:$0xff] %v14078_v51  ;;  %6439 = vrot.lane.b32.xlu0 %v14078_v51, %s10112_s29  ;;  %v5872_v33 = vsel %vm10192_vm2, %v5867_v27, %v5871_v12  ;;  %v5923_v37 = vrot.slane %v5921_v48, 4  ;;  %v5927_v4 = vshll.u32 %v5262_v6, 16  ;;  %v4021_v41 = vsel %vm12170_vm4, 0, %v4020_v60  ;;  %v4130_v12 = vld [vmem:[#allocation3 + $0x158] sm:$0x1] }
 0x3cd   :  { %v5882_v19 = vsel %vm10192_vm2, %v5877_v32, %v5881_v15  ;;  %v5915_v26 = vrot.slane %v5914_v25, 4  ;;  %4022 = vst [vmem:[#allocation3 + $0x150] sm:$0x1] %v4021_v41  ;;  %v3332_v42 = vadd.f32 %v3331_v47, %v14041_v31  ;;  %v3536_v46 = vsel %vm330_vm6, %v3421_v24, 0.0  ;;  %v18328_v27 = vld [vmem:[#allocation88_spill] sm:$0xff]  ;;  %v18329_v41 = vld [vmem:[#allocation62_spill] sm:$0xff] }
 0x3ce   :  { %v14093_v10 = vcombine.low %v5872_v33, %v5882_v19  ;;  %v5924_v0 = vor.u32 %v5923_v37, %v5919_v34  ;;  %v3333_v48 = vsel %vm330_vm6, %v18327_v29, 0.0  ;;  %v3424_v6 = vmul.f32 %v18328_v27, %v18328_v27  ;;  %v4127_v25 = vld [vmem:[#allocation3 + $0x14c] sm:$0x1] }
 0x3cf   :  { %v3334_v55 = vadd.f32 %v3333_v48, %v3332_v42  ;;  %v3422_v60 = vmul.f32 %v18327_v29, %v18327_v29  ;;  %v3537_v32 = vadd.f32 %v3536_v46, %v3535_v36  ;;  %v5920_v31 = vsel %vm10192_vm2, %v5915_v26, %v5919_v34  ;;  %v4026_v42 = vld [vmem:[#allocation3 + $0x168] sm:$0x1]  ;;  %v18330_v26 = vld [vmem:[#allocation5_spill] sm:$0xff] }
 0x3d0   :  { %18326 = vst [vmem:[#allocation24_spill] sm:$0xff] %v14093_v10  ;;  %6437 = vrot.lane.b32.xlu1 %v14093_v10, %s10112_s29  ;;  %v5925_v24 = vrot.slane %v5924_v0, 4  ;;  %v5929_v47 = vrot.slane %v5927_v4, 5  ;;  %v4018_v15 = vsel %vm12170_vm4, 0, %v4017_v43  ;;  %v4131_v37 = vsel %vm12185_vm8, 0, %v4130_v12 }
 0x3d1   :  { %v3538_v33 = vsel %vm330_vm6, %v3422_v60, 0.0  ;;  %4019 = vst [vmem:[#allocation3 + $0x144] sm:$0x1] %v4018_v15  ;;  %v3335_v36 = vsel %vm330_vm6, %v18329_v41, 0.0  ;;  %v3423_v19 = vmul.f32 %v18329_v41, %v18329_v41  ;;  %v3425_v43 = vmul.f32 %v18330_v26, %v18330_v26  ;;  %4132 = vst [vmem:[#allocation3 + $0x158] sm:$0x1] %v4131_v37 }
 0x3d2   :  { %v5930_v34 = vsel %vm10192_vm2, %v5925_v24, %v5929_v47  ;;  %v3539_v4 = vadd.f32 %v3538_v33, %v3537_v32  ;;  %v3336_v46 = vadd.f32 %v3335_v36, %v3334_v55  ;;  %v4023_v0 = vld [vmem:[#allocation3 + $0x15c] sm:$0x1]  ;;  %v3337_v12 = vsel %vm330_vm6, %v18328_v27, 0.0  ;;  %v4136_v55 = vld [vmem:[#allocation3 + $0x170] sm:$0x1] }
 0x3d3   :  { %v14118_v48 = vcombine.low %v5920_v31, %v5930_v34  ;;  %v3540_v60 = vsel %vm330_vm6, %v3423_v19, 0.0  ;;  %v4128_v15 = vsel %vm12185_vm8, 0, %v4127_v25  ;;  %v3542_v51 = vsel %vm330_vm6, %v3424_v6, 0.0  ;;  %v4133_v37 = vld [vmem:[#allocation3 + $0x164] sm:$0x1] }
 0x3d4   :  { %v3338_v24 = vadd.f32 %v3337_v12, %v3336_v46  ;;  %v3541_v32 = vadd.f32 %v3540_v60, %v3539_v4  ;;  %4129 = vst [vmem:[#allocation3 + $0x14c] sm:$0x1] %v4128_v15  ;;  %v4027_v47 = vsel %vm12170_vm4, 0, %v4026_v42  ;;  %v3339_v31 = vsel %vm330_vm6, %v18330_v26, 0.0  ;;  %v4032_v4 = vld [vmem:[#allocation3 + $0x180] sm:$0x1] }
 0x3d5   :  { %18331 = vst [vmem:[#allocation92_spill] sm:$0xff] %v14118_v48  ;;  %6441 = vrot.lane.b32.xlu1 %v14118_v48, %s10112_s29  ;;  %4028 = vst [vmem:[#allocation3 + $0x168] sm:$0x1] %v4027_v47  ;;  %v3341_v33 = vsel %vm330_vm6, %v13821_v50, 0.0  ;;  %v3426_v6 = vmul.f32 %v13821_v50, %v13821_v50  ;;  %v4024_v25 = vsel %vm12170_vm4, 0, %v4023_v0  ;;  %v3544_v36 = vsel %vm330_vm6, %v3425_v43, 0.0 }
 0x3d6   :  { %v3543_v19 = vadd.f32 %v3542_v51, %v3541_v32  ;;  %v3428_v42 = vmul.f32 %v13814_v28, %v13814_v28  ;;  %v3340_v34 = vadd.f32 %v3339_v31, %v3338_v24  ;;  %4025 = vst [vmem:[#allocation3 + $0x15c] sm:$0x1] %v4024_v25  ;;  %v4137_v12 = vsel %vm12185_vm8, 0, %v4136_v55  ;;  %v4029_v32 = vld [vmem:[#allocation3 + $0x174] sm:$0x1] }
 0x3d7   :  { %v3546_v46 = vsel %vm330_vm6, %v3426_v6, 0.0  ;;  %v3343_v60 = vsel %vm330_vm6, %v13827_v62, 0.0  ;;  %v3427_v0 = vmul.f32 %v13827_v62, %v13827_v62  ;;  %v3429_v51 = vmul.f32 %v13823_v18, %v13823_v18  ;;  %4138 = vst [vmem:[#allocation3 + $0x170] sm:$0x1] %v4137_v12  ;;  %v4142_v31 = vld [vmem:[#allocation3 + $0x188] sm:$0x1] }
 0x3d8   :  { %v3342_v15 = vadd.f32 %v3341_v33, %v3340_v34  ;;  %v3545_v43 = vadd.f32 %v3544_v36, %v3543_v19  ;;  %v4134_v24 = vsel %vm12185_vm8, 0, %v4133_v37  ;;  %v4033_v55 = vsel %vm12170_vm4, 0, %v4032_v4  ;;  %v4139_v36 = vld [vmem:[#allocation3 + $0x17c] sm:$0x1]  ;;  %v14393_v48 = vld [vmem:[#allocation3 + $0x10] sm:$0xf] }
 0x3d9   :  { %v3548_v47 = vsel %vm330_vm6, %v3427_v0, 0.0  ;;  %4135 = vst [vmem:[#allocation3 + $0x164] sm:$0x1] %v4134_v24  ;;  %v3345_v6 = vsel %vm330_vm6, %v13814_v28, 0.0  ;;  %4034 = vst [vmem:[#allocation3 + $0x180] sm:$0x1] %v4033_v55  ;;  %v3430_v34 = vmul.f32 %v13907_v59, %v13907_v59 }
 0x3da   :  { %v3547_v33 = vadd.f32 %v3546_v46, %v3545_v43  ;;  %v3344_v25 = vadd.f32 %v3343_v60, %v3342_v15  ;;  %v3550_v19 = vsel %vm330_vm6, %v3428_v42, 0.0  ;;  %v3347_v37 = vsel %vm330_vm6, %v13823_v18, 0.0  ;;  %v10019_v55 = vld [vmem:[#allocation3 + $0x4] sm:$0xf]  ;;  %18372 = vst [vmem:[#allocation59_spill] sm:$0xff] %v14393_v48 }
 0x3db   :  { %v4030_v12 = vsel %vm12170_vm4, 0, %v4029_v32  ;;  %v3552_v4 = vsel %vm330_vm6, %v3429_v51, 0.0  ;;  %v4143_v46 = vsel %vm12185_vm8, 0, %v4142_v31  ;;  %v3432_v42 = vmul.f32 %v13904_v17, %v13904_v17  ;;  %v4038_v51 = vld [vmem:[#allocation3 + $0x198] sm:$0x1] }
 0x3dc   :  { %v3346_v0 = vadd.f32 %v3345_v6, %v3344_v25  ;;  %v3549_v24 = vadd.f32 %v3548_v47, %v3547_v33  ;;  %4031 = vst [vmem:[#allocation3 + $0x174] sm:$0x1] %v4030_v12  ;;  %v3349_v60 = vsel %vm330_vm6, %v13907_v59, 0.0  ;;  %4144 = vst [vmem:[#allocation3 + $0x188] sm:$0x1] %v4143_v46  ;;  %v3431_v15 = vmul.f32 %v13918_v38, %v13918_v38 }
 0x3dd   :  { %v4140_v43 = vsel %vm12185_vm8, 0, %v4139_v36  ;;  %v10020_v6 = vld [vmem:[#allocation3] sm:$0xf]  ;;  %v14177_v33 = vcombine.low %v13787_v8, %v13777_v54  ;;  %v4035_v25 = vld [vmem:[#allocation3 + $0x18c] sm:$0x1]  ;;  %v3554_v12 = vsel %vm330_vm6, %v3430_v34, 0.0  ;;  %v3433_v46 = vmul.f32 %v13913_v11, %v13913_v11  ;;  %v6412_v8 = vpop.permute.xlu0 %6411 }
 0x3de   :  { %v3551_v32 = vadd.f32 %v3550_v19, %v3549_v24  ;;  %v3348_v47 = vadd.f32 %v3347_v37, %v3346_v0  ;;  %4141 = vst [vmem:[#allocation3 + $0x17c] sm:$0x1] %v4140_v43  ;;  %v9462_v31 = vcombine.low %v10020_v6, %v10019_v55  ;;  %v3351_v36 = vsel %vm330_vm6, %v13918_v38, 0.0  ;;  %v4148_v37 = vld [vmem:[#allocation3 + $0x1a0] sm:$0x1] }
 0x3df   :  { %18332 = vst [vmem:[#allocation25_spill] sm:$0xff] %v14177_v33  ;;  %v14186_v19 = vcombine.low %v13801_v9, %v13804_v7  ;;  %v3353_v0 = vsel %vm330_vm6, %v13904_v17, 0.0  ;;  %5517 = vst.msk [vmem:[#allocation2 + $0x10] sm:$0xff] %vm330_vm6, %v14177_v33  ;;  %v4039_v34 = vsel %vm12170_vm4, 0, %v4038_v51  ;;  %v4145_v43 = vld [vmem:[#allocation3 + $0x194] sm:$0x1]  ;;  %v3434_v7 = vmul.f32 %v14012_v14, %v14012_v14 }
 0x3e0   :  { %v3350_v24 = vadd.f32 %v3349_v60, %v3348_v47  ;;  %v3553_v54 = vadd.f32 %v3552_v4, %v3551_v32  ;;  %5515 = vst.msk [vmem:[#allocation2] sm:$0xff] %vm330_vm6, %v9462_v31  ;;  %v3558_v55 = vsel %vm330_vm6, %v3432_v42, 0.0  ;;  %v3556_v9 = vsel %vm330_vm6, %v3431_v15, 0.0  ;;  %4040 = vst [vmem:[#allocation3 + $0x198] sm:$0x1] %v4039_v34 }
 0x3e1   :  { %18333 = vst [vmem:[#allocation93_spill] sm:$0xff] %v14186_v19  ;;  %6507 = vst.msk [vmem:[#allocation2] sm:$0xff] %vm1326_vm7, %v6412_v8  ;;  %v4036_v4 = vsel %vm12170_vm4, 0, %v4035_v25  ;;  %v3355_v51 = vsel %vm330_vm6, %v13913_v11, 0.0  ;;  %v4149_v42 = vsel %vm12185_vm8, 0, %v4148_v37  ;;  %v3560_v15 = vsel %vm330_vm6, %v3433_v46, 0.0 }
 0x3e2   :  { %5516 = vst.msk [vmem:[#allocation2 + $0x8] sm:$0xff] %vm330_vm6, %v14186_v19  ;;  %v3555_v60 = vadd.f32 %v3554_v12, %v3553_v54  ;;  %v3352_v32 = vadd.f32 %v3351_v36, %v3350_v24  ;;  %4037 = vst [vmem:[#allocation3 + $0x18c] sm:$0x1] %v4036_v4  ;;  %v3357_v47 = vsel %vm330_vm6, %v14012_v14, 0.0  ;;  %v3562_v6 = vsel %vm330_vm6, %v3434_v7, 0.0 }
 0x3e3   :  { %4150 = vst [vmem:[#allocation3 + $0x1a0] sm:$0x1] %v4149_v42  ;;  %v4146_v31 = vsel %vm12185_vm8, 0, %v4145_v43  ;;  %v3359_v36 = vsel %vm330_vm6, %v14019_v56, 0.0  ;;  %v14218_v37 = vcombine.low %v13812_v39, %v13819_v30  ;;  %v3435_v46 = vmul.f32 %v14019_v56, %v14019_v56  ;;  %v3990_v42 = vld [vmem:[#allocation3 + $0xd8] sm:$0x1] }
 0x3e4   :  { %v3354_v25 = vadd.f32 %v3353_v0, %v3352_v32  ;;  %v3557_v12 = vadd.f32 %v3556_v9, %v3555_v60  ;;  %4147 = vst [vmem:[#allocation3 + $0x194] sm:$0x1] %v4146_v31  ;;  %v14224_v24 = vcombine.low %v13832_v40, %v13837_v13  ;;  %v14228_v54 = vcombine.low %v13851_v58, %v13855_v3  ;;  %v18343_v3 = vld [vmem:[#allocation15_spill] sm:$0xff] }
 0x3e5   :  { %18334 = vst [vmem:[#allocation26_spill] sm:$0xff] %v14218_v37  ;;  %v14232_v0 = vcombine.low %v13865_v57, %v13869_v49  ;;  %5519 = vst.msk [vmem:[#allocation2 + $0x20] sm:$0xff] %vm330_vm6, %v14218_v37  ;;  %v14238_v39 = vcombine.low %v13882_v61, %v13886_v23  ;;  %v14242_v30 = vcombine.low %v13898_v52, %v13902_v2  ;;  %v18344_v57 = vld [vmem:[#allocation14_spill] sm:$0xff]  ;;  %v18346_v52 = vld [vmem:[#allocation20_spill] sm:$0xff]  ;;  %v3564_v43 = vsel %vm330_vm6, %v3435_v46, 0.0 }
 0x3e6   :  { %18335 = vst [vmem:[#allocation94_spill] sm:$0xff] %v14224_v24  ;;  %18336 = vst [vmem:[#allocation31_spill] sm:$0xff] %v14228_v54  ;;  %v3559_v8 = vadd.f32 %v3558_v55, %v3557_v12  ;;  %v3356_v34 = vadd.f32 %v3355_v51, %v3354_v25  ;;  %v14252_v40 = vcombine.low %v13920_v22, %v13925_v63  ;;  %v18347_v2 = vld [vmem:[#allocation19_spill] sm:$0xff]  ;;  %v18349_v63 = vld [vmem:[#allocation22_spill] sm:$0xff] }
 0x3e7   :  { %18337 = vst [vmem:[#allocation95_spill] sm:$0xff] %v14232_v0  ;;  %18338 = vst [vmem:[#allocation34_spill] sm:$0xff] %v14238_v39  ;;  %v14256_v13 = vcombine.low %v13937_v53, %v13941_v44  ;;  %v14260_v58 = vcombine.low %v13974_v1, %v13980_v20  ;;  %v14264_v49 = vcombine.low %v18344_v57, %v18343_v3  ;;  %v18350_v53 = vld [vmem:[#allocation89_spill] sm:$0xff]  ;;  %v18353_v55 = vld [vmem:[#allocation23_spill] sm:$0xff] }
 0x3e8   :  { %18339 = vst [vmem:[#allocation38_spill] sm:$0xff] %v14242_v30  ;;  %5518 = vst.msk [vmem:[#allocation2 + $0x18] sm:$0xff] %vm330_vm6, %v14224_v24  ;;  %v3358_v61 = vadd.f32 %v3357_v47, %v3356_v34  ;;  %v3561_v23 = vadd.f32 %v3560_v15, %v3559_v8  ;;  %v14272_v22 = vcombine.low %v18347_v2, %v18346_v52  ;;  %v18352_v1 = vld [vmem:[#allocation17_spill] sm:$0xff]  ;;  %v18355_v51 = vld [vmem:[#allocation18_spill] sm:$0xff] }
 0x3e9   :  { %5521 = vst.msk [vmem:[#allocation2 + $0x30] sm:$0xff] %vm330_vm6, %v14228_v54  ;;  %5520 = vst.msk [vmem:[#allocation2 + $0x28] sm:$0xff] %vm330_vm6, %v14232_v0  ;;  %v14276_v44 = vcombine.low %v18350_v53, %v18349_v63  ;;  %v3436_v20 = vmul.f32 %v18352_v1, %v18352_v1  ;;  %v14291_v9 = vcombine.low %v18353_v55, %v14067_v35  ;;  %v3361_v60 = vsel %vm330_vm6, %v18352_v1, 0.0  ;;  %v4100_v35 = vld [vmem:[#allocation3 + $0xe0] sm:$0x1] }
 0x3ea   :  { %18340 = vst [vmem:[#allocation27_spill] sm:$0xff] %v14252_v40  ;;  %18341 = vst [vmem:[#allocation43_spill] sm:$0xff] %v14256_v13  ;;  %v3563_v7 = vadd.f32 %v3562_v6, %v3561_v23  ;;  %v3360_v4 = vadd.f32 %v3359_v36, %v3358_v61  ;;  %v3437_v32 = vmul.f32 %v18355_v51, %v18355_v51  ;;  %v3991_v6 = vsel %vm12170_vm4, 0, %v3990_v42  ;;  %v5270_v25 = vld [vmem:[#allocation3 + $0xdc] sm:$0xf] }
 0x3eb   :  { %18342 = vst [vmem:[#allocation46_spill] sm:$0xff] %v14260_v58  ;;  %18345 = vst [vmem:[#allocation49_spill] sm:$0xff] %v14264_v49  ;;  %v4101_v31 = vsel %vm12185_vm8, 0, %v4100_v35  ;;  %v3566_v12 = vsel %vm330_vm6, %v3436_v20, 0.0  ;;  %v3363_v36 = vsel %vm330_vm6, %v18355_v51, 0.0  ;;  %v5941_v46 = vshll.u32 %v5270_v25, 16 }
 0x3ec   :  { %5523 = vst.msk [vmem:[#allocation2 + $0x40] sm:$0xff] %vm330_vm6, %v14238_v39  ;;  %5522 = vst.msk [vmem:[#allocation2 + $0x38] sm:$0xff] %vm330_vm6, %v14242_v30  ;;  %v3362_v15 = vadd.f32 %v3361_v60, %v3360_v4  ;;  %v3565_v47 = vadd.f32 %v3564_v43, %v3563_v7  ;;  %v5945_v8 = vshrl.u32 %v5270_v25, 16  ;;  %v3568_v57 = vsel %vm330_vm6, %v3437_v32, 0.0 }
 0x3ed   :  { %18348 = vst [vmem:[#allocation53_spill] sm:$0xff] %v14272_v22  ;;  %18351 = vst [vmem:[#allocation54_spill] sm:$0xff] %v14276_v44  ;;  %v14311_v52 = vrot.slane %v5941_v46, 5 }
 0x3ee   :  { %5525 = vst.msk [vmem:[#allocation2 + $0x50] sm:$0xff] %vm330_vm6, %v14252_v40  ;;  %5524 = vst.msk [vmem:[#allocation2 + $0x48] sm:$0xff] %vm330_vm6, %v14256_v13  ;;  %v3364_v34 = vadd.f32 %v3363_v36, %v3362_v15  ;;  %v3567_v3 = vadd.f32 %v3566_v12, %v3565_v47  ;;  %v5947_v2 = vrot.slane %v5945_v8, 4 }
 0x3ef   :  { %5527 = vst.msk [vmem:[#allocation2 + $0x60] sm:$0xff] %vm330_vm6, %v14260_v58  ;;  %5526 = vst.msk [vmem:[#allocation2 + $0x58] sm:$0xff] %vm330_vm6, %v14264_v49 }
 0x3f0   :  { %18354 = vst [vmem:[#allocation83_spill] sm:$0xff] %v14291_v9  ;;  %5529 = vst.msk [vmem:[#allocation2 + $0x70] sm:$0xff] %vm330_vm6, %v14272_v22  ;;  %v3365_v61 = vrot.slane %v3364_v34, 4  ;;  %v3569_v23 = vadd.f32 %v3568_v57, %v3567_v3  ;;  %v5948_v42 = vor.u32 %v5947_v2, %v14311_v52  ;;  %v14400_v22 = vld [vmem:[%s17635_s4] ss:$0 sm:$0xff] }
 0x3f1   :  { %5528 = vst.msk [vmem:[#allocation2 + $0x68] sm:$0xff] %vm330_vm6, %v14276_v44  ;;  %5530 = vst.msk [vmem:[#allocation2 + $0x78] sm:$0xff] %vm330_vm6, %v14291_v9 }
 0x3f2   :  { %3992 = vst [vmem:[#allocation3 + $0xd8] sm:$0x1] %v3991_v6  ;;  %4102 = vst [vmem:[#allocation3 + $0xe0] sm:$0x1] %v4101_v31  ;;  %v3366_v63 = vadd.f32 %v3365_v61, %v3364_v34  ;;  %v3570_v53 = vrot.slane %v3569_v23, 4  ;;  %v5949_v36 = vrot.slane %v5948_v42, 4 }
 0x3f4   :  { %v3367_v43 = vrot.slane %v3366_v63, 2  ;;  %v3571_v20 = vadd.f32 %v3570_v53, %v3569_v23 }
 0x3f6   :  { %v3368_v15 = vadd.f32 %v3367_v43, %v3366_v63  ;;  %v3572_v47 = vrot.slane %v3571_v20, 2 }
 0x3f8   :  { %v3369_v31 = vrot.slane %v3368_v15, 1  ;;  %v3573_v25 = vadd.f32 %v3572_v47, %v3571_v20 }
 0x3f9   :  { %v5269_v55 = vld [vmem:[#allocation3 + $0xd8] sm:$0xf]  ;;  %v5271_v7 = vld [vmem:[#allocation3 + $0xe0] sm:$0x1] }
 0x3fa   :  { %v5932_v4 = vshrl.u32 %v5269_v55, 16  ;;  %v5935_v60 = vshll.u32 %v5269_v55, 16  ;;  %v5951_v35 = vshll.u32 %v5271_v7, 16  ;;  %v3370_v8 = vadd.f32 %v3369_v31, %v3368_v15  ;;  %v18356_v55 = vld [vmem:[#allocation30_spill] sm:$0xff] }
 0x3fb   :  { %v3574_v34 = vrot.slane %v3573_v25, 1 }
 0x3fc   :  { %v5934_v6 = vrot.slane %v5932_v4, 4  ;;  %v5937_v32 = vrot.slane %v5935_v60, 5  ;;  %v5953_v46 = vrot.slane %v5951_v35, 5  ;;  %v14314_v57 = vmul.f32 0.00390625, %v3370_v8  ;;  %v18357_v4 = vld [vmem:[#allocation73_spill] sm:$0xff]  ;;  %v18359_v35 = vld [vmem:[#allocation32_spill] sm:$0xff] }
 0x3fd   :  { %v3575_v61 = vadd.f32 %v3574_v34, %v3573_v25  ;;  %v18365_v34 = vld [vmem:[#allocation79_spill] sm:$0xff] }
 0x3fe   :  { %v5938_v12 = vor.u32 %v5937_v32, %v5934_v6  ;;  %v5954_v2 = vsel %vm10192_vm2, %v5949_v36, %v5953_v46  ;;  %v3579_v53 = vmul.f32 %v14314_v57, %v14314_v57  ;;  %v3642_v43 = vsub.f32 %v14012_v14, %v14314_v57  ;;  %v18360_v6 = vld [vmem:[#allocation51_spill] sm:$0xff]  ;;  %v18364_v46 = vld [vmem:[#allocation37_spill] sm:$0xff] }
 0x3ff   :  { %v3577_v63 = vmul.f32 0.00390625, %v3575_v61  ;;  %v3643_v20 = vsub.f32 %v14019_v56, %v14314_v57  ;;  %v3614_v7 = vsub.f32 %v18356_v55, %v14314_v57  ;;  %v3615_v60 = vsub.f32 %v18357_v4, %v14314_v57  ;;  %v18361_v14 = vld [vmem:[#allocation55_spill] sm:$0xff]  ;;  %v18362_v56 = vld [vmem:[#allocation52_spill] sm:$0xff] }
 0x400   :  { %v5939_v3 = vrot.slane %v5938_v12, 4  ;;  %v3617_v15 = vsub.f32 %v18359_v35, %v14314_v57  ;;  %v3618_v32 = vsub.f32 %v18360_v6, %v14314_v57  ;;  %v3619_v31 = vsub.f32 %v18361_v14, %v14314_v57  ;;  %v18363_v12 = vld [vmem:[#allocation57_spill] sm:$0xff]  ;;  %v18366_v61 = vld [vmem:[#allocation36_spill] sm:$0xff]  ;;  %v18367_v55 = vld [vmem:[#allocation39_spill] sm:$0xff] }
 0x401   :  { %v3581_v47 = vsub.f32 %v3577_v63, %v3579_v53  ;;  %v3620_v25 = vsub.f32 %v18362_v56, %v14314_v57  ;;  %v3621_v36 = vsub.f32 %v18363_v12, %v14314_v57  ;;  %v3622_v8 = vsub.f32 %v18364_v46, %v14314_v57  ;;  %v18369_v6 = vld [vmem:[#allocation70_spill] sm:$0xff]  ;;  %v18370_v56 = vld [vmem:[#allocation48_spill] sm:$0xff] }
 0x402   :  { %v5944_v23 = vsel %vm10192_vm2, %v5939_v3, %v14311_v52  ;;  %v18358_v52 = vld [vmem:[#allocation29_spill] sm:$0xff]  ;;  %v3623_v3 = vsub.f32 %v18365_v34, %v14314_v57  ;;  %v3624_v63 = vsub.f32 %v18366_v61, %v14314_v57  ;;  %v3625_v4 = vsub.f32 %v18367_v55, %v14314_v57 }
 0x403   :  { %v3616_v42 = vsub.f32 %v18358_v52, %v14314_v57  ;;  %v3647_v53 = vadd.f32 1e-05, %v3581_v47  ;;  %v18368_v52 = vld [vmem:[#allocation64_spill] sm:$0xff]  ;;  %v3627_v14 = vsub.f32 %v18369_v6, %v14314_v57  ;;  %v3628_v12 = vsub.f32 %v18370_v56, %v14314_v57 }
 0x404   :  { %v3626_v35 = vsub.f32 %v18368_v52, %v14314_v57  ;;  %v3629_v46 = vsub.f32 %v18324_v16, %v14314_v57  ;;  %v3630_v34 = vsub.f32 %v18327_v29, %v14314_v57  ;;  %v3631_v47 = vsub.f32 %v18329_v41, %v14314_v57 }
 0x405   :  { %9949 = vrsqrt.f32 %v3647_v53  ;;  %v3632_v61 = vsub.f32 %v18328_v27, %v14314_v57  ;;  %v3633_v55 = vsub.f32 %v18330_v26, %v14314_v57  ;;  %v3634_v52 = vsub.f32 %v13821_v50, %v14314_v57 }
 0x406   :  { %v3635_v6 = vsub.f32 %v13827_v62, %v14314_v57  ;;  %v3636_v16 = vsub.f32 %v13814_v28, %v14314_v57  ;;  %v3637_v29 = vsub.f32 %v13823_v18, %v14314_v57  ;;  %v3638_v41 = vsub.f32 %v13907_v59, %v14314_v57  ;;  %v6416_v53 = vpop.permute.xlu0 %6415 }
 0x407   :  { %v3639_v27 = vsub.f32 %v13918_v38, %v14314_v57  ;;  %v3640_v26 = vsub.f32 %v13904_v17, %v14314_v57  ;;  %v3641_v50 = vsub.f32 %v13913_v11, %v14314_v57  ;;  %v3644_v62 = vsub.f32 %v18352_v1, %v14314_v57  ;;  %6509 = vst.msk [vmem:[#allocation2 + $0x10] sm:$0xff] %vm1326_vm7, %v6416_v53  ;;  %v14390_v17 = vld [vmem:[#allocation3 + $0xc] sm:$0xf] }
 0x408   :  { %v3645_v28 = vsub.f32 %v18355_v51, %v14314_v57  ;;  %v9510_v18 = vcombine.low %v5944_v23, %v5954_v2  ;;  %18371 = vst [vmem:[#allocation40_spill] sm:$0xff] %v14390_v17 }
 0x409   :  { %v6414_v59 = vpop.permute.xlu1 %6413 }
 0x40a   :  { %6443 = vrot.lane.b32.xlu0 %v9510_v18, %s10112_s29  ;;  %6508 = vst.msk [vmem:[#allocation2 + $0x8] sm:$0xff] %vm1326_vm7, %v6414_v59 }
 0x40e   :  { %v6420_v56 = vpop.permute.xlu0 %6419 }
 0x40f   :  { %v9950_v38 = vpop.eup %9949  ;;  %6511 = vst.msk [vmem:[#allocation2 + $0x20] sm:$0xff] %vm1326_vm7, %v6420_v56 }
 0x410   :  { %v3710_v53 = vmul.f32 %v9950_v38, %v3642_v43  ;;  %v3711_v9 = vmul.f32 %v9950_v38, %v3643_v20  ;;  %v3682_v51 = vmul.f32 %v9950_v38, %v3614_v7  ;;  %v3683_v57 = vmul.f32 %v9950_v38, %v3615_v60 }
 0x411   :  { %v3684_v23 = vmul.f32 %v9950_v38, %v3616_v42  ;;  %v3685_v2 = vmul.f32 %v9950_v38, %v3617_v15  ;;  %v3686_v18 = vmul.f32 %v9950_v38, %v3618_v32  ;;  %v3687_v59 = vmul.f32 %v9950_v38, %v3619_v31  ;;  %v14408_v42 = vld [vmem:[%s17636_s5] ss:$0 sm:$0xff] }
 0x412   :  { %v3780_v11 = vmul.f32 %v14400_v22, %v3710_v53  ;;  %v3781_v10 = vmul.f32 %v14400_v22, %v3711_v9  ;;  %v3688_v1 = vmul.f32 %v9950_v38, %v3620_v25  ;;  %v3689_v43 = vmul.f32 %v9950_v38, %v3621_v36  ;;  %v6418_v20 = vpop.permute.xlu1 %6417 }
 0x413   :  { %v3690_v44 = vmul.f32 %v9950_v38, %v3622_v8  ;;  %v3691_v56 = vmul.f32 %v9950_v38, %v3623_v3  ;;  %v3692_v7 = vmul.f32 %v9950_v38, %v3624_v63  ;;  %v3693_v60 = vmul.f32 %v9950_v38, %v3625_v4  ;;  %6510 = vst.msk [vmem:[#allocation2 + $0x18] sm:$0xff] %vm1326_vm7, %v6418_v20 }
 0x414   :  { %v3850_v15 = vadd.f32 %v14408_v42, %v3780_v11  ;;  %v3851_v32 = vadd.f32 %v14408_v42, %v3781_v10  ;;  %v3694_v31 = vmul.f32 %v9950_v38, %v3626_v35  ;;  %v3695_v9 = vmul.f32 %v9950_v38, %v3627_v14 }
 0x415   :  { %v3696_v25 = vmul.f32 %v9950_v38, %v3628_v12  ;;  %v3697_v36 = vmul.f32 %v9950_v38, %v3629_v46  ;;  %v3698_v53 = vmul.f32 %v9950_v38, %v3630_v34  ;;  %v3699_v8 = vmul.f32 %v9950_v38, %v3631_v47  ;;  %v6424_v20 = vpop.permute.xlu0 %6423 }
 0x416   :  { %v3914_v3 = vmax.f32 %v3850_v15, 0.0  ;;  %v3915_v63 = vmax.f32 %v3851_v32, 0.0  ;;  %v3700_v4 = vmul.f32 %v9950_v38, %v3632_v61  ;;  %v3701_v58 = vmul.f32 %v9950_v38, %v3633_v55  ;;  %6513 = vst.msk [vmem:[#allocation2 + $0x30] sm:$0xff] %vm1326_vm7, %v6424_v20 }
 0x417   :  { %v3702_v49 = vmul.f32 %v9950_v38, %v3634_v52  ;;  %v3703_v40 = vmul.f32 %v9950_v38, %v3635_v6  ;;  %v3704_v13 = vmul.f32 %v9950_v38, %v3636_v16  ;;  %v3705_v5 = vmul.f32 %v9950_v38, %v3637_v29 }
 0x418   :  { %v9703_v11 = vpack.c.bf16 %v3914_v3, %v3914_v3  ;;  %v9704_v39 = vpack.c.bf16 %v3915_v63, %v3915_v63  ;;  %v3706_v10 = vmul.f32 %v9950_v38, %v3638_v41  ;;  %v3707_v35 = vmul.f32 %v9950_v38, %v3639_v27 }
 0x419   :  { %v3708_v14 = vmul.f32 %v9950_v38, %v3640_v26  ;;  %v3709_v12 = vmul.f32 %v9950_v38, %v3641_v50  ;;  %v3712_v46 = vmul.f32 %v9950_v38, %v3644_v62  ;;  %v3713_v34 = vmul.f32 %v9950_v38, %v3645_v28  ;;  %v5205_v50 = vld [vmem:[#allocation3 + $0x194] sm:$0x1] }
 0x41a   :  { %v4859_v47 = vshrl.u32 %v9703_v11, 16  ;;  %v4867_v15 = vshrl.u32 %v9704_v39, 16  ;;  %v4870_v32 = vshll.u32 %v9704_v39, 16  ;;  %v4862_v61 = vshll.u32 %v9703_v11, 16 }
 0x41b   :  { %v3752_v55 = vmul.f32 %v14400_v22, %v3682_v51  ;;  %v3753_v52 = vmul.f32 %v14400_v22, %v3683_v57  ;;  %v3754_v6 = vmul.f32 %v14400_v22, %v3684_v23  ;;  %v3755_v16 = vmul.f32 %v14400_v22, %v3685_v2 }
 0x41c   :  { %v4861_v29 = vrot.slane %v4859_v47, 7  ;;  %v4869_v3 = vrot.slane %v4867_v15, 7  ;;  %v3756_v41 = vmul.f32 %v14400_v22, %v3686_v18  ;;  %v3757_v27 = vmul.f32 %v14400_v22, %v3687_v59  ;;  %v6422_v26 = vpop.permute.xlu1 %6421  ;;  %v5201_v15 = vld [vmem:[#allocation3 + $0x18c] sm:$0xf] }
 0x41d   :  { %v3758_v62 = vmul.f32 %v14400_v22, %v3688_v1  ;;  %v3759_v39 = vmul.f32 %v14400_v22, %v3689_v43  ;;  %v3760_v28 = vmul.f32 %v14400_v22, %v3690_v44  ;;  %v3761_v38 = vmul.f32 %v14400_v22, %v3691_v56  ;;  %6512 = vst.msk [vmem:[#allocation2 + $0x28] sm:$0xff] %vm1326_vm7, %v6422_v26 }
 0x41e   :  { %v4865_v51 = vrot.slane %v4861_v29, 4  ;;  %v4872_v57 = vor.u32 %v4870_v32, %v4869_v3  ;;  %v4874_v23 = vrot.slane %v4869_v3, 4  ;;  %v4864_v2 = vor.u32 %v4862_v61, %v4861_v29 }
 0x41f   :  { %v3762_v18 = vmul.f32 %v14400_v22, %v3692_v7  ;;  %v3763_v59 = vmul.f32 %v14400_v22, %v3693_v60  ;;  %v3764_v63 = vmul.f32 %v14400_v22, %v3694_v31  ;;  %v3765_v1 = vmul.f32 %v14400_v22, %v3695_v9  ;;  %v6428_v47 = vpop.permute.xlu0 %6427 }
 0x420   :  { %v4873_v43 = vsel %vm13013_vm15, %v4865_v51, %v4872_v57  ;;  %v5206_v44 = vsel %vm12170_vm4, %v4874_v23, %v5205_v50  ;;  %v3766_v56 = vmul.f32 %v14400_v22, %v3696_v25  ;;  %v3767_v11 = vmul.f32 %v14400_v22, %v3697_v36  ;;  %6515 = vst.msk [vmem:[#allocation2 + $0x40] sm:$0xff] %vm1326_vm7, %v6428_v47 }
 0x421   :  { %5204 = vst.msk [vmem:[#allocation3 + $0x190] sm:$0xf] %vm3918_vm0, %v4873_v43  ;;  %5207 = vst [vmem:[#allocation3 + $0x194] sm:$0x1] %v5206_v44  ;;  %v3768_v7 = vmul.f32 %v14400_v22, %v3698_v53  ;;  %v3769_v60 = vmul.f32 %v14400_v22, %v3699_v8  ;;  %v3770_v31 = vmul.f32 %v14400_v22, %v3700_v4 }
 0x422   :  { %v3771_v9 = vmul.f32 %v14400_v22, %v3701_v58  ;;  %v3772_v32 = vmul.f32 %v14400_v22, %v3702_v49  ;;  %v3773_v25 = vmul.f32 %v14400_v22, %v3703_v40  ;;  %v3774_v36 = vmul.f32 %v14400_v22, %v3704_v13 }
 0x423   :  { %v3775_v61 = vmul.f32 %v14400_v22, %v3705_v5  ;;  %v3776_v29 = vmul.f32 %v14400_v22, %v3706_v10  ;;  %v3777_v53 = vmul.f32 %v14400_v22, %v3707_v35  ;;  %v3778_v8 = vmul.f32 %v14400_v22, %v3708_v14  ;;  %v6426_v13 = vpop.permute.xlu1 %6425 }
 0x424   :  { %v3779_v4 = vmul.f32 %v14400_v22, %v3709_v12  ;;  %v3782_v58 = vmul.f32 %v14400_v22, %v3712_v46  ;;  %v3783_v3 = vmul.f32 %v14400_v22, %v3713_v34  ;;  %v5202_v49 = vsel %vm13033_vm3, %v4864_v2, %v5201_v15  ;;  %6514 = vst.msk [vmem:[#allocation2 + $0x38] sm:$0xff] %vm1326_vm7, %v6426_v13 }
 0x425   :  { %v14453_v40 = vadd.f32 %v14408_v42, %v3752_v55  ;;  %v14456_v5 = vadd.f32 %v14408_v42, %v3753_v52  ;;  %v14459_v10 = vadd.f32 %v14408_v42, %v3754_v6  ;;  %v14462_v35 = vadd.f32 %v14408_v42, %v3755_v16  ;;  %5203 = vst [vmem:[#allocation3 + $0x18c] sm:$0xf] %v5202_v49 }
 0x426   :  { %v14465_v14 = vadd.f32 %v14408_v42, %v3756_v41  ;;  %v14469_v22 = vadd.f32 %v14408_v42, %v3757_v27  ;;  %v14472_v12 = vadd.f32 %v14408_v42, %v3758_v62  ;;  %v14475_v46 = vadd.f32 %v14408_v42, %v3759_v39 }
 0x427   :  { %v14478_v34 = vadd.f32 %v14408_v42, %v3760_v28  ;;  %v14481_v55 = vadd.f32 %v14408_v42, %v3761_v38  ;;  %v14484_v52 = vadd.f32 %v14408_v42, %v3762_v18  ;;  %v14487_v6 = vadd.f32 %v14408_v42, %v3763_v59  ;;  %v6432_v41 = vpop.permute.xlu0 %6431 }
 0x428   :  { %v14490_v16 = vadd.f32 %v14408_v42, %v3764_v63  ;;  %v14493_v27 = vadd.f32 %v14408_v42, %v3765_v1  ;;  %v14496_v50 = vadd.f32 %v14408_v42, %v3766_v56  ;;  %v14499_v62 = vadd.f32 %v14408_v42, %v3767_v11  ;;  %6517 = vst.msk [vmem:[#allocation2 + $0x50] sm:$0xff] %vm1326_vm7, %v6432_v41 }
 0x429   :  { %v14502_v39 = vadd.f32 %v14408_v42, %v3768_v7  ;;  %v14506_v28 = vadd.f32 %v14408_v42, %v3769_v60  ;;  %v14509_v38 = vadd.f32 %v14408_v42, %v3770_v31  ;;  %v14512_v51 = vadd.f32 %v14408_v42, %v3771_v9 }
 0x42a   :  { %v14515_v57 = vadd.f32 %v14408_v42, %v3772_v32  ;;  %v14518_v23 = vadd.f32 %v14408_v42, %v3773_v25  ;;  %v14521_v2 = vadd.f32 %v14408_v42, %v3774_v36  ;;  %v14524_v18 = vadd.f32 %v14408_v42, %v3775_v61 }
 0x42b   :  { %v14527_v59 = vadd.f32 %v14408_v42, %v3776_v29  ;;  %v14530_v63 = vadd.f32 %v14408_v42, %v3777_v53  ;;  %v14533_v1 = vadd.f32 %v14408_v42, %v3778_v8  ;;  %v14536_v43 = vadd.f32 %v14408_v42, %v3779_v4  ;;  %v6430_v7 = vpop.permute.xlu1 %6429 }
 0x42c   :  { %v14539_v44 = vadd.f32 %v14408_v42, %v3782_v58  ;;  %v14542_v56 = vadd.f32 %v14408_v42, %v3783_v3  ;;  %v3886_v11 = vmax.f32 %v14453_v40, 0.0  ;;  %v3887_v47 = vmax.f32 %v14456_v5, 0.0  ;;  %6516 = vst.msk [vmem:[#allocation2 + $0x48] sm:$0xff] %vm1326_vm7, %v6430_v7 }
 0x42d   :  { %v3888_v15 = vmax.f32 %v14459_v10, 0.0  ;;  %v3889_v60 = vmax.f32 %v14462_v35, 0.0  ;;  %v3890_v31 = vmax.f32 %v14465_v14, 0.0  ;;  %v3891_v9 = vmax.f32 %v14469_v22, 0.0 }
 0x42e   :  { %v3892_v32 = vmax.f32 %v14472_v12, 0.0  ;;  %v3893_v42 = vmax.f32 %v14475_v46, 0.0  ;;  %v3894_v25 = vmax.f32 %v14478_v34, 0.0  ;;  %v3895_v36 = vmax.f32 %v14481_v55, 0.0 }
 0x42f   :  { %v3896_v61 = vmax.f32 %v14484_v52, 0.0  ;;  %v3897_v29 = vmax.f32 %v14487_v6, 0.0  ;;  %v3898_v53 = vmax.f32 %v14490_v16, 0.0  ;;  %v3899_v8 = vmax.f32 %v14493_v27, 0.0 }
 0x430   :  { %v3900_v4 = vmax.f32 %v14496_v50, 0.0  ;;  %v3901_v58 = vmax.f32 %v14499_v62, 0.0  ;;  %v3902_v3 = vmax.f32 %v14502_v39, 0.0  ;;  %v3903_v49 = vmax.f32 %v14506_v28, 0.0 }
 0x431   :  { %v3904_v40 = vmax.f32 %v14509_v38, 0.0  ;;  %v3905_v13 = vmax.f32 %v14512_v51, 0.0  ;;  %v3906_v5 = vmax.f32 %v14515_v57, 0.0  ;;  %v3907_v10 = vmax.f32 %v14518_v23, 0.0 }
 0x432   :  { %v3908_v35 = vmax.f32 %v14521_v2, 0.0  ;;  %v3909_v14 = vmax.f32 %v14524_v18, 0.0  ;;  %v3910_v22 = vmax.f32 %v14527_v59, 0.0  ;;  %v3911_v12 = vmax.f32 %v14530_v63, 0.0 }
 0x433   :  { %v3912_v46 = vmax.f32 %v14533_v1, 0.0  ;;  %v3913_v34 = vmax.f32 %v14536_v43, 0.0  ;;  %v3916_v55 = vmax.f32 %v14539_v44, 0.0  ;;  %v3917_v52 = vmax.f32 %v14542_v56, 0.0  ;;  %v6436_v62 = vpop.permute.xlu0 %6435 }
 0x434   :  { %v14575_v6 = vpack.c.bf16 %v3886_v11, %v3886_v11  ;;  %v14577_v16 = vpack.c.bf16 %v3887_v47, %v3887_v47  ;;  %v14579_v41 = vpack.c.bf16 %v3888_v15, %v3888_v15  ;;  %v14581_v27 = vpack.c.bf16 %v3889_v60, %v3889_v60  ;;  %6519 = vst.msk [vmem:[#allocation2 + $0x60] sm:$0xff] %vm1326_vm7, %v6436_v62 }
 0x435   :  { %v14583_v50 = vpack.c.bf16 %v3890_v31, %v3890_v31  ;;  %v14585_v39 = vpack.c.bf16 %v3891_v9, %v3891_v9  ;;  %v14587_v28 = vpack.c.bf16 %v3892_v32, %v3892_v32  ;;  %v14589_v38 = vpack.c.bf16 %v3893_v42, %v3893_v42 }
 0x436   :  { %v14591_v51 = vpack.c.bf16 %v3894_v25, %v3894_v25  ;;  %v14594_v57 = vpack.c.bf16 %v3895_v36, %v3895_v36  ;;  %v14596_v23 = vpack.c.bf16 %v3896_v61, %v3896_v61  ;;  %v14598_v2 = vpack.c.bf16 %v3897_v29, %v3897_v29  ;;  %v6434_v44 = vpop.permute.xlu1 %6433 }
 0x437   :  { %v14600_v18 = vpack.c.bf16 %v3898_v53, %v3898_v53  ;;  %v14602_v59 = vpack.c.bf16 %v3899_v8, %v3899_v8  ;;  %v14604_v63 = vpack.c.bf16 %v3900_v4, %v3900_v4  ;;  %v14606_v1 = vpack.c.bf16 %v3901_v58, %v3901_v58  ;;  %6518 = vst.msk [vmem:[#allocation2 + $0x58] sm:$0xff] %vm1326_vm7, %v6434_v44 }
 0x438   :  { %v14608_v43 = vpack.c.bf16 %v3902_v3, %v3902_v3  ;;  %v14610_v56 = vpack.c.bf16 %v3903_v49, %v3903_v49  ;;  %v14612_v11 = vpack.c.bf16 %v3904_v40, %v3904_v40  ;;  %v14614_v47 = vpack.c.bf16 %v3905_v13, %v3905_v13 }
 0x439   :  { %v14616_v15 = vpack.c.bf16 %v3906_v5, %v3906_v5  ;;  %v14619_v7 = vpack.c.bf16 %v3907_v10, %v3907_v10  ;;  %v14621_v60 = vpack.c.bf16 %v3908_v35, %v3908_v35  ;;  %v14623_v31 = vpack.c.bf16 %v3909_v14, %v3909_v14 }
 0x43a   :  { %v14625_v9 = vpack.c.bf16 %v3910_v22, %v3910_v22  ;;  %v14627_v32 = vpack.c.bf16 %v3911_v12, %v3911_v12  ;;  %v14629_v42 = vpack.c.bf16 %v3912_v46, %v3912_v46  ;;  %v14631_v25 = vpack.c.bf16 %v3913_v34, %v3913_v34 }
 0x43b   :  { %v14633_v36 = vpack.c.bf16 %v3916_v55, %v3916_v55  ;;  %v14635_v61 = vpack.c.bf16 %v3917_v52, %v3917_v52  ;;  %v4646_v49 = vshrl.u32 %v14581_v27, 16  ;;  %v4655_v13 = vshrl.u32 %v14583_v50, 16 }
 0x43c   :  { %18375 = vst [vmem:[#allocation58_spill] sm:$0xff] %v14625_v9  ;;  %18376 = vst [vmem:[#allocation61_spill] sm:$0xff] %v14627_v32  ;;  %v4663_v10 = vshrl.u32 %v14585_v39, 16  ;;  %v4672_v14 = vshrl.u32 %v14587_v28, 16  ;;  %v4680_v12 = vshrl.u32 %v14589_v38, 16  ;;  %v4689_v34 = vshrl.u32 %v14591_v51, 16 }
 0x43d   :  { %18377 = vst [vmem:[#allocation60_spill] sm:$0xff] %v14629_v42  ;;  %18378 = vst [vmem:[#allocation41_spill] sm:$0xff] %v14631_v25  ;;  %v4697_v52 = vshrl.u32 %v14594_v57, 16  ;;  %v4706_v5 = vshrl.u32 %v14596_v23, 16  ;;  %v4714_v40 = vshrl.u32 %v14598_v2, 16  ;;  %v4723_v46 = vshrl.u32 %v14600_v18, 16 }
 0x43e   :  { %18379 = vst [vmem:[#allocation42_spill] sm:$0xff] %v14633_v36  ;;  %18380 = vst [vmem:[#allocation44_spill] sm:$0xff] %v14635_v61  ;;  %v6440_v62 = vpop.permute.xlu0 %6439  ;;  %v4731_v55 = vshrl.u32 %v14602_v59, 16  ;;  %v4740_v44 = vshrl.u32 %v14604_v63, 16  ;;  %v4748_v35 = vshrl.u32 %v14606_v1, 16  ;;  %v4765_v8 = vshrl.u32 %v14610_v56, 16 }
 0x43f   :  { %6521 = vst.msk [vmem:[#allocation2 + $0x70] sm:$0xff] %vm1326_vm7, %v6440_v62  ;;  %v4757_v62 = vshrl.u32 %v14608_v43, 16  ;;  %v4774_v30 = vshrl.u32 %v14612_v11, 16  ;;  %v4782_v54 = vshrl.u32 %v14614_v47, 16  ;;  %v4791_v58 = vshrl.u32 %v14616_v15, 16 }
 0x440   :  { %v4799_v22 = vshrl.u32 %v14619_v7, 16  ;;  %v4808_v3 = vshrl.u32 %v14621_v60, 16  ;;  %v4816_v4 = vshrl.u32 %v14623_v31, 16  ;;  %v4833_v33 = vshrl.u32 %v14627_v32, 16 }
 0x441   :  { %v4842_v45 = vshrl.u32 %v14629_v42, 16  ;;  %v4850_v17 = vshrl.u32 %v14631_v25, 16  ;;  %v4876_v21 = vshrl.u32 %v14633_v36, 16  ;;  %v4884_v26 = vshrl.u32 %v14635_v61, 16 }
 0x442   :  { %v6438_v29 = vpop.permute.xlu1 %6437  ;;  %v18381_v0 = vshrl.u32 %v14575_v6, 16  ;;  %v18382_v37 = vshrl.u32 %v14577_v16, 16  ;;  %v18383_v24 = vshrl.u32 %v14579_v41, 16  ;;  %v14712_v32 = vrot.slane %v4646_v49, 7 }
 0x443   :  { %6520 = vst.msk [vmem:[#allocation2 + $0x68] sm:$0xff] %vm1326_vm7, %v6438_v29  ;;  %v4825_v29 = vshrl.u32 %v14625_v9, 16  ;;  %v14714_v19 = vrot.slane %v4655_v13, 7  ;;  %v14716_v36 = vrot.slane %v4663_v10, 7  ;;  %v14720_v53 = vrot.slane %v4680_v12, 7 }
 0x444   :  { %v14702_v20 = vrot.slane %v18381_v0, 7  ;;  %v14706_v42 = vrot.slane %v18382_v37, 7  ;;  %v14710_v25 = vrot.slane %v18383_v24, 7  ;;  %v14722_v0 = vrot.slane %v4689_v34, 7 }
 0x445   :  { %v14724_v61 = vrot.slane %v4697_v52, 7  ;;  %v14726_v37 = vrot.slane %v4706_v5, 7  ;;  %v14728_v9 = vrot.slane %v4714_v40, 7  ;;  %v14730_v24 = vrot.slane %v4723_v46, 7 }
 0x446   :  { %v14732_v49 = vrot.slane %v4731_v55, 7  ;;  %v14734_v13 = vrot.slane %v4740_v44, 7  ;;  %v14736_v10 = vrot.slane %v4748_v35, 7  ;;  %v14740_v12 = vrot.slane %v4765_v8, 7 }
 0x447   :  { %v6442_v48 = vpop.permute.xlu1 %6441  ;;  %v14742_v34 = vrot.slane %v4774_v30, 7  ;;  %v14744_v52 = vrot.slane %v4782_v54, 7  ;;  %v14746_v5 = vrot.slane %v4791_v58, 7  ;;  %v14748_v40 = vrot.slane %v4799_v22, 7 }
 0x448   :  { %6522 = vst.msk [vmem:[#allocation2 + $0x78] sm:$0xff] %vm1326_vm7, %v6442_v48  ;;  %v14718_v48 = vrot.slane %v4672_v14, 7  ;;  %v14738_v14 = vrot.slane %v4757_v62, 7  ;;  %v14750_v46 = vrot.slane %v4808_v3, 7  ;;  %v14752_v55 = vrot.slane %v4816_v4, 7 }
 0x449   :  { %18384 = vst [vmem:[#allocation45_spill] sm:$0xff] %v14744_v52  ;;  %18385 = vst [vmem:[#allocation47_spill] sm:$0xff] %v14748_v40  ;;  %v14754_v44 = vrot.slane %v4825_v29, 7  ;;  %v14756_v35 = vrot.slane %v4833_v33, 7  ;;  %v14758_v62 = vrot.slane %v4842_v45, 7  ;;  %v14760_v8 = vrot.slane %v4850_v17, 7 }
 0x44a   :  { %18386 = vst [vmem:[#allocation71_spill] sm:$0xff] %v14752_v55  ;;  %v14762_v30 = vrot.slane %v4876_v21, 7  ;;  %v14764_v54 = vrot.slane %v4884_v26, 7  ;;  %v18390_v58 = vshll.u32 %v14575_v6, 16  ;;  %v18391_v3 = vshll.u32 %v14577_v16, 16  ;;  %v18420_v26 = vld [vmem:[#allocation61_spill] sm:$0xff] }
 0x44b   :  { %18387 = vst [vmem:[#allocation6_spill] sm:$0xff] %v14756_v35  ;;  %18388 = vst [vmem:[#allocation75_spill] sm:$0xff] %v14760_v8  ;;  %v18392_v21 = vshll.u32 %v14579_v41, 16  ;;  %v18393_v6 = vshll.u32 %v14581_v27, 16  ;;  %v18394_v16 = vshll.u32 %v14583_v50, 16  ;;  %v4661_v45 = vrot.slane %v14714_v19, 4 }
 0x44c   :  { %18389 = vst [vmem:[#allocation56_spill] sm:$0xff] %v14764_v54  ;;  %v14769_v22 = vor.u32 %v18390_v58, %v14702_v20  ;;  %v14775_v33 = vor.u32 %v18391_v3, %v14706_v42  ;;  %v18395_v41 = vshll.u32 %v14585_v39, 16  ;;  %v18396_v27 = vshll.u32 %v14587_v28, 16 }
 0x44d   :  { %v14781_v17 = vor.u32 %v18392_v21, %v14710_v25  ;;  %v14787_v29 = vor.u32 %v18393_v6, %v14712_v32  ;;  %v14793_v3 = vor.u32 %v18394_v16, %v14714_v19  ;;  %v4678_v58 = vrot.slane %v14718_v48, 4 }
 0x44e   :  { %v4668_v21 = vor.u32 %v18395_v41, %v14716_v36  ;;  %v14803_v6 = vor.u32 %v18396_v27, %v14718_v48  ;;  %v18397_v50 = vshll.u32 %v14589_v38, 16  ;;  %v18398_v19 = vshll.u32 %v14591_v51, 16 }
 0x44f   :  { %v4695_v41 = vrot.slane %v14722_v0, 4  ;;  %v18399_v28 = vshll.u32 %v14594_v57, 16  ;;  %v18400_v48 = vshll.u32 %v14596_v23, 16  ;;  %v18401_v51 = vshll.u32 %v14598_v2, 16 }
 0x450   :  { %v4685_v16 = vor.u32 %v18397_v50, %v14720_v53  ;;  %v14813_v39 = vor.u32 %v18398_v19, %v14722_v0  ;;  %v4712_v50 = vrot.slane %v14726_v37, 4  ;;  %v18402_v0 = vshll.u32 %v14600_v18, 16 }
 0x451   :  { %v4702_v27 = vor.u32 %v18399_v28, %v14724_v61  ;;  %v14823_v38 = vor.u32 %v18400_v48, %v14726_v37  ;;  %v4719_v19 = vor.u32 %v18401_v51, %v14728_v9  ;;  %v4729_v28 = vrot.slane %v14730_v24, 4 }
 0x452   :  { %v14833_v57 = vor.u32 %v18402_v0, %v14730_v24  ;;  %v18403_v23 = vshll.u32 %v14602_v59, 16  ;;  %v18404_v37 = vshll.u32 %v14604_v63, 16  ;;  %v4746_v51 = vrot.slane %v14734_v13, 4 }
 0x453   :  { %v18405_v18 = vshll.u32 %v14606_v1, 16  ;;  %v18406_v24 = vshll.u32 %v14608_v43, 16  ;;  %v18407_v63 = vshll.u32 %v14610_v56, 16  ;;  %v18410_v43 = vshll.u32 %v14614_v47, 16 }
 0x454   :  { %v4736_v48 = vor.u32 %v18403_v23, %v14732_v49  ;;  %v14843_v2 = vor.u32 %v18404_v37, %v14734_v13  ;;  %v4763_v23 = vrot.slane %v14738_v14, 4  ;;  %v18408_v13 = vshll.u32 %v14612_v11, 16 }
 0x455   :  { %v4753_v0 = vor.u32 %v18405_v18, %v14736_v10  ;;  %v14853_v59 = vor.u32 %v18406_v24, %v14738_v14  ;;  %v4770_v37 = vor.u32 %v18407_v63, %v14740_v12  ;;  %v4780_v18 = vrot.slane %v14742_v34, 4 }
 0x456   :  { %v14863_v1 = vor.u32 %v18408_v13, %v14742_v34  ;;  %v4787_v24 = vor.u32 %v18410_v43, %v14744_v52  ;;  %v18411_v14 = vshll.u32 %v14616_v15, 16  ;;  %v4797_v63 = vrot.slane %v14746_v5, 4 }
 0x457   :  { %v18413_v11 = vshll.u32 %v14619_v7, 16  ;;  %v18414_v34 = vshll.u32 %v14621_v60, 16  ;;  %v4814_v43 = vrot.slane %v14750_v46, 4  ;;  %v18416_v15 = vshll.u32 %v14623_v31, 16 }
 0x458   :  { %18409 = vst [vmem:[#allocation74_spill] sm:$0xff] %v14863_v1  ;;  %v14873_v56 = vor.u32 %v18411_v14, %v14746_v5  ;;  %v18417_v5 = vld [vmem:[#allocation58_spill] sm:$0xff]  ;;  %v18421_v60 = vshll.u32 %v18420_v26, 16  ;;  %v4848_v4 = vrot.slane %v14758_v62, 4 }
 0x459   :  { %v4804_v13 = vor.u32 %v18413_v11, %v14748_v40  ;;  %v14883_v47 = vor.u32 %v18414_v34, %v14750_v46  ;;  %v4821_v14 = vor.u32 %v18416_v15, %v14752_v55  ;;  %v4831_v11 = vrot.slane %v14754_v44, 4  ;;  %v18422_v46 = vld [vmem:[#allocation60_spill] sm:$0xff]  ;;  %v14905_v15 = vld [vmem:[#allocation3 + $0xe4] sm:$0xf] }
 0x45a   :  { %18412 = vst [vmem:[#allocation7_spill] sm:$0xff] %v14873_v56  ;;  %v18418_v56 = vshll.u32 %v18417_v5, 16  ;;  %v4838_v34 = vor.u32 %v18421_v60, %v14756_v35  ;;  %v18423_v40 = vshll.u32 %v18422_v46, 16  ;;  %v18427_v26 = vld [vmem:[#allocation42_spill] sm:$0xff]  ;;  %v5114_v46 = vld [vmem:[#allocation3 + $0xf8] sm:$0x1] }
 0x45b   :  { %18415 = vst [vmem:[#allocation78_spill] sm:$0xff] %v14883_v47  ;;  %v18428_v60 = vshll.u32 %v18427_v26, 16  ;;  %v14917_v47 = vld [vmem:[#allocation3 + $0xf0] sm:$0xf]  ;;  %v5121_v1 = vld [vmem:[#allocation3 + $0x104] sm:$0x1] }
 0x45c   :  { %v14893_v7 = vor.u32 %v18418_v56, %v14754_v44  ;;  %v14903_v31 = vor.u32 %v18423_v40, %v14758_v62  ;;  %v18425_v56 = vld [vmem:[#allocation41_spill] sm:$0xff]  ;;  %v5107_v40 = vld [vmem:[#allocation3 + $0xec] sm:$0x1]  ;;  %v18430_v35 = vld [vmem:[#allocation44_spill] sm:$0xff] }
 0x45d   :  { %v18426_v5 = vshll.u32 %v18425_v56, 16  ;;  %v14915_v55 = vor.u32 %v18428_v60, %v14762_v30  ;;  %v18431_v62 = vshll.u32 %v18430_v35, 16  ;;  %v14929_v60 = vld [vmem:[#allocation3 + $0x108] sm:$0xf]  ;;  %v14945_v56 = vld [vmem:[#allocation3 + $0x114] sm:$0xf] }
 0x45e   :  { %18419 = vst [vmem:[#allocation65_spill] sm:$0xff] %v14893_v7  ;;  %18424 = vst [vmem:[#allocation77_spill] sm:$0xff] %v14903_v31  ;;  %v4882_v31 = vrot.slane %v14762_v30, 4  ;;  %v18434_v30 = vrot.slane %v14710_v25, 4  ;;  %v5135_v25 = vld [vmem:[#allocation3 + $0x11c] sm:$0x1]  ;;  %v5125_v44 = vsel %vm13033_vm3, %v14803_v6, %v14929_v60 }
 0x45f   :  { %v4855_v7 = vor.u32 %v18426_v5, %v14760_v8  ;;  %18429 = vst [vmem:[#allocation8_spill] sm:$0xff] %v14915_v55  ;;  %v4889_v52 = vor.u32 %v18431_v62, %v14764_v54  ;;  %v18432_v5 = vrot.slane %v14702_v20, 4  ;;  %v5117_v55 = vld [vmem:[#allocation3 + $0xfc] sm:$0xf]  ;;  %v5128_v8 = vld [vmem:[#allocation3 + $0x110] sm:$0x1]  ;;  %v4669_v62 = vsel %vm13013_vm15, %v4661_v45, %v4668_v21 }
 0x460   :  { %v4652_v35 = vsel %vm13013_vm15, %v18434_v30, %v14787_v29  ;;  %v4686_v20 = vsel %vm13013_vm15, %v4678_v58, %v4685_v16  ;;  %v5142_v54 = vld [vmem:[#allocation3 + $0x128] sm:$0x1]  ;;  %v4720_v29 = vsel %vm13013_vm15, %v4712_v50, %v4719_v19  ;;  %v4737_v45 = vsel %vm13013_vm15, %v4729_v28, %v4736_v48  ;;  %5120 = vst.msk [vmem:[#allocation3 + $0x100] sm:$0xf] %vm3918_vm0, %v4669_v62  ;;  %v14959_v16 = vld [vmem:[#allocation3 + $0x138] sm:$0xf] }
 0x461   :  { %v4635_v26 = vsel %vm13013_vm15, %v18432_v5, %v14775_v33  ;;  %v4703_v33 = vsel %vm13013_vm15, %v4695_v41, %v4702_v27  ;;  %v14943_v5 = vld [vmem:[#allocation3 + $0x120] sm:$0xf]  ;;  %v4754_v58 = vsel %vm13013_vm15, %v4746_v51, %v4753_v0  ;;  %v4771_v21 = vsel %vm13013_vm15, %v4763_v23, %v4770_v37  ;;  %5113 = vst.msk [vmem:[#allocation3 + $0xf4] sm:$0xf] %vm3918_vm0, %v4652_v35  ;;  %v14961_v41 = vld [vmem:[#allocation3 + $0x12c] sm:$0xf] }
 0x462   :  { %5106 = vst.msk [vmem:[#allocation3 + $0xe8] sm:$0xf] %vm3918_vm0, %v4635_v26  ;;  %5127 = vst.msk [vmem:[#allocation3 + $0x10c] sm:$0xf] %vm3918_vm0, %v4686_v20  ;;  %v5156_v27 = vld [vmem:[#allocation3 + $0x140] sm:$0x1]  ;;  %v4788_v50 = vsel %vm13013_vm15, %v4780_v18, %v4787_v24  ;;  %v4805_v19 = vsel %vm13013_vm15, %v4797_v63, %v4804_v13  ;;  %v4822_v28 = vsel %vm13013_vm15, %v4814_v43, %v4821_v14 }
 0x463   :  { %5134 = vst.msk [vmem:[#allocation3 + $0x118] sm:$0xf] %vm3918_vm0, %v4703_v33  ;;  %v4839_v48 = vsel %vm13013_vm15, %v4831_v11, %v4838_v34  ;;  %5141 = vst.msk [vmem:[#allocation3 + $0x124] sm:$0xf] %vm3918_vm0, %v4720_v29  ;;  %v5149_v51 = vld [vmem:[#allocation3 + $0x134] sm:$0x1]  ;;  %v4856_v37 = vsel %vm13013_vm15, %v4848_v4, %v4855_v7  ;;  %v4890_v18 = vsel %vm13013_vm15, %v4882_v31, %v4889_v52 }
 0x464   :  { %5148 = vst.msk [vmem:[#allocation3 + $0x130] sm:$0xf] %vm3918_vm0, %v4737_v45  ;;  %5155 = vst.msk [vmem:[#allocation3 + $0x13c] sm:$0xf] %vm3918_vm0, %v4754_v58  ;;  %v14975_v0 = vld [vmem:[#allocation3 + $0x150] sm:$0xf]  ;;  %v5104_v63 = vsel %vm13033_vm3, %v14769_v22, %v14905_v15  ;;  %v5118_v34 = vsel %vm13033_vm3, %v14793_v3, %v5117_v55  ;;  %v5132_v3 = vsel %vm13033_vm3, %v14813_v39, %v14945_v56 }
 0x465   :  { %5162 = vst.msk [vmem:[#allocation3 + $0x148] sm:$0xf] %vm3918_vm0, %v4771_v21  ;;  %v5159_v23 = vld [vmem:[#allocation3 + $0x144] sm:$0xf]  ;;  %v18436_v13 = vrot.slane %v14706_v42, 4  ;;  %v5111_v42 = vsel %vm13033_vm3, %v14781_v17, %v14917_v47  ;;  %v18438_v22 = vrot.slane %v14712_v32, 4  ;;  %v5146_v39 = vsel %vm13033_vm3, %v14833_v57, %v14961_v41  ;;  %vm18478_vm15 = vmmov %vm18477_vm9 }
 0x466   :  { %5169 = vst.msk [vmem:[#allocation3 + $0x154] sm:$0xf] %vm3918_vm0, %v4788_v50  ;;  %5176 = vst.msk [vmem:[#allocation3 + $0x160] sm:$0xf] %vm3918_vm0, %v4805_v19  ;;  %v5170_v4 = vld [vmem:[#allocation3 + $0x158] sm:$0x1]  ;;  %v5160_v57 = vsel %vm13033_vm3, %v14853_v59, %v5159_v23 }
 0x467   :  { %v5108_v14 = vsel %vm12170_vm4, %v18436_v13, %v5107_v40  ;;  %5183 = vst.msk [vmem:[#allocation3 + $0x16c] sm:$0xf] %vm3918_vm0, %v4822_v28  ;;  %5190 = vst.msk [vmem:[#allocation3 + $0x178] sm:$0xf] %vm3918_vm0, %v4839_v48  ;;  %v5163_v52 = vld [vmem:[#allocation3 + $0x14c] sm:$0x1]  ;;  %v5115_v11 = vsel %vm12170_vm4, %v18438_v22, %v5114_v46 }
 0x468   :  { %v14993_v7 = vld [vmem:[#allocation3 + $0x168] sm:$0xf]  ;;  %v18439_v31 = vrot.slane %v14716_v36, 4  ;;  %5105 = vst [vmem:[#allocation3 + $0xe4] sm:$0xf] %v5104_v63  ;;  %v18440_v55 = vrot.slane %v14720_v53, 4 }
 0x469   :  { %5109 = vst [vmem:[#allocation3 + $0xec] sm:$0x1] %v5108_v14  ;;  %5197 = vst.msk [vmem:[#allocation3 + $0x184] sm:$0xf] %vm3918_vm0, %v4856_v37  ;;  %v5173_v17 = vld [vmem:[#allocation3 + $0x15c] sm:$0xf] }
 0x46a   :  { %v5122_v15 = vsel %vm12170_vm4, %v18439_v31, %v5121_v1  ;;  %5211 = vst.msk [vmem:[#allocation3 + $0x19c] sm:$0xf] %vm3918_vm0, %v4890_v18  ;;  %v5184_v32 = vld [vmem:[#allocation3 + $0x170] sm:$0x1]  ;;  %v5177_v47 = vld [vmem:[#allocation3 + $0x164] sm:$0x1]  ;;  %v5129_v36 = vsel %vm12170_vm4, %v18440_v55, %v5128_v8  ;;  %v5139_v8 = vsel %vm13033_vm3, %v14823_v38, %v14943_v5 }
 0x46b   :  { %v18441_v1 = vrot.slane %v14724_v61, 4  ;;  %5112 = vst [vmem:[#allocation3 + $0xf0] sm:$0xf] %v5111_v42  ;;  %5116 = vst [vmem:[#allocation3 + $0xf8] sm:$0x1] %v5115_v11  ;;  %v18442_v26 = vrot.slane %v14728_v9, 4 }
 0x46c   :  { %5119 = vst [vmem:[#allocation3 + $0xfc] sm:$0xf] %v5118_v34  ;;  %5123 = vst [vmem:[#allocation3 + $0x104] sm:$0x1] %v5122_v15  ;;  %v5194_v6 = vld [vmem:[#allocation3 + $0x180] sm:$0xf] }
 0x46d   :  { %v5136_v46 = vsel %vm12170_vm4, %v18441_v1, %v5135_v25  ;;  %v5187_v40 = vld [vmem:[#allocation3 + $0x174] sm:$0xf]  ;;  %v5191_v53 = vld [vmem:[#allocation3 + $0x17c] sm:$0x1]  ;;  %v5143_v61 = vsel %vm12170_vm4, %v18442_v26, %v5142_v54  ;;  %v18443_v56 = vrot.slane %v14732_v49, 4  ;;  %v5153_v54 = vsel %vm13033_vm3, %v14843_v2, %v14959_v16  ;;  %v18446_v2 = vld [vmem:[#allocation74_spill] sm:$0xff] }
 0x46e   :  { %5126 = vst [vmem:[#allocation3 + $0x108] sm:$0xf] %v5125_v44  ;;  %5130 = vst [vmem:[#allocation3 + $0x110] sm:$0x1] %v5129_v36  ;;  %v5198_v38 = vld [vmem:[#allocation3 + $0x188] sm:$0x1] }
 0x46f   :  { %v5150_v60 = vsel %vm12170_vm4, %v18443_v56, %v5149_v51  ;;  %5133 = vst [vmem:[#allocation3 + $0x114] sm:$0xf] %v5132_v3  ;;  %5137 = vst [vmem:[#allocation3 + $0x11c] sm:$0x1] %v5136_v46  ;;  %v5208_v30 = vld [vmem:[#allocation3 + $0x198] sm:$0xf] }
 0x470   :  { %v5212_v9 = vld [vmem:[#allocation3 + $0x1a0] sm:$0x1]  ;;  %v18444_v35 = vrot.slane %v14736_v10, 4  ;;  %v18445_v62 = vrot.slane %v14740_v12, 4  ;;  %5140 = vst [vmem:[#allocation3 + $0x120] sm:$0xf] %v5139_v8  ;;  %v5167_v10 = vsel %vm13033_vm3, %v18446_v2, %v14975_v0 }
 0x471   :  { %5144 = vst [vmem:[#allocation3 + $0x128] sm:$0x1] %v5143_v61  ;;  %5147 = vst [vmem:[#allocation3 + $0x12c] sm:$0xf] %v5146_v39  ;;  %v18447_v33 = vld [vmem:[#allocation45_spill] sm:$0xff]  ;;  %v18449_v59 = vld [vmem:[#allocation7_spill] sm:$0xff] }
 0x472   :  { %v5157_v49 = vsel %vm12170_vm4, %v18444_v35, %v5156_v27  ;;  %v5164_v20 = vsel %vm12170_vm4, %v18445_v62, %v5163_v52  ;;  %5151 = vst [vmem:[#allocation3 + $0x134] sm:$0x1] %v5150_v60  ;;  %v18448_v5 = vrot.slane %v18447_v33, 4  ;;  %v5174_v12 = vsel %vm13033_vm3, %v18449_v59, %v5173_v17  ;;  %v18450_v29 = vld [vmem:[#allocation47_spill] sm:$0xff]  ;;  %5154 = vst [vmem:[#allocation3 + $0x138] sm:$0xf] %v5153_v54 }
 0x473   :  { %v18451_v45 = vrot.slane %v18450_v29, 4  ;;  %5158 = vst [vmem:[#allocation3 + $0x140] sm:$0x1] %v5157_v49  ;;  %5161 = vst [vmem:[#allocation3 + $0x144] sm:$0xf] %v5160_v57  ;;  %v18452_v16 = vld [vmem:[#allocation78_spill] sm:$0xff] }
 0x474   :  { %v5171_v25 = vsel %vm12170_vm4, %v18448_v5, %v5170_v4  ;;  %5165 = vst [vmem:[#allocation3 + $0x14c] sm:$0x1] %v5164_v20  ;;  %v15074_v21 = vld [vmem:[#allocation3 + $0xf4] sm:$0xf]  ;;  %v5181_v41 = vsel %vm13033_vm3, %v18452_v16, %v14993_v7  ;;  %v18453_v27 = vld [vmem:[#allocation71_spill] sm:$0xff]  ;;  %v18455_v28 = vld [vmem:[#allocation65_spill] sm:$0xff] }
 0x475   :  { %v5178_v58 = vsel %vm12170_vm4, %v18451_v45, %v5177_v47  ;;  %v18454_v50 = vrot.slane %v18453_v27, 4  ;;  %v5188_v48 = vsel %vm13033_vm3, %v18455_v28, %v5187_v40  ;;  %v18456_v51 = vld [vmem:[#allocation6_spill] sm:$0xff]  ;;  %5168 = vst [vmem:[#allocation3 + $0x150] sm:$0xf] %v5167_v10  ;;  %5172 = vst [vmem:[#allocation3 + $0x158] sm:$0x1] %v5171_v25 }
 0x476   :  { %v18457_v0 = vrot.slane %v18456_v51, 4  ;;  %5175 = vst [vmem:[#allocation3 + $0x15c] sm:$0xf] %v5174_v12  ;;  %5179 = vst [vmem:[#allocation3 + $0x164] sm:$0x1] %v5178_v58  ;;  %v18458_v18 = vld [vmem:[#allocation77_spill] sm:$0xff] }
 0x477   :  { %v5185_v19 = vsel %vm12170_vm4, %v18454_v50, %v5184_v32  ;;  %v5273_v37 = vld [vmem:[#allocation3 + $0xe8] sm:$0xf]  ;;  %v5195_v63 = vsel %vm13033_vm3, %v18458_v18, %v5194_v6  ;;  %v18461_v52 = vld [vmem:[#allocation8_spill] sm:$0xff]  ;;  %5182 = vst [vmem:[#allocation3 + $0x168] sm:$0xf] %v5181_v41  ;;  %v5989_v34 = vshll.u32 %v15074_v21, 16 }
 0x478   :  { %v5192_v23 = vsel %vm12170_vm4, %v18457_v0, %v5191_v53  ;;  %v18459_v13 = vld [vmem:[#allocation75_spill] sm:$0xff]  ;;  %v5209_v7 = vsel %vm13033_vm3, %v18461_v52, %v5208_v30  ;;  %v18462_v42 = vld [vmem:[#allocation56_spill] sm:$0xff]  ;;  %5186 = vst [vmem:[#allocation3 + $0x170] sm:$0x1] %v5185_v19  ;;  %5189 = vst [vmem:[#allocation3 + $0x174] sm:$0xf] %v5188_v48 }
 0x479   :  { %v18460_v14 = vrot.slane %v18459_v13, 4  ;;  %v18463_v22 = vrot.slane %v18462_v42, 4  ;;  %5193 = vst [vmem:[#allocation3 + $0x17c] sm:$0x1] %v5192_v23  ;;  %5196 = vst [vmem:[#allocation3 + $0x180] sm:$0xf] %v5195_v63 }
 0x47a   :  { %5210 = vst [vmem:[#allocation3 + $0x198] sm:$0xf] %v5209_v7  ;;  %v5993_v31 = vshrl.u32 %v15074_v21, 16  ;;  %v5272_v15 = vld [vmem:[#allocation3 + $0xe4] sm:$0xf]  ;;  %v18464_v24 = vld [vmem:[#allocation59_spill] sm:$0xff] }
 0x47b   :  { %v5199_v4 = vsel %vm12170_vm4, %v18460_v14, %v5198_v38  ;;  %v5213_v11 = vsel %vm12170_vm4, %v18463_v22, %v5212_v9  ;;  %v18465_v17 = vrot.slane %v18464_v24, 5  ;;  %v15111_v47 = vld [vmem:[#allocation3 + $0x14] sm:$0x1]  ;;  %v15114_v55 = vld [vmem:[#allocation3 + $0xf0] sm:$0xf]  ;;  %v5956_v3 = vshrl.u32 %v5272_v15, 16 }
 0x47c   :  { %5200 = vst [vmem:[#allocation3 + $0x188] sm:$0x1] %v5199_v4  ;;  %5214 = vst [vmem:[#allocation3 + $0x1a0] sm:$0x1] %v5213_v11  ;;  %v6583_v44 = vrot.slane %v15111_v47, 5  ;;  %v5959_v1 = vshll.u32 %v5272_v15, 16  ;;  %v15124_v26 = vcombine.low %v5272_v15, %v5273_v37  ;;  %v15303_v47 = vcombine.low %v15114_v55, %v15074_v21 }
 0x47d   :  { %v15109_v32 = vrot.slane %v18465_v17, 4  ;;  %v5277_v36 = vld [vmem:[#allocation3 + $0xf8] sm:$0x1]  ;;  %v18466_v46 = vmov %v18465_v17  ;;  %v18467_v6 = vld [vmem:[#allocation40_spill] sm:$0xff]  ;;  %v5980_v61 = vshrl.u32 %v15114_v55, 16  ;;  %v5983_v39 = vshll.u32 %v15114_v55, 16 }
 0x47e   :  { %v18468_v40 = vrot.slane %v18467_v6, 9  ;;  %v5991_v56 = vrot.slane %v5989_v34, 5  ;;  %v5995_v60 = vrot.slane %v5993_v31, 4  ;;  %v5274_v38 = vld [vmem:[#allocation3 + $0xec] sm:$0x1]  ;;  %v5999_v30 = vshll.u32 %v5277_v36, 16 }
 0x47f   :  { %v5958_v9 = vrot.slane %v5956_v3, 4  ;;  %v5961_v54 = vrot.slane %v5959_v1, 5  ;;  %v5965_v35 = vshll.u32 %v5273_v37, 16  ;;  %v15128_v49 = vld [vmem:[#allocation3 + $0x108] sm:$0xf]  ;;  %5532 = vst.msk [vmem:[#allocation2 + $0x88] sm:$0xff] %vm330_vm6, %v15124_v26 }
 0x480   :  { %v15122_v8 = vsel %vm10900_vm5, %v18468_v40, %v18466_v46  ;;  %v5982_v57 = vrot.slane %v5980_v61, 4  ;;  %v5985_v62 = vrot.slane %v5983_v39, 5  ;;  %v5996_v20 = vor.u32 %v5995_v60, %v5991_v56  ;;  %v15132_v10 = vld [vmem:[#allocation3 + $0x10c] sm:$0xf]  ;;  %v5283_v58 = vld [vmem:[#allocation3 + $0x110] sm:$0x1] }
 0x481   :  { %v5969_v2 = vshrl.u32 %v5273_v37, 16  ;;  %v6001_v33 = vrot.slane %v5999_v30, 5  ;;  %v5962_v5 = vor.u32 %v5961_v54, %v5958_v9  ;;  %v5967_v25 = vrot.slane %v5965_v35, 5  ;;  %v15137_v28 = vld [vmem:[#allocation3 + $0xfc] sm:$0xf]  ;;  %5533 = vst.msk [vmem:[#allocation2 + $0x90] sm:$0xff] %vm330_vm6, %v15303_v47 }
 0x482   :  { %v5975_v59 = vshll.u32 %v5274_v38, 16  ;;  %v5986_v12 = vor.u32 %v5985_v62, %v5982_v57  ;;  %v5997_v29 = vrot.slane %v5996_v20, 4  ;;  %v6028_v16 = vshrl.u32 %v15128_v49, 16  ;;  %v15144_v4 = vld [vmem:[#allocation3 + $0x100] sm:$0xf] }
 0x483   :  { %v5971_v45 = vrot.slane %v5969_v2, 4  ;;  %v5963_v41 = vrot.slane %v5962_v5, 4  ;;  %v6031_v50 = vshll.u32 %v15128_v49, 16  ;;  %v6037_v19 = vshll.u32 %v15132_v10, 16  ;;  %v5280_v15 = vld [vmem:[#allocation3 + $0x104] sm:$0x1] }
 0x484   :  { %v5977_v27 = vrot.slane %v5975_v59, 5  ;;  %v5987_v48 = vrot.slane %v5986_v12, 4  ;;  %v6002_v0 = vsel %vm10192_vm2, %v5997_v29, %v6001_v33  ;;  %v6030_v37 = vrot.slane %v6028_v16, 4  ;;  %v15152_v17 = vld [vmem:[#allocation3 + $0x120] sm:$0xf] }
 0x485   :  { %v5972_v23 = vor.u32 %v5971_v45, %v5967_v25  ;;  %v5968_v18 = vsel %vm10192_vm2, %v5963_v41, %v5967_v25  ;;  %v6033_v63 = vrot.slane %v6031_v50, 5  ;;  %v6039_v13 = vrot.slane %v6037_v19, 5  ;;  %v5289_v62 = vld [vmem:[#allocation3 + $0x128] sm:$0x1]  ;;  %v15171_v59 = vld [vmem:[#allocation3 + $0x114] sm:$0xf] }
 0x486   :  { %v6041_v14 = vshrl.u32 %v15132_v10, 16  ;;  %v5992_v52 = vsel %vm10192_vm2, %v5987_v48, %v5991_v56  ;;  %v6047_v42 = vshll.u32 %v5283_v58, 16  ;;  %v6004_v22 = vshrl.u32 %v15137_v28, 16  ;;  %v15161_v56 = vld [vmem:[#allocation3 + $0x124] sm:$0xf] }
 0x487   :  { %v5973_v7 = vrot.slane %v5972_v23, 4  ;;  %v15149_v11 = vcombine.low %v5992_v52, %v6002_v0  ;;  %v6034_v34 = vor.u32 %v6033_v63, %v6030_v37  ;;  %v6007_v24 = vshll.u32 %v15137_v28, 16  ;;  %v15176_v16 = vld [vmem:[#allocation3 + $0x118] sm:$0xf]  ;;  %v5286_v37 = vld [vmem:[#allocation3 + $0x11c] sm:$0x1] }
 0x488   :  { %v6043_v31 = vrot.slane %v6041_v14, 4  ;;  %v6049_v3 = vrot.slane %v6047_v42, 5  ;;  %v6006_v1 = vrot.slane %v6004_v22, 4  ;;  %v6013_v46 = vshll.u32 %v15144_v4, 16 }
 0x489   :  { %v5978_v36 = vsel %vm10192_vm2, %v5973_v7, %v5977_v27  ;;  %6447 = vrot.lane.b32.xlu0 %v15149_v11, %s10112_s29  ;;  %v6035_v40 = vrot.slane %v6034_v34, 4  ;;  %v6009_v39 = vrot.slane %v6007_v24, 5  ;;  %v6017_v38 = vshrl.u32 %v15144_v4, 16 }
 0x48a   :  { %v15159_v6 = vcombine.low %v5968_v18, %v5978_v36  ;;  %v6044_v61 = vor.u32 %v6043_v31, %v6039_v13  ;;  %v6015_v60 = vrot.slane %v6013_v46, 5  ;;  %v6023_v30 = vshll.u32 %v5280_v15, 16  ;;  %v15188_v31 = vld [vmem:[#allocation3 + $0x138] sm:$0xf] }
 0x48b   :  { %v6076_v9 = vshrl.u32 %v15152_v17, 16  ;;  %v6040_v54 = vsel %vm10192_vm2, %v6035_v40, %v6039_v13  ;;  %v6010_v57 = vor.u32 %v6009_v39, %v6006_v1  ;;  %v6079_v20 = vshll.u32 %v15152_v17, 16  ;;  %v15192_v1 = vld [vmem:[#allocation3 + $0x13c] sm:$0xf] }
 0x48c   :  { %6445 = vrot.lane.b32.xlu1 %v15159_v6, %s10112_s29  ;;  %v6045_v35 = vrot.slane %v6044_v61, 4  ;;  %v6019_v2 = vrot.slane %v6017_v38, 4  ;;  %v6025_v33 = vrot.slane %v6023_v30, 5  ;;  %v6085_v25 = vshll.u32 %v15161_v56, 16  ;;  %v5295_v30 = vld [vmem:[#allocation3 + $0x140] sm:$0x1] }
 0x48d   :  { %v6078_v5 = vrot.slane %v6076_v9, 4  ;;  %v6011_v29 = vrot.slane %v6010_v57, 4  ;;  %v6081_v45 = vrot.slane %v6079_v20, 5  ;;  %v6089_v58 = vshrl.u32 %v15161_v56, 16 }
 0x48e   :  { %v6050_v12 = vsel %vm10192_vm2, %v6045_v35, %v6049_v3  ;;  %v6020_v27 = vor.u32 %v6019_v2, %v6015_v60  ;;  %v6087_v50 = vrot.slane %v6085_v25, 5  ;;  %v6095_v19 = vshll.u32 %v5289_v62, 16  ;;  %v15206_v2 = vld [vmem:[#allocation3 + $0x12c] sm:$0xf] }
 0x48f   :  { %v15178_v41 = vcombine.low %v6040_v54, %v6050_v12  ;;  %v6016_v48 = vsel %vm10192_vm2, %v6011_v29, %v6015_v60  ;;  %v6082_v0 = vor.u32 %v6081_v45, %v6078_v5  ;;  %v6091_v23 = vrot.slane %v6089_v58, 4  ;;  %v15210_v29 = vld [vmem:[#allocation3 + $0x130] sm:$0xf] }
 0x490   :  { %v6052_v18 = vshrl.u32 %v15171_v59, 16  ;;  %v6021_v63 = vrot.slane %v6020_v27, 4  ;;  %v6097_v13 = vrot.slane %v6095_v19, 5  ;;  %v6055_v14 = vshll.u32 %v15171_v59, 16 }
 0x491   :  { %6451 = vrot.lane.b32.xlu0 %v15178_v41, %s10112_s29  ;;  %v6061_v52 = vshll.u32 %v15176_v16, 16  ;;  %v6083_v7 = vrot.slane %v6082_v0, 4  ;;  %v6092_v42 = vor.u32 %v6091_v23, %v6087_v50  ;;  %v6065_v34 = vshrl.u32 %v15176_v16, 16  ;;  %v5292_v0 = vld [vmem:[#allocation3 + $0x134] sm:$0x1] }
 0x492   :  { %v6054_v22 = vrot.slane %v6052_v18, 4  ;;  %v6026_v15 = vsel %vm10192_vm2, %v6021_v63, %v6025_v33  ;;  %v6057_v24 = vrot.slane %v6055_v14, 5  ;;  %v6071_v3 = vshll.u32 %v5286_v37, 16 }
 0x493   :  { %v6063_v36 = vrot.slane %v6061_v52, 5  ;;  %v15194_v46 = vcombine.low %v6016_v48, %v6026_v15  ;;  %v6088_v40 = vsel %vm10192_vm2, %v6083_v7, %v6087_v50  ;;  %v6093_v61 = vrot.slane %v6092_v42, 4  ;;  %v15221_v52 = vld [vmem:[#allocation3 + $0x150] sm:$0xf]  ;;  %v15225_v15 = vld [vmem:[#allocation3 + $0x154] sm:$0xf] }
 0x494   :  { %v6067_v39 = vrot.slane %v6065_v34, 4  ;;  %v6058_v60 = vor.u32 %v6057_v24, %v6054_v22  ;;  %v6073_v38 = vrot.slane %v6071_v3, 5  ;;  %v6124_v9 = vshrl.u32 %v15188_v31, 16 }
 0x495   :  { %v6127_v54 = vshll.u32 %v15188_v31, 16  ;;  %6449 = vrot.lane.b32.xlu1 %v15194_v46, %s10112_s29  ;;  %v6098_v35 = vsel %vm10192_vm2, %v6093_v61, %v6097_v13  ;;  %v6133_v62 = vshll.u32 %v15192_v1, 16  ;;  %v6137_v20 = vshrl.u32 %v15192_v1, 16 }
 0x496   :  { %v6068_v57 = vor.u32 %v6067_v39, %v6063_v36  ;;  %v15208_v33 = vcombine.low %v6088_v40, %v6098_v35  ;;  %v6059_v5 = vrot.slane %v6058_v60, 4  ;;  %v6126_v25 = vrot.slane %v6124_v9, 4  ;;  %v5301_v60 = vld [vmem:[#allocation3 + $0x158] sm:$0x1] }
 0x497   :  { %v6129_v12 = vrot.slane %v6127_v54, 5  ;;  %v6135_v58 = vrot.slane %v6133_v62, 5  ;;  %v6139_v27 = vrot.slane %v6137_v20, 4  ;;  %v6143_v50 = vshll.u32 %v5295_v30, 16  ;;  %v15237_v62 = vld [vmem:[#allocation3 + $0x144] sm:$0xf] }
 0x498   :  { %v6069_v45 = vrot.slane %v6068_v57, 4  ;;  %6455 = vrot.lane.b32.xlu0 %v15208_v33, %s10112_s29  ;;  %v6064_v19 = vsel %vm10192_vm2, %v6059_v5, %v6063_v36  ;;  %v6100_v23 = vshrl.u32 %v15206_v2, 16  ;;  %v6103_v37 = vshll.u32 %v15206_v2, 16 }
 0x499   :  { %v6130_v48 = vor.u32 %v6129_v12, %v6126_v25  ;;  %v6140_v63 = vor.u32 %v6139_v27, %v6135_v58  ;;  %v6145_v13 = vrot.slane %v6143_v50, 5  ;;  %v6109_v14 = vshll.u32 %v15210_v29, 16 }
 0x49a   :  { %v6074_v18 = vsel %vm10192_vm2, %v6069_v45, %v6073_v38  ;;  %v6102_v22 = vrot.slane %v6100_v23, 4  ;;  %v6105_v34 = vrot.slane %v6103_v37, 5  ;;  %v6113_v3 = vshrl.u32 %v15210_v29, 16  ;;  %v15241_v45 = vld [vmem:[#allocation3 + $0x148] sm:$0xf] }
 0x49b   :  { %v15223_v7 = vcombine.low %v6064_v19, %v6074_v18  ;;  %v6131_v42 = vrot.slane %v6130_v48, 4  ;;  %v6141_v24 = vrot.slane %v6140_v63, 4  ;;  %v6111_v36 = vrot.slane %v6109_v14, 5  ;;  %v5298_v23 = vld [vmem:[#allocation3 + $0x14c] sm:$0x1] }
 0x49c   :  { %v6119_v40 = vshll.u32 %v5292_v0, 16  ;;  %v6106_v39 = vor.u32 %v6105_v34, %v6102_v22  ;;  %v6172_v38 = vshrl.u32 %v15221_v52, 16  ;;  %v6175_v30 = vshll.u32 %v15221_v52, 16 }
 0x49d   :  { %6453 = vrot.lane.b32.xlu1 %v15223_v7, %s10112_s29  ;;  %v6136_v61 = vsel %vm10192_vm2, %v6131_v42, %v6135_v58  ;;  %v6146_v9 = vsel %vm10192_vm2, %v6141_v24, %v6145_v13  ;;  %v6115_v54 = vrot.slane %v6113_v3, 4  ;;  %v6181_v57 = vshll.u32 %v15225_v15, 16 }
 0x49e   :  { %v6121_v35 = vrot.slane %v6119_v40, 5  ;;  %v15239_v20 = vcombine.low %v6136_v61, %v6146_v9  ;;  %v6107_v5 = vrot.slane %v6106_v39, 4  ;;  %v6174_v25 = vrot.slane %v6172_v38, 4  ;;  %v15252_v40 = vld [vmem:[#allocation3 + $0x168] sm:$0xf] }
 0x49f   :  { %v6177_v12 = vrot.slane %v6175_v30, 5  ;;  %v6116_v58 = vor.u32 %v6115_v54, %v6111_v36  ;;  %v6183_v27 = vrot.slane %v6181_v57, 5  ;;  %v6185_v50 = vshrl.u32 %v15225_v15, 16  ;;  %v15256_v38 = vld [vmem:[#allocation3 + $0x16c] sm:$0xf] }
 0x4a0   :  { %v6191_v19 = vshll.u32 %v5301_v60, 16  ;;  %6459 = vrot.lane.b32.xlu0 %v15239_v20, %s10112_s29  ;;  %v6112_v48 = vsel %vm10192_vm2, %v6107_v5, %v6111_v36  ;;  %v6148_v37 = vshrl.u32 %v15237_v62, 16  ;;  %v6151_v18 = vshll.u32 %v15237_v62, 16  ;;  %v5307_v5 = vld [vmem:[#allocation3 + $0x170] sm:$0x1] }
 0x4a1   :  { %v6178_v0 = vor.u32 %v6177_v12, %v6174_v25  ;;  %v6117_v63 = vrot.slane %v6116_v58, 4  ;;  %v6187_v13 = vrot.slane %v6185_v50, 4  ;;  %v6157_v42 = vshll.u32 %v15241_v45, 16 }
 0x4a2   :  { %v6193_v14 = vrot.slane %v6191_v19, 5  ;;  %v6150_v34 = vrot.slane %v6148_v37, 4  ;;  %v6153_v24 = vrot.slane %v6151_v18, 5  ;;  %v6161_v3 = vshrl.u32 %v15241_v45, 16 }
 0x4a3   :  { %v6179_v22 = vrot.slane %v6178_v0, 4  ;;  %v6122_v36 = vsel %vm10192_vm2, %v6117_v63, %v6121_v35  ;;  %v6188_v61 = vor.u32 %v6187_v13, %v6183_v27  ;;  %v6159_v39 = vrot.slane %v6157_v42, 5  ;;  %v15272_v13 = vld [vmem:[#allocation3 + $0x160] sm:$0xf] }
 0x4a4   :  { %v6167_v60 = vshll.u32 %v5298_v23, 16  ;;  %v15258_v30 = vcombine.low %v6112_v48, %v6122_v36  ;;  %v6154_v54 = vor.u32 %v6153_v24, %v6150_v34  ;;  %v6163_v57 = vrot.slane %v6161_v3, 4  ;;  %v15268_v23 = vld [vmem:[#allocation3 + $0x15c] sm:$0xf] }
 0x4a5   :  { %v6184_v9 = vsel %vm10192_vm2, %v6179_v22, %v6183_v27  ;;  %v6189_v25 = vrot.slane %v6188_v61, 4  ;;  %v6220_v58 = vshrl.u32 %v15252_v40, 16  ;;  %v6223_v50 = vshll.u32 %v15252_v40, 16 }
 0x4a6   :  { %v6169_v12 = vrot.slane %v6167_v60, 5  ;;  %6457 = vrot.lane.b32.xlu1 %v15258_v30, %s10112_s29  ;;  %v6155_v35 = vrot.slane %v6154_v54, 4  ;;  %v6164_v19 = vor.u32 %v6163_v57, %v6159_v39  ;;  %v6229_v48 = vshll.u32 %v15256_v38, 16  ;;  %v5304_v60 = vld [vmem:[#allocation3 + $0x164] sm:$0x1] }
 0x4a7   :  { %v6233_v0 = vshrl.u32 %v15256_v38, 16  ;;  %v6194_v27 = vsel %vm10192_vm2, %v6189_v25, %v6193_v14  ;;  %v6222_v37 = vrot.slane %v6220_v58, 4  ;;  %v6225_v18 = vrot.slane %v6223_v50, 5 }
 0x4a8   :  { %v6239_v63 = vshll.u32 %v5307_v5, 16  ;;  %v15274_v42 = vcombine.low %v6184_v9, %v6194_v27  ;;  %v6160_v22 = vsel %vm10192_vm2, %v6155_v35, %v6159_v39  ;;  %v6165_v34 = vrot.slane %v6164_v19, 4 }
 0x4a9   :  { %v6231_v24 = vrot.slane %v6229_v48, 5  ;;  %v6226_v3 = vor.u32 %v6225_v18, %v6222_v37  ;;  %v6235_v36 = vrot.slane %v6233_v0, 4  ;;  %v6196_v54 = vshrl.u32 %v15268_v23, 16  ;;  %v10026_v37 = vld [vmem:[#allocation3] sm:$0xf] }
 0x4aa   :  { %v6241_v61 = vrot.slane %v6239_v63, 5  ;;  %6463 = vrot.lane.b32.xlu0 %v15274_v42, %s10112_s29  ;;  %v6170_v14 = vsel %vm10192_vm2, %v6165_v34, %v6169_v12  ;;  %v6199_v9 = vshll.u32 %v15268_v23, 16  ;;  %v6205_v57 = vshll.u32 %v15272_v13, 16  ;;  %v10027_v63 = vld [vmem:[#allocation3 + $0x4] sm:$0xf] }
 0x4ab   :  { %v6209_v39 = vshrl.u32 %v15272_v13, 16  ;;  %v15286_v5 = vcombine.low %v6160_v22, %v6170_v14  ;;  %v6227_v25 = vrot.slane %v6226_v3, 4  ;;  %v6236_v58 = vor.u32 %v6235_v36, %v6231_v24  ;;  %v10028_v36 = vld [vmem:[#allocation3 + $0x8] sm:$0x1] }
 0x4ac   :  { %v6198_v50 = vrot.slane %v6196_v54, 4  ;;  %v6201_v35 = vrot.slane %v6199_v9, 5  ;;  %v6207_v19 = vrot.slane %v6205_v57, 5  ;;  %v6215_v0 = vshll.u32 %v5304_v60, 16  ;;  %v10029_v57 = vld [vmem:[#allocation3 + $0xdc] sm:$0xf] }
 0x4ad   :  { %v6211_v48 = vrot.slane %v6209_v39, 4  ;;  %6461 = vrot.lane.b32.xlu1 %v15286_v5, %s10112_s29  ;;  %v6232_v12 = vsel %vm10192_vm2, %v6227_v25, %v6231_v24  ;;  %v6237_v27 = vrot.slane %v6236_v58, 4  ;;  %v9526_v18 = vrot.slane %v10026_v37, 9  ;;  %v10030_v39 = vld [vmem:[#allocation3 + $0xd8] sm:$0xf] }
 0x4ae   :  { %v6573_v34 = vrot.slane %v10027_v63, 5  ;;  %v6202_v22 = vor.u32 %v6201_v35, %v6198_v50  ;;  %v6584_v3 = vsel %vm10900_vm5, %v15109_v32, %v6583_v44  ;;  %v6576_v60 = vrot.slane %v10028_v36, 5  ;;  %v6444_v44 = vpop.permute.xlu0 %6443  ;;  %v18474_v37 = vld [vmem:[#allocation69_spill] sm:$0xff]  ;;  %v10035_v36 = vld [vmem:[#allocation3 + $0x24] sm:$0xf] }
 0x4af   :  { %v6212_v14 = vor.u32 %v6211_v48, %v6207_v19  ;;  %v6242_v54 = vsel %vm10192_vm2, %v6237_v27, %v6241_v61  ;;  %v6217_v9 = vrot.slane %v6215_v0, 5  ;;  %v9478_v25 = vcombine.low %v10030_v39, %v10029_v57  ;;  %v18476_v39 = vld [vmem:[#allocation76_spill] sm:$0xff] }
 0x4b0   :  { %v6575_v24 = vrot.slane %v6573_v34, 4  ;;  %v15299_v58 = vcombine.low %v6232_v12, %v6242_v54  ;;  %v6203_v50 = vrot.slane %v6202_v22, 4  ;;  %v6574_v32 = vsel %vm10900_vm5, %v9526_v18, %v6573_v34  ;;  %v10034_v18 = vld [vmem:[#allocation3 + $0x28] sm:$0xf]  ;;  %v9937_v34 = vld [vmem:[%s17637_s3] sm:$0xff]  }
 0x4b1   :  { %v6213_v35 = vrot.slane %v6212_v14, 4  ;;  %5531 = vst.msk [vmem:[#allocation2 + $0x80] sm:$0xff] %vm330_vm6, %v9478_v25  ;;  %v15310_v61 = vcombine.low %v15128_v49, %v15132_v10  ;;  %v15314_v48 = vcombine.low %v15137_v28, %v15144_v4  ;;  %v15318_v0 = vcombine.low %v15152_v17, %v15161_v56  ;;  %9847 = vmatprep.subr.bf16.mxu1 %v9937_v34  ;;  %v9938_v22 = vld [vmem:[%s17637_s3 + $0x8] sm:$0xff]  }
 0x4b2   :  { %6467 = vrot.lane.b32.xlu0 %v15299_v58, %s10112_s29  ;;  %v6208_v21 = vsel %vm10192_vm2, %v6203_v50, %v6207_v19  ;;  %v6577_v49 = vsel %vm10900_vm5, %v6575_v24, %v6576_v60  ;;  %6523 = vst.msk [vmem:[#allocation2 + $0x80] sm:$0xff] %vm1326_vm7, %v6444_v44  ;;  %v15333_v10 = vcombine.low %v15171_v59, %v15176_v16  ;;  %v18473_v19 = vld [vmem:[#allocation9_spill] sm:$0xff]  ;;  %v6594_v63 = vrot.slane %v10034_v18, 5  ;;  %v10036_v54 = vld [vmem:[#allocation3 + $0x2c] sm:$0x1]  ;;  %v18482_v18 = vld [vmem:[#allocation80_spill] sm:$0xff] }
 0x4b3   :  { %v6218_v55 = vsel %vm10192_vm2, %v6213_v35, %v6217_v9  ;;  %5535 = vst.msk [vmem:[#allocation2 + $0xa0] sm:$0xff] %vm330_vm6, %v15310_v61  ;;  %5534 = vst.msk [vmem:[#allocation2 + $0x98] sm:$0xff] %vm330_vm6, %v15314_v48  ;;  %v15345_v4 = vcombine.low %v15188_v31, %v15192_v1  ;;  %v15349_v17 = vcombine.low %v15206_v2, %v15210_v29  ;;  %9848 = vmatpush3.bf16.msra.mxu1 %v9937_v34  ;;  %v9939_v24 = vld [vmem:[%s17637_s3 + $0x10] ss:$0 sps:$4 sm:$0x33]   ;;  %vm18495_vm0 = vcmask 97344  }
 0x4b4   :  { %v15335_v28 = vcombine.low %v6208_v21, %v6218_v55  ;;  %5537 = vst.msk [vmem:[#allocation2 + $0xb0] sm:$0xff] %vm330_vm6, %v15318_v0  ;;  %v15353_v56 = vcombine.low %v15221_v52, %v15225_v15  ;;  %v9559_v59 = vcombine.low %v15122_v8, %v6584_v3  ;;  %5536 = vst.msk [vmem:[#allocation2 + $0xa8] sm:$0xff] %vm330_vm6, %v15333_v10  ;;  %v10031_v8 = vld [vmem:[#allocation3 + $0x1c] sm:$0xf]  ;;  %v6596_v14 = vrot.slane %v6594_v63, 4  ;;  %v18475_v3 = vld [vmem:[#allocation94_spill] sm:$0xff] }
 0x4b5   :  { %v15360_v16 = vcombine.low %v15237_v62, %v15241_v45  ;;  %v15364_v31 = vcombine.low %v15252_v40, %v15256_v38  ;;  %v15368_v1 = vcombine.low %v15268_v23, %v15272_v13  ;;  %v9558_v2 = vcombine.low %v6574_v32, %v6577_v49  ;;  %5539 = vst.msk [vmem:[#allocation2 + $0xc0] sm:$0xff] %vm330_vm6, %v15345_v4  ;;  %v18471_v15 = vld [vmem:[#allocation25_spill] sm:$0xff]  ;;  %v10033_v40 = vld [vmem:[#allocation3 + $0x20] sm:$0x1]  ;;  %v10037_v32 = vld [vmem:[#allocation3 + $0x34] sm:$0xf] }
 0x4b6   :  { %6465 = vrot.lane.b32.xlu1 %v15335_v28, %s10112_s29  ;;  %v6587_v29 = vrot.slane %v10031_v8, 5  ;;  %5538 = vst.msk [vmem:[#allocation2 + $0xb8] sm:$0xff] %vm330_vm6, %v15349_v17  ;;  %5541 = vst.msk [vmem:[#allocation2 + $0xd0] sm:$0xff] %vm330_vm6, %v15353_v56  ;;  %6893 = vrot.lane.b32.xlu0 %v9559_v59, %s10113_s15  ;;  %v10032_v62 = vld [vmem:[#allocation3 + $0x18] sm:$0xf]  ;;  %v6590_v38 = vrot.slane %v10033_v40, 5 }
 0x4b7   :  { %5540 = vst.msk [vmem:[#allocation2 + $0xc8] sm:$0xff] %vm330_vm6, %v15360_v16  ;;  %5543 = vst.msk [vmem:[#allocation2 + $0xe0] sm:$0xff] %vm330_vm6, %v15364_v31  ;;  %v9528_v45 = vrot.slane %v10032_v62, 9  ;;  %v18472_v23 = vld [vmem:[#allocation93_spill] sm:$0xff]  ;;  %9849 = vmatprep.subr.bf16.mxu1 %v9938_v22  ;;  %v9529_v60 = vrot.slane %v10035_v36, 9  ;;  %v6597_v9 = vrot.slane %v10036_v54, 5 }
 0x4b8   :  { %5542 = vst.msk [vmem:[#allocation2 + $0xd8] sm:$0xff] %vm330_vm6, %v15368_v1  ;;  %v6589_v52 = vrot.slane %v6587_v29, 4  ;;  %9850 = vmatpush3.bf16.msra.mxu1 %v9938_v22  ;;  %v8108_v25 = vsel %vm18478_vm15, %v9939_v24, 0  ;;  %v6601_v44 = vrot.slane %v10037_v32, 5  ;;  %v18479_v55 = vld [vmem:[#allocation26_spill] sm:$0xff]  ;;  %v18483_v36 = vld [vmem:[#allocation31_spill] sm:$0xff]  ;;  %vm18497_vm1 = vmmov %vm18495_vm0 }
 0x4b9   :  { %v6588_v12 = vsel %vm10900_vm5, %v9528_v45, %v6587_v29  ;;  %v6598_v57 = vsel %vm10900_vm5, %v6596_v14, %v6597_v9  ;;  %9918 = vmatprep.subr.msk.bf16.mxu1 %vm18477_vm9, %v9939_v24  ;;  %v6595_v50 = vsel %vm10900_vm5, %v9529_v60, %v6594_v63  ;;  %v10038_v49 = vld [vmem:[#allocation3 + $0x30] sm:$0xf]  ;;  %v10040_v45 = vld [vmem:[#allocation3 + $0x40] sm:$0xf]  ;;  %v10043_v22 = vld [vmem:[#allocation3 + $0x4c] sm:$0xf] }
 0x4ba   :  { %6891 = vrot.lane.b32.xlu1 %v9558_v2, %s10113_s15  ;;  %7031 = vrot.lane.b32.xlu0 %v18471_v15, %s10114_s16  ;;  %v6591_v13 = vsel %vm10900_vm5, %v6589_v52, %v6590_v38  ;;  %v9561_v35 = vcombine.low %v6595_v50, %v6598_v57  ;;  %v6603_v21 = vrot.slane %v6601_v44, 4  ;;  %v10039_v2 = vld [vmem:[#allocation3 + $0x38] sm:$0x1]  ;;  %v18480_v52 = vld [vmem:[#allocation10_spill] sm:$0xff]  ;;  %v6608_v40 = vrot.slane %v10040_v45, 5  ;;  %vm18505_vm15 = vmmov %vm18495_vm0 }
 0x4bb   :  { %v9560_v27 = vcombine.low %v6588_v12, %v6591_v13  ;;  %v6604_v8 = vrot.slane %v10039_v2, 5  ;;  %v10041_v13 = vld [vmem:[#allocation3 + $0x3c] sm:$0xf]  ;;  %v10042_v12 = vld [vmem:[#allocation3 + $0x44] sm:$0x1]  ;;  %v6615_v14 = vrot.slane %v10043_v22, 5 }
 0x4bc   :  { %9852 = vmatpush3.bf16.msra.mxu1 %v8108_v25  ;;  %v6610_v38 = vrot.slane %v6608_v40, 4  ;;  %v10044_v60 = vld [vmem:[#allocation3 + $0x48] sm:$0xf]  ;;  %v10045_v9 = vld [vmem:[#allocation3 + $0x50] sm:$0x1]  ;;  %v18487_v22 = vld [vmem:[#allocation34_spill] sm:$0xff] }
 0x4bd   :  { %v6605_v29 = vsel %vm10900_vm5, %v6603_v21, %v6604_v8  ;;  %v9532_v54 = vrot.slane %v10044_v60, 9  ;;  %v6618_v24 = vrot.slane %v10045_v9, 5  ;;  %v10048_v8 = vld [vmem:[#allocation3 + $0x5c] sm:$0x1]  ;;  %v10051_v60 = vld [vmem:[#allocation3 + $0x68] sm:$0x1] }
 0x4be   :  { %7029 = vrot.lane.b32.xlu1 %v18472_v23, %s10114_s16  ;;  %7213 = vrot.lane.b32.xlu0 %v18473_v19, %s10115_s17  ;;  %v18481_v23 = vld [vmem:[#allocation95_spill] sm:$0xff]  ;;  %v4097_v9 = vld [vmem:[#allocation3 + $0xd4] sm:$0x1]  ;;  %vm18503_vm3 = vcmask 294144  }
 0x4bf   :  { %v6616_v25 = vsel %vm10900_vm5, %v9532_v54, %v6615_v14  ;;  %v6632_v54 = vrot.slane %v10051_v60, 5  ;;  %vm18504_vm9 = vmmov %vm18503_vm3 }
 0x4c2   :  { %7211 = vrot.lane.b32.xlu1 %v18474_v37, %s10115_s17  ;;  %7363 = vrot.lane.b32.xlu0 %v9560_v27, %s10116_s20 }
 0x4c6   :  { %7361 = vrot.lane.b32.xlu1 %v9559_v59, %s10116_s20  ;;  %7501 = vrot.lane.b32.xlu0 %v18475_v3, %s10117_s23  ;;  %v9530_v59 = vrot.slane %v10038_v49, 9  ;;  %v18485_v49 = vld [vmem:[#allocation38_spill] sm:$0xff] }
 0x4ca   :  { %7499 = vrot.lane.b32.xlu1 %v18471_v15, %s10117_s23  ;;  %7683 = vrot.lane.b32.xlu0 %v18476_v39, %s10118_s26  ;;  %v6602_v15 = vsel %vm10900_vm5, %v9530_v59, %v6601_v44  ;;  %v10047_v59 = vld [vmem:[#allocation3 + $0x54] sm:$0xf] }
 0x4cb   :  { %v9562_v62 = vcombine.low %v6602_v15, %v6605_v29  ;;  %v9533_v2 = vrot.slane %v10047_v59, 9  ;;  %v6625_v29 = vrot.slane %v10048_v8, 5  ;;  %v18486_v15 = vld [vmem:[#allocation82_spill] sm:$0xff]  ;;  %v18490_v59 = vld [vmem:[#allocation43_spill] sm:$0xff] }
 0x4ce   :  { %7681 = vrot.lane.b32.xlu1 %v18473_v19, %s10118_s26  ;;  %7833 = vrot.lane.b32.xlu0 %v9561_v35, %s10119_s2  ;;  %v9531_v19 = vrot.slane %v10041_v13, 9 }
 0x4d0   :  { %v6609_v63 = vsel %vm10900_vm5, %v9531_v19, %v6608_v40  ;;  %v15489_v19 = vld [vmem:[#allocation3 + $0x174] sm:$0xf] }
 0x4d2   :  { %7831 = vrot.lane.b32.xlu1 %v9560_v27, %s10119_s2  ;;  %6897 = vrot.lane.b32.xlu0 %v9561_v35, %s10113_s15 }
 0x4d6   :  { %6895 = vrot.lane.b32.xlu1 %v9560_v27, %s10113_s15  ;;  %7035 = vrot.lane.b32.xlu0 %v18479_v55, %s10114_s16  ;;  %v6611_v27 = vrot.slane %v10042_v12, 5  ;;  %v15491_v12 = vld [vmem:[#allocation3 + $0x178] sm:$0xf] }
 0x4d8   :  { %v6612_v37 = vsel %vm10900_vm5, %v6610_v38, %v6611_v27 }
 0x4d9   :  { %v9563_v34 = vcombine.low %v6609_v63, %v6612_v37  ;;  %v3987_v37 = vld [vmem:[#allocation3 + $0xcc] sm:$0x1] }
 0x4da   :  { %7033 = vrot.lane.b32.xlu1 %v18475_v3, %s10114_s16  ;;  %7217 = vrot.lane.b32.xlu0 %v18480_v52, %s10115_s17  ;;  %v6617_v3 = vrot.slane %v6615_v14, 4 }
 0x4dc   :  { %v6619_v57 = vsel %vm10900_vm5, %v6617_v3, %v6618_v24  ;;  %v10050_v3 = vld [vmem:[#allocation3 + $0x60] sm:$0xf] }
 0x4dd   :  { %v9564_v50 = vcombine.low %v6616_v25, %v6619_v57  ;;  %v18489_v25 = vld [vmem:[#allocation12_spill] sm:$0xff] }
 0x4de   :  { %7215 = vrot.lane.b32.xlu1 %v18476_v39, %s10115_s17  ;;  %7367 = vrot.lane.b32.xlu0 %v9562_v62, %s10116_s20  ;;  %v18484_v39 = vld [vmem:[#allocation11_spill] sm:$0xff] }
 0x4e2   :  { %7365 = vrot.lane.b32.xlu1 %v9561_v35, %s10116_s20  ;;  %7505 = vrot.lane.b32.xlu0 %v18481_v23, %s10117_s23  ;;  %v10046_v35 = vld [vmem:[#allocation3 + $0x58] sm:$0xf] }
 0x4e3   :  { %v6622_v32 = vrot.slane %v10046_v35, 5 }
 0x4e5   :  { %v6624_v21 = vrot.slane %v6622_v32, 4  ;;  %v6623_v45 = vsel %vm10900_vm5, %v9533_v2, %v6622_v32  ;;  %v10053_v2 = vld [vmem:[#allocation3 + $0x6c] sm:$0xf] }
 0x4e6   :  { %7503 = vrot.lane.b32.xlu1 %v18479_v55, %s10117_s23  ;;  %7687 = vrot.lane.b32.xlu0 %v18482_v18, %s10118_s26  ;;  %v9535_v8 = vrot.slane %v10053_v2, 9 }
 0x4ea   :  { %7685 = vrot.lane.b32.xlu1 %v18480_v52, %s10118_s26  ;;  %7837 = vrot.lane.b32.xlu0 %v9563_v34, %s10119_s2  ;;  %v6626_v52 = vsel %vm10900_vm5, %v6624_v21, %v6625_v29  ;;  %v10054_v29 = vld [vmem:[#allocation3 + $0x74] sm:$0x1] }
 0x4eb   :  { %v9565_v40 = vcombine.low %v6623_v45, %v6626_v52  ;;  %v6639_v52 = vrot.slane %v10054_v29, 5  ;;  %v6244_v45 = vshrl.u32 %v15489_v19, 16 }
 0x4ee   :  { %7835 = vrot.lane.b32.xlu1 %v9562_v62, %s10119_s2  ;;  %6901 = vrot.lane.b32.xlu0 %v9563_v34, %s10113_s15 }
 0x4f2   :  { %6899 = vrot.lane.b32.xlu1 %v9562_v62, %s10113_s15  ;;  %7039 = vrot.lane.b32.xlu0 %v18483_v36, %s10114_s16 }
 0x4f6   :  { %7037 = vrot.lane.b32.xlu1 %v18481_v23, %s10114_s16  ;;  %7221 = vrot.lane.b32.xlu0 %v18484_v39, %s10115_s17  ;;  %v10049_v23 = vld [vmem:[#allocation3 + $0x64] sm:$0xf] }
 0x4f7   :  { %v6629_v13 = vrot.slane %v10049_v23, 5 }
 0x4f9   :  { %v6631_v63 = vrot.slane %v6629_v13, 4 }
 0x4fa   :  { %7219 = vrot.lane.b32.xlu1 %v18482_v18, %s10115_s17  ;;  %7371 = vrot.lane.b32.xlu0 %v9564_v50, %s10116_s20  ;;  %v15497_v18 = vcombine.low %v15489_v19, %v15491_v12 }
 0x4fb   :  { %v6448_v44 = vpop.permute.xlu0 %6447  ;;  %v6633_v24 = vsel %vm10900_vm5, %v6631_v63, %v6632_v54  ;;  %v5311_v54 = vld [vmem:[#allocation3 + $0x180] sm:$0xf] }
 0x4fc   :  { %6525 = vst.msk [vmem:[#allocation2 + $0x90] sm:$0xff] %vm1326_vm7, %v6448_v44  ;;  %v10052_v44 = vld [vmem:[#allocation3 + $0x70] sm:$0xf] }
 0x4fd   :  { %5544 = vst.msk [vmem:[#allocation2 + $0xe8] sm:$0xff] %vm330_vm6, %v15497_v18  ;;  %v6636_v21 = vrot.slane %v10052_v44, 5 }
 0x4fe   :  { %7369 = vrot.lane.b32.xlu1 %v9563_v34, %s10116_s20  ;;  %v6446_v55 = vpop.permute.xlu1 %6445  ;;  %7509 = vrot.lane.b32.xlu0 %v18485_v49, %s10117_s23  ;;  %v3988_v34 = vsel %vm12170_vm4, 0, %v3987_v37  ;;  %v15539_v37 = vld [vmem:[#allocation3 + $0x78] sm:$0xf] }
 0x4ff   :  { %6524 = vst.msk [vmem:[#allocation2 + $0x88] sm:$0xff] %vm1326_vm7, %v6446_v55  ;;  %3989 = vst [vmem:[#allocation3 + $0xcc] sm:$0x1] %v3988_v34  ;;  %v6246_v34 = vrot.slane %v6244_v45, 4  ;;  %v6268_v45 = vshrl.u32 %v5311_v54, 16 }
 0x502   :  { %7507 = vrot.lane.b32.xlu1 %v18483_v36, %s10117_s23  ;;  %7691 = vrot.lane.b32.xlu0 %v18486_v15, %s10118_s26  ;;  %v9534_v36 = vrot.slane %v10050_v3, 9  ;;  %v18491_v3 = vld [vmem:[#allocation16_spill] sm:$0xff] }
 0x503   :  { %v6452_v62 = vpop.permute.xlu0 %6451 }
 0x504   :  { %6527 = vst.msk [vmem:[#allocation2 + $0xa0] sm:$0xff] %vm1326_vm7, %v6452_v62  ;;  %v6630_v35 = vsel %vm10900_vm5, %v9534_v36, %v6629_v13  ;;  %v15528_v62 = vld [vmem:[#allocation3 + $0x7c] sm:$0xf]  ;;  %v6257_v13 = vshrl.u32 %v15491_v12, 16  ;;  %v6637_v36 = vsel %vm10900_vm5, %v9535_v8, %v6636_v21 }
 0x505   :  { %v15518_v32 = vcombine.low %v6630_v35, %v6633_v24 }
 0x506   :  { %7689 = vrot.lane.b32.xlu1 %v18484_v39, %s10118_s26  ;;  %7841 = vrot.lane.b32.xlu0 %v9565_v40, %s10119_s2  ;;  %v4098_v39 = vsel %vm12185_vm8, 0, %v4097_v9  ;;  %v5312_v9 = vld [vmem:[#allocation3 + $0x184] sm:$0xf]  ;;  %v6259_v35 = vrot.slane %v6257_v13, 4  ;;  %v6271_v13 = vshll.u32 %v5311_v54, 16 }
 0x507   :  { %v6450_v38 = vpop.permute.xlu1 %6449  ;;  %4099 = vst [vmem:[#allocation3 + $0xd4] sm:$0x1] %v4098_v39 }
 0x508   :  { %6526 = vst.msk [vmem:[#allocation2 + $0x98] sm:$0xff] %vm1326_vm7, %v6450_v38  ;;  %v6247_v38 = vshll.u32 %v15489_v19, 16 }
 0x50a   :  { %7839 = vrot.lane.b32.xlu1 %v9564_v50, %s10119_s2  ;;  %6905 = vrot.lane.b32.xlu0 %v9565_v40, %s10113_s15  ;;  %v6456_v27 = vpop.permute.xlu0 %6455 }
 0x50b   :  { %6529 = vst.msk [vmem:[#allocation2 + $0xb0] sm:$0xff] %vm1326_vm7, %v6456_v27  ;;  %v5310_v27 = vld [vmem:[#allocation3 + $0x17c] sm:$0x1] }
 0x50c   :  { %v6263_v44 = vshll.u32 %v5310_v27, 16  ;;  %v6779_v2 = vrot.slane %v5310_v27, 5  ;;  %v6281_v27 = vshrl.u32 %v5312_v9, 16 }
 0x50e   :  { %6903 = vrot.lane.b32.xlu1 %v9564_v50, %s10113_s15  ;;  %7043 = vrot.lane.b32.xlu0 %v18487_v22, %s10114_s16  ;;  %v6265_v29 = vrot.slane %v6263_v44, 5  ;;  %v5315_v44 = vld [vmem:[#allocation3 + $0x190] sm:$0xf] }
 0x50f   :  { %v6454_v14 = vpop.permute.xlu1 %6453 }
 0x510   :  { %6528 = vst.msk [vmem:[#allocation2 + $0xa8] sm:$0xff] %vm1326_vm7, %v6454_v14  ;;  %v6249_v14 = vrot.slane %v6247_v38, 5  ;;  %v5313_v38 = vld [vmem:[#allocation3 + $0x188] sm:$0x1] }
 0x512   :  { %7041 = vrot.lane.b32.xlu1 %v18485_v49, %s10114_s16  ;;  %7225 = vrot.lane.b32.xlu0 %v18489_v25, %s10115_s17  ;;  %v6460_v50 = vpop.permute.xlu0 %6459  ;;  %v6638_v49 = vrot.slane %v6636_v21, 4  ;;  %v6776_v21 = vrot.slane %v15491_v12, 5 }
 0x513   :  { %6531 = vst.msk [vmem:[#allocation2 + $0xc0] sm:$0xff] %vm1326_vm7, %v6460_v50  ;;  %v6250_v50 = vor.u32 %v6249_v14, %v6246_v34  ;;  %v6277_v34 = vshll.u32 %v5312_v9, 16  ;;  %v15568_v14 = vld [vmem:[#allocation3 + $0x18c] sm:$0xf] }
 0x515   :  { %v6251_v8 = vrot.slane %v6250_v50, 4  ;;  %v6273_v50 = vrot.slane %v6271_v13, 5 }
 0x516   :  { %7223 = vrot.lane.b32.xlu1 %v18486_v15, %s10115_s17  ;;  %7375 = vrot.lane.b32.xlu0 %v15518_v32, %s10116_s20  ;;  %v17932_v15 = vrot.slane %v15528_v62, 5 }
 0x518   :  { %v6458_v55 = vpop.permute.xlu1 %6457  ;;  %v15548_v60 = vrot.slane %v17932_v15, 4 }
 0x519   :  { %6530 = vst.msk [vmem:[#allocation2 + $0xb8] sm:$0xff] %vm1326_vm7, %v6458_v55 }
 0x51a   :  { %7373 = vrot.lane.b32.xlu1 %v9565_v40, %s10116_s20  ;;  %7513 = vrot.lane.b32.xlu0 %v18490_v59, %s10117_s23  ;;  %v6640_v40 = vsel %vm10900_vm5, %v6638_v49, %v6639_v52  ;;  %v9555_v49 = vrot.slane %v15489_v19, 9  ;;  %v15558_v52 = vcombine.low %v5311_v54, %v5312_v9  ;;  %v6778_v19 = vrot.slane %v6776_v21, 4 }
 0x51b   :  { %v15551_v39 = vcombine.low %v6637_v36, %v6640_v40 }
 0x51c   :  { %v6464_v23 = vpop.permute.xlu0 %6463  ;;  %18492 = vst [vmem:[#allocation84_spill] sm:$0xff] %v15558_v52  ;;  %v6777_v40 = vsel %vm10900_vm5, %v9555_v49, %v6776_v21  ;;  %5545 = vst.msk [vmem:[#allocation2 + $0xf0] sm:$0xff] %vm330_vm6, %v15558_v52  ;;  %v6279_v49 = vrot.slane %v6277_v34, 5  ;;  %v6283_v21 = vrot.slane %v6281_v27, 4  ;;  %v6786_v52 = vrot.slane %v5313_v38, 5 }
 0x51d   :  { %6533 = vst.msk [vmem:[#allocation2 + $0xd0] sm:$0xff] %vm1326_vm7, %v6464_v23 }
 0x51e   :  { %7511 = vrot.lane.b32.xlu1 %v18487_v22, %s10117_s23  ;;  %7695 = vrot.lane.b32.xlu0 %v18491_v3, %s10118_s26  ;;  %v6253_v22 = vshll.u32 %v15491_v12, 16  ;;  %v6284_v15 = vor.u32 %v6283_v21, %v6279_v49 }
 0x51f   :  { %v6462_v24 = vpop.permute.xlu1 %6461 }
 0x520   :  { %6532 = vst.msk [vmem:[#allocation2 + $0xc8] sm:$0xff] %vm1326_vm7, %v6462_v24  ;;  %v6255_v55 = vrot.slane %v6253_v22, 5  ;;  %v6780_v24 = vsel %vm10900_vm5, %v6778_v19, %v6779_v2  ;;  %v6783_v19 = vrot.slane %v5312_v9, 5  ;;  %v6285_v9 = vrot.slane %v6284_v15, 4 }
 0x522   :  { %7693 = vrot.lane.b32.xlu1 %v18489_v25, %s10118_s26  ;;  %7845 = vrot.lane.b32.xlu0 %v15551_v39, %s10119_s2  ;;  %v6260_v23 = vor.u32 %v6259_v35, %v6255_v55  ;;  %v6256_v12 = vsel %vm10192_vm2, %v6251_v8, %v6255_v55  ;;  %v6270_v25 = vrot.slane %v6268_v45, 4  ;;  %v6287_v35 = vshll.u32 %v5313_v38, 16 }
 0x523   :  { %v15575_v55 = vcombine.low %v6777_v40, %v6780_v24  ;;  %v9556_v8 = vrot.slane %v5311_v54, 9  ;;  %v15584_v40 = vcombine.low %v15568_v14, %v5315_v44  ;;  %v6295_v38 = vshll.u32 %v15568_v14, 16  ;;  %v18496_v24 = vld [vmem:[#allocation27_spill] sm:$0xff] }
 0x524   :  { %v6468_v36 = vpop.permute.xlu0 %6467  ;;  %v6261_v22 = vrot.slane %v6260_v23, 4  ;;  %v6274_v2 = vor.u32 %v6273_v50, %v6270_v25  ;;  %v6289_v23 = vrot.slane %v6287_v35, 5  ;;  %v5316_v25 = vld [vmem:[#allocation3 + $0x194] sm:$0x1]  ;;  %v10057_v50 = vld [vmem:[#allocation3 + $0x80] sm:$0x1] }
 0x525   :  { %6535 = vst.msk [vmem:[#allocation2 + $0xe0] sm:$0xff] %vm1326_vm7, %v6468_v36  ;;  %18493 = vst [vmem:[#allocation68_spill] sm:$0xff] %v15575_v55  ;;  %v6784_v34 = vsel %vm10900_vm5, %v9556_v8, %v6783_v19  ;;  %v6785_v36 = vrot.slane %v6783_v19, 4  ;;  %v6646_v35 = vrot.slane %v10057_v50, 5  ;;  %v6297_v19 = vrot.slane %v6295_v38, 5 }
 0x526   :  { %7843 = vrot.lane.b32.xlu1 %v15518_v32, %s10119_s2  ;;  %6909 = vrot.lane.b32.xlu0 %v15551_v39, %s10113_s15  ;;  %v6266_v45 = vsel %vm10192_vm2, %v6261_v22, %v6265_v29  ;;  %18494 = vst [vmem:[#allocation81_spill] sm:$0xff] %v15584_v40  ;;  %v6275_v27 = vrot.slane %v6274_v2, 4  ;;  %v6292_v29 = vshrl.u32 %v15568_v14, 16  ;;  %5546 = vst.msk [vmem:[#allocation2 + $0xf8] sm:$0xff] %vm330_vm6, %v15584_v40  ;;  %v6301_v22 = vshll.u32 %v5315_v44, 16 }
 0x527   :  { %v15581_v63 = vcombine.low %v6256_v12, %v6266_v45  ;;  %v6305_v12 = vshrl.u32 %v5315_v44, 16  ;;  %v6290_v45 = vsel %vm10192_vm2, %v6285_v9, %v6289_v23  ;;  %v6311_v55 = vshll.u32 %v5316_v25, 16 }
 0x528   :  { %v6466_v13 = vpop.permute.xlu1 %6465  ;;  %v6894_v54 = vpop.permute.xlu0 %6893  ;;  %v6280_v21 = vsel %vm10192_vm2, %v6275_v27, %v6279_v49  ;;  %v6294_v15 = vrot.slane %v6292_v29, 4  ;;  %v9557_v49 = vrot.slane %v15568_v14, 9  ;;  %v6790_v27 = vrot.slane %v5315_v44, 5 }
 0x529   :  { %6534 = vst.msk [vmem:[#allocation2 + $0xd8] sm:$0xff] %vm1326_vm7, %v6466_v13  ;;  %v6303_v13 = vrot.slane %v6301_v22, 5  ;;  %v15607_v40 = vcombine.low %v6280_v21, %v6290_v45  ;;  %v6307_v50 = vrot.slane %v6305_v12, 4  ;;  %v18500_v29 = vrot.slane %v15539_v37, 9 }
 0x52a   :  { %6907 = vrot.lane.b32.xlu1 %v15518_v32, %s10113_s15  ;;  %6988 = vst.msk [vmem:[#allocation2 + $0x8] sm:$0xff] %vm18495_vm0, %v6894_v54  ;;  %7047 = vrot.lane.b32.xlu0 %v18496_v24, %s10114_s16  ;;  %v6787_v32 = vsel %vm10900_vm5, %v6785_v36, %v6786_v52  ;;  %v6647_v52 = vsel %vm10900_vm5, %v15548_v60, %v6646_v35  ;;  %v18499_v36 = vrot.slane %v15528_v62, 5  ;;  %v6792_v22 = vrot.slane %v6790_v27, 4  ;;  %v10058_v62 = vld [vmem:[#allocation3 + $0x88] sm:$0xf] }
 0x52b   :  { %v15604_v2 = vcombine.low %v6784_v34, %v6787_v32  ;;  %v6298_v23 = vor.u32 %v6297_v19, %v6294_v15  ;;  %v18498_v34 = vld [vmem:[#allocation13_spill] sm:$0xff]  ;;  %v6308_v9 = vor.u32 %v6307_v50, %v6303_v13  ;;  %v6791_v12 = vsel %vm10900_vm5, %v9557_v49, %v6790_v27  ;;  %v10059_v49 = vld [vmem:[#allocation3 + $0x84] sm:$0xf] }
 0x52c   :  { %v6892_v8 = vpop.permute.xlu1 %6891  ;;  %v7032_v54 = vpop.permute.xlu0 %7031  ;;  %v6644_v14 = vsel %vm10900_vm5, %v18500_v29, %v18499_v36  ;;  %v6793_v60 = vrot.slane %v5316_v25, 5  ;;  %v6313_v32 = vrot.slane %v6311_v55, 5  ;;  %v6650_v37 = vrot.slane %v10058_v62, 5  ;;  %v18502_v29 = vld [vmem:[#allocation90_spill] sm:$0xff] }
 0x52d   :  { %6987 = vst.msk [vmem:[#allocation2] sm:$0xff] %vm18497_vm1, %v6892_v8  ;;  %v6299_v38 = vrot.slane %v6298_v23, 4  ;;  %v9568_v35 = vcombine.low %v6644_v14, %v6647_v52  ;;  %v6309_v21 = vrot.slane %v6308_v9, 4  ;;  %v9537_v52 = vrot.slane %v10059_v49, 9  ;;  %v10060_v23 = vld [vmem:[#allocation3 + $0x8c] sm:$0x1] }
 0x52e   :  { %7045 = vrot.lane.b32.xlu1 %v18490_v59, %s10114_s16  ;;  %7126 = vst.msk [vmem:[#allocation2 + $0x8] sm:$0xff] %vm1949_vm10, %v7032_v54  ;;  %7229 = vrot.lane.b32.xlu0 %v18498_v34, %s10115_s17  ;;  %v6794_v8 = vsel %vm10900_vm5, %v6792_v22, %v6793_v60  ;;  %v18501_v54 = vld [vmem:[#allocation49_spill] sm:$0xff]  ;;  %v6653_v27 = vrot.slane %v10060_v23, 5  ;;  %v10061_v22 = vld [vmem:[#allocation3 + $0x94] sm:$0xf]  ;;  %vm18508_vm1 = vcmask 293888  }
 0x52f   :  { %v6304_v15 = vsel %vm10192_vm2, %v6299_v38, %v6303_v13  ;;  %v6314_v25 = vsel %vm10192_vm2, %v6309_v21, %v6313_v32  ;;  %v15637_v45 = vcombine.low %v6791_v12, %v6794_v8  ;;  %v6652_v13 = vrot.slane %v6650_v37, 4  ;;  %v18506_v32 = vld [vmem:[#allocation46_spill] sm:$0xff]  ;;  %v10063_v8 = vld [vmem:[#allocation3 + $0x98] sm:$0x1] }
 0x530   :  { %v7030_v59 = vpop.permute.xlu1 %7029  ;;  %v7214_v44 = vpop.permute.xlu0 %7213  ;;  %v15639_v19 = vcombine.low %v6304_v15, %v6314_v25  ;;  %v6651_v9 = vsel %vm10900_vm5, %v9537_v52, %v6650_v37  ;;  %v6657_v60 = vrot.slane %v10061_v22, 5  ;;  %v10062_v37 = vld [vmem:[#allocation3 + $0x90] sm:$0xf]  ;;  %v6660_v25 = vrot.slane %v10063_v8, 5  ;;  %v10066_v22 = vld [vmem:[#allocation3 + $0xa4] sm:$0x1] }
 0x531   :  { %7125 = vst.msk [vmem:[#allocation2] sm:$0xff] %vm1949_vm10, %v7030_v59  ;;  %v9538_v15 = vrot.slane %v10062_v37, 9 }
 0x532   :  { %7227 = vrot.lane.b32.xlu1 %v18491_v3, %s10115_s17  ;;  %7308 = vst.msk [vmem:[#allocation2 + $0x8] sm:$0xff] %vm2132_vm11, %v7214_v44  ;;  %7379 = vrot.lane.b32.xlu0 %v9568_v35, %s10116_s20  ;;  %v6659_v21 = vrot.slane %v6657_v60, 4 }
 0x533   :  { %v6658_v52 = vsel %vm10900_vm5, %v9538_v15, %v6657_v60  ;;  %v6667_v60 = vrot.slane %v10066_v22, 5 }
 0x534   :  { %v7212_v55 = vpop.permute.xlu1 %7211  ;;  %v7364_v3 = vpop.permute.xlu0 %7363 }
 0x535   :  { %7307 = vst.msk [vmem:[#allocation2] sm:$0xff] %vm2132_vm11, %v7212_v55 }
 0x536   :  { %7377 = vrot.lane.b32.xlu1 %v15551_v39, %s10116_s20  ;;  %7458 = vst.msk [vmem:[#allocation2 + $0x8] sm:$0xff] %vm2283_vm12, %v7364_v3  ;;  %7517 = vrot.lane.b32.xlu0 %v18501_v54, %s10117_s23  ;;  %v6654_v39 = vsel %vm10900_vm5, %v6652_v13, %v6653_v27  ;;  %v18507_v3 = vld [vmem:[#allocation21_spill] sm:$0xff]  ;;  %v10064_v27 = vld [vmem:[#allocation3 + $0xa0] sm:$0xf] }
 0x537   :  { %v9569_v38 = vcombine.low %v6651_v9, %v6654_v39 }
 0x538   :  { %v7362_v50 = vpop.permute.xlu1 %7361  ;;  %v7502_v36 = vpop.permute.xlu0 %7501 }
 0x539   :  { %7457 = vst.msk [vmem:[#allocation2] sm:$0xff] %vm2283_vm12, %v7362_v50 }
 0x53a   :  { %7515 = vrot.lane.b32.xlu1 %v18496_v24, %s10117_s23  ;;  %7596 = vst.msk [vmem:[#allocation2 + $0x8] sm:$0xff] %vm2422_vm13, %v7502_v36  ;;  %7699 = vrot.lane.b32.xlu0 %v18502_v29, %s10118_s26  ;;  %v6664_v36 = vrot.slane %v10064_v27, 5  ;;  %v10069_v27 = vld [vmem:[#allocation3 + $0xb0] sm:$0x1] }
 0x53c   :  { %v7500_v14 = vpop.permute.xlu1 %7499  ;;  %v7684_v59 = vpop.permute.xlu0 %7683  ;;  %v6666_v9 = vrot.slane %v6664_v36, 4 }
 0x53d   :  { %7595 = vst.msk [vmem:[#allocation2] sm:$0xff] %vm2422_vm13, %v7500_v14 }
 0x53e   :  { %7697 = vrot.lane.b32.xlu1 %v18498_v34, %s10118_s26  ;;  %7778 = vst.msk [vmem:[#allocation2 + $0x8] sm:$0xff] %vm2605_vm14, %v7684_v59  ;;  %7849 = vrot.lane.b32.xlu0 %v9569_v38, %s10119_s2  ;;  %v18510_v59 = vld [vmem:[#allocation54_spill] sm:$0xff] }
 0x540   :  { %v7682_v24 = vpop.permute.xlu1 %7681  ;;  %v7834_v12 = vpop.permute.xlu0 %7833 }
 0x541   :  { %7777 = vst.msk [vmem:[#allocation2] sm:$0xff] %vm2605_vm14, %v7682_v24  ;;  %v10065_v24 = vld [vmem:[#allocation3 + $0x9c] sm:$0xf] }
 0x542   :  { %7847 = vrot.lane.b32.xlu1 %v9568_v35, %s10119_s2  ;;  %7928 = vst.msk [vmem:[#allocation2 + $0x8] sm:$0xff] %vm18503_vm3, %v7834_v12  ;;  %6913 = vrot.lane.b32.xlu0 %v9569_v38, %s10113_s15  ;;  %vm18509_vm3 = vmmov %vm18508_vm1  ;;  %v9539_v12 = vrot.slane %v10065_v24, 9 }
 0x544   :  { %v7832_v44 = vpop.permute.xlu1 %7831  ;;  %v6898_v34 = vpop.permute.xlu0 %6897 }
 0x545   :  { %7927 = vst.msk [vmem:[#allocation2] sm:$0xff] %vm18504_vm9, %v7832_v44 }
 0x546   :  { %6911 = vrot.lane.b32.xlu1 %v9568_v35, %s10113_s15  ;;  %6990 = vst.msk [vmem:[#allocation2 + $0x18] sm:$0xff] %vm18505_vm15, %v6898_v34  ;;  %7051 = vrot.lane.b32.xlu0 %v18506_v32, %s10114_s16  ;;  %v6661_v35 = vsel %vm10900_vm5, %v6659_v21, %v6660_v25  ;;  %v18511_v34 = vld [vmem:[#allocation24_spill] sm:$0xff]  ;;  %v10067_v25 = vld [vmem:[#allocation3 + $0xac] sm:$0xf]  ;;  %vm18512_vm15 = vmmov %vm18504_vm9 }
 0x548   :  { %v6896_v62 = vpop.permute.xlu1 %6895  ;;  %v7036_v55 = vpop.permute.xlu0 %7035 }
 0x549   :  { %6989 = vst.msk [vmem:[#allocation2 + $0x10] sm:$0xff] %vm18495_vm0, %v6896_v62  ;;  %v7960_v13 = vld [vmem:[#allocation2 + $0x8] sm:$0xff]  ;;  %v6665_v62 = vsel %vm10900_vm5, %v9539_v12, %v6664_v36  ;;  %v6674_v36 = vrot.slane %v10069_v27, 5 }
 0x54a   :  { %7049 = vrot.lane.b32.xlu1 %v18501_v54, %s10114_s16  ;;  %7128 = vst.msk [vmem:[#allocation2 + $0x18] sm:$0xff] %vm1949_vm10, %v7036_v55  ;;  %7233 = vrot.lane.b32.xlu0 %v18507_v3, %s10115_s17  ;;  %v9570_v54 = vcombine.low %v6658_v52, %v6661_v35  ;;  %v6671_v55 = vrot.slane %v10067_v25, 5  ;;  %v10068_v52 = vld [vmem:[#allocation3 + $0xa8] sm:$0xf] }
 0x54c   :  { %v7034_v50 = vpop.permute.xlu1 %7033  ;;  %v7959_v49 = vld [vmem:[#allocation2] sm:$0xff]  ;;  %v7218_v23 = vpop.permute.xlu0 %7217 }
 0x54d   :  { %7127 = vst.msk [vmem:[#allocation2 + $0x10] sm:$0xff] %vm1949_vm10, %v7034_v50  ;;  %9853 = vmatprep.mubr.msk.bf16.mxu1 %vm18508_vm1, %v7959_v49  ;;  %v18513_v50 = vld [vmem:[#allocation53_spill] sm:$0xff]  ;;  %vm18514_vm1 = vmmov %vm18495_vm0 }
 0x54e   :  { %7231 = vrot.lane.b32.xlu1 %v18502_v29, %s10115_s17  ;;  %9854 = vmatmul.mubr.msk.bf16.vlgmr.msra.gmra.mrb[0].mxu1 %vm18509_vm3, %v7960_v13  ;;  %7310 = vst.msk [vmem:[#allocation2 + $0x18] sm:$0xff] %vm2132_vm11, %v7218_v23  ;;  %v6673_v13 = vrot.slane %v6671_v55, 4  ;;  %v9540_v23 = vrot.slane %v10068_v52, 9  ;;  %v10072_v52 = vld [vmem:[#allocation3 + $0xbc] sm:$0x1] }
 0x54f   :  { %7383 = vrot.lane.b32.xlu0 %v9570_v54, %s10116_s20 }
 0x550   :  { %v7216_v39 = vpop.permute.xlu1 %7215  ;;  %v7368_v14 = vpop.permute.xlu0 %7367  ;;  %v6672_v12 = vsel %vm10900_vm5, %v9540_v23, %v6671_v55  ;;  %v6681_v23 = vrot.slane %v10072_v52, 5 }
 0x551   :  { %7309 = vst.msk [vmem:[#allocation2 + $0x10] sm:$0xff] %vm2132_vm11, %v7216_v39 }
 0x552   :  { %7381 = vrot.lane.b32.xlu1 %v9569_v38, %s10116_s20  ;;  %7460 = vst.msk [vmem:[#allocation2 + $0x18] sm:$0xff] %vm2283_vm12, %v7368_v14  ;;  %v6668_v38 = vsel %vm10900_vm5, %v6666_v9, %v6667_v60  ;;  %v18515_v14 = vld [vmem:[#allocation91_spill] sm:$0xff]  ;;  %v10070_v60 = vld [vmem:[#allocation3 + $0xb8] sm:$0xf] }
 0x553   :  { %7521 = vrot.lane.b32.xlu0 %v18510_v59, %s10117_s23  ;;  %v9571_v15 = vcombine.low %v6665_v62, %v6668_v38  ;;  %v15735_v38 = vld [vmem:[#allocation3 + $0xc0] sm:$0xf] }
 0x554   :  { %v7366_v29 = vpop.permute.xlu1 %7365  ;;  %v7506_v44 = vpop.permute.xlu0 %7505 }
 0x555   :  { %7459 = vst.msk [vmem:[#allocation2 + $0x10] sm:$0xff] %vm2283_vm12, %v7366_v29 }
 0x556   :  { %7519 = vrot.lane.b32.xlu1 %v18506_v32, %s10117_s23  ;;  %7598 = vst.msk [vmem:[#allocation2 + $0x18] sm:$0xff] %vm2422_vm13, %v7506_v44  ;;  %v6678_v44 = vrot.slane %v10070_v60, 5 }
 0x557   :  { %7703 = vrot.lane.b32.xlu0 %v18511_v34, %s10118_s26 }
 0x558   :  { %v7504_v21 = vpop.permute.xlu1 %7503  ;;  %v7688_v37 = vpop.permute.xlu0 %7687 }
 0x559   :  { %7597 = vst.msk [vmem:[#allocation2 + $0x10] sm:$0xff] %vm2422_vm13, %v7504_v21  ;;  %v15739_v21 = vld [vmem:[#allocation3 + $0xc4] sm:$0xf] }
 0x55a   :  { %7701 = vrot.lane.b32.xlu1 %v18507_v3, %s10118_s26  ;;  %7780 = vst.msk [vmem:[#allocation2 + $0x18] sm:$0xff] %vm2605_vm14, %v7688_v37  ;;  %v7171_v25 = vshrl.u32 %v15739_v21, 16  ;;  %v7167_v55 = vshll.u32 %v15739_v21, 16 }
 0x55b   :  { %7853 = vrot.lane.b32.xlu0 %v9571_v15, %s10119_s2 }
 0x55c   :  { %v7686_v32 = vpop.permute.xlu1 %7685  ;;  %v7838_v8 = vpop.permute.xlu0 %7837 }
 0x55d   :  { %7779 = vst.msk [vmem:[#allocation2 + $0x10] sm:$0xff] %vm2605_vm14, %v7686_v32  ;;  %v7158_v32 = vshrl.u32 %v15735_v38, 16 }
 0x55e   :  { %7851 = vrot.lane.b32.xlu1 %v9570_v54, %s10119_s2  ;;  %7930 = vst.msk [vmem:[#allocation2 + $0x18] sm:$0xff] %vm18504_vm9, %v7838_v8  ;;  %vm18516_vm9 = vmmov %vm18509_vm3  ;;  %v7161_v8 = vshll.u32 %v15735_v38, 16 }
 0x55f   :  { %6917 = vrot.lane.b32.xlu0 %v9571_v15, %s10113_s15  ;;  %v7160_v27 = vrot.slane %v7158_v32, 4 }
 0x560   :  { %v7836_v35 = vpop.permute.xlu1 %7835  ;;  %v6902_v3 = vpop.permute.xlu0 %6901 }
 0x561   :  { %7929 = vst.msk [vmem:[#allocation2 + $0x10] sm:$0xff] %vm18512_vm15, %v7836_v35  ;;  %v18517_v35 = vld [vmem:[#allocation83_spill] sm:$0xff] }
 0x562   :  { %6915 = vrot.lane.b32.xlu1 %v9570_v54, %s10113_s15  ;;  %6992 = vst.msk [vmem:[#allocation2 + $0x28] sm:$0xff] %vm18495_vm0, %v6902_v3  ;;  %v6675_v54 = vsel %vm10900_vm5, %v6673_v13, %v6674_v36  ;;  %v10071_v13 = vld [vmem:[#allocation3 + $0xb4] sm:$0xf]  ;;  %vm18519_vm0 = vmmov %vm18512_vm15 }
 0x563   :  { %7055 = vrot.lane.b32.xlu0 %v18513_v50, %s10114_s16 }
 0x564   :  { %v6900_v49 = vpop.permute.xlu1 %6899  ;;  %v7040_v39 = vpop.permute.xlu0 %7039 }
 0x565   :  { %6991 = vst.msk [vmem:[#allocation2 + $0x20] sm:$0xff] %vm18514_vm1, %v6900_v49  ;;  %v7962_v9 = vld [vmem:[#allocation2 + $0x18] sm:$0xff]  ;;  %v9541_v49 = vrot.slane %v10071_v13, 9 }
 0x566   :  { %7053 = vrot.lane.b32.xlu1 %v18510_v59, %s10114_s16  ;;  %7130 = vst.msk [vmem:[#allocation2 + $0x28] sm:$0xff] %vm1949_vm10, %v7040_v39  ;;  %v15729_v59 = vcombine.low %v6672_v12, %v6675_v54  ;;  %v7163_v39 = vrot.slane %v7161_v8, 5  ;;  %v7169_v54 = vrot.slane %v7167_v55, 5 }
 0x567   :  { %7237 = vrot.lane.b32.xlu0 %v18515_v14, %s10115_s17  ;;  %v6679_v12 = vsel %vm10900_vm5, %v9541_v49, %v6678_v44 }
 0x568   :  { %v7038_v29 = vpop.permute.xlu1 %7037  ;;  %v7961_v24 = vld [vmem:[#allocation2 + $0x10] sm:$0xff]  ;;  %v7222_v22 = vpop.permute.xlu0 %7221  ;;  %v7164_v32 = vor.u32 %v7163_v39, %v7160_v27 }
 0x569   :  { %7129 = vst.msk [vmem:[#allocation2 + $0x20] sm:$0xff] %vm1949_vm10, %v7038_v29  ;;  %9857 = vmatprep.mubr.msk.bf16.mxu1 %vm18509_vm3, %v7961_v24  ;;  %v18518_v29 = vld [vmem:[#allocation92_spill] sm:$0xff]  ;;  %vm18520_vm3 = vmmov %vm18514_vm1 }
 0x56a   :  { %7235 = vrot.lane.b32.xlu1 %v18511_v34, %s10115_s17  ;;  %9858 = vmatmul.mubr.msk.bf16.gmra.mrb[4].mxu1 %vm18516_vm9, %v7962_v9  ;;  %7312 = vst.msk [vmem:[#allocation2 + $0x28] sm:$0xff] %vm2132_vm11, %v7222_v22  ;;  %v6680_v34 = vrot.slane %v6678_v44, 4  ;;  %v7173_v9 = vrot.slane %v7171_v25, 4  ;;  %v5265_v22 = vld [vmem:[#allocation3 + $0xc8] sm:$0x1]  ;;  %v7165_v49 = vrot.slane %v7164_v32, 4 }
 0x56b   :  { %7387 = vrot.lane.b32.xlu0 %v15729_v59, %s10116_s20  ;;  %v7177_v44 = vshll.u32 %v5265_v22, 16 }
 0x56c   :  { %v7220_v62 = vpop.permute.xlu1 %7219  ;;  %v7372_v37 = vpop.permute.xlu0 %7371  ;;  %v6682_v36 = vsel %vm10900_vm5, %v6680_v34, %v6681_v23  ;;  %v7174_v34 = vor.u32 %v7173_v9, %v7169_v54  ;;  %v7343_v23 = vrot.slane %v15739_v21, 5  ;;  %v7170_v32 = vsel %vm10192_vm2, %v7165_v49, %v7169_v54 }
 0x56d   :  { %7311 = vst.msk [vmem:[#allocation2 + $0x20] sm:$0xff] %vm2132_vm11, %v7220_v62  ;;  %v15763_v62 = vld [vmem:[#allocation3 + $0xcc] sm:$0xf] }
 0x56e   :  { %7385 = vrot.lane.b32.xlu1 %v9571_v15, %s10116_s20  ;;  %7462 = vst.msk [vmem:[#allocation2 + $0x28] sm:$0xff] %vm2283_vm12, %v7372_v37  ;;  %v15765_v37 = vld [vmem:[#allocation3 + $0xd0] sm:$0xf]  ;;  %v7628_v25 = vshrl.u32 %v15763_v62, 16  ;;  %v7631_v55 = vshll.u32 %v15763_v62, 16  ;;  %v7175_v52 = vrot.slane %v7174_v34, 4 }
 0x56f   :  { %7525 = vrot.lane.b32.xlu0 %v18517_v35, %s10117_s23  ;;  %v7637_v13 = vshll.u32 %v15765_v37, 16 }
 0x570   :  { %v7370_v3 = vpop.permute.xlu1 %7369  ;;  %v7510_v15 = vpop.permute.xlu0 %7509  ;;  %v7633_v39 = vrot.slane %v7631_v55, 5 }
 0x571   :  { %7461 = vst.msk [vmem:[#allocation2 + $0x20] sm:$0xff] %vm2283_vm12, %v7370_v3  ;;  %v7641_v3 = vshrl.u32 %v15765_v37, 16  ;;  %v7639_v9 = vrot.slane %v7637_v13, 5 }
 0x572   :  { %7523 = vrot.lane.b32.xlu1 %v18513_v50, %s10117_s23  ;;  %7600 = vst.msk [vmem:[#allocation2 + $0x28] sm:$0xff] %vm2422_vm13, %v7510_v15  ;;  %v15761_v50 = vcombine.low %v6679_v12, %v6682_v36  ;;  %v7179_v15 = vrot.slane %v7177_v44, 5  ;;  %v7630_v36 = vrot.slane %v7628_v25, 4  ;;  %v7345_v44 = vrot.slane %v7343_v23, 4 }
 0x573   :  { %7707 = vrot.lane.b32.xlu0 %v18518_v29, %s10118_s26  ;;  %v9594_v25 = vrot.slane %v15735_v38, 9 }
 0x574   :  { %v7508_v24 = vpop.permute.xlu1 %7507  ;;  %v7692_v60 = vpop.permute.xlu0 %7691  ;;  %v7180_v34 = vsel %vm10192_vm2, %v7175_v52, %v7179_v15 }
 0x575   :  { %7599 = vst.msk [vmem:[#allocation2 + $0x20] sm:$0xff] %vm2422_vm13, %v7508_v24  ;;  %v7643_v24 = vrot.slane %v7641_v3, 4  ;;  %v7346_v3 = vrot.slane %v5265_v22, 5  ;;  %v7344_v22 = vsel %vm10900_vm5, %v9594_v25, %v7343_v23  ;;  %v9598_v23 = vcombine.low %v15763_v62, %v15765_v37 }
 0x576   :  { %7705 = vrot.lane.b32.xlu1 %v18515_v14, %s10118_s26  ;;  %7782 = vst.msk [vmem:[#allocation2 + $0x28] sm:$0xff] %vm2605_vm14, %v7692_v60  ;;  %v9590_v60 = vcombine.low %v15735_v38, %v15739_v21  ;;  %v7634_v21 = vor.u32 %v7633_v39, %v7630_v36 }
 0x577   :  { %7857 = vrot.lane.b32.xlu0 %v15761_v50, %s10119_s2  ;;  %v7644_v13 = vor.u32 %v7643_v24, %v7639_v9  ;;  %v7347_v54 = vsel %vm10900_vm5, %v7345_v44, %v7346_v3  ;;  %v7813_v24 = vrot.slane %v15765_v37, 5  ;;  %v10073_v37 = vld [vmem:[#allocation3 + $0xe8] sm:$0xf] }
 0x578   :  { %v7690_v8 = vpop.permute.xlu1 %7689  ;;  %v7842_v14 = vpop.permute.xlu0 %7841  ;;  %v7635_v15 = vrot.slane %v7634_v21, 4  ;;  %v6692_v21 = vrot.slane %v10073_v37, 5 }
 0x579   :  { %7781 = vst.msk [vmem:[#allocation2 + $0x20] sm:$0xff] %vm2605_vm14, %v7690_v8  ;;  %v5268_v8 = vld [vmem:[#allocation3 + $0xd4] sm:$0x1]  ;;  %v7645_v36 = vrot.slane %v7644_v13, 4  ;;  %v10074_v13 = vld [vmem:[#allocation3 + $0xdc] sm:$0xf] }
 0x57a   :  { %7855 = vrot.lane.b32.xlu1 %v15729_v59, %s10119_s2  ;;  %7932 = vst.msk [vmem:[#allocation2 + $0x28] sm:$0xff] %vm18512_vm15, %v7842_v14  ;;  %v7647_v14 = vshll.u32 %v5268_v8, 16  ;;  %vm18521_vm15 = vmmov %vm18516_vm9  ;;  %v7640_v44 = vsel %vm10192_vm2, %v7635_v15, %v7639_v9  ;;  %v6685_v9 = vrot.slane %v10074_v13, 5  ;;  %v10076_v15 = vld [vmem:[#allocation3 + $0xe0] sm:$0x1] }
 0x57b   :  { %6921 = vrot.lane.b32.xlu0 %v15761_v50, %s10113_s15 }
 0x57c   :  { %v7840_v27 = vpop.permute.xlu1 %7839  ;;  %v6906_v12 = vpop.permute.xlu0 %6905  ;;  %v7649_v39 = vrot.slane %v7647_v14, 5 }
 0x57d   :  { %7931 = vst.msk [vmem:[#allocation2 + $0x20] sm:$0xff] %vm18519_vm0, %v7840_v27  ;;  %v9592_v27 = vcombine.low %v7170_v32, %v7180_v34  ;;  %v9602_v32 = vrot.slane %v15763_v62, 9 }
 0x57e   :  { %6919 = vrot.lane.b32.xlu1 %v15729_v59, %s10113_s15  ;;  %6994 = vst.msk [vmem:[#allocation2 + $0x38] sm:$0xff] %vm18514_vm1, %v6906_v12  ;;  %v9596_v12 = vcombine.low %v7344_v22, %v7347_v54  ;;  %v7650_v25 = vsel %vm10192_vm2, %v7645_v36, %v7649_v39  ;;  %v10075_v22 = vld [vmem:[#allocation3 + $0xd8] sm:$0xf]  ;;  %v6688_v36 = vrot.slane %v10076_v15, 5  ;;  %vm18522_vm1 = vmmov %vm18519_vm0 }
 0x57f   :  { %7059 = vrot.lane.b32.xlu0 %v9590_v60, %s10114_s16  ;;  %v9600_v62 = vcombine.low %v7640_v44, %v7650_v25 }
 0x580   :  { %v6904_v55 = vpop.permute.xlu1 %6903  ;;  %v7044_v59 = vpop.permute.xlu0 %7043 }
 0x581   :  { %6993 = vst.msk [vmem:[#allocation2 + $0x30] sm:$0xff] %vm18520_vm3, %v6904_v55  ;;  %v7964_v38 = vld [vmem:[#allocation2 + $0x28] sm:$0xff]  ;;  %v7815_v55 = vrot.slane %v7813_v24, 4 }
 0x582   :  { %7057 = vrot.lane.b32.xlu1 %v18517_v35, %s10114_s16  ;;  %7132 = vst.msk [vmem:[#allocation2 + $0x38] sm:$0xff] %vm1949_vm10, %v7044_v59  ;;  %v7814_v59 = vsel %vm10900_vm5, %v9602_v32, %v7813_v24  ;;  %v10077_v24 = vld [vmem:[#allocation3 + $0xe4] sm:$0xf] }
 0x583   :  { %7241 = vrot.lane.b32.xlu0 %v9592_v27, %s10115_s17 }
 0x584   :  { %v7042_v49 = vpop.permute.xlu1 %7041  ;;  %v7963_v52 = vld [vmem:[#allocation2 + $0x20] sm:$0xff]  ;;  %v7226_v35 = vpop.permute.xlu0 %7225 }
 0x585   :  { %7131 = vst.msk [vmem:[#allocation2 + $0x30] sm:$0xff] %vm1949_vm10, %v7042_v49  ;;  %9861 = vmatprep.mubr.msk.bf16.mxu1 %vm18516_vm9, %v7963_v52  ;;  %v9542_v49 = vrot.slane %v10075_v22, 9  ;;  %v6687_v52 = vrot.slane %v6685_v9, 4  ;;  %vm18523_vm9 = vmmov %vm18520_vm3 }
 0x586   :  { %7239 = vrot.lane.b32.xlu1 %v18518_v29, %s10115_s17  ;;  %9862 = vmatmul.mubr.msk.bf16.gmra.mrb[8].mxu1 %vm18521_vm15, %v7964_v38  ;;  %7314 = vst.msk [vmem:[#allocation2 + $0x38] sm:$0xff] %vm2132_vm11, %v7226_v35  ;;  %v7816_v29 = vrot.slane %v5268_v8, 5  ;;  %v9543_v35 = vrot.slane %v10077_v24, 9  ;;  %v10082_v24 = vld [vmem:[#allocation3 + $0x100] sm:$0xf] }
 0x587   :  { %7391 = vrot.lane.b32.xlu0 %v9596_v12, %s10116_s20  ;;  %v6686_v44 = vsel %vm10900_vm5, %v9542_v49, %v6685_v9  ;;  %v6689_v25 = vsel %vm10900_vm5, %v6687_v52, %v6688_v36 }
 0x588   :  { %v7224_v34 = vpop.permute.xlu1 %7223  ;;  %v7376_v3 = vpop.permute.xlu0 %7375  ;;  %v7817_v8 = vsel %vm10900_vm5, %v7815_v55, %v7816_v29  ;;  %v6693_v29 = vsel %vm10900_vm5, %v9543_v35, %v6692_v21  ;;  %v9574_v37 = vcombine.low %v6686_v44, %v6689_v25  ;;  %v6706_v35 = vrot.slane %v10082_v24, 5  ;;  %v10084_v25 = vld [vmem:[#allocation3 + $0x104] sm:$0x1] }
 0x589   :  { %7313 = vst.msk [vmem:[#allocation2 + $0x30] sm:$0xff] %vm2132_vm11, %v7224_v34  ;;  %v9604_v38 = vcombine.low %v7814_v59, %v7817_v8  ;;  %v10080_v59 = vld [vmem:[#allocation3 + $0xf0] sm:$0xf] }
 0x58a   :  { %7389 = vrot.lane.b32.xlu1 %v15761_v50, %s10116_s20  ;;  %7464 = vst.msk [vmem:[#allocation2 + $0x38] sm:$0xff] %vm2283_vm12, %v7376_v3  ;;  %v6694_v50 = vrot.slane %v6692_v21, 4  ;;  %v9544_v8 = vrot.slane %v10080_v59, 9 }
 0x58b   :  { %7529 = vrot.lane.b32.xlu0 %v9598_v23, %s10117_s23  ;;  %v10078_v23 = vld [vmem:[#allocation3 + $0xec] sm:$0x1] }
 0x58c   :  { %v7374_v14 = vpop.permute.xlu1 %7373  ;;  %v7514_v54 = vpop.permute.xlu0 %7513  ;;  %v6695_v32 = vrot.slane %v10078_v23, 5 }
 0x58d   :  { %7463 = vst.msk [vmem:[#allocation2 + $0x30] sm:$0xff] %vm2283_vm12, %v7374_v14 }
 0x58e   :  { %7527 = vrot.lane.b32.xlu1 %v9590_v60, %s10117_s23  ;;  %7602 = vst.msk [vmem:[#allocation2 + $0x38] sm:$0xff] %vm2422_vm13, %v7514_v54  ;;  %v6696_v60 = vsel %vm10900_vm5, %v6694_v50, %v6695_v32  ;;  %v10081_v54 = vld [vmem:[#allocation3 + $0xf8] sm:$0x1] }
 0x58f   :  { %7711 = vrot.lane.b32.xlu0 %v9600_v62, %s10118_s26  ;;  %v9575_v3 = vcombine.low %v6693_v29, %v6696_v60  ;;  %v10079_v62 = vld [vmem:[#allocation3 + $0xf4] sm:$0xf]  ;;  %v6702_v50 = vrot.slane %v10081_v54, 5  ;;  %v10086_v54 = vld [vmem:[#allocation3 + $0x108] sm:$0xf] }
 0x590   :  { %v7512_v39 = vpop.permute.xlu1 %7511  ;;  %v7696_v34 = vpop.permute.xlu0 %7695  ;;  %v6699_v13 = vrot.slane %v10079_v62, 5 }
 0x591   :  { %7601 = vst.msk [vmem:[#allocation2 + $0x30] sm:$0xff] %vm2422_vm13, %v7512_v39 }
 0x592   :  { %7709 = vrot.lane.b32.xlu1 %v9592_v27, %s10118_s26  ;;  %7784 = vst.msk [vmem:[#allocation2 + $0x38] sm:$0xff] %vm2605_vm14, %v7696_v34  ;;  %v6701_v21 = vrot.slane %v6699_v13, 4  ;;  %v6700_v36 = vsel %vm10900_vm5, %v9544_v8, %v6699_v13  ;;  %v6708_v34 = vrot.slane %v6706_v35, 4 }
 0x593   :  { %7861 = vrot.lane.b32.xlu0 %v9604_v38, %s10119_s2 }
 0x594   :  { %v7694_v55 = vpop.permute.xlu1 %7693  ;;  %v7846_v27 = vpop.permute.xlu0 %7845  ;;  %v6703_v22 = vsel %vm10900_vm5, %v6701_v21, %v6702_v50  ;;  %v9546_v50 = vrot.slane %v10086_v54, 9  ;;  %v10093_v54 = vld [vmem:[#allocation3 + $0x128] sm:$0x1] }
 0x595   :  { %7783 = vst.msk [vmem:[#allocation2 + $0x30] sm:$0xff] %vm2605_vm14, %v7694_v55  ;;  %v6709_v55 = vrot.slane %v10084_v25, 5  ;;  %v10090_v25 = vld [vmem:[#allocation3 + $0x11c] sm:$0x1] }
 0x596   :  { %7859 = vrot.lane.b32.xlu1 %v9596_v12, %s10119_s2  ;;  %7934 = vst.msk [vmem:[#allocation2 + $0x38] sm:$0xff] %vm18519_vm0, %v7846_v27  ;;  %vm18524_vm0 = vmmov %vm18521_vm15 }
 0x597   :  { %6925 = vrot.lane.b32.xlu0 %v9575_v3, %s10113_s15  ;;  %v6710_v27 = vsel %vm10900_vm5, %v6708_v34, %v6709_v55  ;;  %v6723_v55 = vrot.slane %v10090_v25, 5 }
 0x598   :  { %v7844_v9 = vpop.permute.xlu1 %7843  ;;  %v6910_v14 = vpop.permute.xlu0 %6909 }
 0x599   :  { %7933 = vst.msk [vmem:[#allocation2 + $0x30] sm:$0xff] %vm18522_vm1, %v7844_v9 }
 0x59a   :  { %6923 = vrot.lane.b32.xlu1 %v9574_v37, %s10113_s15  ;;  %6996 = vst.msk [vmem:[#allocation2 + $0x48] sm:$0xff] %vm18520_vm3, %v6910_v14  ;;  %v10085_v14 = vld [vmem:[#allocation3 + $0x10c] sm:$0xf]  ;;  %vm18525_vm3 = vmmov %vm18522_vm1 }
 0x59b   :  { %7063 = vrot.lane.b32.xlu0 %v15303_v47, %s10114_s16  ;;  %v6713_v21 = vrot.slane %v10085_v14, 5 }
 0x59c   :  { %v6908_v12 = vpop.permute.xlu1 %6907  ;;  %v7048_v38 = vpop.permute.xlu0 %7047 }
 0x59d   :  { %6995 = vst.msk [vmem:[#allocation2 + $0x40] sm:$0xff] %vm18523_vm9, %v6908_v12  ;;  %v7966_v49 = vld [vmem:[#allocation2 + $0x38] sm:$0xff]  ;;  %v6715_v59 = vrot.slane %v6713_v21, 4 }
 0x59e   :  { %7061 = vrot.lane.b32.xlu1 %v15124_v26, %s10114_s16  ;;  %7134 = vst.msk [vmem:[#allocation2 + $0x48] sm:$0xff] %vm1949_vm10, %v7048_v38  ;;  %v9576_v26 = vcombine.low %v6700_v36, %v6703_v22  ;;  %v10087_v38 = vld [vmem:[#allocation3 + $0x110] sm:$0x1] }
 0x59f   :  { %7245 = vrot.lane.b32.xlu0 %v15149_v11, %s10115_s17  ;;  %v6716_v22 = vrot.slane %v10087_v38, 5 }
 0x5a0   :  { %v7046_v52 = vpop.permute.xlu1 %7045  ;;  %v7965_v15 = vld [vmem:[#allocation2 + $0x30] sm:$0xff]  ;;  %v7230_v39 = vpop.permute.xlu0 %7229 }
 0x5a1   :  { %7133 = vst.msk [vmem:[#allocation2 + $0x40] sm:$0xff] %vm1949_vm10, %v7046_v52  ;;  %9865 = vmatprep.mubr.msk.bf16.mxu1 %vm18521_vm15, %v7965_v15  ;;  %vm18526_vm15 = vmmov %vm18523_vm9  ;;  %v6717_v52 = vsel %vm10900_vm5, %v6715_v59, %v6716_v22  ;;  %v10092_v59 = vld [vmem:[#allocation3 + $0x120] sm:$0xf] }
 0x5a2   :  { %9866 = vmatmul.mubr.msk.bf16.gmra.mrb[12].mxu1 %vm18524_vm0, %v7966_v49  ;;  %7243 = vrot.lane.b32.xlu1 %v15159_v6, %s10115_s17  ;;  %7316 = vst.msk [vmem:[#allocation2 + $0x48] sm:$0xff] %vm2132_vm11, %v7230_v39  ;;  %v10083_v6 = vld [vmem:[#allocation3 + $0xfc] sm:$0xf] }
 0x5a3   :  { %7395 = vrot.lane.b32.xlu0 %v9576_v26, %s10116_s20  ;;  %v9545_v44 = vrot.slane %v10083_v6, 9 }
 0x5a4   :  { %v7228_v23 = vpop.permute.xlu1 %7227  ;;  %v7380_v32 = vpop.permute.xlu0 %7379 }
 0x5a5   :  { %7315 = vst.msk [vmem:[#allocation2 + $0x40] sm:$0xff] %vm2132_vm11, %v7228_v23  ;;  %v6707_v37 = vsel %vm10900_vm5, %v9545_v44, %v6706_v35  ;;  %v10088_v35 = vld [vmem:[#allocation3 + $0x118] sm:$0xf] }
 0x5a6   :  { %7393 = vrot.lane.b32.xlu1 %v9575_v3, %s10116_s20  ;;  %7466 = vst.msk [vmem:[#allocation2 + $0x48] sm:$0xff] %vm2283_vm12, %v7380_v32  ;;  %v9577_v13 = vcombine.low %v6707_v37, %v6710_v27  ;;  %v6720_v23 = vrot.slane %v10088_v35, 5 }
 0x5a7   :  { %7533 = vrot.lane.b32.xlu0 %v15314_v48, %s10117_s23 }
 0x5a8   :  { %v7378_v60 = vpop.permute.xlu1 %7377  ;;  %v7518_v29 = vpop.permute.xlu0 %7517 }
 0x5a9   :  { %7465 = vst.msk [vmem:[#allocation2 + $0x40] sm:$0xff] %vm2283_vm12, %v7378_v60  ;;  %v6722_v60 = vrot.slane %v6720_v23, 4 }
 0x5aa   :  { %7531 = vrot.lane.b32.xlu1 %v15303_v47, %s10117_s23  ;;  %7604 = vst.msk [vmem:[#allocation2 + $0x48] sm:$0xff] %vm2422_vm13, %v7518_v29 }
 0x5ab   :  { %7715 = vrot.lane.b32.xlu0 %v15194_v46, %s10118_s26  ;;  %v6724_v27 = vsel %vm10900_vm5, %v6722_v60, %v6723_v55  ;;  %v10096_v60 = vld [vmem:[#allocation3 + $0x134] sm:$0x1] }
 0x5ac   :  { %v7516_v3 = vpop.permute.xlu1 %7515  ;;  %v7700_v62 = vpop.permute.xlu0 %7699 }
 0x5ad   :  { %7603 = vst.msk [vmem:[#allocation2 + $0x40] sm:$0xff] %vm2422_vm13, %v7516_v3 }
 0x5ae   :  { %7713 = vrot.lane.b32.xlu1 %v15149_v11, %s10118_s26  ;;  %7786 = vst.msk [vmem:[#allocation2 + $0x48] sm:$0xff] %vm2605_vm14, %v7700_v62 }
 0x5af   :  { %7865 = vrot.lane.b32.xlu0 %v9577_v13, %s10119_s2 }
 0x5b0   :  { %v7698_v47 = vpop.permute.xlu1 %7697  ;;  %v7850_v9 = vpop.permute.xlu0 %7849 }
 0x5b1   :  { %7785 = vst.msk [vmem:[#allocation2 + $0x40] sm:$0xff] %vm2605_vm14, %v7698_v47 }
 0x5b2   :  { %7863 = vrot.lane.b32.xlu1 %v9576_v26, %s10119_s2  ;;  %7936 = vst.msk [vmem:[#allocation2 + $0x48] sm:$0xff] %vm18522_vm1, %v7850_v9  ;;  %vm18527_vm1 = vmmov %vm18524_vm0  ;;  %v10091_v9 = vld [vmem:[#allocation3 + $0x124] sm:$0xf] }
 0x5b3   :  { %6929 = vrot.lane.b32.xlu0 %v9577_v13, %s10113_s15  ;;  %v6727_v14 = vrot.slane %v10091_v9, 5  ;;  %v10098_v9 = vld [vmem:[#allocation3 + $0x138] sm:$0xf] }
 0x5b4   :  { %v7848_v12 = vpop.permute.xlu1 %7847  ;;  %v6914_v11 = vpop.permute.xlu0 %6913 }
 0x5b5   :  { %7935 = vst.msk [vmem:[#allocation2 + $0x40] sm:$0xff] %vm18525_vm3, %v7848_v12  ;;  %v6729_v12 = vrot.slane %v6727_v14, 4 }
 0x5b6   :  { %6927 = vrot.lane.b32.xlu1 %v9576_v26, %s10113_s15  ;;  %6998 = vst.msk [vmem:[#allocation2 + $0x58] sm:$0xff] %vm18523_vm9, %v6914_v11  ;;  %v6714_v26 = vsel %vm10900_vm5, %v9546_v50, %v6713_v21  ;;  %vm18528_vm9 = vmmov %vm18525_vm3  ;;  %v6730_v50 = vrot.slane %v10093_v54, 5 }
 0x5b7   :  { %7067 = vrot.lane.b32.xlu0 %v15310_v61, %s10114_s16 }
 0x5b8   :  { %v6912_v8 = vpop.permute.xlu1 %6911  ;;  %v7052_v49 = vpop.permute.xlu0 %7051  ;;  %v6731_v22 = vsel %vm10900_vm5, %v6729_v12, %v6730_v50 }
 0x5b9   :  { %6997 = vst.msk [vmem:[#allocation2 + $0x50] sm:$0xff] %vm18526_vm15, %v6912_v8  ;;  %v7968_v15 = vld [vmem:[#allocation2 + $0x48] sm:$0xff]  ;;  %v9548_v8 = vrot.slane %v10092_v59, 9 }
 0x5ba   :  { %7065 = vrot.lane.b32.xlu1 %v15314_v48, %s10114_s16  ;;  %7136 = vst.msk [vmem:[#allocation2 + $0x58] sm:$0xff] %vm1949_vm10, %v7052_v49  ;;  %v9578_v48 = vcombine.low %v6714_v26, %v6717_v52  ;;  %v10094_v26 = vld [vmem:[#allocation3 + $0x130] sm:$0xf] }
 0x5bb   :  { %7249 = vrot.lane.b32.xlu0 %v15178_v41, %s10115_s17 }
 0x5bc   :  { %v7050_v36 = vpop.permute.xlu1 %7049  ;;  %v7967_v39 = vld [vmem:[#allocation2 + $0x40] sm:$0xff]  ;;  %v7234_v24 = vpop.permute.xlu0 %7233 }
 0x5bd   :  { %7135 = vst.msk [vmem:[#allocation2 + $0x50] sm:$0xff] %vm1949_vm10, %v7050_v36  ;;  %9869 = vmatprep.mubr.msk.bf16.mxu1 %vm18524_vm0, %v7967_v39  ;;  %vm18529_vm0 = vmmov %vm18526_vm15  ;;  %v6728_v36 = vsel %vm10900_vm5, %v9548_v8, %v6727_v14  ;;  %v9550_v14 = vrot.slane %v10098_v9, 9 }
 0x5be   :  { %9870 = vmatmul.mubr.msk.bf16.gmra.mrb[16].mxu1 %vm18527_vm1, %v7968_v15  ;;  %7247 = vrot.lane.b32.xlu1 %v15194_v46, %s10115_s17  ;;  %7318 = vst.msk [vmem:[#allocation2 + $0x58] sm:$0xff] %vm2132_vm11, %v7234_v24  ;;  %v10089_v46 = vld [vmem:[#allocation3 + $0x114] sm:$0xf]  ;;  %v6734_v24 = vrot.slane %v10094_v26, 5  ;;  %v10101_v26 = vld [vmem:[#allocation3 + $0x144] sm:$0xf] }
 0x5bf   :  { %7399 = vrot.lane.b32.xlu0 %v9578_v48, %s10116_s20  ;;  %v9547_v44 = vrot.slane %v10089_v46, 9 }
 0x5c0   :  { %v7232_v32 = vpop.permute.xlu1 %7231 }
 0x5c1   :  { %7317 = vst.msk [vmem:[#allocation2 + $0x50] sm:$0xff] %vm2132_vm11, %v7232_v32  ;;  %v7384_v34 = vpop.permute.xlu0 %7383  ;;  %v6721_v37 = vsel %vm10900_vm5, %v9547_v44, %v6720_v23  ;;  %v6736_v23 = vrot.slane %v6734_v24, 4 }
 0x5c2   :  { %7397 = vrot.lane.b32.xlu1 %v9577_v13, %s10116_s20  ;;  %7468 = vst.msk [vmem:[#allocation2 + $0x58] sm:$0xff] %vm2283_vm12, %v7384_v34  ;;  %v9579_v13 = vcombine.low %v6721_v37, %v6724_v27  ;;  %v10097_v37 = vld [vmem:[#allocation3 + $0x13c] sm:$0xf] }
 0x5c3   :  { %7537 = vrot.lane.b32.xlu0 %v15333_v10, %s10117_s23 }
 0x5c4   :  { %v7382_v6 = vpop.permute.xlu1 %7381 }
 0x5c5   :  { %7467 = vst.msk [vmem:[#allocation2 + $0x50] sm:$0xff] %vm2283_vm12, %v7382_v6  ;;  %v7522_v29 = vpop.permute.xlu0 %7521  ;;  %v6737_v6 = vrot.slane %v10096_v60, 5 }
 0x5c6   :  { %7535 = vrot.lane.b32.xlu1 %v15310_v61, %s10117_s23  ;;  %7606 = vst.msk [vmem:[#allocation2 + $0x58] sm:$0xff] %vm2422_vm13, %v7522_v29 }
 0x5c7   :  { %7719 = vrot.lane.b32.xlu0 %v15223_v7, %s10118_s26  ;;  %v6738_v44 = vsel %vm10900_vm5, %v6736_v23, %v6737_v6 }
 0x5c8   :  { %v7520_v3 = vpop.permute.xlu1 %7519 }
 0x5c9   :  { %7605 = vst.msk [vmem:[#allocation2 + $0x50] sm:$0xff] %vm2422_vm13, %v7520_v3  ;;  %v7704_v62 = vpop.permute.xlu0 %7703 }
 0x5ca   :  { %7717 = vrot.lane.b32.xlu1 %v15178_v41, %s10118_s26  ;;  %7788 = vst.msk [vmem:[#allocation2 + $0x58] sm:$0xff] %vm2605_vm14, %v7704_v62  ;;  %v6741_v62 = vrot.slane %v10097_v37, 5  ;;  %v10105_v37 = vld [vmem:[#allocation3 + $0x158] sm:$0x1] }
 0x5cb   :  { %7869 = vrot.lane.b32.xlu0 %v9579_v13, %s10119_s2 }
 0x5cc   :  { %v7702_v61 = vpop.permute.xlu1 %7701  ;;  %v6742_v50 = vsel %vm10900_vm5, %v9550_v14, %v6741_v62 }
 0x5cd   :  { %7787 = vst.msk [vmem:[#allocation2 + $0x50] sm:$0xff] %vm2605_vm14, %v7702_v61  ;;  %v7854_v47 = vpop.permute.xlu0 %7853  ;;  %v6743_v61 = vrot.slane %v6741_v62, 4  ;;  %v6758_v62 = vrot.slane %v10105_v37, 5  ;;  %v10111_v37 = vld [vmem:[#allocation3 + $0x170] sm:$0x1] }
 0x5ce   :  { %7867 = vrot.lane.b32.xlu1 %v9578_v48, %s10119_s2  ;;  %7938 = vst.msk [vmem:[#allocation2 + $0x58] sm:$0xff] %vm18525_vm3, %v7854_v47  ;;  %vm18530_vm3 = vmmov %vm18527_vm1 }
 0x5cf   :  { %6933 = vrot.lane.b32.xlu0 %v9579_v13, %s10113_s15 }
 0x5d0   :  { %v7852_v21 = vpop.permute.xlu1 %7851 }
 0x5d1   :  { %7937 = vst.msk [vmem:[#allocation2 + $0x50] sm:$0xff] %vm18528_vm9, %v7852_v21  ;;  %v6918_v41 = vpop.permute.xlu0 %6917  ;;  %v10099_v21 = vld [vmem:[#allocation3 + $0x140] sm:$0x1] }
 0x5d2   :  { %6931 = vrot.lane.b32.xlu1 %v9578_v48, %s10113_s15  ;;  %7000 = vst.msk [vmem:[#allocation2 + $0x68] sm:$0xff] %vm18526_vm15, %v6918_v41  ;;  %vm18531_vm15 = vmmov %vm18528_vm9  ;;  %v6744_v41 = vrot.slane %v10099_v21, 5 }
 0x5d3   :  { %7071 = vrot.lane.b32.xlu0 %v15318_v0, %s10114_s16 }
 0x5d4   :  { %v6916_v11 = vpop.permute.xlu1 %6915 }
 0x5d5   :  { %6999 = vst.msk [vmem:[#allocation2 + $0x60] sm:$0xff] %vm18529_vm0, %v6916_v11  ;;  %v7056_v38 = vpop.permute.xlu0 %7055  ;;  %v7970_v49 = vld [vmem:[#allocation2 + $0x58] sm:$0xff]  ;;  %v6745_v11 = vsel %vm10900_vm5, %v6743_v61, %v6744_v41  ;;  %v10106_v41 = vld [vmem:[#allocation3 + $0x160] sm:$0xf] }
 0x5d6   :  { %7069 = vrot.lane.b32.xlu1 %v15333_v10, %s10114_s16  ;;  %7138 = vst.msk [vmem:[#allocation2 + $0x68] sm:$0xff] %vm1949_vm10, %v7056_v38  ;;  %v9580_v10 = vcombine.low %v6728_v36, %v6731_v22  ;;  %v10100_v22 = vld [vmem:[#allocation3 + $0x148] sm:$0xf] }
 0x5d7   :  { %7253 = vrot.lane.b32.xlu0 %v15208_v33, %s10115_s17 }
 0x5d8   :  { %v7054_v52 = vpop.permute.xlu1 %7053  ;;  %v7969_v15 = vld [vmem:[#allocation2 + $0x50] sm:$0xff] }
 0x5d9   :  { %7137 = vst.msk [vmem:[#allocation2 + $0x60] sm:$0xff] %vm1949_vm10, %v7054_v52  ;;  %9873 = vmatprep.mubr.msk.bf16.mxu1 %vm18527_vm1, %v7969_v15  ;;  %v7238_v39 = vpop.permute.xlu0 %7237  ;;  %vm18532_vm1 = vmmov %vm18529_vm0 }
 0x5da   :  { %9874 = vmatmul.mubr.msk.bf16.gmra.mrb[20].mxu1 %vm18530_vm3, %v7970_v49  ;;  %7251 = vrot.lane.b32.xlu1 %v15223_v7, %s10115_s17  ;;  %7320 = vst.msk [vmem:[#allocation2 + $0x68] sm:$0xff] %vm2132_vm11, %v7238_v39  ;;  %v10095_v7 = vld [vmem:[#allocation3 + $0x12c] sm:$0xf]  ;;  %v6748_v49 = vrot.slane %v10100_v22, 5  ;;  %v4041_v39 = vld [vmem:[#allocation3 + $0x1a4] sm:$0x1] }
 0x5db   :  { %7403 = vrot.lane.b32.xlu0 %v9580_v10, %s10116_s20  ;;  %v9549_v34 = vrot.slane %v10095_v7, 9  ;;  %v4151_v7 = vld [vmem:[#allocation3 + $0x1ac] sm:$0x1] }
 0x5dc   :  { %v7236_v48 = vpop.permute.xlu1 %7235  ;;  %v6750_v36 = vrot.slane %v6748_v49, 4  ;;  %v4152_v43 = vsel %vm12185_vm8, 0, %v4151_v7  ;;  %vm18534_vm8 = vmmov %vm18531_vm15 }
 0x5dd   :  { %7319 = vst.msk [vmem:[#allocation2 + $0x60] sm:$0xff] %vm2132_vm11, %v7236_v48  ;;  %v7388_v35 = vpop.permute.xlu0 %7387  ;;  %v6735_v55 = vsel %vm10900_vm5, %v9549_v34, %v6734_v24  ;;  %v9551_v24 = vrot.slane %v10101_v26, 9  ;;  %v10102_v48 = vld [vmem:[#allocation3 + $0x14c] sm:$0x1]  ;;  %4153 = vst [vmem:[#allocation3 + $0x1ac] sm:$0x1] %v4152_v43 }
 0x5de   :  { %7401 = vrot.lane.b32.xlu1 %v9579_v13, %s10116_s20  ;;  %7470 = vst.msk [vmem:[#allocation2 + $0x68] sm:$0xff] %vm2283_vm12, %v7388_v35  ;;  %v9581_v27 = vcombine.low %v6735_v55, %v6738_v44  ;;  %v6751_v35 = vrot.slane %v10102_v48, 5  ;;  %v10103_v44 = vld [vmem:[#allocation3 + $0x154] sm:$0xf] }
 0x5df   :  { %7541 = vrot.lane.b32.xlu0 %v15349_v17, %s10117_s23  ;;  %v6749_v60 = vsel %vm10900_vm5, %v9551_v24, %v6748_v49  ;;  %v10109_v24 = vld [vmem:[#allocation3 + $0x16c] sm:$0xf] }
 0x5e0   :  { %v7386_v32 = vpop.permute.xlu1 %7385  ;;  %v6769_v48 = vrot.slane %v10109_v24, 5 }
 0x5e1   :  { %7469 = vst.msk [vmem:[#allocation2 + $0x60] sm:$0xff] %vm2283_vm12, %v7386_v32  ;;  %v7526_v46 = vpop.permute.xlu0 %7525  ;;  %v6752_v32 = vsel %vm10900_vm5, %v6750_v36, %v6751_v35 }
 0x5e2   :  { %7539 = vrot.lane.b32.xlu1 %v15318_v0, %s10117_s23  ;;  %7608 = vst.msk [vmem:[#allocation2 + $0x68] sm:$0xff] %vm2422_vm13, %v7526_v46  ;;  %v9583_v6 = vcombine.low %v6749_v60, %v6752_v32 }
 0x5e3   :  { %7723 = vrot.lane.b32.xlu0 %v15258_v30, %s10118_s26 }
 0x5e4   :  { %v7524_v25 = vpop.permute.xlu1 %7523 }
 0x5e5   :  { %7607 = vst.msk [vmem:[#allocation2 + $0x60] sm:$0xff] %vm2422_vm13, %v7524_v25  ;;  %v7708_v29 = vpop.permute.xlu0 %7707  ;;  %v6755_v25 = vrot.slane %v10103_v44, 5 }
 0x5e6   :  { %7721 = vrot.lane.b32.xlu1 %v15208_v33, %s10118_s26  ;;  %7790 = vst.msk [vmem:[#allocation2 + $0x68] sm:$0xff] %vm2605_vm14, %v7708_v29 }
 0x5e7   :  { %7873 = vrot.lane.b32.xlu0 %v9581_v27, %s10119_s2  ;;  %v6757_v29 = vrot.slane %v6755_v25, 4 }
 0x5e8   :  { %v7706_v0 = vpop.permute.xlu1 %7705 }
 0x5e9   :  { %7789 = vst.msk [vmem:[#allocation2 + $0x60] sm:$0xff] %vm2605_vm14, %v7706_v0  ;;  %v7858_v3 = vpop.permute.xlu0 %7857  ;;  %v10104_v0 = vld [vmem:[#allocation3 + $0x150] sm:$0xf] }
 0x5ea   :  { %7871 = vrot.lane.b32.xlu1 %v9580_v10, %s10119_s2  ;;  %7940 = vst.msk [vmem:[#allocation2 + $0x68] sm:$0xff] %vm18528_vm9, %v7858_v3  ;;  %vm18533_vm9 = vmmov %vm18530_vm3  ;;  %v9552_v3 = vrot.slane %v10104_v0, 9  ;;  %v10110_v0 = vld [vmem:[#allocation3 + $0x168] sm:$0xf] }
 0x5eb   :  { %6937 = vrot.lane.b32.xlu0 %v9581_v27, %s10113_s15 }
 0x5ec   :  { %v7856_v13 = vpop.permute.xlu1 %7855  ;;  %v6756_v14 = vsel %vm10900_vm5, %v9552_v3, %v6755_v25  ;;  %v9554_v3 = vrot.slane %v10110_v0, 9 }
 0x5ed   :  { %7939 = vst.msk [vmem:[#allocation2 + $0x60] sm:$0xff] %vm18531_vm15, %v7856_v13  ;;  %v6922_v33 = vpop.permute.xlu0 %6921  ;;  %vm18536_vm15 = vmmov %vm18529_vm0 }
 0x5ee   :  { %6935 = vrot.lane.b32.xlu1 %v9580_v10, %s10113_s15  ;;  %7002 = vst.msk [vmem:[#allocation2 + $0x78] sm:$0xff] %vm18529_vm0, %v6922_v33  ;;  %v6759_v33 = vsel %vm10900_vm5, %v6757_v29, %v6758_v62  ;;  %v6772_v62 = vrot.slane %v10111_v37, 5 }
 0x5ef   :  { %7075 = vrot.lane.b32.xlu0 %v15345_v4, %s10114_s16 }
 0x5f0   :  { %v6920_v47 = vpop.permute.xlu1 %6919 }
 0x5f1   :  { %7001 = vst.msk [vmem:[#allocation2 + $0x70] sm:$0xff] %vm18532_vm1, %v6920_v47  ;;  %v7060_v12 = vpop.permute.xlu0 %7059  ;;  %v7972_v59 = vld [vmem:[#allocation2 + $0x68] sm:$0xff]  ;;  %vm18537_vm1 = vmmov %vm18530_vm3 }
 0x5f2   :  { %7073 = vrot.lane.b32.xlu1 %v15349_v17, %s10114_s16  ;;  %7140 = vst.msk [vmem:[#allocation2 + $0x78] sm:$0xff] %vm1949_vm10, %v7060_v12  ;;  %v9582_v17 = vcombine.low %v6742_v50, %v6745_v11  ;;  %v6762_v12 = vrot.slane %v10106_v41, 5 }
 0x5f3   :  { %7257 = vrot.lane.b32.xlu0 %v15239_v20, %s10115_s17 }
 0x5f4   :  { %v7058_v8 = vpop.permute.xlu1 %7057  ;;  %v7971_v54 = vld [vmem:[#allocation2 + $0x60] sm:$0xff] }
 0x5f5   :  { %7139 = vst.msk [vmem:[#allocation2 + $0x70] sm:$0xff] %vm1949_vm10, %v7058_v8  ;;  %9877 = vmatprep.mubr.msk.bf16.mxu1 %vm18530_vm3, %v7971_v54  ;;  %v7242_v38 = vpop.permute.xlu0 %7241  ;;  %vm18538_vm3 = vmmov %vm18537_vm1  ;;  %v6764_v8 = vrot.slane %v6762_v12, 4 }
 0x5f6   :  { %9878 = vmatmul.mubr.msk.bf16.gmra.mrb[24].mxu1 %vm18533_vm9, %v7972_v59  ;;  %7255 = vrot.lane.b32.xlu1 %v15258_v30, %s10115_s17  ;;  %7322 = vst.msk [vmem:[#allocation2 + $0x78] sm:$0xff] %vm2132_vm11, %v7242_v38  ;;  %v4042_v30 = vsel %vm12170_vm4, 0, %v4041_v39  ;;  %vm18535_vm4 = vmmov %vm18534_vm8  ;;  %v10108_v38 = vld [vmem:[#allocation3 + $0x164] sm:$0x1] }
 0x5f7   :  { %7407 = vrot.lane.b32.xlu0 %v9582_v17, %s10116_s20  ;;  %4043 = vst [vmem:[#allocation3 + $0x1a4] sm:$0x1] %v4042_v30  ;;  %vm18539_vm9 = vmmov %vm18535_vm4 }
 0x5f8   :  { %v7240_v52 = vpop.permute.xlu1 %7239 }
 0x5f9   :  { %7321 = vst.msk [vmem:[#allocation2 + $0x70] sm:$0xff] %vm2132_vm11, %v7240_v52  ;;  %v7392_v15 = vpop.permute.xlu0 %7391 }
 0x5fa   :  { %7405 = vrot.lane.b32.xlu1 %v9581_v27, %s10116_s20  ;;  %7472 = vst.msk [vmem:[#allocation2 + $0x78] sm:$0xff] %vm2283_vm12, %v7392_v15 }
 0x5fb   :  { %7545 = vrot.lane.b32.xlu0 %v15360_v16, %s10117_s23 }
 0x5fc   :  { %v7390_v10 = vpop.permute.xlu1 %7389 }
 0x5fd   :  { %7471 = vst.msk [vmem:[#allocation2 + $0x70] sm:$0xff] %vm2283_vm12, %v7390_v10  ;;  %v7530_v23 = vpop.permute.xlu0 %7529 }
 0x5fe   :  { %7543 = vrot.lane.b32.xlu1 %v15345_v4, %s10117_s23  ;;  %7610 = vst.msk [vmem:[#allocation2 + $0x78] sm:$0xff] %vm2422_vm13, %v7530_v23 }
 0x5ff   :  { %7727 = vrot.lane.b32.xlu0 %v15286_v5, %s10118_s26 }
 0x600   :  { %v7528_v34 = vpop.permute.xlu1 %7527 }
 0x601   :  { %7609 = vst.msk [vmem:[#allocation2 + $0x70] sm:$0xff] %vm2422_vm13, %v7528_v34  ;;  %v7712_v4 = vpop.permute.xlu0 %7711 }
 0x602   :  { %7725 = vrot.lane.b32.xlu1 %v15239_v20, %s10118_s26  ;;  %7792 = vst.msk [vmem:[#allocation2 + $0x78] sm:$0xff] %vm2605_vm14, %v7712_v4 }
 0x603   :  { %7877 = vrot.lane.b32.xlu0 %v9583_v6, %s10119_s2 }
 0x604   :  { %v7710_v46 = vpop.permute.xlu1 %7709 }
 0x605   :  { %7791 = vst.msk [vmem:[#allocation2 + $0x70] sm:$0xff] %vm2605_vm14, %v7710_v46  ;;  %v7862_v57 = vpop.permute.xlu0 %7861  ;;  %v6771_v46 = vrot.slane %v6769_v48, 4 }
 0x606   :  { %7875 = vrot.lane.b32.xlu1 %v9582_v17, %s10119_s2  ;;  %7942 = vst.msk [vmem:[#allocation2 + $0x78] sm:$0xff] %vm18534_vm8, %v7862_v57  ;;  %vm18540_vm8 = vmmov %vm18535_vm4 }
 0x607   :  { %6941 = vrot.lane.b32.xlu0 %v9583_v6, %s10113_s15 }
 0x608   :  { %v7860_v55 = vpop.permute.xlu1 %7859 }
 0x609   :  { %7941 = vst.msk [vmem:[#allocation2 + $0x70] sm:$0xff] %vm18535_vm4, %v7860_v55  ;;  %v6926_v20 = vpop.permute.xlu0 %6925  ;;  %vm18541_vm4 = vmmov %vm18529_vm0 }
 0x60a   :  { %6939 = vrot.lane.b32.xlu1 %v9582_v17, %s10113_s15  ;;  %7004 = vst.msk [vmem:[#allocation2 + $0x88] sm:$0xff] %vm18536_vm15, %v6926_v20  ;;  %v6765_v17 = vrot.slane %v10108_v38, 5  ;;  %vm18542_vm15 = vmmov %vm18529_vm0 }
 0x60b   :  { %7079 = vrot.lane.b32.xlu0 %v15353_v56, %s10114_s16 }
 0x60c   :  { %v6924_v27 = vpop.permute.xlu1 %6923  ;;  %v6766_v49 = vsel %vm10900_vm5, %v6764_v8, %v6765_v17 }
 0x60d   :  { %7003 = vst.msk [vmem:[#allocation2 + $0x80] sm:$0xff] %vm18529_vm0, %v6924_v27  ;;  %v7064_v13 = vpop.permute.xlu0 %7063  ;;  %v7974_v61 = vld [vmem:[#allocation2 + $0x78] sm:$0xff]  ;;  %vm18543_vm0 = vmmov %vm18537_vm1 }
 0x60e   :  { %7077 = vrot.lane.b32.xlu1 %v15360_v16, %s10114_s16  ;;  %7142 = vst.msk [vmem:[#allocation2 + $0x88] sm:$0xff] %vm1949_vm10, %v7064_v13  ;;  %v9584_v16 = vcombine.low %v6756_v14, %v6759_v33 }
 0x60f   :  { %7261 = vrot.lane.b32.xlu0 %v15274_v42, %s10115_s17 }
 0x610   :  { %v7062_v47 = vpop.permute.xlu1 %7061  ;;  %v7973_v9 = vld [vmem:[#allocation2 + $0x70] sm:$0xff] }
 0x611   :  { %7141 = vst.msk [vmem:[#allocation2 + $0x80] sm:$0xff] %vm1949_vm10, %v7062_v47  ;;  %9881 = vmatprep.mubr.msk.bf16.mxu1 %vm18537_vm1, %v7973_v9  ;;  %v7246_v21 = vpop.permute.xlu0 %7245  ;;  %v6773_v9 = vsel %vm10900_vm5, %v6771_v46, %v6772_v62  ;;  %vm18544_vm1 = vmmov %vm18543_vm0 }
 0x612   :  { %9882 = vmatmul.mubr.msk.bf16.gmra.mrb[28].mxu1 %vm18538_vm3, %v7974_v61  ;;  %7259 = vrot.lane.b32.xlu1 %v15286_v5, %s10115_s17  ;;  %7324 = vst.msk [vmem:[#allocation2 + $0x88] sm:$0xff] %vm2132_vm11, %v7246_v21  ;;  %v10107_v5 = vld [vmem:[#allocation3 + $0x15c] sm:$0xf]  ;;  %vm18546_vm3 = vmmov %vm18540_vm8 }
 0x613   :  { %7411 = vrot.lane.b32.xlu0 %v9584_v16, %s10116_s20  ;;  %v9553_v50 = vrot.slane %v10107_v5, 9 }
 0x614   :  { %v7244_v11 = vpop.permute.xlu1 %7243 }
 0x615   :  { %7323 = vst.msk [vmem:[#allocation2 + $0x80] sm:$0xff] %vm2132_vm11, %v7244_v11  ;;  %v7396_v59 = vpop.permute.xlu0 %7395  ;;  %v6763_v15 = vsel %vm10900_vm5, %v9553_v50, %v6762_v12  ;;  %v6770_v11 = vsel %vm10900_vm5, %v9554_v3, %v6769_v48 }
 0x616   :  { %7409 = vrot.lane.b32.xlu1 %v9583_v6, %s10116_s20  ;;  %7474 = vst.msk [vmem:[#allocation2 + $0x88] sm:$0xff] %vm2283_vm12, %v7396_v59  ;;  %v16074_v39 = vcombine.low %v6763_v15, %v6766_v49  ;;  %v9586_v8 = vcombine.low %v6770_v11, %v6773_v9  ;;  %v18551_v11 = vld [vmem:[#allocation81_spill] sm:$0xff] }
 0x617   :  { %7549 = vrot.lane.b32.xlu0 %v15368_v1, %s10117_s23 }
 0x618   :  { %v7394_v54 = vpop.permute.xlu1 %7393 }
 0x619   :  { %7473 = vst.msk [vmem:[#allocation2 + $0x80] sm:$0xff] %vm2283_vm12, %v7394_v54  ;;  %v7534_v22 = vpop.permute.xlu0 %7533 }
 0x61a   :  { %7547 = vrot.lane.b32.xlu1 %v15353_v56, %s10117_s23  ;;  %7612 = vst.msk [vmem:[#allocation2 + $0x88] sm:$0xff] %vm2422_vm13, %v7534_v22  ;;  %v18545_v22 = vld [vmem:[#allocation68_spill] sm:$0xff] }
 0x61b   :  { %7731 = vrot.lane.b32.xlu0 %v15335_v28, %s10118_s26 }
 0x61c   :  { %v7532_v52 = vpop.permute.xlu1 %7531 }
 0x61d   :  { %7611 = vst.msk [vmem:[#allocation2 + $0x80] sm:$0xff] %vm2422_vm13, %v7532_v52  ;;  %v7716_v36 = vpop.permute.xlu0 %7715 }
 0x61e   :  { %7729 = vrot.lane.b32.xlu1 %v15274_v42, %s10118_s26  ;;  %7794 = vst.msk [vmem:[#allocation2 + $0x88] sm:$0xff] %vm2605_vm14, %v7716_v36 }
 0x61f   :  { %7881 = vrot.lane.b32.xlu0 %v16074_v39, %s10119_s2 }
 0x620   :  { %v7714_v56 = vpop.permute.xlu1 %7713 }
 0x621   :  { %7793 = vst.msk [vmem:[#allocation2 + $0x80] sm:$0xff] %vm2605_vm14, %v7714_v56  ;;  %v16082_v30 = vpop.f32.mrb[0].mxu1  ;;  %v7866_v10 = vpop.permute.xlu0 %7865 }
 0x622   :  { %v16084_v26 = vpop.f32.mrb[1].mxu1  ;;  %7879 = vrot.lane.b32.xlu1 %v9584_v16, %s10119_s2  ;;  %7944 = vst.msk [vmem:[#allocation2 + $0x88] sm:$0xff] %vm18539_vm9, %v7866_v10  ;;  %v8543_v7 = vmul.f32 %v16082_v30, %v16082_v30  ;;  %v8404_v57 = vsel %vm330_vm6, %v16082_v30, 0.0  ;;  %vm18547_vm9 = vmmov %vm18546_vm3 }
 0x623   :  { %v8541_v42 = vmul.f32 %v16084_v26, %v16084_v26  ;;  %v16090_v35 = vpop.f32.mrb[2].mxu1  ;;  %6945 = vrot.lane.b32.xlu0 %v16074_v39, %s10113_s15  ;;  %v8401_v43 = vsel %vm330_vm6, %v16084_v26, 0.0 }
 0x624   :  { %v16094_v23 = vpop.f32.mrb[3].mxu1  ;;  %v7864_v32 = vpop.permute.xlu1 %7863  ;;  %v8544_v25 = vmul.f32 %v16090_v35, %v16090_v35  ;;  %v8608_v13 = vsel %vm330_vm6, %v8543_v7, 0.0  ;;  %v8406_v33 = vsel %vm330_vm6, %v16090_v35, 0.0 }
 0x625   :  { %v8402_v34 = vsel %vm330_vm6, %v16094_v23, 0.0  ;;  %v8542_v60 = vmul.f32 %v16094_v23, %v16094_v23  ;;  %7943 = vst.msk [vmem:[#allocation2 + $0x80] sm:$0xff] %vm18540_vm8, %v7864_v32  ;;  %v6930_v4 = vpop.permute.xlu0 %6929  ;;  %v8605_v44 = vsel %vm330_vm6, %v8541_v42, 0.0  ;;  %vm18548_vm8 = vmmov %vm18541_vm4 }
 0x626   :  { %v8403_v6 = vadd.f32 %v8402_v34, %v8401_v43  ;;  %6943 = vrot.lane.b32.xlu1 %v9584_v16, %s10113_s15  ;;  %7006 = vst.msk [vmem:[#allocation2 + $0x98] sm:$0xff] %vm18541_vm4, %v6930_v4  ;;  %v8610_v21 = vsel %vm330_vm6, %v8544_v25, 0.0 }
 0x627   :  { %v8606_v55 = vsel %vm330_vm6, %v8542_v60, 0.0  ;;  %7083 = vrot.lane.b32.xlu0 %v15364_v31, %s10114_s16 }
 0x628   :  { %v8405_v20 = vadd.f32 %v8404_v57, %v8403_v6  ;;  %v8607_v29 = vadd.f32 %v8606_v55, %v8605_v44  ;;  %v6928_v27 = vpop.permute.xlu1 %6927 }
 0x629   :  { %7005 = vst.msk [vmem:[#allocation2 + $0x90] sm:$0xff] %vm18542_vm15, %v6928_v27  ;;  %v7068_v61 = vpop.permute.xlu0 %7067  ;;  %v7976_v16 = vld [vmem:[#allocation2 + $0x88] sm:$0xff]  ;;  %vm18549_vm15 = vmmov %vm18543_vm0 }
 0x62a   :  { %v8609_v47 = vadd.f32 %v8608_v13, %v8607_v29  ;;  %7081 = vrot.lane.b32.xlu1 %v15368_v1, %s10114_s16  ;;  %7144 = vst.msk [vmem:[#allocation2 + $0x98] sm:$0xff] %vm1949_vm10, %v7068_v61  ;;  %v8407_v14 = vadd.f32 %v8406_v33, %v8405_v20  ;;  %v18550_v61 = vld [vmem:[#allocation84_spill] sm:$0xff] }
 0x62b   :  { %7265 = vrot.lane.b32.xlu0 %v15299_v58, %s10115_s17 }
 0x62c   :  { %v7066_v41 = vpop.permute.xlu1 %7065  ;;  %v7975_v12 = vld [vmem:[#allocation2 + $0x80] sm:$0xff]  ;;  %v8611_v59 = vadd.f32 %v8610_v21, %v8609_v47 }
 0x62d   :  { %7143 = vst.msk [vmem:[#allocation2 + $0x90] sm:$0xff] %vm1949_vm10, %v7066_v41  ;;  %9885 = vmatprep.mubr.msk.bf16.mxu1 %vm18543_vm0, %v7975_v12  ;;  %v7250_v1 = vpop.permute.xlu0 %7249  ;;  %v16221_v12 = vld [vmem:[#allocation3 + $0x19c] sm:$0xf] }
 0x62e   :  { %7263 = vrot.lane.b32.xlu1 %v15335_v28, %s10115_s17  ;;  %9886 = vmatmul.mubr.msk.bf16.gmra.mrb[32].mxu1 %vm18544_vm1, %v7976_v16  ;;  %7326 = vst.msk [vmem:[#allocation2 + $0x98] sm:$0xff] %vm2132_vm11, %v7250_v1  ;;  %v16218_v16 = vld [vmem:[#allocation3 + $0x198] sm:$0xf]  ;;  %vm18552_vm1 = vmmov %vm18546_vm3 }
 0x62f   :  { %7415 = vrot.lane.b32.xlu0 %v9586_v8, %s10116_s20 }
 0x630   :  { %v7248_v54 = vpop.permute.xlu1 %7247 }
 0x631   :  { %7325 = vst.msk [vmem:[#allocation2 + $0x90] sm:$0xff] %vm2132_vm11, %v7248_v54  ;;  %v7400_v5 = vpop.permute.xlu0 %7399  ;;  %v7195_v54 = vshrl.u32 %v16221_v12, 16 }
 0x632   :  { %7413 = vrot.lane.b32.xlu1 %v16074_v39, %s10116_s20  ;;  %7476 = vst.msk [vmem:[#allocation2 + $0x98] sm:$0xff] %vm2283_vm12, %v7400_v5  ;;  %v7191_v5 = vshll.u32 %v16221_v12, 16 }
 0x633   :  { %7553 = vrot.lane.b32.xlu0 %v15497_v18, %s10117_s23 }
 0x634   :  { %v7398_v50 = vpop.permute.xlu1 %7397 }
 0x635   :  { %7475 = vst.msk [vmem:[#allocation2 + $0x90] sm:$0xff] %vm2283_vm12, %v7398_v50  ;;  %v7538_v28 = vpop.permute.xlu0 %7537 }
 0x636   :  { %7551 = vrot.lane.b32.xlu1 %v15364_v31, %s10117_s23  ;;  %7614 = vst.msk [vmem:[#allocation2 + $0x98] sm:$0xff] %vm2422_vm13, %v7538_v28 }
 0x637   :  { %7735 = vrot.lane.b32.xlu0 %v15581_v63, %s10118_s26 }
 0x638   :  { %v7536_v38 = vpop.permute.xlu1 %7535 }
 0x639   :  { %7613 = vst.msk [vmem:[#allocation2 + $0x90] sm:$0xff] %vm2422_vm13, %v7536_v38  ;;  %v7720_v17 = vpop.permute.xlu0 %7719 }
 0x63a   :  { %7733 = vrot.lane.b32.xlu1 %v15299_v58, %s10118_s26  ;;  %7796 = vst.msk [vmem:[#allocation2 + $0x98] sm:$0xff] %vm2605_vm14, %v7720_v17 }
 0x63b   :  { %7885 = vrot.lane.b32.xlu0 %v18545_v22, %s10119_s2 }
 0x63c   :  { %v7718_v49 = vpop.permute.xlu1 %7717 }
 0x63d   :  { %7795 = vst.msk [vmem:[#allocation2 + $0x90] sm:$0xff] %vm2605_vm14, %v7718_v49  ;;  %v16155_v31 = vpop.f32.mrb[4].mxu1  ;;  %v7870_v52 = vpop.permute.xlu0 %7869 }
 0x63e   :  { %v16157_v15 = vpop.f32.mrb[5].mxu1  ;;  %7883 = vrot.lane.b32.xlu1 %v9586_v8, %s10119_s2  ;;  %7946 = vst.msk [vmem:[#allocation2 + $0x98] sm:$0xff] %vm18546_vm3, %v7870_v52  ;;  %v8547_v48 = vmul.f32 %v16155_v31, %v16155_v31  ;;  %v8412_v4 = vsel %vm330_vm6, %v16155_v31, 0.0  ;;  %vm18553_vm3 = vmmov %vm18552_vm1 }
 0x63f   :  { %v8408_v58 = vsel %vm330_vm6, %v16157_v15, 0.0  ;;  %v8545_v36 = vmul.f32 %v16157_v15, %v16157_v15  ;;  %v16165_v39 = vpop.f32.mrb[6].mxu1  ;;  %6947 = vrot.lane.b32.xlu0 %v9586_v8, %s10113_s15  ;;  %v7185_v8 = vshll.u32 %v16218_v16, 16 }
 0x640   :  { %v8409_v56 = vadd.f32 %v8408_v58, %v8407_v14  ;;  %v16168_v10 = vpop.f32.mrb[7].mxu1  ;;  %v7868_v24 = vpop.permute.xlu1 %7867  ;;  %v8548_v6 = vmul.f32 %v16165_v39, %v16165_v39  ;;  %v8616_v55 = vsel %vm330_vm6, %v8547_v48, 0.0  ;;  %v8414_v20 = vsel %vm330_vm6, %v16165_v39, 0.0 }
 0x641   :  { %v8612_v42 = vsel %vm330_vm6, %v8545_v36, 0.0  ;;  %v8410_v32 = vsel %vm330_vm6, %v16168_v10, 0.0  ;;  %v8546_v7 = vmul.f32 %v16168_v10, %v16168_v10  ;;  %7945 = vst.msk [vmem:[#allocation2 + $0x90] sm:$0xff] %vm18547_vm9, %v7868_v24  ;;  %v6934_v43 = vpop.permute.xlu0 %6933  ;;  %v7187_v24 = vrot.slane %v7185_v8, 5  ;;  %vm18554_vm9 = vmmov %vm18541_vm4 }
 0x642   :  { %v8613_v34 = vadd.f32 %v8612_v42, %v8611_v59  ;;  %v8411_v60 = vadd.f32 %v8410_v32, %v8409_v56  ;;  %6469 = vrot.lane.b32.xlu1 %v15581_v63, %s10112_s29  ;;  %7008 = vst.msk [vmem:[#allocation2 + $0xa8] sm:$0xff] %vm18548_vm8, %v6934_v43  ;;  %v7182_v59 = vshrl.u32 %v16218_v16, 16  ;;  %v16250_v48 = vrot.slane %v7191_v5, 5  ;;  %vm18555_vm8 = vmmov %vm18541_vm4 }
 0x643   :  { %v8614_v46 = vsel %vm330_vm6, %v8546_v7, 0.0  ;;  %7085 = vrot.lane.b32.xlu0 %v15497_v18, %s10114_s16  ;;  %v8618_v18 = vsel %vm330_vm6, %v8548_v6, 0.0  ;;  %v7197_v42 = vrot.slane %v7195_v54, 4 }
 0x644   :  { %v8413_v57 = vadd.f32 %v8412_v4, %v8411_v60  ;;  %v8615_v44 = vadd.f32 %v8614_v46, %v8613_v34  ;;  %v6932_v25 = vpop.permute.xlu1 %6931  ;;  %v7184_v52 = vrot.slane %v7182_v59, 4 }
 0x645   :  { %7007 = vst.msk [vmem:[#allocation2 + $0xa0] sm:$0xff] %vm18541_vm4, %v6932_v25  ;;  %v7072_v29 = vpop.permute.xlu0 %7071  ;;  %v7978_v3 = vld [vmem:[#allocation2 + $0x98] sm:$0xff]  ;;  %v16270_v25 = vld [vmem:[#allocation3 + $0x1a0] sm:$0x1]  ;;  %vm18556_vm4 = vmmov %vm18543_vm0 }
 0x646   :  { %v8617_v27 = vadd.f32 %v8616_v55, %v8615_v44  ;;  %6949 = vrot.lane.b32.xlu1 %v18545_v22, %s10113_s15  ;;  %7146 = vst.msk [vmem:[#allocation2 + $0xa8] sm:$0xff] %vm1949_vm10, %v7072_v29  ;;  %v8415_v0 = vadd.f32 %v8414_v20, %v8413_v57  ;;  %v16272_v55 = vld [vmem:[#allocation3 + $0x1a8] sm:$0xf] }
 0x647   :  { %7267 = vrot.lane.b32.xlu0 %v15581_v63, %s10115_s17 }
 0x648   :  { %v7070_v37 = vpop.permute.xlu1 %7069  ;;  %v7977_v62 = vld [vmem:[#allocation2 + $0x90] sm:$0xff]  ;;  %v8619_v13 = vadd.f32 %v8618_v18, %v8617_v27  ;;  %v16274_v27 = vld [vmem:[#allocation3 + $0x1a4] sm:$0xf] }
 0x649   :  { %7145 = vst.msk [vmem:[#allocation2 + $0xa0] sm:$0xff] %vm1949_vm10, %v7070_v37  ;;  %9889 = vmatprep.mubr.msk.bf16.mxu1 %vm18549_vm15, %v7977_v62  ;;  %v7254_v33 = vpop.permute.xlu0 %7253  ;;  %v7188_v37 = vor.u32 %v7187_v24, %v7184_v52  ;;  %vm18557_vm15 = vmmov %vm18543_vm0  ;;  %v9591_v24 = vcombine.low %v16218_v16, %v16221_v12 }
 0x64a   :  { %7087 = vrot.lane.b32.xlu1 %v18550_v61, %s10114_s16  ;;  %9890 = vmatmul.mubr.msk.bf16.gmra.mrb[36].mxu1 %vm18543_vm0, %v7978_v3  ;;  %7328 = vst.msk [vmem:[#allocation2 + $0xa8] sm:$0xff] %vm2132_vm11, %v7254_v33  ;;  %vm18558_vm0 = vmmov %vm18552_vm1 }
 0x64b   :  { %7417 = vrot.lane.b32.xlu0 %v18545_v22, %s10116_s20  ;;  %v7189_v54 = vrot.slane %v7188_v37, 4 }
 0x64c   :  { %v7252_v63 = vpop.permute.xlu1 %7251 }
 0x64d   :  { %7327 = vst.msk [vmem:[#allocation2 + $0xa0] sm:$0xff] %vm2132_vm11, %v7252_v63  ;;  %v7404_v47 = vpop.permute.xlu0 %7403 }
 0x64e   :  { %7269 = vrot.lane.b32.xlu1 %v15607_v40, %s10115_s17  ;;  %7478 = vst.msk [vmem:[#allocation2 + $0xa8] sm:$0xff] %vm2283_vm12, %v7404_v47 }
 0x64f   :  { %7555 = vrot.lane.b32.xlu0 %v18550_v61, %s10117_s23  ;;  %v7665_v61 = vshrl.u32 %v16272_v55, 16 }
 0x650   :  { %v7402_v9 = vpop.permute.xlu1 %7401 }
 0x651   :  { %7477 = vst.msk [vmem:[#allocation2 + $0xa0] sm:$0xff] %vm2283_vm12, %v7402_v9  ;;  %v7542_v14 = vpop.permute.xlu0 %7541  ;;  %v7652_v9 = vshrl.u32 %v16274_v27, 16 }
 0x652   :  { %7419 = vrot.lane.b32.xlu1 %v15604_v2, %s10116_s20  ;;  %7616 = vst.msk [vmem:[#allocation2 + $0xa8] sm:$0xff] %vm2422_vm13, %v7542_v14  ;;  %v7655_v14 = vshll.u32 %v16274_v27, 16 }
 0x653   :  { %7737 = vrot.lane.b32.xlu0 %v15607_v40, %s10118_s26 }
 0x654   :  { %v7540_v21 = vpop.permute.xlu1 %7539 }
 0x655   :  { %7615 = vst.msk [vmem:[#allocation2 + $0xa0] sm:$0xff] %vm2422_vm13, %v7540_v21  ;;  %v7724_v41 = vpop.permute.xlu0 %7723  ;;  %v7661_v21 = vshll.u32 %v16272_v55, 16 }
 0x656   :  { %7557 = vrot.lane.b32.xlu1 %v18551_v11, %s10117_s23  ;;  %7798 = vst.msk [vmem:[#allocation2 + $0xa8] sm:$0xff] %vm2605_vm14, %v7724_v41 }
 0x657   :  { %7887 = vrot.lane.b32.xlu0 %v15604_v2, %s10119_s2  ;;  %v7663_v52 = vrot.slane %v7661_v21, 5 }
 0x658   :  { %v7722_v1 = vpop.permute.xlu1 %7721 }
 0x659   :  { %7797 = vst.msk [vmem:[#allocation2 + $0xa0] sm:$0xff] %vm2605_vm14, %v7722_v1  ;;  %v16233_v50 = vpop.f32.mrb[8].mxu1  ;;  %v7874_v28 = vpop.permute.xlu0 %7873 }
 0x65a   :  { %v16235_v38 = vpop.f32.mrb[9].mxu1  ;;  %7739 = vrot.lane.b32.xlu1 %v15639_v19, %s10118_s26  ;;  %7948 = vst.msk [vmem:[#allocation2 + $0xa8] sm:$0xff] %vm18552_vm1, %v7874_v28  ;;  %v8551_v32 = vmul.f32 %v16233_v50, %v16233_v50  ;;  %v8420_v46 = vsel %vm330_vm6, %v16233_v50, 0.0 }
 0x65b   :  { %v8416_v17 = vsel %vm330_vm6, %v16235_v38, 0.0  ;;  %v8549_v22 = vmul.f32 %v16235_v38, %v16235_v38  ;;  %v16244_v49 = vpop.f32.mrb[10].mxu1  ;;  %7889 = vrot.lane.b32.xlu0 %v15637_v45, %s10119_s2 }
 0x65c   :  { %v8417_v58 = vadd.f32 %v8416_v17, %v8415_v0  ;;  %v16248_v36 = vpop.f32.mrb[11].mxu1  ;;  %v7872_v56 = vpop.permute.xlu1 %7871  ;;  %v8552_v57 = vmul.f32 %v16244_v49, %v16244_v49  ;;  %v8624_v0 = vsel %vm330_vm6, %v8551_v32, 0.0  ;;  %v8422_v18 = vsel %vm330_vm6, %v16244_v49, 0.0 }
 0x65d   :  { %v8620_v7 = vsel %vm330_vm6, %v8549_v22, 0.0  ;;  %v8418_v43 = vsel %vm330_vm6, %v16248_v36, 0.0  ;;  %v8550_v34 = vmul.f32 %v16248_v36, %v16248_v36  ;;  %7947 = vst.msk [vmem:[#allocation2 + $0xa0] sm:$0xff] %vm18553_vm3, %v7872_v56  ;;  %v6938_v60 = vpop.permute.xlu0 %6937  ;;  %v7654_v17 = vrot.slane %v7652_v9, 4  ;;  %vm18562_vm3 = vmmov %vm18556_vm4 }
 0x65e   :  { %v8621_v4 = vadd.f32 %v8620_v7, %v8619_v13  ;;  %v8419_v6 = vadd.f32 %v8418_v43, %v8417_v58  ;;  %6471 = vrot.lane.b32.xlu1 %v15607_v40, %s10112_s29  ;;  %7010 = vst.msk [vmem:[#allocation2 + $0xb8] sm:$0xff] %vm18554_vm9, %v6938_v60  ;;  %v7201_v13 = vshll.u32 %v16270_v25, 16  ;;  %v8626_v63 = vsel %vm330_vm6, %v8552_v57, 0.0  ;;  %vm18563_vm9 = vmmov %vm18562_vm3 }
 0x65f   :  { %v8622_v44 = vsel %vm330_vm6, %v8550_v34, 0.0  ;;  %6951 = vrot.lane.b32.xlu0 %v15604_v2, %s10113_s15  ;;  %v7198_v2 = vor.u32 %v7197_v42, %v16250_v48  ;;  %v7657_v22 = vrot.slane %v7655_v14, 5  ;;  %v7667_v58 = vrot.slane %v7665_v61, 4  ;;  %v5322_v42 = vld [vmem:[#allocation3 + $0x1ac] sm:$0x1] }
 0x660   :  { %v8421_v20 = vadd.f32 %v8420_v46, %v8419_v6  ;;  %v8623_v29 = vadd.f32 %v8622_v44, %v8621_v4  ;;  %v6936_v40 = vpop.permute.xlu1 %6935  ;;  %v7203_v28 = vrot.slane %v7201_v13, 5  ;;  %v7194_v7 = vsel %vm10192_vm2, %v7189_v54, %v16250_v48 }
 0x661   :  { %7009 = vst.msk [vmem:[#allocation2 + $0xb0] sm:$0xff] %vm18555_vm8, %v6936_v40  ;;  %v7076_v3 = vpop.permute.xlu0 %7075  ;;  %v7980_v47 = vld [vmem:[#allocation2 + $0xa8] sm:$0xff]  ;;  %v7199_v5 = vrot.slane %v7198_v2, 4  ;;  %v9595_v34 = vrot.slane %v16218_v16, 9  ;;  %v7658_v60 = vor.u32 %v7657_v22, %v7654_v17  ;;  %v7668_v4 = vor.u32 %v7667_v58, %v7663_v52 }
 0x662   :  { %v8625_v62 = vadd.f32 %v8624_v0, %v8623_v29  ;;  %6473 = vrot.lane.b32.xlu1 %v15639_v19, %s10112_s29  ;;  %7148 = vst.msk [vmem:[#allocation2 + $0xb8] sm:$0xff] %vm1949_vm10, %v7076_v3  ;;  %v16285_v33 = vadd.f32 %v8422_v18, %v8421_v20  ;;  %v7671_v6 = vshll.u32 %v5322_v42, 16  ;;  %v7820_v16 = vrot.slane %v16272_v55, 5 }
 0x663   :  { %7089 = vrot.lane.b32.xlu0 %v18551_v11, %s10114_s16  ;;  %v7350_v11 = vrot.slane %v16221_v12, 5  ;;  %v7204_v43 = vsel %vm10192_vm2, %v7199_v5, %v7203_v28  ;;  %v7353_v12 = vrot.slane %v16270_v25, 5  ;;  %v7659_v25 = vrot.slane %v7658_v60, 4 }
 0x664   :  { %v7074_v41 = vpop.permute.xlu1 %7073  ;;  %v7979_v59 = vld [vmem:[#allocation2 + $0xa0] sm:$0xff]  ;;  %v16294_v1 = vadd.f32 %v8626_v63, %v8625_v62  ;;  %v9593_v48 = vcombine.low %v7194_v7, %v7204_v43  ;;  %v7669_v20 = vrot.slane %v7668_v4, 4  ;;  %v7673_v29 = vrot.slane %v7671_v6, 5 }
 0x665   :  { %7147 = vst.msk [vmem:[#allocation2 + $0xb0] sm:$0xff] %vm1949_vm10, %v7074_v41  ;;  %9893 = vmatprep.mubr.msk.bf16.mxu1 %vm18556_vm4, %v7979_v59  ;;  %v7258_v8 = vpop.permute.xlu0 %7257  ;;  %v9599_v3 = vcombine.low %v16274_v27, %v16272_v55  ;;  %v7822_v37 = vrot.slane %v7820_v16, 4  ;;  %v7664_v2 = vsel %vm10192_vm2, %v7659_v25, %v7663_v52  ;;  %v9603_v13 = vrot.slane %v16274_v27, 9  ;;  %vm18565_vm4 = vmmov %vm18558_vm0 }
 0x666   :  { %6953 = vrot.lane.b32.xlu1 %v15637_v45, %s10113_s15  ;;  %9894 = vmatmul.mubr.msk.bf16.gmra.mrb[40].mxu1 %vm18557_vm15, %v7980_v47  ;;  %7330 = vst.msk [vmem:[#allocation2 + $0xb8] sm:$0xff] %vm2132_vm11, %v7258_v8  ;;  %v7674_v62 = vsel %vm10192_vm2, %v7669_v20, %v7673_v29  ;;  %v7823_v61 = vrot.slane %v5322_v42, 5  ;;  %vm18559_vm2 = vmmov %vm18558_vm0 }
 0x667   :  { %7271 = vrot.lane.b32.xlu0 %v15639_v19, %s10115_s17  ;;  %v7352_v19 = vrot.slane %v7350_v11, 4  ;;  %v9601_v55 = vcombine.low %v7664_v2, %v7674_v62  ;;  %v7821_v41 = vsel %vm10900_vm5, %v9603_v13, %v7820_v16 }
 0x668   :  { %v7256_v56 = vpop.permute.xlu1 %7255  ;;  %v7824_v59 = vsel %vm10900_vm5, %v7822_v37, %v7823_v61 }
 0x669   :  { %7329 = vst.msk [vmem:[#allocation2 + $0xb0] sm:$0xff] %vm2132_vm11, %v7256_v56  ;;  %v7408_v32 = vpop.permute.xlu0 %7407  ;;  %v7354_v44 = vsel %vm10900_vm5, %v7352_v19, %v7353_v12  ;;  %v9605_v58 = vcombine.low %v7821_v41, %v7824_v59 }
 0x66a   :  { %7091 = vrot.lane.b32.xlu1 %v9591_v24, %s10114_s16  ;;  %7480 = vst.msk [vmem:[#allocation2 + $0xb8] sm:$0xff] %vm2283_vm12, %v7408_v32 }
 0x66b   :  { %7421 = vrot.lane.b32.xlu0 %v15637_v45, %s10116_s20  ;;  %v7351_v45 = vsel %vm10900_vm5, %v9595_v34, %v7350_v11  ;;  %vm18560_vm5 = vmmov %vm18555_vm8 }
 0x66c   :  { %v7406_v46 = vpop.permute.xlu1 %7405  ;;  %v9597_v0 = vcombine.low %v7351_v45, %v7354_v44  ;;  %vm18561_vm1 = vmmov %vm18560_vm5 }
 0x66d   :  { %7479 = vst.msk [vmem:[#allocation2 + $0xb0] sm:$0xff] %vm2283_vm12, %v7406_v46  ;;  %v7546_v57 = vpop.permute.xlu0 %7545  ;;  %vm18564_vm8 = vmmov %vm18558_vm0 }
 0x66e   :  { %7273 = vrot.lane.b32.xlu1 %v9593_v48, %s10115_s17  ;;  %7618 = vst.msk [vmem:[#allocation2 + $0xb8] sm:$0xff] %vm2422_vm13, %v7546_v57  ;;  %vm18566_vm15 = vmmov %vm18561_vm1 }
 0x66f   :  { %7559 = vrot.lane.b32.xlu0 %v9591_v24, %s10117_s23 }
 0x670   :  { %v7544_v40 = vpop.permute.xlu1 %7543 }
 0x671   :  { %7617 = vst.msk [vmem:[#allocation2 + $0xb0] sm:$0xff] %vm2422_vm13, %v7544_v40  ;;  %v7728_v18 = vpop.permute.xlu0 %7727 }
 0x672   :  { %7423 = vrot.lane.b32.xlu1 %v9597_v0, %s10116_s20  ;;  %7800 = vst.msk [vmem:[#allocation2 + $0xb8] sm:$0xff] %vm2605_vm14, %v7728_v18 }
 0x673   :  { %7741 = vrot.lane.b32.xlu0 %v9593_v48, %s10118_s26 }
 0x674   :  { %v7726_v63 = vpop.permute.xlu1 %7725 }
 0x675   :  { %7799 = vst.msk [vmem:[#allocation2 + $0xb0] sm:$0xff] %vm2605_vm14, %v7726_v63  ;;  %v16340_v47 = vpop.f32.mrb[12].mxu1  ;;  %v7878_v9 = vpop.permute.xlu0 %7877 }
 0x676   :  { %v16342_v14 = vpop.f32.mrb[13].mxu1  ;;  %7561 = vrot.lane.b32.xlu1 %v9599_v3, %s10117_s23  ;;  %7950 = vst.msk [vmem:[#allocation2 + $0xb8] sm:$0xff] %vm18558_vm0, %v7878_v9  ;;  %v8555_v11 = vmul.f32 %v16340_v47, %v16340_v47  ;;  %v8428_v56 = vsel %vm330_vm6, %v16340_v47, 0.0  ;;  %vm18567_vm0 = vmmov %vm18561_vm1 }
 0x677   :  { %v8424_v51 = vsel %vm330_vm6, %v16342_v14, 0.0  ;;  %v8553_v27 = vmul.f32 %v16342_v14, %v16342_v14  ;;  %v16350_v21 = vpop.f32.mrb[14].mxu1  ;;  %7891 = vrot.lane.b32.xlu0 %v9597_v0, %s10119_s2 }
 0x678   :  { %v8425_v8 = vadd.f32 %v8424_v51, %v16285_v33  ;;  %v16358_v54 = vpop.f32.mrb[15].mxu1  ;;  %v7876_v5 = vpop.permute.xlu1 %7875  ;;  %v8556_v24 = vmul.f32 %v16350_v21, %v16350_v21  ;;  %v8632_v19 = vsel %vm330_vm6, %v8555_v11, 0.0 }
 0x679   :  { %v8628_v28 = vsel %vm330_vm6, %v8553_v27, 0.0  ;;  %v8426_v17 = vsel %vm330_vm6, %v16358_v54, 0.0  ;;  %v8554_v22 = vmul.f32 %v16358_v54, %v16358_v54  ;;  %7949 = vst.msk [vmem:[#allocation2 + $0xb0] sm:$0xff] %vm18559_vm2, %v7876_v5  ;;  %v6942_v53 = vpop.permute.xlu0 %6941  ;;  %vm18568_vm2 = vmmov %vm18562_vm3 }
 0x67a   :  { %v8629_v52 = vadd.f32 %v8628_v28, %v16294_v1  ;;  %v8427_v33 = vadd.f32 %v8426_v17, %v8425_v8  ;;  %7743 = vrot.lane.b32.xlu1 %v9601_v55, %s10118_s26  ;;  %7012 = vst.msk [vmem:[#allocation2 + $0xc8] sm:$0xff] %vm18560_vm5, %v6942_v53  ;;  %v8430_v1 = vsel %vm330_vm6, %v16350_v21, 0.0  ;;  %v8634_v4 = vsel %vm330_vm6, %v8556_v24, 0.0  ;;  %vm18569_vm5 = vmmov %vm18568_vm2 }
 0x67b   :  { %v8630_v42 = vsel %vm330_vm6, %v8554_v22, 0.0 }
 0x67c   :  { %v8429_v32 = vadd.f32 %v8428_v56, %v8427_v33  ;;  %v8631_v7 = vadd.f32 %v8630_v42, %v8629_v52  ;;  %v6940_v43 = vpop.permute.xlu1 %6939 }
 0x67d   :  { %7011 = vst.msk [vmem:[#allocation2 + $0xc0] sm:$0xff] %vm18561_vm1, %v6940_v43  ;;  %v7080_v34 = vpop.permute.xlu0 %7079  ;;  %v7982_v6 = vld [vmem:[#allocation2 + $0xb8] sm:$0xff]  ;;  %vm18570_vm1 = vmmov %vm18565_vm4 }
 0x67e   :  { %v8633_v12 = vadd.f32 %v8632_v19, %v8631_v7  ;;  %7893 = vrot.lane.b32.xlu1 %v9605_v58, %s10119_s2  ;;  %7150 = vst.msk [vmem:[#allocation2 + $0xc8] sm:$0xff] %vm1949_vm10, %v7080_v34  ;;  %v8431_v60 = vadd.f32 %v8430_v1, %v8429_v32 }
 0x680   :  { %v7078_v46 = vpop.permute.xlu1 %7077  ;;  %v7981_v48 = vld [vmem:[#allocation2 + $0xb0] sm:$0xff]  ;;  %v8635_v57 = vadd.f32 %v8634_v4, %v8633_v12 }
 0x681   :  { %7149 = vst.msk [vmem:[#allocation2 + $0xc0] sm:$0xff] %vm1949_vm10, %v7078_v46  ;;  %9897 = vmatprep.mubr.msk.bf16.mxu1 %vm18562_vm3, %v7981_v48  ;;  %v7262_v44 = vpop.permute.xlu0 %7261  ;;  %vm18571_vm3 = vmmov %vm18570_vm1 }
 0x682   :  { %9898 = vmatmul.mubr.msk.bf16.gmra.mrb[44].mxu1 %vm18563_vm9, %v7982_v6  ;;  %7332 = vst.msk [vmem:[#allocation2 + $0xc8] sm:$0xff] %vm2132_vm11, %v7262_v44  ;;  %vm18572_vm9 = vmmov %vm18567_vm0 }
 0x684   :  { %v7260_v16 = vpop.permute.xlu1 %7259 }
 0x685   :  { %7331 = vst.msk [vmem:[#allocation2 + $0xc0] sm:$0xff] %vm2132_vm11, %v7260_v16  ;;  %v7412_v45 = vpop.permute.xlu0 %7411 }
 0x686   :  { %7482 = vst.msk [vmem:[#allocation2 + $0xc8] sm:$0xff] %vm2283_vm12, %v7412_v45 }
 0x688   :  { %v7410_v25 = vpop.permute.xlu1 %7409 }
 0x689   :  { %7481 = vst.msk [vmem:[#allocation2 + $0xc0] sm:$0xff] %vm2283_vm12, %v7410_v25  ;;  %v7550_v20 = vpop.permute.xlu0 %7549 }
 0x68a   :  { %7620 = vst.msk [vmem:[#allocation2 + $0xc8] sm:$0xff] %vm2422_vm13, %v7550_v20 }
 0x68c   :  { %v7548_v29 = vpop.permute.xlu1 %7547 }
 0x68d   :  { %7619 = vst.msk [vmem:[#allocation2 + $0xc0] sm:$0xff] %vm2422_vm13, %v7548_v29  ;;  %v7732_v40 = vpop.permute.xlu0 %7731 }
 0x68e   :  { %7802 = vst.msk [vmem:[#allocation2 + $0xc8] sm:$0xff] %vm2605_vm14, %v7732_v40 }
 0x690   :  { %v7730_v0 = vpop.permute.xlu1 %7729 }
 0x691   :  { %7801 = vst.msk [vmem:[#allocation2 + $0xc0] sm:$0xff] %vm2605_vm14, %v7730_v0  ;;  %v16394_v18 = vpop.f32.mrb[16].mxu1  ;;  %v7882_v3 = vpop.permute.xlu0 %7881 }
 0x692   :  { %v16396_v37 = vpop.f32.mrb[17].mxu1  ;;  %7952 = vst.msk [vmem:[#allocation2 + $0xc8] sm:$0xff] %vm18564_vm8, %v7882_v3  ;;  %v8559_v55 = vmul.f32 %v16394_v18, %v16394_v18  ;;  %v8436_v11 = vsel %vm330_vm6, %v16394_v18, 0.0  ;;  %vm18573_vm8 = vmmov %vm18567_vm0 }
 0x693   :  { %v8432_v2 = vsel %vm330_vm6, %v16396_v37, 0.0  ;;  %v8557_v62 = vmul.f32 %v16396_v37, %v16396_v37  ;;  %v16403_v13 = vpop.f32.mrb[18].mxu1 }
 0x694   :  { %v8433_v61 = vadd.f32 %v8432_v2, %v8431_v60  ;;  %v16405_v63 = vpop.f32.mrb[19].mxu1  ;;  %v7880_v9 = vpop.permute.xlu1 %7879  ;;  %v8560_v28 = vmul.f32 %v16403_v13, %v16403_v13  ;;  %v8640_v33 = vsel %vm330_vm6, %v8559_v55, 0.0  ;;  %v8438_v58 = vsel %vm330_vm6, %v16403_v13, 0.0 }
 0x695   :  { %v8636_v51 = vsel %vm330_vm6, %v8557_v62, 0.0  ;;  %v8434_v27 = vsel %vm330_vm6, %v16405_v63, 0.0  ;;  %v8558_v41 = vmul.f32 %v16405_v63, %v16405_v63  ;;  %7951 = vst.msk [vmem:[#allocation2 + $0xc0] sm:$0xff] %vm18565_vm4, %v7880_v9  ;;  %v6946_v59 = vpop.permute.xlu0 %6945  ;;  %vm18574_vm4 = vmmov %vm18568_vm2 }
 0x696   :  { %v8637_v8 = vadd.f32 %v8636_v51, %v8635_v57  ;;  %v8435_v5 = vadd.f32 %v8434_v27, %v8433_v61  ;;  %7014 = vst.msk [vmem:[#allocation2 + $0xd8] sm:$0xff] %vm18566_vm15, %v6946_v59  ;;  %v8642_v32 = vsel %vm330_vm6, %v8560_v28, 0.0  ;;  %vm18575_vm15 = vmmov %vm18568_vm2 }
 0x697   :  { %v8638_v17 = vsel %vm330_vm6, %v8558_v41, 0.0 }
 0x698   :  { %v8437_v22 = vadd.f32 %v8436_v11, %v8435_v5  ;;  %v8639_v53 = vadd.f32 %v8638_v17, %v8637_v8  ;;  %v6944_v52 = vpop.permute.xlu1 %6943 }
 0x699   :  { %7013 = vst.msk [vmem:[#allocation2 + $0xd0] sm:$0xff] %vm18567_vm0, %v6944_v52  ;;  %v7084_v56 = vpop.permute.xlu0 %7083  ;;  %v7984_v7 = vld [vmem:[#allocation2 + $0xc8] sm:$0xff]  ;;  %vm18576_vm0 = vmmov %vm18570_vm1 }
 0x69a   :  { %v8641_v24 = vadd.f32 %v8640_v33, %v8639_v53  ;;  %7152 = vst.msk [vmem:[#allocation2 + $0xd8] sm:$0xff] %vm1949_vm10, %v7084_v56  ;;  %v8439_v42 = vadd.f32 %v8438_v58, %v8437_v22 }
 0x69c   :  { %v7082_v43 = vpop.permute.xlu1 %7081  ;;  %v7983_v19 = vld [vmem:[#allocation2 + $0xc0] sm:$0xff]  ;;  %v8643_v1 = vadd.f32 %v8642_v32, %v8641_v24 }
 0x69d   :  { %7151 = vst.msk [vmem:[#allocation2 + $0xd0] sm:$0xff] %vm1949_vm10, %v7082_v43  ;;  %9901 = vmatprep.mubr.msk.bf16.mxu1 %vm18568_vm2, %v7983_v19  ;;  %v7266_v34 = vpop.permute.xlu0 %7265  ;;  %vm18577_vm2 = vmmov %vm18576_vm0 }
 0x69e   :  { %9902 = vmatmul.mubr.msk.bf16.gmra.mrb[48].mxu1 %vm18569_vm5, %v7984_v7  ;;  %7334 = vst.msk [vmem:[#allocation2 + $0xd8] sm:$0xff] %vm2132_vm11, %v7266_v34  ;;  %vm18578_vm5 = vmmov %vm18573_vm8 }
 0x6a0   :  { %v7264_v12 = vpop.permute.xlu1 %7263 }
 0x6a1   :  { %7333 = vst.msk [vmem:[#allocation2 + $0xd0] sm:$0xff] %vm2132_vm11, %v7264_v12  ;;  %v7416_v60 = vpop.permute.xlu0 %7415 }
 0x6a2   :  { %7484 = vst.msk [vmem:[#allocation2 + $0xd8] sm:$0xff] %vm2283_vm12, %v7416_v60 }
 0x6a4   :  { %v7414_v4 = vpop.permute.xlu1 %7413 }
 0x6a5   :  { %7483 = vst.msk [vmem:[#allocation2 + $0xd0] sm:$0xff] %vm2283_vm12, %v7414_v4  ;;  %v7554_v6 = vpop.permute.xlu0 %7553 }
 0x6a6   :  { %7622 = vst.msk [vmem:[#allocation2 + $0xd8] sm:$0xff] %vm2422_vm13, %v7554_v6 }
 0x6a8   :  { %v7552_v46 = vpop.permute.xlu1 %7551 }
 0x6a9   :  { %7621 = vst.msk [vmem:[#allocation2 + $0xd0] sm:$0xff] %vm2422_vm13, %v7552_v46  ;;  %v7736_v48 = vpop.permute.xlu0 %7735 }
 0x6aa   :  { %7804 = vst.msk [vmem:[#allocation2 + $0xd8] sm:$0xff] %vm2605_vm14, %v7736_v48 }
 0x6ac   :  { %v7734_v57 = vpop.permute.xlu1 %7733 }
 0x6ad   :  { %7803 = vst.msk [vmem:[#allocation2 + $0xd0] sm:$0xff] %vm2605_vm14, %v7734_v57  ;;  %v16438_v44 = vpop.f32.mrb[20].mxu1  ;;  %v7886_v16 = vpop.permute.xlu0 %7885 }
 0x6ae   :  { %v16440_v45 = vpop.f32.mrb[21].mxu1  ;;  %7954 = vst.msk [vmem:[#allocation2 + $0xd8] sm:$0xff] %vm18570_vm1, %v7886_v16  ;;  %v8563_v2 = vmul.f32 %v16438_v44, %v16438_v44  ;;  %v8444_v41 = vsel %vm330_vm6, %v16438_v44, 0.0  ;;  %vm18579_vm1 = vmmov %vm18574_vm4 }
 0x6af   :  { %v8440_v25 = vsel %vm330_vm6, %v16440_v45, 0.0  ;;  %v8561_v20 = vmul.f32 %v16440_v45, %v16440_v45  ;;  %v16447_v29 = vpop.f32.mrb[22].mxu1 }
 0x6b0   :  { %v8441_v40 = vadd.f32 %v8440_v25, %v8439_v42  ;;  %v16449_v0 = vpop.f32.mrb[23].mxu1  ;;  %v7884_v3 = vpop.permute.xlu1 %7883  ;;  %v8564_v59 = vmul.f32 %v16447_v29, %v16447_v29  ;;  %v8648_v17 = vsel %vm330_vm6, %v8563_v2, 0.0  ;;  %v8446_v22 = vsel %vm330_vm6, %v16447_v29, 0.0 }
 0x6b1   :  { %v8644_v62 = vsel %vm330_vm6, %v8561_v20, 0.0  ;;  %v8442_v61 = vsel %vm330_vm6, %v16449_v0, 0.0  ;;  %v8562_v9 = vmul.f32 %v16449_v0, %v16449_v0  ;;  %7953 = vst.msk [vmem:[#allocation2 + $0xd0] sm:$0xff] %vm18571_vm3, %v7884_v3  ;;  %v6948_v55 = vpop.permute.xlu0 %6947  ;;  %vm18580_vm3 = vmmov %vm18579_vm1 }
 0x6b2   :  { %v8645_v51 = vadd.f32 %v8644_v62, %v8643_v1  ;;  %v8443_v27 = vadd.f32 %v8442_v61, %v8441_v40  ;;  %7015 = vst.msk [vmem:[#allocation2 + $0xe0] sm:$0xff] %vm18572_vm9, %v6948_v55  ;;  %v8650_v58 = vsel %vm330_vm6, %v8564_v59, 0.0  ;;  %vm18581_vm9 = vmmov %vm18578_vm5 }
 0x6b3   :  { %v8646_v8 = vsel %vm330_vm6, %v8562_v9, 0.0 }
 0x6b4   :  { %v8445_v5 = vadd.f32 %v8444_v41, %v8443_v27  ;;  %v8647_v11 = vadd.f32 %v8646_v8, %v8645_v51  ;;  %v6470_v28 = vpop.permute.xlu1 %6469 }
 0x6b5   :  { %6536 = vst.msk [vmem:[#allocation2 + $0xe8] sm:$0xff] %vm1326_vm7, %v6470_v28  ;;  %v7086_v53 = vpop.permute.xlu0 %7085  ;;  %v7986_v56 = vld [vmem:[#allocation2 + $0xd8] sm:$0xff] }
 0x6b6   :  { %v8649_v52 = vadd.f32 %v8648_v17, %v8647_v11  ;;  %7153 = vst.msk [vmem:[#allocation2 + $0xe0] sm:$0xff] %vm1949_vm10, %v7086_v53  ;;  %v8447_v33 = vadd.f32 %v8446_v22, %v8445_v5 }
 0x6b8   :  { %v6950_v24 = vpop.permute.xlu1 %6949  ;;  %v7985_v42 = vld [vmem:[#allocation2 + $0xd0] sm:$0xff]  ;;  %v8651_v32 = vadd.f32 %v8650_v58, %v8649_v52 }
 0x6b9   :  { %7016 = vst.msk [vmem:[#allocation2 + $0xe8] sm:$0xff] %vm18573_vm8, %v6950_v24  ;;  %9905 = vmatprep.mubr.msk.bf16.mxu1 %vm18574_vm4, %v7985_v42  ;;  %v7268_v7 = vpop.permute.xlu0 %7267 }
 0x6ba   :  { %9906 = vmatmul.mubr.msk.bf16.gmra.mrb[52].mxu1 %vm18575_vm15, %v7986_v56  ;;  %7335 = vst.msk [vmem:[#allocation2 + $0xe0] sm:$0xff] %vm2132_vm11, %v7268_v7 }
 0x6bc   :  { %v7088_v43 = vpop.permute.xlu1 %7087 }
 0x6bd   :  { %7154 = vst.msk [vmem:[#allocation2 + $0xe8] sm:$0xff] %vm1949_vm10, %v7088_v43  ;;  %v7418_v19 = vpop.permute.xlu0 %7417 }
 0x6be   :  { %7485 = vst.msk [vmem:[#allocation2 + $0xe0] sm:$0xff] %vm2283_vm12, %v7418_v19 }
 0x6c0   :  { %v7270_v1 = vpop.permute.xlu1 %7269 }
 0x6c1   :  { %7336 = vst.msk [vmem:[#allocation2 + $0xe8] sm:$0xff] %vm2132_vm11, %v7270_v1  ;;  %v7556_v34 = vpop.permute.xlu0 %7555 }
 0x6c2   :  { %7623 = vst.msk [vmem:[#allocation2 + $0xe0] sm:$0xff] %vm2422_vm13, %v7556_v34 }
 0x6c4   :  { %v7420_v12 = vpop.permute.xlu1 %7419 }
 0x6c5   :  { %7486 = vst.msk [vmem:[#allocation2 + $0xe8] sm:$0xff] %vm2283_vm12, %v7420_v12  ;;  %v7738_v60 = vpop.permute.xlu0 %7737 }
 0x6c6   :  { %7805 = vst.msk [vmem:[#allocation2 + $0xe0] sm:$0xff] %vm2605_vm14, %v7738_v60 }
 0x6c8   :  { %v7558_v4 = vpop.permute.xlu1 %7557 }
 0x6c9   :  { %7624 = vst.msk [vmem:[#allocation2 + $0xe8] sm:$0xff] %vm2422_vm13, %v7558_v4  ;;  %v16482_v6 = vpop.f32.mrb[24].mxu1  ;;  %v7888_v46 = vpop.permute.xlu0 %7887 }
 0x6ca   :  { %v16484_v48 = vpop.f32.mrb[25].mxu1  ;;  %7955 = vst.msk [vmem:[#allocation2 + $0xe0] sm:$0xff] %vm18576_vm0, %v7888_v46  ;;  %v8567_v2 = vmul.f32 %v16482_v6, %v16482_v6  ;;  %v8452_v41 = vsel %vm330_vm6, %v16482_v6, 0.0 }
 0x6cb   :  { %v8448_v57 = vsel %vm330_vm6, %v16484_v48, 0.0  ;;  %v8565_v16 = vmul.f32 %v16484_v48, %v16484_v48  ;;  %v16491_v25 = vpop.f32.mrb[26].mxu1 }
 0x6cc   :  { %v8449_v20 = vadd.f32 %v8448_v57, %v8447_v33  ;;  %v16493_v40 = vpop.f32.mrb[27].mxu1  ;;  %v7740_v3 = vpop.permute.xlu1 %7739  ;;  %v8568_v59 = vmul.f32 %v16491_v25, %v16491_v25  ;;  %v8656_v17 = vsel %vm330_vm6, %v8567_v2, 0.0  ;;  %v8454_v22 = vsel %vm330_vm6, %v16491_v25, 0.0 }
 0x6cd   :  { %v8652_v62 = vsel %vm330_vm6, %v8565_v16, 0.0  ;;  %v8450_v61 = vsel %vm330_vm6, %v16493_v40, 0.0  ;;  %v8566_v9 = vmul.f32 %v16493_v40, %v16493_v40  ;;  %7806 = vst.msk [vmem:[#allocation2 + $0xe8] sm:$0xff] %vm2605_vm14, %v7740_v3  ;;  %v7890_v55 = vpop.permute.xlu0 %7889 }
 0x6ce   :  { %v8653_v51 = vadd.f32 %v8652_v62, %v8651_v32  ;;  %v8451_v27 = vadd.f32 %v8450_v61, %v8449_v20  ;;  %7956 = vst.msk [vmem:[#allocation2 + $0xe8] sm:$0xff] %vm18577_vm2, %v7890_v55  ;;  %v8658_v56 = vsel %vm330_vm6, %v8568_v59, 0.0 }
 0x6cf   :  { %v8654_v8 = vsel %vm330_vm6, %v8566_v9, 0.0 }
 0x6d0   :  { %v8453_v5 = vadd.f32 %v8452_v41, %v8451_v27  ;;  %v8655_v11 = vadd.f32 %v8654_v8, %v8653_v51  ;;  %v6472_v28 = vpop.permute.xlu1 %6471 }
 0x6d1   :  { %6537 = vst.msk [vmem:[#allocation2 + $0xf0] sm:$0xff] %vm1326_vm7, %v6472_v28  ;;  %v6952_v53 = vpop.permute.xlu0 %6951  ;;  %v7987_v52 = vld [vmem:[#allocation2 + $0xe0] sm:$0xff] }
 0x6d2   :  { %v8657_v33 = vadd.f32 %v8656_v17, %v8655_v11  ;;  %7017 = vst.msk [vmem:[#allocation2 + $0xf0] sm:$0xff] %vm18578_vm5, %v6952_v53  ;;  %9909 = vmatprep.mubr.msk.bf16.mxu1 %vm18579_vm1, %v7987_v52  ;;  %v8455_v58 = vadd.f32 %v8454_v22, %v8453_v5 }
 0x6d4   :  { %v6474_v24 = vpop.permute.xlu1 %6473  ;;  %v8659_v42 = vadd.f32 %v8658_v56, %v8657_v33 }
 0x6d5   :  { %6538 = vst.msk [vmem:[#allocation2 + $0xf8] sm:$0xff] %vm1326_vm7, %v6474_v24  ;;  %v7090_v32 = vpop.permute.xlu0 %7089  ;;  %v7988_v7 = vld [vmem:[#allocation2 + $0xe8] sm:$0xff]  ;;  %vm18582_vm7 = vmmov %vm18576_vm0 }
 0x6d6   :  { %7155 = vst.msk [vmem:[#allocation2 + $0xf0] sm:$0xff] %vm1949_vm10, %v7090_v32  ;;  %9910 = vmatmul.mubr.msk.bf16.gmra.mrb[56].mxu1 %vm18580_vm3, %v7988_v7 }
 0x6d8   :  { %v6954_v43 = vpop.permute.xlu1 %6953 }
 0x6d9   :  { %7018 = vst.msk [vmem:[#allocation2 + $0xf8] sm:$0xff] %vm18581_vm9, %v6954_v43  ;;  %v7272_v19 = vpop.permute.xlu0 %7271 }
 0x6da   :  { %7337 = vst.msk [vmem:[#allocation2 + $0xf0] sm:$0xff] %vm2132_vm11, %v7272_v19 }
 0x6dc   :  { %v7092_v1 = vpop.permute.xlu1 %7091 }
 0x6dd   :  { %7156 = vst.msk [vmem:[#allocation2 + $0xf8] sm:$0xff] %vm1949_vm10, %v7092_v1  ;;  %v7422_v34 = vpop.permute.xlu0 %7421  ;;  %vm18583_vm10 = vmmov %vm18576_vm0 }
 0x6de   :  { %7487 = vst.msk [vmem:[#allocation2 + $0xf0] sm:$0xff] %vm2283_vm12, %v7422_v34 }
 0x6e0   :  { %v7274_v12 = vpop.permute.xlu1 %7273 }
 0x6e1   :  { %7338 = vst.msk [vmem:[#allocation2 + $0xf8] sm:$0xff] %vm2132_vm11, %v7274_v12  ;;  %v7560_v60 = vpop.permute.xlu0 %7559  ;;  %vm18584_vm11 = vmmov %vm18579_vm1 }
 0x6e2   :  { %7625 = vst.msk [vmem:[#allocation2 + $0xf0] sm:$0xff] %vm2422_vm13, %v7560_v60 }
 0x6e4   :  { %v7424_v4 = vpop.permute.xlu1 %7423 }
 0x6e5   :  { %7488 = vst.msk [vmem:[#allocation2 + $0xf8] sm:$0xff] %vm2283_vm12, %v7424_v4  ;;  %v16526_v46 = vpop.f32.mrb[28].mxu1  ;;  %v7742_v57 = vpop.permute.xlu0 %7741  ;;  %vm18585_vm12 = vmmov %vm18579_vm1 }
 0x6e6   :  { %v16528_v16 = vpop.f32.mrb[29].mxu1  ;;  %7807 = vst.msk [vmem:[#allocation2 + $0xf0] sm:$0xff] %vm2605_vm14, %v7742_v57  ;;  %v8571_v55 = vmul.f32 %v16526_v46, %v16526_v46  ;;  %v8460_v11 = vsel %vm330_vm6, %v16526_v46, 0.0 }
 0x6e7   :  { %v8456_v20 = vsel %vm330_vm6, %v16528_v16, 0.0  ;;  %v8569_v3 = vmul.f32 %v16528_v16, %v16528_v16  ;;  %v16535_v2 = vpop.f32.mrb[30].mxu1 }
 0x6e8   :  { %v8457_v62 = vadd.f32 %v8456_v20, %v8455_v58  ;;  %v16537_v61 = vpop.f32.mrb[31].mxu1  ;;  %v7562_v9 = vpop.permute.xlu1 %7561  ;;  %v8572_v28 = vmul.f32 %v16535_v2, %v16535_v2  ;;  %v8664_v33 = vsel %vm330_vm6, %v8571_v55, 0.0  ;;  %v8462_v58 = vsel %vm330_vm6, %v16535_v2, 0.0 }
 0x6e9   :  { %v8660_v51 = vsel %vm330_vm6, %v8569_v3, 0.0  ;;  %v8458_v27 = vsel %vm330_vm6, %v16537_v61, 0.0  ;;  %v8570_v41 = vmul.f32 %v16537_v61, %v16537_v61  ;;  %7626 = vst.msk [vmem:[#allocation2 + $0xf8] sm:$0xff] %vm2422_vm13, %v7562_v9  ;;  %v7892_v59 = vpop.permute.xlu0 %7891 }
 0x6ea   :  { %v8661_v8 = vadd.f32 %v8660_v51, %v8659_v42  ;;  %v8459_v5 = vadd.f32 %v8458_v27, %v8457_v62  ;;  %7957 = vst.msk [vmem:[#allocation2 + $0xf0] sm:$0xff] %vm18582_vm7, %v7892_v59  ;;  %v8666_v42 = vsel %vm330_vm6, %v8572_v28, 0.0 }
 0x6eb   :  { %v8662_v17 = vsel %vm330_vm6, %v8570_v41, 0.0 }
 0x6ec   :  { %v8461_v22 = vadd.f32 %v8460_v11, %v8459_v5  ;;  %v8663_v53 = vadd.f32 %v8662_v17, %v8661_v8  ;;  %v7744_v52 = vpop.permute.xlu1 %7743 }
 0x6ed   :  { %7808 = vst.msk [vmem:[#allocation2 + $0xf8] sm:$0xff] %vm2605_vm14, %v7744_v52 }
 0x6ee   :  { %v8463_v56 = vadd.f32 %v8462_v58, %v8461_v22  ;;  %v8665_v24 = vadd.f32 %v8664_v33, %v8663_v53 }
 0x6f0   :  { %v8464_v32 = vrot.slane %v8463_v56, 4  ;;  %v8667_v7 = vadd.f32 %v8666_v42, %v8665_v24  ;;  %v7894_v43 = vpop.permute.xlu1 %7893 }
 0x6f1   :  { %7958 = vst.msk [vmem:[#allocation2 + $0xf8] sm:$0xff] %vm18583_vm10, %v7894_v43  ;;  %v7989_v19 = vld [vmem:[#allocation2 + $0xf0] sm:$0xff] }
 0x6f2   :  { %v8465_v1 = vadd.f32 %v8464_v32, %v8463_v56  ;;  %v8668_v34 = vrot.slane %v8667_v7, 4  ;;  %9913 = vmatprep.mubr.msk.bf16.mxu1 %vm18584_vm11, %v7989_v19 }
 0x6f4   :  { %v8466_v12 = vrot.slane %v8465_v1, 2  ;;  %v8669_v60 = vadd.f32 %v8668_v34, %v8667_v7 }
 0x6f6   :  { %v8467_v4 = vadd.f32 %v8466_v12, %v8465_v1  ;;  %v8670_v57 = vrot.slane %v8669_v60, 2 }
 0x6f8   :  { %v8468_v20 = vrot.slane %v8467_v4, 1  ;;  %v8671_v3 = vadd.f32 %v8670_v57, %v8669_v60  ;;  %v7990_v62 = vld [vmem:[#allocation2 + $0xf8] sm:$0xff] }
 0x6f9   :  { %9914 = vmatmul.mubr.msk.bf16.gmra.mrb[60].mxu1 %vm18585_vm12, %v7990_v62 }
 0x6fa   :  { %v8469_v9 = vadd.f32 %v8468_v20, %v8467_v4  ;;  %v8672_v55 = vrot.slane %v8671_v3, 1 }
 0x6fc   :  { %v16561_v51 = vmul.f32 0.00390625, %v8469_v9  ;;  %v8673_v27 = vadd.f32 %v8672_v55, %v8671_v3 }
 0x6fe   :  { %v8743_v41 = vmul.f32 0.00390625, %v8673_v27  ;;  %v8745_v59 = vmul.f32 %v16561_v51, %v16561_v51  ;;  %v8749_v8 = vsub.f32 %v16084_v26, %v16561_v51  ;;  %v8750_v5 = vsub.f32 %v16094_v23, %v16561_v51 }
 0x6ff   :  { %v8751_v11 = vsub.f32 %v16082_v30, %v16561_v51  ;;  %v8752_v28 = vsub.f32 %v16090_v35, %v16561_v51  ;;  %v8753_v17 = vsub.f32 %v16157_v15, %v16561_v51  ;;  %v8754_v22 = vsub.f32 %v16168_v10, %v16561_v51 }
 0x700   :  { %v8747_v53 = vsub.f32 %v8743_v41, %v8745_v59  ;;  %v8755_v52 = vsub.f32 %v16155_v31, %v16561_v51  ;;  %v8756_v26 = vsub.f32 %v16165_v39, %v16561_v51  ;;  %v8757_v23 = vsub.f32 %v16235_v38, %v16561_v51 }
 0x701   :  { %v8758_v30 = vsub.f32 %v16248_v36, %v16561_v51  ;;  %v8759_v35 = vsub.f32 %v16233_v50, %v16561_v51  ;;  %v8760_v15 = vsub.f32 %v16244_v49, %v16561_v51  ;;  %v8761_v10 = vsub.f32 %v16342_v14, %v16561_v51  ;;  %v16591_v33 = vpop.f32.mrb[32].mxu1 }
 0x702   :  { %18586 = vst [vmem:[#allocation86_spill] sm:$0xff] %v16591_v33  ;;  %v8762_v31 = vsub.f32 %v16358_v54, %v16561_v51  ;;  %v8763_v39 = vsub.f32 %v16340_v47, %v16561_v51  ;;  %v8764_v38 = vsub.f32 %v16350_v21, %v16561_v51  ;;  %v8765_v50 = vsub.f32 %v16396_v37, %v16561_v51  ;;  %v16601_v36 = vpop.f32.mrb[33].mxu1 }
 0x703   :  { %18587 = vst [vmem:[#allocation66_spill] sm:$0xff] %v16601_v36  ;;  %v8766_v49 = vsub.f32 %v16405_v63, %v16561_v51  ;;  %v8767_v14 = vsub.f32 %v16394_v18, %v16561_v51  ;;  %v8768_v54 = vsub.f32 %v16403_v13, %v16561_v51  ;;  %v8769_v47 = vsub.f32 %v16440_v45, %v16561_v51  ;;  %v16611_v58 = vpop.f32.mrb[34].mxu1 }
 0x704   :  { %18588 = vst [vmem:[#allocation85_spill] sm:$0xff] %v16611_v58  ;;  %v8770_v21 = vsub.f32 %v16449_v0, %v16561_v51  ;;  %v8771_v37 = vsub.f32 %v16438_v44, %v16561_v51  ;;  %v8772_v63 = vsub.f32 %v16447_v29, %v16561_v51  ;;  %v8773_v18 = vsub.f32 %v16484_v48, %v16561_v51  ;;  %v16621_v56 = vpop.f32.mrb[35].mxu1 }
 0x705   :  { %18589 = vst [vmem:[#allocation72_spill] sm:$0xff] %v16621_v56  ;;  %v8774_v13 = vsub.f32 %v16493_v40, %v16561_v51  ;;  %v8775_v45 = vsub.f32 %v16482_v6, %v16561_v51  ;;  %v8776_v0 = vsub.f32 %v16491_v25, %v16561_v51  ;;  %v8777_v44 = vsub.f32 %v16528_v16, %v16561_v51 }
 0x706   :  { %v8778_v29 = vsub.f32 %v16537_v61, %v16561_v51  ;;  %v8779_v48 = vsub.f32 %v16526_v46, %v16561_v51  ;;  %v8780_v24 = vsub.f32 %v16535_v2, %v16561_v51  ;;  %v8813_v42 = vadd.f32 1e-05, %v8747_v53 }
 0x707   :  { %v8573_v40 = vmul.f32 %v16601_v36, %v16601_v36  ;;  %v8470_v6 = vsel %vm330_vm6, %v16601_v36, 0.0  ;;  %v8471_v25 = vsel %vm330_vm6, %v16621_v56, 0.0  ;;  %v8575_v16 = vmul.f32 %v16591_v33, %v16591_v33  ;;  %v9042_v36 = vld [vmem:[%s17640_s1 + $0xa8] sm:$0xff] }
 0x708   :  { %9951 = vrsqrt.f32 %v8813_v42  ;;  %v8472_v61 = vadd.f32 %v8471_v25, %v8470_v6  ;;  %v8574_v46 = vmul.f32 %v16621_v56, %v16621_v56  ;;  %v8473_v2 = vsel %vm330_vm6, %v16591_v33, 0.0  ;;  %v9041_v56 = vld [vmem:[%s17640_s1 + $0xa0] sm:$0xff] }
 0x709   :  { %v8674_v32 = vsel %vm330_vm6, %v8573_v40, 0.0  ;;  %v8576_v7 = vmul.f32 %v16611_v58, %v16611_v58  ;;  %v8475_v1 = vsel %vm330_vm6, %v16611_v58, 0.0  ;;  %v8677_v12 = vsel %vm330_vm6, %v8575_v16, 0.0 }
 0x70a   :  { %v8474_v43 = vadd.f32 %v8473_v2, %v8472_v61  ;;  %v8675_v19 = vsel %vm330_vm6, %v8574_v46, 0.0 }
 0x70b   :  { %v8676_v34 = vadd.f32 %v8675_v19, %v8674_v32  ;;  %v8679_v57 = vsel %vm330_vm6, %v8576_v7, 0.0 }
 0x70c   :  { %v16656_v60 = vadd.f32 %v8475_v1, %v8474_v43 }
 0x70d   :  { %v8678_v4 = vadd.f32 %v8677_v12, %v8676_v34 }
 0x70e   :  { %18590 = vst [vmem:[#allocation63_spill] sm:$0xff] %v16656_v60 }
 0x70f   :  { %v16659_v20 = vadd.f32 %v8679_v57, %v8678_v4  ;;  %v16695_v57 = vld [vmem:[%s17639_s7] ss:$0 sm:$0xff] }
 0x710   :  { %18595 = vst [vmem:[#allocation15_spill] sm:$0xff] %v16695_v57 }
 0x711   :  { %18591 = vst [vmem:[#allocation87_spill] sm:$0xff] %v16659_v20 }
 0x712   :  { %v9952_v3 = vpop.eup %9951 }
 0x713   :  { %v8817_v62 = vmul.f32 %v9952_v3, %v8749_v8  ;;  %v8818_v9 = vmul.f32 %v9952_v3, %v8750_v5  ;;  %v8819_v55 = vmul.f32 %v9952_v3, %v8751_v11  ;;  %v8820_v51 = vmul.f32 %v9952_v3, %v8752_v28  ;;  %v16664_v8 = vld [vmem:[%s17638_s6] ss:$0 sm:$0xff] }
 0x714   :  { %v8821_v27 = vmul.f32 %v9952_v3, %v8753_v17  ;;  %v8822_v41 = vmul.f32 %v9952_v3, %v8754_v22  ;;  %v8823_v59 = vmul.f32 %v9952_v3, %v8755_v52  ;;  %v8824_v53 = vmul.f32 %v9952_v3, %v8756_v26  ;;  %18592 = vst [vmem:[#allocation88_spill] sm:$0xff] %v16664_v8 }
 0x715   :  { %v8825_v42 = vmul.f32 %v9952_v3, %v8757_v23  ;;  %v8826_v40 = vmul.f32 %v9952_v3, %v8758_v30  ;;  %v8827_v6 = vmul.f32 %v9952_v3, %v8759_v35  ;;  %v8828_v25 = vmul.f32 %v9952_v3, %v8760_v15 }
 0x716   :  { %v8829_v16 = vmul.f32 %v9952_v3, %v8761_v10  ;;  %v8830_v61 = vmul.f32 %v9952_v3, %v8762_v31  ;;  %v8831_v46 = vmul.f32 %v9952_v3, %v8763_v39  ;;  %v8832_v2 = vmul.f32 %v9952_v3, %v8764_v38 }
 0x717   :  { %v8833_v32 = vmul.f32 %v9952_v3, %v8765_v50  ;;  %v8834_v7 = vmul.f32 %v9952_v3, %v8766_v49  ;;  %v8835_v43 = vmul.f32 %v9952_v3, %v8767_v14  ;;  %v8836_v19 = vmul.f32 %v9952_v3, %v8768_v54 }
 0x718   :  { %v8837_v5 = vmul.f32 %v9952_v3, %v8769_v47  ;;  %v8838_v11 = vmul.f32 %v9952_v3, %v8770_v21  ;;  %v8839_v28 = vmul.f32 %v9952_v3, %v8771_v37  ;;  %v8840_v17 = vmul.f32 %v9952_v3, %v8772_v63 }
 0x719   :  { %v8841_v22 = vmul.f32 %v9952_v3, %v8773_v18  ;;  %v8842_v52 = vmul.f32 %v9952_v3, %v8774_v13  ;;  %v8843_v26 = vmul.f32 %v9952_v3, %v8775_v45  ;;  %v8844_v23 = vmul.f32 %v9952_v3, %v8776_v0 }
 0x71a   :  { %v8845_v30 = vmul.f32 %v9952_v3, %v8777_v44  ;;  %v8846_v35 = vmul.f32 %v9952_v3, %v8778_v29  ;;  %v8847_v15 = vmul.f32 %v9952_v3, %v8779_v48  ;;  %v8848_v10 = vmul.f32 %v9952_v3, %v8780_v24 }
 0x71b   :  { %v8887_v31 = vmul.f32 %v16664_v8, %v8817_v62  ;;  %v8888_v39 = vmul.f32 %v16664_v8, %v8818_v9  ;;  %v8889_v38 = vmul.f32 %v16664_v8, %v8819_v55  ;;  %v8890_v50 = vmul.f32 %v16664_v8, %v8820_v51 }
 0x71c   :  { %v8891_v49 = vmul.f32 %v16664_v8, %v8821_v27  ;;  %v8892_v14 = vmul.f32 %v16664_v8, %v8822_v41  ;;  %v8893_v54 = vmul.f32 %v16664_v8, %v8823_v59  ;;  %v8894_v47 = vmul.f32 %v16664_v8, %v8824_v53 }
 0x71d   :  { %v8895_v21 = vmul.f32 %v16664_v8, %v8825_v42  ;;  %v8896_v37 = vmul.f32 %v16664_v8, %v8826_v40  ;;  %v8897_v63 = vmul.f32 %v16664_v8, %v8827_v6  ;;  %v8898_v18 = vmul.f32 %v16664_v8, %v8828_v25  ;;  %v16678_v13 = vpop.f32.mrb[36].mxu1 }
 0x71e   :  { %18593 = vst [vmem:[#allocation62_spill] sm:$0xff] %v16678_v13  ;;  %v8899_v45 = vmul.f32 %v16664_v8, %v8829_v16  ;;  %v8900_v0 = vmul.f32 %v16664_v8, %v8830_v61  ;;  %v8901_v44 = vmul.f32 %v16664_v8, %v8831_v46  ;;  %v8902_v29 = vmul.f32 %v16664_v8, %v8832_v2  ;;  %v16684_v48 = vpop.f32.mrb[37].mxu1 }
 0x71f   :  { %v8903_v24 = vmul.f32 %v16664_v8, %v8833_v32  ;;  %v8904_v1 = vmul.f32 %v16664_v8, %v8834_v7  ;;  %v8905_v34 = vmul.f32 %v16664_v8, %v8835_v43  ;;  %v8906_v12 = vmul.f32 %v16664_v8, %v8836_v19  ;;  %v16690_v4 = vpop.f32.mrb[38].mxu1 }
 0x720   :  { %18594 = vst [vmem:[#allocation5_spill] sm:$0xff] %v16690_v4  ;;  %v8907_v3 = vmul.f32 %v16664_v8, %v8837_v5  ;;  %v8908_v62 = vmul.f32 %v16664_v8, %v8838_v11  ;;  %v8909_v9 = vmul.f32 %v16664_v8, %v8839_v28  ;;  %v8910_v55 = vmul.f32 %v16664_v8, %v8840_v17  ;;  %v16701_v51 = vpop.f32.mrb[39].mxu1  ;;  %v9043_v4 = vld [vmem:[%s17640_s1 + $0xb0] sm:$0xff] }
 0x721   :  { %18596 = vst [vmem:[#allocation14_spill] sm:$0xff] %v16701_v51  ;;  %v8911_v27 = vmul.f32 %v16664_v8, %v8841_v22  ;;  %v8912_v41 = vmul.f32 %v16664_v8, %v8842_v52  ;;  %v8913_v59 = vmul.f32 %v16664_v8, %v8843_v26  ;;  %v8914_v53 = vmul.f32 %v16664_v8, %v8844_v23 }
 0x722   :  { %v8915_v42 = vmul.f32 %v16664_v8, %v8845_v30  ;;  %v8916_v40 = vmul.f32 %v16664_v8, %v8846_v35  ;;  %v8917_v6 = vmul.f32 %v16664_v8, %v8847_v15  ;;  %v8918_v25 = vmul.f32 %v16664_v8, %v8848_v10  ;;  %v9021_v30 = vld [vmem:[%s17640_s1] sm:$0xff]  ;;  %v9022_v35 = vld [vmem:[%s17640_s1 + $0x8] sm:$0xff]  ;;  %v9023_v15 = vld [vmem:[%s17640_s1 + $0x10] sm:$0xff] }
 0x723   :  { %v8957_v16 = vadd.f32 %v16695_v57, %v8887_v31  ;;  %v8958_v61 = vadd.f32 %v16695_v57, %v8888_v39  ;;  %v8959_v46 = vadd.f32 %v16695_v57, %v8889_v38  ;;  %v8960_v2 = vadd.f32 %v16695_v57, %v8890_v50  ;;  %v9024_v10 = vld [vmem:[%s17640_s1 + $0x18] sm:$0xff] }
 0x724   :  { %v8961_v32 = vadd.f32 %v16695_v57, %v8891_v49  ;;  %v8962_v7 = vadd.f32 %v16695_v57, %v8892_v14  ;;  %v8963_v43 = vadd.f32 %v16695_v57, %v8893_v54  ;;  %v8964_v19 = vadd.f32 %v16695_v57, %v8894_v47  ;;  %v9025_v49 = vld [vmem:[%s17640_s1 + $0x20] sm:$0xff]  ;;  %v9026_v14 = vld [vmem:[%s17640_s1 + $0x28] sm:$0xff]  ;;  %v9027_v54 = vld [vmem:[%s17640_s1 + $0x30] sm:$0xff] }
 0x725   :  { %v8965_v5 = vadd.f32 %v16695_v57, %v8895_v21  ;;  %v8966_v11 = vadd.f32 %v16695_v57, %v8896_v37  ;;  %v8967_v28 = vadd.f32 %v16695_v57, %v8897_v63  ;;  %v8968_v17 = vadd.f32 %v16695_v57, %v8898_v18  ;;  %v9028_v47 = vld [vmem:[%s17640_s1 + $0x38] sm:$0xff] }
 0x726   :  { %v16724_v22 = vadd.f32 %v16695_v57, %v8899_v45  ;;  %v16727_v52 = vadd.f32 %v16695_v57, %v8900_v0  ;;  %v16730_v26 = vadd.f32 %v16695_v57, %v8901_v44  ;;  %v16733_v23 = vadd.f32 %v16695_v57, %v8902_v29  ;;  %v9029_v45 = vld [vmem:[%s17640_s1 + $0x40] sm:$0xff]  ;;  %v9030_v0 = vld [vmem:[%s17640_s1 + $0x48] sm:$0xff]  ;;  %v9031_v44 = vld [vmem:[%s17640_s1 + $0x50] sm:$0xff] }
 0x727   :  { %v16748_v31 = vadd.f32 %v16695_v57, %v8903_v24  ;;  %v16751_v39 = vadd.f32 %v16695_v57, %v8904_v1  ;;  %v16754_v38 = vadd.f32 %v16695_v57, %v8905_v34  ;;  %v16757_v50 = vadd.f32 %v16695_v57, %v8906_v12  ;;  %v9032_v12 = vld [vmem:[%s17640_s1 + $0x58] sm:$0xff] }
 0x728   :  { %v16772_v21 = vadd.f32 %v16695_v57, %v8907_v3  ;;  %v16775_v37 = vadd.f32 %v16695_v57, %v8908_v62  ;;  %v16778_v63 = vadd.f32 %v16695_v57, %v8909_v9  ;;  %v16781_v18 = vadd.f32 %v16695_v57, %v8910_v55  ;;  %v9033_v3 = vld [vmem:[%s17640_s1 + $0x60] sm:$0xff]  ;;  %v9034_v62 = vld [vmem:[%s17640_s1 + $0x68] sm:$0xff] }
 0x729   :  { %v16793_v29 = vadd.f32 %v16695_v57, %v8911_v27  ;;  %v16796_v24 = vadd.f32 %v16695_v57, %v8912_v41  ;;  %v16799_v1 = vadd.f32 %v16695_v57, %v8913_v59  ;;  %v16802_v34 = vadd.f32 %v16695_v57, %v8914_v53  ;;  %v9035_v59 = vld [vmem:[%s17640_s1 + $0x70] sm:$0xff]  ;;  %v9036_v53 = vld [vmem:[%s17640_s1 + $0x78] sm:$0xff] }
 0x72a   :  { %v16814_v9 = vadd.f32 %v16695_v57, %v8915_v42  ;;  %v16817_v55 = vadd.f32 %v16695_v57, %v8916_v40  ;;  %v16820_v27 = vadd.f32 %v16695_v57, %v8917_v6  ;;  %v16823_v41 = vadd.f32 %v16695_v57, %v8918_v25  ;;  %v9037_v42 = vld [vmem:[%s17640_s1 + $0x80] sm:$0xff]  ;;  %v9038_v40 = vld [vmem:[%s17640_s1 + $0x88] sm:$0xff]  ;;  %v9039_v6 = vld [vmem:[%s17640_s1 + $0x90] sm:$0xff] }
 0x72b   :  { %v9040_v25 = vld [vmem:[%s17640_s1 + $0x98] sm:$0xff]  ;;  %v9085_v57 = vadd.f32 %v9021_v30, %v8957_v16  ;;  %v9086_v8 = vadd.f32 %v9022_v35, %v8958_v61  ;;  %v9087_v58 = vadd.f32 %v9023_v15, %v8959_v46  ;;  %v9088_v33 = vadd.f32 %v9024_v10, %v8960_v2  ;;  %v9045_v61 = vld [vmem:[%s17640_s1 + $0xc0] sm:$0xff]  ;;  %v9046_v46 = vld [vmem:[%s17640_s1 + $0xc8] sm:$0xff] }
 0x72c   :  { %v9089_v20 = vadd.f32 %v9025_v49, %v8961_v32  ;;  %v9090_v13 = vadd.f32 %v9026_v14, %v8962_v7  ;;  %v9091_v51 = vadd.f32 %v9027_v54, %v8963_v43  ;;  %v9092_v60 = vadd.f32 %v9028_v47, %v8964_v19  ;;  %v9044_v16 = vld [vmem:[%s17640_s1 + $0xb8] sm:$0xff]  ;;  %v9047_v32 = vld [vmem:[%s17640_s1 + $0xd0] sm:$0xff]  ;;  %v9050_v19 = vld [vmem:[%s17640_s1 + $0xe8] sm:$0xff] }
 0x72d   :  { %v9093_v2 = vadd.f32 %v9029_v45, %v8965_v5  ;;  %v9094_v30 = vadd.f32 %v9030_v0, %v8966_v11  ;;  %v9095_v35 = vadd.f32 %v9031_v44, %v8967_v28  ;;  %v9096_v15 = vadd.f32 %v9032_v12, %v8968_v17  ;;  %9149 = vst.msk [vmem:[%s17641_s8] sm:$0xff] %vm330_vm6, %v9085_v57  ;;  %v9048_v57 = vld [vmem:[%s17640_s1 + $0xd8] sm:$0xff]  ;;  %v18597_v49 = vld [vmem:[#allocation63_spill] sm:$0xff]  ;;  %v18598_v54 = vld [vmem:[#allocation14_spill] sm:$0xff] }
 0x72e   :  { %9150 = vst.msk [vmem:[%s17641_s8 + $0x8] sm:$0xff] %vm330_vm6, %v9086_v8  ;;  %9151 = vst.msk [vmem:[%s17641_s8 + $0x10] sm:$0xff] %vm330_vm6, %v9087_v58  ;;  %v9049_v8 = vld [vmem:[%s17640_s1 + $0xe0] sm:$0xff]  ;;  %v9097_v7 = vadd.f32 %v9033_v3, %v16724_v22  ;;  %v9098_v58 = vadd.f32 %v9034_v62, %v16727_v52  ;;  %v9099_v43 = vadd.f32 %v9035_v59, %v16730_v26  ;;  %v8479_v47 = vsel %vm330_vm6, %v18598_v54, 0.0  ;;  %v18600_v45 = vld [vmem:[#allocation87_spill] sm:$0xff] }
 0x72f   :  { %9152 = vst.msk [vmem:[%s17641_s8 + $0x18] sm:$0xff] %vm330_vm6, %v9088_v33  ;;  %v9100_v33 = vadd.f32 %v9036_v53, %v16733_v23  ;;  %9153 = vst.msk [vmem:[%s17641_s8 + $0x20] sm:$0xff] %vm330_vm6, %v9089_v20  ;;  %v9051_v20 = vld [vmem:[%s17640_s1 + $0xf0] sm:$0xff]  ;;  %v9101_v5 = vadd.f32 %v9037_v42, %v16748_v31  ;;  %v9103_v11 = vadd.f32 %v9039_v6, %v16754_v38  ;;  %v8477_v38 = vsel %vm330_vm6, %v16684_v48, 0.0 }
 0x730   :  { %9154 = vst.msk [vmem:[%s17641_s8 + $0x28] sm:$0xff] %vm330_vm6, %v9090_v13  ;;  %9155 = vst.msk [vmem:[%s17641_s8 + $0x30] sm:$0xff] %vm330_vm6, %v9091_v51  ;;  %v9052_v13 = vld [vmem:[%s17640_s1 + $0xf8] sm:$0xff]  ;;  %v9102_v51 = vadd.f32 %v9038_v40, %v16751_v39  ;;  %v9105_v28 = vadd.f32 %v9041_v56, %v16772_v21  ;;  %v9106_v17 = vadd.f32 %v9042_v36, %v16775_v37  ;;  %v18599_v21 = vld [vmem:[#allocation62_spill] sm:$0xff] }
 0x731   :  { %9156 = vst.msk [vmem:[%s17641_s8 + $0x38] sm:$0xff] %vm330_vm6, %v9092_v60  ;;  %v9104_v60 = vadd.f32 %v9040_v25, %v16757_v50  ;;  %9157 = vst.msk [vmem:[%s17641_s8 + $0x40] sm:$0xff] %vm330_vm6, %v9093_v2  ;;  %v9107_v22 = vadd.f32 %v9043_v4, %v16778_v63  ;;  %v9108_v52 = vadd.f32 %v9044_v16, %v16781_v18 }
 0x732   :  { %9158 = vst.msk [vmem:[%s17641_s8 + $0x48] sm:$0xff] %vm330_vm6, %v9094_v30  ;;  %9159 = vst.msk [vmem:[%s17641_s8 + $0x50] sm:$0xff] %vm330_vm6, %v9095_v35  ;;  %v9109_v36 = vadd.f32 %v9045_v61, %v16793_v29  ;;  %v9110_v56 = vadd.f32 %v9046_v46, %v16796_v24  ;;  %v9111_v4 = vadd.f32 %v9047_v32, %v16799_v1  ;;  %v8481_v29 = vsel %vm330_vm6, %v18599_v21, 0.0  ;;  %v18601_v24 = vld [vmem:[#allocation5_spill] sm:$0xff] }
 0x733   :  { %9160 = vst.msk [vmem:[%s17641_s8 + $0x58] sm:$0xff] %vm330_vm6, %v9096_v15  ;;  %9161 = vst.msk [vmem:[%s17641_s8 + $0x60] sm:$0xff] %vm330_vm6, %v9097_v7  ;;  %v9112_v26 = vadd.f32 %v9048_v57, %v16802_v34  ;;  %v9113_v23 = vadd.f32 %v9049_v8, %v16814_v9  ;;  %v9114_v10 = vadd.f32 %v9050_v19, %v16817_v55  ;;  %v8483_v9 = vsel %vm330_vm6, %v18601_v24, 0.0 }
 0x734   :  { %9162 = vst.msk [vmem:[%s17641_s8 + $0x68] sm:$0xff] %vm330_vm6, %v9098_v58  ;;  %9163 = vst.msk [vmem:[%s17641_s8 + $0x70] sm:$0xff] %vm330_vm6, %v9099_v43  ;;  %v9115_v31 = vadd.f32 %v9051_v20, %v16820_v27  ;;  %v9116_v39 = vadd.f32 %v9052_v13, %v16823_v41  ;;  %v8577_v50 = vmul.f32 %v16684_v48, %v16684_v48 }
 0x735   :  { %9164 = vst.msk [vmem:[%s17641_s8 + $0x78] sm:$0xff] %vm330_vm6, %v9100_v33  ;;  %9165 = vst.msk [vmem:[%s17641_s8 + $0x80] sm:$0xff] %vm330_vm6, %v9101_v5  ;;  %v8478_v14 = vadd.f32 %v8477_v38, %v18597_v49  ;;  %v8579_v37 = vmul.f32 %v18599_v21, %v18599_v21  ;;  %v8578_v18 = vmul.f32 %v18598_v54, %v18598_v54 }
 0x736   :  { %9166 = vst.msk [vmem:[%s17641_s8 + $0x88] sm:$0xff] %vm330_vm6, %v9102_v51  ;;  %9167 = vst.msk [vmem:[%s17641_s8 + $0x90] sm:$0xff] %vm330_vm6, %v9103_v11  ;;  %v8681_v63 = vsel %vm330_vm6, %v8577_v50, 0.0  ;;  %v8580_v1 = vmul.f32 %v18601_v24, %v18601_v24 }
 0x737   :  { %9168 = vst.msk [vmem:[%s17641_s8 + $0x98] sm:$0xff] %vm330_vm6, %v9104_v60  ;;  %9169 = vst.msk [vmem:[%s17641_s8 + $0xa0] sm:$0xff] %vm330_vm6, %v9105_v28  ;;  %v8682_v0 = vadd.f32 %v8681_v63, %v18600_v45  ;;  %v8480_v44 = vadd.f32 %v8479_v47, %v8478_v14  ;;  %v8683_v34 = vsel %vm330_vm6, %v8578_v18, 0.0  ;;  %v8685_v62 = vsel %vm330_vm6, %v8579_v37, 0.0 }
 0x738   :  { %9170 = vst.msk [vmem:[%s17641_s8 + $0xa8] sm:$0xff] %vm330_vm6, %v9106_v17  ;;  %9171 = vst.msk [vmem:[%s17641_s8 + $0xb0] sm:$0xff] %vm330_vm6, %v9107_v22  ;;  %v8687_v53 = vsel %vm330_vm6, %v8580_v1, 0.0 }
 0x739   :  { %9172 = vst.msk [vmem:[%s17641_s8 + $0xb8] sm:$0xff] %vm330_vm6, %v9108_v52  ;;  %9173 = vst.msk [vmem:[%s17641_s8 + $0xc0] sm:$0xff] %vm330_vm6, %v9109_v36  ;;  %v8482_v12 = vadd.f32 %v8481_v29, %v8480_v44  ;;  %v8684_v3 = vadd.f32 %v8683_v34, %v8682_v0  ;;  %v17048_v55 = vpop.f32.mrb[40].mxu1 }
 0x73a   :  { %9174 = vst.msk [vmem:[%s17641_s8 + $0xc8] sm:$0xff] %vm330_vm6, %v9110_v56  ;;  %9175 = vst.msk [vmem:[%s17641_s8 + $0xd0] sm:$0xff] %vm330_vm6, %v9111_v4  ;;  %v17050_v41 = vpop.f32.mrb[41].mxu1  ;;  %v8583_v46 = vmul.f32 %v17048_v55, %v17048_v55  ;;  %v8489_v57 = vsel %vm330_vm6, %v17048_v55, 0.0 }
 0x73b   :  { %9176 = vst.msk [vmem:[%s17641_s8 + $0xd8] sm:$0xff] %vm330_vm6, %v9112_v26  ;;  %9177 = vst.msk [vmem:[%s17641_s8 + $0xe0] sm:$0xff] %vm330_vm6, %v9113_v23  ;;  %v8686_v27 = vadd.f32 %v8685_v62, %v8684_v3  ;;  %v8484_v59 = vadd.f32 %v8483_v9, %v8482_v12  ;;  %v8485_v42 = vsel %vm330_vm6, %v17050_v41, 0.0  ;;  %v8581_v40 = vmul.f32 %v17050_v41, %v17050_v41  ;;  %v17057_v6 = vpop.f32.mrb[42].mxu1 }
 0x73c   :  { %9178 = vst.msk [vmem:[%s17641_s8 + $0xe8] sm:$0xff] %vm330_vm6, %v9114_v10  ;;  %9179 = vst.msk [vmem:[%s17641_s8 + $0xf0] sm:$0xff] %vm330_vm6, %v9115_v31  ;;  %v17059_v61 = vpop.f32.mrb[43].mxu1  ;;  %v8584_v8 = vmul.f32 %v17057_v6, %v17057_v6  ;;  %v8693_v33 = vsel %vm330_vm6, %v8583_v46, 0.0  ;;  %v8491_v19 = vsel %vm330_vm6, %v17057_v6, 0.0 }
 0x73d   :  { %9180 = vst.msk [vmem:[%s17641_s8 + $0xf8] sm:$0xff] %vm330_vm6, %v9116_v39  ;;  %v8486_v25 = vadd.f32 %v8485_v42, %v8484_v59  ;;  %v8688_v16 = vadd.f32 %v8687_v53, %v8686_v27  ;;  %v8689_v2 = vsel %vm330_vm6, %v8581_v40, 0.0  ;;  %v8487_v30 = vsel %vm330_vm6, %v17059_v61, 0.0 }
 0x73e   :  { %v8582_v35 = vmul.f32 %v17059_v61, %v17059_v61  ;;  %v8695_v5 = vsel %vm330_vm6, %v8584_v8, 0.0 }
 0x73f   :  { %v8690_v15 = vadd.f32 %v8689_v2, %v8688_v16  ;;  %v8488_v32 = vadd.f32 %v8487_v30, %v8486_v25 }
 0x740   :  { %v8691_v7 = vsel %vm330_vm6, %v8582_v35, 0.0 }
 0x741   :  { %v8490_v58 = vadd.f32 %v8489_v57, %v8488_v32  ;;  %v8692_v43 = vadd.f32 %v8691_v7, %v8690_v15 }
 0x743   :  { %v8694_v20 = vadd.f32 %v8693_v33, %v8692_v43  ;;  %v8492_v13 = vadd.f32 %v8491_v19, %v8490_v58 }
 0x745   :  { %v8696_v51 = vadd.f32 %v8695_v5, %v8694_v20 }
 0x755   :  { %v17077_v11 = vpop.f32.mrb[44].mxu1 }
 0x756   :  { %v17079_v60 = vpop.f32.mrb[45].mxu1  ;;  %v8587_v56 = vmul.f32 %v17077_v11, %v17077_v11  ;;  %v8497_v39 = vsel %vm330_vm6, %v17077_v11, 0.0 }
 0x757   :  { %v8493_v28 = vsel %vm330_vm6, %v17079_v60, 0.0  ;;  %v8585_v17 = vmul.f32 %v17079_v60, %v17079_v60  ;;  %v17085_v22 = vpop.f32.mrb[46].mxu1 }
 0x758   :  { %v8494_v52 = vadd.f32 %v8493_v28, %v8492_v13  ;;  %v17087_v36 = vpop.f32.mrb[47].mxu1  ;;  %v8588_v38 = vmul.f32 %v17085_v22, %v17085_v22  ;;  %v8701_v47 = vsel %vm330_vm6, %v8587_v56, 0.0  ;;  %v8499_v37 = vsel %vm330_vm6, %v17085_v22, 0.0 }
 0x759   :  { %v8697_v4 = vsel %vm330_vm6, %v8585_v17, 0.0  ;;  %v8495_v26 = vsel %vm330_vm6, %v17087_v36, 0.0  ;;  %v8586_v23 = vmul.f32 %v17087_v36, %v17087_v36 }
 0x75a   :  { %v8698_v10 = vadd.f32 %v8697_v4, %v8696_v51  ;;  %v8496_v31 = vadd.f32 %v8495_v26, %v8494_v52  ;;  %v8703_v45 = vsel %vm330_vm6, %v8588_v38, 0.0 }
 0x75b   :  { %v8699_v50 = vsel %vm330_vm6, %v8586_v23, 0.0 }
 0x75c   :  { %v8498_v49 = vadd.f32 %v8497_v39, %v8496_v31  ;;  %v8700_v14 = vadd.f32 %v8699_v50, %v8698_v10 }
 0x75e   :  { %v8702_v63 = vadd.f32 %v8701_v47, %v8700_v14  ;;  %v8500_v18 = vadd.f32 %v8499_v37, %v8498_v49 }
 0x760   :  { %v8704_v0 = vadd.f32 %v8703_v45, %v8702_v63 }
 0x771   :  { %v17105_v44 = vpop.f32.mrb[48].mxu1 }
 0x772   :  { %v17107_v29 = vpop.f32.mrb[49].mxu1  ;;  %v8591_v9 = vmul.f32 %v17105_v44, %v17105_v44  ;;  %v8505_v25 = vsel %vm330_vm6, %v17105_v44, 0.0 }
 0x773   :  { %v8501_v1 = vsel %vm330_vm6, %v17107_v29, 0.0  ;;  %v8589_v34 = vmul.f32 %v17107_v29, %v17107_v29  ;;  %v17113_v12 = vpop.f32.mrb[50].mxu1 }
 0x774   :  { %v8502_v3 = vadd.f32 %v8501_v1, %v8500_v18  ;;  %v17115_v62 = vpop.f32.mrb[51].mxu1  ;;  %v8592_v16 = vmul.f32 %v17113_v12, %v17113_v12  ;;  %v8709_v35 = vsel %vm330_vm6, %v8591_v9, 0.0  ;;  %v8507_v15 = vsel %vm330_vm6, %v17113_v12, 0.0 }
 0x775   :  { %v8705_v27 = vsel %vm330_vm6, %v8589_v34, 0.0  ;;  %v8503_v59 = vsel %vm330_vm6, %v17115_v62, 0.0  ;;  %v8590_v53 = vmul.f32 %v17115_v62, %v17115_v62 }
 0x776   :  { %v8706_v42 = vadd.f32 %v8705_v27, %v8704_v0  ;;  %v8504_v40 = vadd.f32 %v8503_v59, %v8502_v3  ;;  %v8711_v8 = vsel %vm330_vm6, %v8592_v16, 0.0 }
 0x777   :  { %v8707_v46 = vsel %vm330_vm6, %v8590_v53, 0.0 }
 0x778   :  { %v8506_v2 = vadd.f32 %v8505_v25, %v8504_v40  ;;  %v8708_v30 = vadd.f32 %v8707_v46, %v8706_v42 }
 0x77a   :  { %v8710_v32 = vadd.f32 %v8709_v35, %v8708_v30  ;;  %v8508_v57 = vadd.f32 %v8507_v15, %v8506_v2 }
 0x77c   :  { %v8712_v7 = vadd.f32 %v8711_v8, %v8710_v32 }
 0x78d   :  { %v17133_v58 = vpop.f32.mrb[52].mxu1 }
 0x78e   :  { %v17135_v43 = vpop.f32.mrb[53].mxu1  ;;  %v8595_v51 = vmul.f32 %v17133_v58, %v17133_v58  ;;  %v8513_v26 = vsel %vm330_vm6, %v17133_v58, 0.0 }
 0x78f   :  { %v8509_v33 = vsel %vm330_vm6, %v17135_v43, 0.0  ;;  %v8593_v19 = vmul.f32 %v17135_v43, %v17135_v43  ;;  %v17141_v20 = vpop.f32.mrb[54].mxu1 }
 0x790   :  { %v8510_v13 = vadd.f32 %v8509_v33, %v8508_v57  ;;  %v17143_v5 = vpop.f32.mrb[55].mxu1  ;;  %v8596_v23 = vmul.f32 %v17141_v20, %v17141_v20  ;;  %v8717_v38 = vsel %vm330_vm6, %v8595_v51, 0.0  ;;  %v8515_v50 = vsel %vm330_vm6, %v17141_v20, 0.0 }
 0x791   :  { %v8713_v28 = vsel %vm330_vm6, %v8593_v19, 0.0  ;;  %v8511_v17 = vsel %vm330_vm6, %v17143_v5, 0.0  ;;  %v8594_v52 = vmul.f32 %v17143_v5, %v17143_v5 }
 0x792   :  { %v8714_v56 = vadd.f32 %v8713_v28, %v8712_v7  ;;  %v8512_v4 = vadd.f32 %v8511_v17, %v8510_v13  ;;  %v8719_v47 = vsel %vm330_vm6, %v8596_v23, 0.0 }
 0x793   :  { %v8715_v10 = vsel %vm330_vm6, %v8594_v52, 0.0 }
 0x794   :  { %v8514_v31 = vadd.f32 %v8513_v26, %v8512_v4  ;;  %v8716_v39 = vadd.f32 %v8715_v10, %v8714_v56 }
 0x796   :  { %v8718_v49 = vadd.f32 %v8717_v38, %v8716_v39  ;;  %v8516_v14 = vadd.f32 %v8515_v50, %v8514_v31 }
 0x798   :  { %v8720_v37 = vadd.f32 %v8719_v47, %v8718_v49 }
 0x7a9   :  { %v17161_v63 = vpop.f32.mrb[56].mxu1 }
 0x7aa   :  { %v17163_v18 = vpop.f32.mrb[57].mxu1  ;;  %v8599_v9 = vmul.f32 %v17161_v63, %v17161_v63  ;;  %v8521_v25 = vsel %vm330_vm6, %v17161_v63, 0.0 }
 0x7ab   :  { %v8517_v45 = vsel %vm330_vm6, %v17163_v18, 0.0  ;;  %v8597_v0 = vmul.f32 %v17163_v18, %v17163_v18  ;;  %v17169_v1 = vpop.f32.mrb[58].mxu1 }
 0x7ac   :  { %v8518_v34 = vadd.f32 %v8517_v45, %v8516_v14  ;;  %v17171_v3 = vpop.f32.mrb[59].mxu1  ;;  %v8600_v16 = vmul.f32 %v17169_v1, %v17169_v1  ;;  %v8725_v35 = vsel %vm330_vm6, %v8599_v9, 0.0  ;;  %v8523_v15 = vsel %vm330_vm6, %v17169_v1, 0.0 }
 0x7ad   :  { %v8721_v27 = vsel %vm330_vm6, %v8597_v0, 0.0  ;;  %v8519_v59 = vsel %vm330_vm6, %v17171_v3, 0.0  ;;  %v8598_v53 = vmul.f32 %v17171_v3, %v17171_v3 }
 0x7ae   :  { %v8722_v42 = vadd.f32 %v8721_v27, %v8720_v37  ;;  %v8520_v40 = vadd.f32 %v8519_v59, %v8518_v34  ;;  %v8727_v8 = vsel %vm330_vm6, %v8600_v16, 0.0 }
 0x7af   :  { %v8723_v46 = vsel %vm330_vm6, %v8598_v53, 0.0 }
 0x7b0   :  { %v8522_v2 = vadd.f32 %v8521_v25, %v8520_v40  ;;  %v8724_v30 = vadd.f32 %v8723_v46, %v8722_v42 }
 0x7b2   :  { %v8726_v32 = vadd.f32 %v8725_v35, %v8724_v30  ;;  %v8524_v57 = vadd.f32 %v8523_v15, %v8522_v2 }
 0x7b4   :  { %v8728_v7 = vadd.f32 %v8727_v8, %v8726_v32 }
 0x7cc   :  { %v17189_v33 = vpop.f32.mrb[60].mxu1 }
 0x7cd   :  { %v17191_v19 = vpop.f32.mrb[61].mxu1  ;;  %v8603_v56 = vmul.f32 %v17189_v33, %v17189_v33  ;;  %v8529_v39 = vsel %vm330_vm6, %v17189_v33, 0.0 }
 0x7ce   :  { %v8525_v13 = vsel %vm330_vm6, %v17191_v19, 0.0  ;;  %v8601_v51 = vmul.f32 %v17191_v19, %v17191_v19  ;;  %v17197_v28 = vpop.f32.mrb[62].mxu1 }
 0x7cf   :  { %v8526_v17 = vadd.f32 %v8525_v13, %v8524_v57  ;;  %v17199_v52 = vpop.f32.mrb[63].mxu1  ;;  %v8604_v38 = vmul.f32 %v17197_v28, %v17197_v28  ;;  %v8733_v47 = vsel %vm330_vm6, %v8603_v56, 0.0  ;;  %v8531_v37 = vsel %vm330_vm6, %v17197_v28, 0.0  ;;  %v18604_v56 = vld [vmem:[#allocation86_spill] sm:$0xff] }
 0x7d0   :  { %v8729_v4 = vsel %vm330_vm6, %v8601_v51, 0.0  ;;  %v8527_v26 = vsel %vm330_vm6, %v17199_v52, 0.0  ;;  %v8602_v23 = vmul.f32 %v17199_v52, %v17199_v52  ;;  %v18603_v51 = vld [vmem:[#allocation72_spill] sm:$0xff] }
 0x7d1   :  { %v8730_v10 = vadd.f32 %v8729_v4, %v8728_v7  ;;  %v8528_v31 = vadd.f32 %v8527_v26, %v8526_v17  ;;  %v8735_v34 = vsel %vm330_vm6, %v8604_v38, 0.0  ;;  %v18602_v7 = vld [vmem:[#allocation66_spill] sm:$0xff]  ;;  %v18605_v26 = vld [vmem:[#allocation85_spill] sm:$0xff] }
 0x7d2   :  { %v8731_v50 = vsel %vm330_vm6, %v8602_v23, 0.0 }
 0x7d3   :  { %v8530_v49 = vadd.f32 %v8529_v39, %v8528_v31  ;;  %v8732_v14 = vadd.f32 %v8731_v50, %v8730_v10 }
 0x7d5   :  { %v8532_v45 = vadd.f32 %v8531_v37, %v8530_v49  ;;  %v8734_v0 = vadd.f32 %v8733_v47, %v8732_v14 }
 0x7d7   :  { %v8533_v9 = vrot.slane %v8532_v45, 4  ;;  %v8736_v27 = vadd.f32 %v8735_v34, %v8734_v0 }
 0x7d9   :  { %v8534_v59 = vadd.f32 %v8533_v9, %v8532_v45  ;;  %v8737_v53 = vrot.slane %v8736_v27, 4 }
 0x7db   :  { %v8535_v42 = vrot.slane %v8534_v59, 2  ;;  %v8738_v40 = vadd.f32 %v8737_v53, %v8736_v27 }
 0x7dd   :  { %v8536_v25 = vadd.f32 %v8535_v42, %v8534_v59  ;;  %v8739_v16 = vrot.slane %v8738_v40, 2 }
 0x7df   :  { %v8537_v46 = vrot.slane %v8536_v25, 1  ;;  %v8740_v2 = vadd.f32 %v8739_v16, %v8738_v40 }
 0x7e1   :  { %v8538_v30 = vadd.f32 %v8537_v46, %v8536_v25  ;;  %v8741_v35 = vrot.slane %v8740_v2, 1 }
 0x7e3   :  { %v17217_v15 = vmul.f32 0.00390625, %v8538_v30  ;;  %v8742_v32 = vadd.f32 %v8741_v35, %v8740_v2 }
 0x7e5   :  { %v8744_v57 = vmul.f32 0.00390625, %v8742_v32  ;;  %v8746_v8 = vmul.f32 %v17217_v15, %v17217_v15  ;;  %v8781_v13 = vsub.f32 %v18602_v7, %v17217_v15  ;;  %v8782_v17 = vsub.f32 %v18603_v51, %v17217_v15 }
 0x7e6   :  { %v8783_v4 = vsub.f32 %v18604_v56, %v17217_v15  ;;  %v8784_v23 = vsub.f32 %v18605_v26, %v17217_v15  ;;  %v8785_v10 = vsub.f32 %v16684_v48, %v17217_v15  ;;  %v8786_v31 = vsub.f32 %v18598_v54, %v17217_v15 }
 0x7e7   :  { %v8748_v39 = vsub.f32 %v8744_v57, %v8746_v8  ;;  %v8787_v38 = vsub.f32 %v18599_v21, %v17217_v15  ;;  %v8788_v50 = vsub.f32 %v18601_v24, %v17217_v15  ;;  %v8789_v49 = vsub.f32 %v17050_v41, %v17217_v15 }
 0x7e8   :  { %v8790_v14 = vsub.f32 %v17059_v61, %v17217_v15  ;;  %v8791_v47 = vsub.f32 %v17048_v55, %v17217_v15  ;;  %v8792_v48 = vsub.f32 %v17057_v6, %v17217_v15  ;;  %v8793_v54 = vsub.f32 %v17079_v60, %v17217_v15 }
 0x7e9   :  { %v8794_v21 = vsub.f32 %v17087_v36, %v17217_v15  ;;  %v8795_v24 = vsub.f32 %v17077_v11, %v17217_v15  ;;  %v8796_v41 = vsub.f32 %v17085_v22, %v17217_v15  ;;  %v8797_v61 = vsub.f32 %v17107_v29, %v17217_v15 }
 0x7ea   :  { %v8798_v55 = vsub.f32 %v17115_v62, %v17217_v15  ;;  %v8799_v6 = vsub.f32 %v17105_v44, %v17217_v15  ;;  %v8800_v60 = vsub.f32 %v17113_v12, %v17217_v15  ;;  %v8801_v36 = vsub.f32 %v17135_v43, %v17217_v15 }
 0x7eb   :  { %v8802_v11 = vsub.f32 %v17143_v5, %v17217_v15  ;;  %v8803_v22 = vsub.f32 %v17133_v58, %v17217_v15  ;;  %v8804_v29 = vsub.f32 %v17141_v20, %v17217_v15  ;;  %v8805_v62 = vsub.f32 %v17163_v18, %v17217_v15 }
 0x7ec   :  { %v8806_v44 = vsub.f32 %v17171_v3, %v17217_v15  ;;  %v8807_v12 = vsub.f32 %v17161_v63, %v17217_v15  ;;  %v8808_v43 = vsub.f32 %v17169_v1, %v17217_v15  ;;  %v8809_v5 = vsub.f32 %v17191_v19, %v17217_v15 }
 0x7ed   :  { %v8810_v58 = vsub.f32 %v17199_v52, %v17217_v15  ;;  %v8811_v20 = vsub.f32 %v17189_v33, %v17217_v15  ;;  %v8812_v18 = vsub.f32 %v17197_v28, %v17217_v15  ;;  %v8814_v37 = vadd.f32 1e-05, %v8748_v39 }
 0x7ef   :  { %9953 = vrsqrt.f32 %v8814_v37 }
 0x7f9   :  { %v9954_v3 = vpop.eup %9953 }
 0x7fa   :  { %v8849_v45 = vmul.f32 %v9954_v3, %v8781_v13  ;;  %v8850_v63 = vmul.f32 %v9954_v3, %v8782_v17  ;;  %v8851_v0 = vmul.f32 %v9954_v3, %v8783_v4  ;;  %v8852_v34 = vmul.f32 %v9954_v3, %v8784_v23  ;;  %v18606_v23 = vld [vmem:[#allocation88_spill] sm:$0xff] }
 0x7fb   :  { %v8853_v1 = vmul.f32 %v9954_v3, %v8785_v10  ;;  %v8854_v9 = vmul.f32 %v9954_v3, %v8786_v31  ;;  %v8855_v27 = vmul.f32 %v9954_v3, %v8787_v38  ;;  %v8856_v19 = vmul.f32 %v9954_v3, %v8788_v50 }
 0x7fc   :  { %v8857_v59 = vmul.f32 %v9954_v3, %v8789_v49  ;;  %v8858_v53 = vmul.f32 %v9954_v3, %v8790_v14  ;;  %v8859_v52 = vmul.f32 %v9954_v3, %v8791_v47  ;;  %v8860_v42 = vmul.f32 %v9954_v3, %v8792_v48 }
 0x7fd   :  { %v8861_v40 = vmul.f32 %v9954_v3, %v8793_v54  ;;  %v8862_v33 = vmul.f32 %v9954_v3, %v8794_v21  ;;  %v8863_v25 = vmul.f32 %v9954_v3, %v8795_v24  ;;  %v8864_v16 = vmul.f32 %v9954_v3, %v8796_v41 }
 0x7fe   :  { %v8865_v28 = vmul.f32 %v9954_v3, %v8797_v61  ;;  %v8866_v46 = vmul.f32 %v9954_v3, %v8798_v55  ;;  %v8867_v2 = vmul.f32 %v9954_v3, %v8799_v6  ;;  %v8868_v30 = vmul.f32 %v9954_v3, %v8800_v60 }
 0x7ff   :  { %v8869_v35 = vmul.f32 %v9954_v3, %v8801_v36  ;;  %v8870_v15 = vmul.f32 %v9954_v3, %v8802_v11  ;;  %v8871_v32 = vmul.f32 %v9954_v3, %v8803_v22  ;;  %v8872_v57 = vmul.f32 %v9954_v3, %v8804_v29 }
 0x800   :  { %v8873_v8 = vmul.f32 %v9954_v3, %v8805_v62  ;;  %v8874_v7 = vmul.f32 %v9954_v3, %v8806_v44  ;;  %v8875_v13 = vmul.f32 %v9954_v3, %v8807_v12  ;;  %v8876_v51 = vmul.f32 %v9954_v3, %v8808_v43 }
 0x801   :  { %v8877_v17 = vmul.f32 %v9954_v3, %v8809_v5  ;;  %v8878_v56 = vmul.f32 %v9954_v3, %v8810_v58  ;;  %v8879_v4 = vmul.f32 %v9954_v3, %v8811_v20  ;;  %v8880_v26 = vmul.f32 %v9954_v3, %v8812_v18 }
 0x802   :  { %v8919_v10 = vmul.f32 %v18606_v23, %v8849_v45  ;;  %v8920_v31 = vmul.f32 %v18606_v23, %v8850_v63  ;;  %v8921_v39 = vmul.f32 %v18606_v23, %v8851_v0  ;;  %v8922_v38 = vmul.f32 %v18606_v23, %v8852_v34  ;;  %v18607_v63 = vld [vmem:[#allocation15_spill] sm:$0xff] }
 0x803   :  { %v8923_v50 = vmul.f32 %v18606_v23, %v8853_v1  ;;  %v8924_v49 = vmul.f32 %v18606_v23, %v8854_v9  ;;  %v8925_v14 = vmul.f32 %v18606_v23, %v8855_v27  ;;  %v8926_v47 = vmul.f32 %v18606_v23, %v8856_v19 }
 0x804   :  { %v8927_v48 = vmul.f32 %v18606_v23, %v8857_v59  ;;  %v8928_v54 = vmul.f32 %v18606_v23, %v8858_v53  ;;  %v8929_v21 = vmul.f32 %v18606_v23, %v8859_v52  ;;  %v8930_v24 = vmul.f32 %v18606_v23, %v8860_v42 }
 0x805   :  { %v8931_v41 = vmul.f32 %v18606_v23, %v8861_v40  ;;  %v8932_v61 = vmul.f32 %v18606_v23, %v8862_v33  ;;  %v8933_v55 = vmul.f32 %v18606_v23, %v8863_v25  ;;  %v8934_v6 = vmul.f32 %v18606_v23, %v8864_v16 }
 0x806   :  { %v8935_v60 = vmul.f32 %v18606_v23, %v8865_v28  ;;  %v8936_v36 = vmul.f32 %v18606_v23, %v8866_v46  ;;  %v8937_v11 = vmul.f32 %v18606_v23, %v8867_v2  ;;  %v8938_v22 = vmul.f32 %v18606_v23, %v8868_v30  ;;  %v9053_v2 = vld [vmem:[%s17640_s1 + $0x100] sm:$0xff]  ;;  %v9054_v30 = vld [vmem:[%s17640_s1 + $0x108] sm:$0xff] }
 0x807   :  { %v8939_v29 = vmul.f32 %v18606_v23, %v8869_v35  ;;  %v8940_v62 = vmul.f32 %v18606_v23, %v8870_v15  ;;  %v8941_v44 = vmul.f32 %v18606_v23, %v8871_v32  ;;  %v8942_v12 = vmul.f32 %v18606_v23, %v8872_v57  ;;  %v9055_v35 = vld [vmem:[%s17640_s1 + $0x110] sm:$0xff]  ;;  %v9056_v15 = vld [vmem:[%s17640_s1 + $0x118] sm:$0xff] }
 0x808   :  { %v8943_v43 = vmul.f32 %v18606_v23, %v8873_v8  ;;  %v8944_v5 = vmul.f32 %v18606_v23, %v8874_v7  ;;  %v8945_v58 = vmul.f32 %v18606_v23, %v8875_v13  ;;  %v8946_v20 = vmul.f32 %v18606_v23, %v8876_v51  ;;  %v9057_v13 = vld [vmem:[%s17640_s1 + $0x120] sm:$0xff]  ;;  %v9058_v51 = vld [vmem:[%s17640_s1 + $0x128] sm:$0xff] }
 0x809   :  { %v8947_v18 = vmul.f32 %v18606_v23, %v8877_v17  ;;  %v8948_v37 = vmul.f32 %v18606_v23, %v8878_v56  ;;  %v8949_v3 = vmul.f32 %v18606_v23, %v8879_v4  ;;  %v8950_v45 = vmul.f32 %v18606_v23, %v8880_v26  ;;  %v9059_v17 = vld [vmem:[%s17640_s1 + $0x130] sm:$0xff]  ;;  %v9060_v56 = vld [vmem:[%s17640_s1 + $0x138] sm:$0xff] }
 0x80a   :  { %v8989_v0 = vadd.f32 %v18607_v63, %v8919_v10  ;;  %v8990_v34 = vadd.f32 %v18607_v63, %v8920_v31  ;;  %v8991_v1 = vadd.f32 %v18607_v63, %v8921_v39  ;;  %v8992_v9 = vadd.f32 %v18607_v63, %v8922_v38  ;;  %v9061_v31 = vld [vmem:[%s17640_s1 + $0x140] sm:$0xff]  ;;  %v9062_v39 = vld [vmem:[%s17640_s1 + $0x148] sm:$0xff]  ;;  %v9063_v38 = vld [vmem:[%s17640_s1 + $0x150] sm:$0xff] }
 0x80b   :  { %v8993_v27 = vadd.f32 %v18607_v63, %v8923_v50  ;;  %v8994_v19 = vadd.f32 %v18607_v63, %v8924_v49  ;;  %v8995_v59 = vadd.f32 %v18607_v63, %v8925_v14  ;;  %v8996_v53 = vadd.f32 %v18607_v63, %v8926_v47 }
 0x80c   :  { %v8997_v52 = vadd.f32 %v18607_v63, %v8927_v48  ;;  %v8998_v42 = vadd.f32 %v18607_v63, %v8928_v54  ;;  %v8999_v40 = vadd.f32 %v18607_v63, %v8929_v21  ;;  %v9000_v33 = vadd.f32 %v18607_v63, %v8930_v24  ;;  %v9064_v48 = vld [vmem:[%s17640_s1 + $0x158] sm:$0xff]  ;;  %v9065_v54 = vld [vmem:[%s17640_s1 + $0x160] sm:$0xff]  ;;  %v9066_v21 = vld [vmem:[%s17640_s1 + $0x168] sm:$0xff] }
 0x80d   :  { %v17330_v25 = vadd.f32 %v18607_v63, %v8931_v41  ;;  %v17333_v16 = vadd.f32 %v18607_v63, %v8932_v61  ;;  %v17336_v28 = vadd.f32 %v18607_v63, %v8933_v55  ;;  %v17339_v46 = vadd.f32 %v18607_v63, %v8934_v6  ;;  %v9067_v6 = vld [vmem:[%s17640_s1 + $0x170] sm:$0xff] }
 0x80e   :  { %v17354_v32 = vadd.f32 %v18607_v63, %v8935_v60  ;;  %v17357_v57 = vadd.f32 %v18607_v63, %v8936_v36  ;;  %v17360_v8 = vadd.f32 %v18607_v63, %v8937_v11  ;;  %v17363_v7 = vadd.f32 %v18607_v63, %v8938_v22  ;;  %v9068_v60 = vld [vmem:[%s17640_s1 + $0x178] sm:$0xff]  ;;  %v9069_v36 = vld [vmem:[%s17640_s1 + $0x180] sm:$0xff]  ;;  %v9070_v11 = vld [vmem:[%s17640_s1 + $0x188] sm:$0xff] }
 0x80f   :  { %v17378_v4 = vadd.f32 %v18607_v63, %v8939_v29  ;;  %v17381_v26 = vadd.f32 %v18607_v63, %v8940_v62  ;;  %v17384_v23 = vadd.f32 %v18607_v63, %v8941_v44  ;;  %v17387_v10 = vadd.f32 %v18607_v63, %v8942_v12  ;;  %v9071_v22 = vld [vmem:[%s17640_s1 + $0x190] sm:$0xff]  ;;  %v9072_v29 = vld [vmem:[%s17640_s1 + $0x198] sm:$0xff] }
 0x810   :  { %v17399_v50 = vadd.f32 %v18607_v63, %v8943_v43  ;;  %v17402_v49 = vadd.f32 %v18607_v63, %v8944_v5  ;;  %v17405_v14 = vadd.f32 %v18607_v63, %v8945_v58  ;;  %v17408_v47 = vadd.f32 %v18607_v63, %v8946_v20  ;;  %v9073_v5 = vld [vmem:[%s17640_s1 + $0x1a0] sm:$0xff]  ;;  %v9074_v58 = vld [vmem:[%s17640_s1 + $0x1a8] sm:$0xff]  ;;  %v9075_v20 = vld [vmem:[%s17640_s1 + $0x1b0] sm:$0xff] }
 0x811   :  { %v17420_v24 = vadd.f32 %v18607_v63, %v8947_v18  ;;  %v17423_v41 = vadd.f32 %v18607_v63, %v8948_v37  ;;  %v17426_v61 = vadd.f32 %v18607_v63, %v8949_v3  ;;  %v17429_v55 = vadd.f32 %v18607_v63, %v8950_v45  ;;  %v9076_v63 = vld [vmem:[%s17640_s1 + $0x1b8] sm:$0xff] }
 0x812   :  { %v9117_v62 = vadd.f32 %v9053_v2, %v8989_v0  ;;  %v9118_v44 = vadd.f32 %v9054_v30, %v8990_v34  ;;  %v9119_v12 = vadd.f32 %v9055_v35, %v8991_v1  ;;  %v9120_v43 = vadd.f32 %v9056_v15, %v8992_v9  ;;  %v9077_v0 = vld [vmem:[%s17640_s1 + $0x1c0] sm:$0xff]  ;;  %v9078_v34 = vld [vmem:[%s17640_s1 + $0x1c8] sm:$0xff] }
 0x813   :  { %v9121_v18 = vadd.f32 %v9057_v13, %v8993_v27  ;;  %v9122_v37 = vadd.f32 %v9058_v51, %v8994_v19  ;;  %v9123_v3 = vadd.f32 %v9059_v17, %v8995_v59  ;;  %v9124_v45 = vadd.f32 %v9060_v56, %v8996_v53  ;;  %v9079_v27 = vld [vmem:[%s17640_s1 + $0x1d0] sm:$0xff]  ;;  %v9080_v19 = vld [vmem:[%s17640_s1 + $0x1d8] sm:$0xff]  ;;  %v9081_v59 = vld [vmem:[%s17640_s1 + $0x1e0] sm:$0xff] }
 0x814   :  { %v9125_v1 = vadd.f32 %v9061_v31, %v8997_v52  ;;  %v9126_v9 = vadd.f32 %v9062_v39, %v8998_v42  ;;  %v9127_v2 = vadd.f32 %v9063_v38, %v8999_v40  ;;  %v9128_v30 = vadd.f32 %v9064_v48, %v9000_v33  ;;  %9181 = vst.msk [vmem:[%s17641_s8 + $0x100] sm:$0xff] %vm330_vm6, %v9117_v62  ;;  %v9082_v33 = vld [vmem:[%s17640_s1 + $0x1e8] sm:$0xff] }
 0x815   :  { %9182 = vst.msk [vmem:[%s17641_s8 + $0x108] sm:$0xff] %vm330_vm6, %v9118_v44  ;;  %9183 = vst.msk [vmem:[%s17641_s8 + $0x110] sm:$0xff] %vm330_vm6, %v9119_v12  ;;  %v9129_v53 = vadd.f32 %v9065_v54, %v17330_v25  ;;  %v9130_v52 = vadd.f32 %v9066_v21, %v17333_v16  ;;  %v9131_v42 = vadd.f32 %v9067_v6, %v17336_v28  ;;  %v9083_v25 = vld [vmem:[%s17640_s1 + $0x1f0] sm:$0xff]  ;;  %v9084_v16 = vld [vmem:[%s17640_s1 + $0x1f8] sm:$0xff] }
 0x816   :  { %9184 = vst.msk [vmem:[%s17641_s8 + $0x118] sm:$0xff] %vm330_vm6, %v9120_v43  ;;  %v9132_v40 = vadd.f32 %v9068_v60, %v17339_v46  ;;  %9185 = vst.msk [vmem:[%s17641_s8 + $0x120] sm:$0xff] %vm330_vm6, %v9121_v18  ;;  %v9133_v28 = vadd.f32 %v9069_v36, %v17354_v32  ;;  %v9134_v46 = vadd.f32 %v9070_v11, %v17357_v57 }
 0x817   :  { %9186 = vst.msk [vmem:[%s17641_s8 + $0x128] sm:$0xff] %vm330_vm6, %v9122_v37  ;;  %9187 = vst.msk [vmem:[%s17641_s8 + $0x130] sm:$0xff] %vm330_vm6, %v9123_v3  ;;  %v9135_v35 = vadd.f32 %v9071_v22, %v17360_v8  ;;  %v9136_v15 = vadd.f32 %v9072_v29, %v17363_v7  ;;  %v9137_v32 = vadd.f32 %v9073_v5, %v17378_v4 }
 0x818   :  { %9188 = vst.msk [vmem:[%s17641_s8 + $0x138] sm:$0xff] %vm330_vm6, %v9124_v45  ;;  %9189 = vst.msk [vmem:[%s17641_s8 + $0x140] sm:$0xff] %vm330_vm6, %v9125_v1  ;;  %v9138_v57 = vadd.f32 %v9074_v58, %v17381_v26  ;;  %v9139_v8 = vadd.f32 %v9075_v20, %v17384_v23  ;;  %v9140_v7 = vadd.f32 %v9076_v63, %v17387_v10 }
 0x819   :  { %9190 = vst.msk [vmem:[%s17641_s8 + $0x148] sm:$0xff] %vm330_vm6, %v9126_v9  ;;  %9191 = vst.msk [vmem:[%s17641_s8 + $0x150] sm:$0xff] %vm330_vm6, %v9127_v2  ;;  %v9141_v13 = vadd.f32 %v9077_v0, %v17399_v50  ;;  %v9142_v51 = vadd.f32 %v9078_v34, %v17402_v49  ;;  %v9143_v17 = vadd.f32 %v9079_v27, %v17405_v14 }
 0x81a   :  { %9192 = vst.msk [vmem:[%s17641_s8 + $0x158] sm:$0xff] %vm330_vm6, %v9128_v30  ;;  %9193 = vst.msk [vmem:[%s17641_s8 + $0x160] sm:$0xff] %vm330_vm6, %v9129_v53  ;;  %v9144_v56 = vadd.f32 %v9080_v19, %v17408_v47  ;;  %v9145_v4 = vadd.f32 %v9081_v59, %v17420_v24  ;;  %v9146_v26 = vadd.f32 %v9082_v33, %v17423_v41 }
 0x81b   :  { %9194 = vst.msk [vmem:[%s17641_s8 + $0x168] sm:$0xff] %vm330_vm6, %v9130_v52  ;;  %9195 = vst.msk [vmem:[%s17641_s8 + $0x170] sm:$0xff] %vm330_vm6, %v9131_v42  ;;  %v9147_v23 = vadd.f32 %v9083_v25, %v17426_v61  ;;  %v9148_v10 = vadd.f32 %v9084_v16, %v17429_v55 }
 0x81c   :  { %9196 = vst.msk [vmem:[%s17641_s8 + $0x178] sm:$0xff] %vm330_vm6, %v9132_v40  ;;  %9197 = vst.msk [vmem:[%s17641_s8 + $0x180] sm:$0xff] %vm330_vm6, %v9133_v28 }
 0x81d   :  { %9198 = vst.msk [vmem:[%s17641_s8 + $0x188] sm:$0xff] %vm330_vm6, %v9134_v46  ;;  %9199 = vst.msk [vmem:[%s17641_s8 + $0x190] sm:$0xff] %vm330_vm6, %v9135_v35 }
 0x81e   :  { %9200 = vst.msk [vmem:[%s17641_s8 + $0x198] sm:$0xff] %vm330_vm6, %v9136_v15  ;;  %9201 = vst.msk [vmem:[%s17641_s8 + $0x1a0] sm:$0xff] %vm330_vm6, %v9137_v32 }
 0x81f   :  { %9202 = vst.msk [vmem:[%s17641_s8 + $0x1a8] sm:$0xff] %vm330_vm6, %v9138_v57  ;;  %9203 = vst.msk [vmem:[%s17641_s8 + $0x1b0] sm:$0xff] %vm330_vm6, %v9139_v8 }
 0x820   :  { %9204 = vst.msk [vmem:[%s17641_s8 + $0x1b8] sm:$0xff] %vm330_vm6, %v9140_v7  ;;  %9205 = vst.msk [vmem:[%s17641_s8 + $0x1c0] sm:$0xff] %vm330_vm6, %v9141_v13 }
 0x821   :  { %9206 = vst.msk [vmem:[%s17641_s8 + $0x1c8] sm:$0xff] %vm330_vm6, %v9142_v51  ;;  %9207 = vst.msk [vmem:[%s17641_s8 + $0x1d0] sm:$0xff] %vm330_vm6, %v9143_v17 }
 0x822   :  { %9208 = vst.msk [vmem:[%s17641_s8 + $0x1d8] sm:$0xff] %vm330_vm6, %v9144_v56  ;;  %9209 = vst.msk [vmem:[%s17641_s8 + $0x1e0] sm:$0xff] %vm330_vm6, %v9145_v4 }
 0x823   :  { %9210 = vst.msk [vmem:[%s17641_s8 + $0x1e8] sm:$0xff] %vm330_vm6, %v9146_v26  ;;  %9211 = vst.msk [vmem:[%s17641_s8 + $0x1f0] sm:$0xff] %vm330_vm6, %v9147_v23 }
 0x824   :  { %9212 = vst.msk [vmem:[%s17641_s8 + $0x1f8] sm:$0xff] %vm330_vm6, %v9148_v10 }

</bundles_post_ra>
